<compile_context>
chip_gen: v5e
topology: v5e:2x2
jax: 0.10.0
libtpu: 0.0.40
codegen_flags: <defaults>
</compile_context>

<pallas_src>
import functools

import jax
import jax.numpy as jnp
from jax import lax
from jax.experimental import pallas as pl
from jax.experimental.pallas import tpu as pltpu


def _round_up(x, m):
    return ((x + m - 1) // m) * m


# ---------------------------------------------------------------------------
# Pallas kernel: fused multi-layer LSTM over a VMEM-resident sequence.
# ---------------------------------------------------------------------------
def _make_encoder_kernel(S, Bp, Hp, Dp, L, T):
    """Builds the fused multi-layer LSTM kernel with static sizes baked in."""
    n_chunks = -(-S // T)

    def kernel(x0_ref, wih_ref, whh_ref, b_ref, h_out_ref, c_out_ref,
               seq_sc, gx_sc, h_sc, c_sc):
        """
        x0_ref : (S*Bp, Dp)   bf16  padded embedded input (seq-major, flat)
        wih_ref: (L, Dp, 4Hp) bf16  input weights (transposed, gate-padded)
        whh_ref: (L, Hp, 4Hp) f32   recurrent weights (transposed)
        b_ref  : (L, 1, 4Hp)  f32   fused bias (b_ih + b_hh)
        h_out  : (L, Bp, Hp)  f32   final hidden state per layer
        c_out  : (L, Bp, Hp)  f32   final cell state per layer
        seq_sc : (*, Hp)      f32   hidden sequence feeding the next layer
        gx_sc  : (T*Bp, 4Hp)  f32   hoisted input projection, one time chunk
        h_sc/c_sc: (Bp, Hp)   f32   running hidden / cell state
        """
        for l in range(L):                        # static Python loop, L small
            h_sc[...] = jnp.zeros_like(h_sc)
            c_sc[...] = jnp.zeros_like(c_sc)
            bias = b_ref[l]                       # (1, 4Hp)
            w_hh = whh_ref[l]                     # (Hp, 4Hp), loaded per layer
            write_seq = l < L - 1                 # last layer: final state only

            for c in range(n_chunks):             # static time-chunk loop
                t0 = c * T
                t_len = min(T, S - t0)
                rows = t_len * Bp

                # Hoisted input projection for this chunk: one well-shaped
                # bf16 MXU matmul with f32 accumulation; only h @ W_hh stays
                # inside the serial time loop.
                if l == 0:
                    x_chunk = x0_ref[pl.ds(t0 * Bp, rows), :]        # bf16
                    w_in = wih_ref[0]                                # (Dp, 4Hp)
                else:
                    # K sliced to Hp: rows Hp..Dp of wih are zero padding.
                    x_chunk = seq_sc[pl.ds(t0 * Bp, rows), :].astype(
                        jnp.bfloat16)
                    w_in = wih_ref[l, 0:Hp, :]                       # (Hp, 4Hp)
                gx_sc[0:rows, :] = (
                    jnp.dot(x_chunk, w_in,
                            preferred_element_type=jnp.float32) + bias)

                def step(t, carry):
                    # TODO(synk): weight-stationary MXU driving
                    # (pltpu.matmul_push_rhs / matmul_acc_lhs) would avoid
                    # re-pushing W_hh every step; kept as jnp.dot for
                    # portability across TPU generations.
                    row = pl.multiple_of(t * Bp, Bp)
                    gates = gx_sc[pl.ds(row, Bp), :] + jnp.dot(
                        h_sc[...], w_hh, preferred_element_type=jnp.float32)
                    # Lane-aligned gate slices (Hp is a multiple of 128).
                    i_g = jax.nn.sigmoid(gates[:, 0 * Hp:1 * Hp])
                    f_g = jax.nn.sigmoid(gates[:, 1 * Hp:2 * Hp])
                    g_g = jnp.tanh(gates[:, 2 * Hp:3 * Hp])
                    o_g = jax.nn.sigmoid(gates[:, 3 * Hp:4 * Hp])
                    c_new = f_g * c_sc[...] + i_g * g_g
                    h_new = o_g * jnp.tanh(c_new)
                    c_sc[...] = c_new
                    h_sc[...] = h_new
                    if write_seq:
                        out_row = pl.multiple_of(t0 * Bp + row, Bp)
                        seq_sc[pl.ds(out_row, Bp), :] = h_new  # next layer in
                    return carry

                lax.fori_loop(0, t_len, step, 0, unroll=min(t_len, 8))

            # Final states written once per layer (not every time step).
            h_out_ref[l] = h_sc[...]
            c_out_ref[l] = c_sc[...]

    return kernel


def _encoder_pallas(x0, w_ih_t, w_hh_t, bias, S, Bp, Hp, Dp, L, T):
    seq_rows = S * Bp if L > 1 else Bp          # seq scratch unused if L == 1
    scratch_shapes = [
        pltpu.VMEM((seq_rows, Hp), jnp.float32),     # inter-layer hidden seq
        pltpu.VMEM((T * Bp, 4 * Hp), jnp.float32),   # hoisted x-gates (chunk)
        pltpu.VMEM((Bp, Hp), jnp.float32),           # h
        pltpu.VMEM((Bp, Hp), jnp.float32),           # c
    ]

    # Size the scoped VMEM limit from the actual working set (v5e's default
    # scoped limit is only 16 MiB); clamp to v7x's 64 MiB physical VMEM.
    needed = (x0.size * x0.dtype.itemsize
              + w_ih_t.size * w_ih_t.dtype.itemsize
              + w_hh_t.size * 4 + bias.size * 4
              + 2 * L * Bp * Hp * 4
              + seq_rows * Hp * 4
              + T * Bp * 4 * Hp * 4
              + 2 * Bp * Hp * 4)
    vmem_limit = int(min(64 * 1024 * 1024,
                         max(32 * 1024 * 1024, needed + 4 * 1024 * 1024)))

    kernel = _make_encoder_kernel(S, Bp, Hp, Dp, L, T)
    vmem = pltpu.MemorySpace.VMEM
    # No grid: single kernel invocation, whole arrays resident in VMEM with
    # no double-buffering (nothing to pipeline against).
    h_pad, c_pad = pl.pallas_call(
        kernel,
        out_shape=(
            jax.ShapeDtypeStruct((L, Bp, Hp), jnp.float32),
            jax.ShapeDtypeStruct((L, Bp, Hp), jnp.float32),
        ),
        in_specs=[pl.BlockSpec(memory_space=vmem)] * 4,
        out_specs=(pl.BlockSpec(memory_space=vmem),
                   pl.BlockSpec(memory_space=vmem)),
        scratch_shapes=scratch_shapes,
        compiler_params=pltpu.CompilerParams(vmem_limit_bytes=vmem_limit),
    )(x0, w_ih_t, w_hh_t, bias)
    return h_pad, c_pad


# ---------------------------------------------------------------------------
# Parameter init / padding helpers (plain JAX glue).
# ---------------------------------------------------------------------------
def init_encoder_params(key, input_dim, embed_dim, hidden_dim, n_layers):
    """Deterministic parameter init matching the PyTorch module's shapes."""
    keys = jax.random.split(key, 1 + 4 * n_layers)
    params = {}
    params["embedding"] = jax.random.normal(
        keys[0], (input_dim, embed_dim), jnp.float32)
    k = 1.0 / jnp.sqrt(hidden_dim)
    layers = []
    for l in range(n_layers):
        in_dim = embed_dim if l == 0 else hidden_dim
        kw = keys[1 + 4 * l: 1 + 4 * (l + 1)]
        w_ih = jax.random.uniform(kw[0], (4 * hidden_dim, in_dim),
                                  jnp.float32, -k, k)
        w_hh = jax.random.uniform(kw[1], (4 * hidden_dim, hidden_dim),
                                  jnp.float32, -k, k)
        b_ih = jax.random.uniform(kw[2], (4 * hidden_dim,), jnp.float32, -k, k)
        b_hh = jax.random.uniform(kw[3], (4 * hidden_dim,), jnp.float32, -k, k)
        layers.append({"w_ih": w_ih, "w_hh": w_hh, "b_ih": b_ih, "b_hh": b_hh})
    params["lstm"] = layers
    return params


def _pad_gate_mat(w, H, Hp, in_dim, in_p):
    """(4H, in_dim) -> (4Hp, in_p); each of the i/f/g/o blocks padded to Hp."""
    w4 = w.reshape(4, H, in_dim)
    w4 = jnp.pad(w4, ((0, 0), (0, Hp - H), (0, in_p - in_dim)))
    return w4.reshape(4 * Hp, in_p)


def _pad_gate_vec(b, H, Hp):
    b4 = b.reshape(4, H)
    b4 = jnp.pad(b4, ((0, 0), (0, Hp - H)))
    return b4.reshape(4 * Hp)


@functools.partial(jax.jit, static_argnames=("hidden_dim", "n_layers"))
def encoder_forward(params, src, hidden_dim, n_layers):
    """src: (S, B) int32 token ids. Returns (hidden, cell), each (n_layers, B, H)."""
    S, B = src.shape
    E = params["embedding"].shape[1]
    H = hidden_dim
    L = n_layers
    Hp = _round_up(H, 128)                 # lane-aligned hidden dim
    Dp = max(_round_up(E, 128), Hp)        # lane-aligned input dim
    Bp = _round_up(B, 8)                   # sublane-aligned batch
    T = min(S, 32)                         # time-chunk length for x @ W_ih
    # TODO(synk): for v7x, a "parallel" batch-tile grid axis (2 TensorCores)
    # and >=128-row batch tiles for the recurrence would raise MXU occupancy;
    # at batch=2 the recurrence is inherently latency-bound.

    # TODO(synk): nn.Dropout / inter-layer LSTM dropout are identity in eval
    # mode; training-mode stochastic dropout is not implemented here.
    embedded = params["embedding"][src].astype(jnp.float32)   # (S, B, E)
    # TODO(synk): the embedding gather could be folded into the kernel via a
    # scalar-prefetched pl.Element row-gather BlockSpec to save an HBM pass.

    # Single-pad build of the seq-major, flattened, bf16 input (one pass).
    x0 = jnp.pad(embedded, ((0, 0), (0, Bp - B), (0, Dp - E)))
    x0 = x0.reshape(S * Bp, Dp).astype(jnp.bfloat16)

    wih_l, whh_l, b_l = [], [], []
    for l in range(L):
        p = params["lstm"][l]
        in_dim = E if l == 0 else H
        wih_l.append(_pad_ate := _pad_gate_mat(p["w_ih"], H, Hp, in_dim, Dp).T)
        whh_l.append(_pad_gate_mat(p["w_hh"], H, Hp, H, Hp).T)        # (Hp,4Hp)
        b_l.append(_pad_gate_vec(p["b_ih"] + p["b_hh"], H, Hp
                                 ).reshape(1, 4 * Hp))
    w_ih_t = jnp.stack(wih_l).astype(jnp.bfloat16)   # (L, Dp, 4Hp) bf16 (MXU)
    w_hh_t = jnp.stack(whh_l)                        # (L, Hp, 4Hp) f32
    bias = jnp.stack(b_l)                            # (L, 1, 4Hp)  f32

    h_pad, c_pad = _encoder_pallas(x0, w_ih_t, w_hh_t, bias,
                                   S, Bp, Hp, Dp, L, T)
    return h_pad[:, :B, :H], c_pad[:, :B, :H]


# ---------------------------------------------------------------------------
# Pure-JAX reference (for correctness sanity check).
# ---------------------------------------------------------------------------
def encoder_reference(params, src):
    x = params["embedding"][src].astype(jnp.float32)
    hp = jax.lax.Precision.HIGHEST
    hs, cs = [], []
    for p in params["lstm"]:
        H = p["w_hh"].shape[1]
        S, B, _ = x.shape
        h = jnp.zeros((B, H), jnp.float32)
        c = jnp.zeros((B, H), jnp.float32)
        outs = []
        for t in range(S):
            g = (jnp.dot(x[t], p["w_ih"].T, precision=hp)
                 + jnp.dot(h, p["w_hh"].T, precision=hp)
                 + p["b_ih"] + p["b_hh"])
            i = jax.nn.sigmoid(g[:, :H])
            f = jax.nn.sigmoid(g[:, H:2 * H])
            gg = jnp.tanh(g[:, 2 * H:3 * H])
            o = jax.nn.sigmoid(g[:, 3 * H:])
            c = f * c + i * gg
            h = o * jnp.tanh(c)
            outs.append(h)
        x = jnp.stack(outs)
        hs.append(h)
        cs.append(c)
    return jnp.stack(hs), jnp.stack(cs)


if __name__ == "__main__":
    INPUT_DIM = 50      # vocab size
    EMBED_DIM = 16
    HIDDEN_DIM = 32
    N_LAYERS = 2
    SEQ_LEN = 8
    BATCH = 2

    key = jax.random.PRNGKey(0)
    pkey, skey = jax.random.split(key)
    params = init_encoder_params(pkey, INPUT_DIM, EMBED_DIM, HIDDEN_DIM, N_LAYERS)
    src = jax.random.randint(skey, (SEQ_LEN, BATCH), 0, INPUT_DIM, jnp.int32)

    hidden, cell = encoder_forward(params, src, HIDDEN_DIM, N_LAYERS)
    jax.block_until_ready((hidden, cell))

    assert hidden.shape == (N_LAYERS, BATCH, HIDDEN_DIM)
    assert cell.shape == (N_LAYERS, BATCH, HIDDEN_DIM)

    h_ref, c_ref = encoder_reference(params, src)
    # bf16 is only used on the (non-recurrent) input projection; the recurrence
    # stays f32, so 2e-2 vs. the f32 HIGHEST-precision reference has headroom.
    assert jnp.allclose(hidden, h_ref, atol=2e-2, rtol=2e-2), \
        float(jnp.max(jnp.abs(hidden - h_ref)))
    assert jnp.allclose(cell, c_ref, atol=2e-2, rtol=2e-2), \
        float(jnp.max(jnp.abs(cell - c_ref)))

    print("KERNEL_OK")
</pallas_src>

<mosaic_0001>
module attributes {stable_mosaic.version = 11 : i64} {
  func.func @kernel(%arg0: memref<64x128xbf16, #tpu.memory_space<vmem>>, %arg1: memref<2x128x512xbf16, #tpu.memory_space<vmem>>, %arg2: memref<2x128x512xf32, #tpu.memory_space<vmem>>, %arg3: memref<2x1x512xf32, #tpu.memory_space<vmem>>, %arg4: memref<2x8x128xf32, #tpu.memory_space<vmem>>, %arg5: memref<2x8x128xf32, #tpu.memory_space<vmem>>, %arg6: memref<64x128xf32, #tpu.memory_space<vmem>>, %arg7: memref<64x512xf32, #tpu.memory_space<vmem>>, %arg8: memref<8x128xf32, #tpu.memory_space<vmem>>, %arg9: memref<8x128xf32, #tpu.memory_space<vmem>>) attributes {dimension_semantics = [], scalar_prefetch = 0 : i64, scratch_operands = 4 : i64, tpu.core_type = #tpu.core_type<tc>} {
    %cst = arith.constant 0.000000e+00 : f32
    %0 = vector.broadcast %cst : f32 to vector<8x128xf32>
    %c0 = arith.constant 0 : index
    %c0_0 = arith.constant 0 : index
    %1 = vector.load %arg8[%c0, %c0_0] : memref<8x128xf32, #tpu.memory_space<vmem>>, vector<8x128xf32>
    tpu.vector_store %arg8[%c0, %c0_0], %0 {strides = array<i32>} : memref<8x128xf32, #tpu.memory_space<vmem>>, vector<8x128xf32>,
    %cst_1 = arith.constant 0.000000e+00 : f32
    %2 = vector.broadcast %cst_1 : f32 to vector<8x128xf32>
    %c0_2 = arith.constant 0 : index
    %c0_3 = arith.constant 0 : index
    %3 = vector.load %arg9[%c0_2, %c0_3] : memref<8x128xf32, #tpu.memory_space<vmem>>, vector<8x128xf32>
    tpu.vector_store %arg9[%c0_2, %c0_3], %2 {strides = array<i32>} : memref<8x128xf32, #tpu.memory_space<vmem>>, vector<8x128xf32>,
    %c0_4 = arith.constant 0 : index
    %c0_5 = arith.constant 0 : index
    %c0_6 = arith.constant 0 : index
    %4 = vector.load %arg3[%c0_4, %c0_5, %c0_6] : memref<2x1x512xf32, #tpu.memory_space<vmem>>, vector<1x1x512xf32>
    %5 = vector.shape_cast %4 : vector<1x1x512xf32> to vector<1x512xf32>
    %c0_7 = arith.constant 0 : index
    %c0_8 = arith.constant 0 : index
    %c0_9 = arith.constant 0 : index
    %6 = vector.load %arg2[%c0_7, %c0_8, %c0_9] : memref<2x128x512xf32, #tpu.memory_space<vmem>>, vector<1x128x512xf32>
    %7 = vector.shape_cast %6 : vector<1x128x512xf32> to vector<128x512xf32>
    %c0_10 = arith.constant 0 : index
    %c0_11 = arith.constant 0 : index
    %8 = vector.load %arg0[%c0_10, %c0_11] : memref<64x128xbf16, #tpu.memory_space<vmem>>, vector<64x128xbf16>
    %c0_12 = arith.constant 0 : index
    %c0_13 = arith.constant 0 : index
    %c0_14 = arith.constant 0 : index
    %9 = vector.load %arg1[%c0_12, %c0_13, %c0_14] : memref<2x128x512xbf16, #tpu.memory_space<vmem>>, vector<1x128x512xbf16>
    %10 = vector.shape_cast %9 : vector<1x128x512xbf16> to vector<128x512xbf16>
    %cst_15 = arith.constant dense<0.000000e+00> : vector<64x512xf32>
    %11 = tpu.matmul %8, %10, %cst_15 {dimension_numbers = #tpu.dot_dimension_numbers<[1], [0], [0], [1], [0, 0, 1, 1], [], []>} : vector<64x128xbf16>, vector<128x512xbf16>, vector<64x512xf32> -> vector<64x512xf32>
    %12 = vector.broadcast %5 : vector<1x512xf32> to vector<64x512xf32>
    %13 = arith.addf %11, %12 : vector<64x512xf32>
    %c0_16 = arith.constant 0 : index
    %c0_17 = arith.constant 0 : index
    %14 = vector.load %arg7[%c0_16, %c0_17] : memref<64x512xf32, #tpu.memory_space<vmem>>, vector<64x512xf32>
    tpu.vector_store %arg7[%c0_16, %c0_17], %13 {strides = array<i32>} : memref<64x512xf32, #tpu.memory_space<vmem>>, vector<64x512xf32>,
    %c0_i32 = arith.constant 0 : i32
    %c8_i32 = arith.constant 8 : i32
    %15 = arith.muli %c0_i32, %c8_i32 : i32
    %16 = tpu.assume_multiple %15, 8 : i32
    %17 = arith.index_cast %16 : i32 to index
    %c0_18 = arith.constant 0 : index
    %18 = vector.load %arg7[%17, %c0_18] : memref<64x512xf32, #tpu.memory_space<vmem>>, vector<8x512xf32>
    %c0_19 = arith.constant 0 : index
    %c0_20 = arith.constant 0 : index
    %19 = vector.load %arg8[%c0_19, %c0_20] : memref<8x128xf32, #tpu.memory_space<vmem>>, vector<8x128xf32>
    %cst_21 = arith.constant dense<0.000000e+00> : vector<8x512xf32>
    %20 = tpu.matmul %19, %7, %cst_21 {dimension_numbers = #tpu.dot_dimension_numbers<[1], [0], [0], [1], [0, 0, 1, 1], [], []>} : vector<8x128xf32>, vector<128x512xf32>, vector<8x512xf32> -> vector<8x512xf32>
    %21 = arith.addf %18, %20 : vector<8x512xf32>
    %22 = vector.extract_strided_slice %21 {offsets = [0, 0], sizes = [8, 128], strides = [1, 1]} : vector<8x512xf32> to vector<8x128xf32>
    %23 = arith.negf %22 : vector<8x128xf32>
    %24 = math.exp %23 : vector<8x128xf32>
    %cst_22 = arith.constant 1.000000e+00 : f32
    %25 = vector.broadcast %cst_22 : f32 to vector<8x128xf32>
    %26 = arith.addf %25, %24 : vector<8x128xf32>
    %27 = arith.divf %25, %26 : vector<8x128xf32>
    %28 = vector.extract_strided_slice %21 {offsets = [0, 128], sizes = [8, 128], strides = [1, 1]} : vector<8x512xf32> to vector<8x128xf32>
    %29 = arith.negf %28 : vector<8x128xf32>
    %30 = math.exp %29 : vector<8x128xf32>
    %cst_23 = arith.constant 1.000000e+00 : f32
    %31 = vector.broadcast %cst_23 : f32 to vector<8x128xf32>
    %32 = arith.addf %31, %30 : vector<8x128xf32>
    %33 = arith.divf %31, %32 : vector<8x128xf32>
    %34 = vector.extract_strided_slice %21 {offsets = [0, 256], sizes = [8, 128], strides = [1, 1]} : vector<8x512xf32> to vector<8x128xf32>
    %35 = math.tanh %34 : vector<8x128xf32>
    %36 = vector.extract_strided_slice %21 {offsets = [0, 384], sizes = [8, 128], strides = [1, 1]} : vector<8x512xf32> to vector<8x128xf32>
    %37 = arith.negf %36 : vector<8x128xf32>
    %38 = math.exp %37 : vector<8x128xf32>
    %cst_24 = arith.constant 1.000000e+00 : f32
    %39 = vector.broadcast %cst_24 : f32 to vector<8x128xf32>
    %40 = arith.addf %39, %38 : vector<8x128xf32>
    %41 = arith.divf %39, %40 : vector<8x128xf32>
    %c0_25 = arith.constant 0 : index
    %c0_26 = arith.constant 0 : index
    %42 = vector.load %arg9[%c0_25, %c0_26] : memref<8x128xf32, #tpu.memory_space<vmem>>, vector<8x128xf32>
    %43 = arith.mulf %33, %42 : vector<8x128xf32>
    %44 = arith.mulf %27, %35 : vector<8x128xf32>
    %45 = arith.addf %43, %44 : vector<8x128xf32>
    %46 = math.tanh %45 : vector<8x128xf32>
    %47 = arith.mulf %41, %46 : vector<8x128xf32>
    %c0_27 = arith.constant 0 : index
    %c0_28 = arith.constant 0 : index
    %48 = vector.load %arg9[%c0_27, %c0_28] : memref<8x128xf32, #tpu.memory_space<vmem>>, vector<8x128xf32>
    tpu.vector_store %arg9[%c0_27, %c0_28], %45 {strides = array<i32>} : memref<8x128xf32, #tpu.memory_space<vmem>>, vector<8x128xf32>,
    %c0_29 = arith.constant 0 : index
    %c0_30 = arith.constant 0 : index
    %49 = vector.load %arg8[%c0_29, %c0_30] : memref<8x128xf32, #tpu.memory_space<vmem>>, vector<8x128xf32>
    tpu.vector_store %arg8[%c0_29, %c0_30], %47 {strides = array<i32>} : memref<8x128xf32, #tpu.memory_space<vmem>>, vector<8x128xf32>,
    %c0_i32_31 = arith.constant 0 : i32
    %50 = arith.addi %c0_i32_31, %16 : i32
    %51 = tpu.assume_multiple %50, 8 : i32
    %52 = arith.index_cast %51 : i32 to index
    %c0_32 = arith.constant 0 : index
    %53 = vector.load %arg6[%52, %c0_32] : memref<64x128xf32, #tpu.memory_space<vmem>>, vector<8x128xf32>
    tpu.vector_store %arg6[%52, %c0_32], %47 {strides = array<i32>} : memref<64x128xf32, #tpu.memory_space<vmem>>, vector<8x128xf32>,
    %c1_i32 = arith.constant 1 : i32
    %c8_i32_33 = arith.constant 8 : i32
    %54 = arith.muli %c1_i32, %c8_i32_33 : i32
    %55 = tpu.assume_multiple %54, 8 : i32
    %56 = arith.index_cast %55 : i32 to index
    %c0_34 = arith.constant 0 : index
    %57 = vector.load %arg7[%56, %c0_34] : memref<64x512xf32, #tpu.memory_space<vmem>>, vector<8x512xf32>
    %c0_35 = arith.constant 0 : index
    %c0_36 = arith.constant 0 : index
    %58 = vector.load %arg8[%c0_35, %c0_36] : memref<8x128xf32, #tpu.memory_space<vmem>>, vector<8x128xf32>
    %cst_37 = arith.constant dense<0.000000e+00> : vector<8x512xf32>
    %59 = tpu.matmul %58, %7, %cst_37 {dimension_numbers = #tpu.dot_dimension_numbers<[1], [0], [0], [1], [0, 0, 1, 1], [], []>} : vector<8x128xf32>, vector<128x512xf32>, vector<8x512xf32> -> vector<8x512xf32>
    %60 = arith.addf %57, %59 : vector<8x512xf32>
    %61 = vector.extract_strided_slice %60 {offsets = [0, 0], sizes = [8, 128], strides = [1, 1]} : vector<8x512xf32> to vector<8x128xf32>
    %62 = arith.negf %61 : vector<8x128xf32>
    %63 = math.exp %62 : vector<8x128xf32>
    %cst_38 = arith.constant 1.000000e+00 : f32
    %64 = vector.broadcast %cst_38 : f32 to vector<8x128xf32>
    %65 = arith.addf %64, %63 : vector<8x128xf32>
    %66 = arith.divf %64, %65 : vector<8x128xf32>
    %67 = vector.extract_strided_slice %60 {offsets = [0, 128], sizes = [8, 128], strides = [1, 1]} : vector<8x512xf32> to vector<8x128xf32>
    %68 = arith.negf %67 : vector<8x128xf32>
    %69 = math.exp %68 : vector<8x128xf32>
    %cst_39 = arith.constant 1.000000e+00 : f32
    %70 = vector.broadcast %cst_39 : f32 to vector<8x128xf32>
    %71 = arith.addf %70, %69 : vector<8x128xf32>
    %72 = arith.divf %70, %71 : vector<8x128xf32>
    %73 = vector.extract_strided_slice %60 {offsets = [0, 256], sizes = [8, 128], strides = [1, 1]} : vector<8x512xf32> to vector<8x128xf32>
    %74 = math.tanh %73 : vector<8x128xf32>
    %75 = vector.extract_strided_slice %60 {offsets = [0, 384], sizes = [8, 128], strides = [1, 1]} : vector<8x512xf32> to vector<8x128xf32>
    %76 = arith.negf %75 : vector<8x128xf32>
    %77 = math.exp %76 : vector<8x128xf32>
    %cst_40 = arith.constant 1.000000e+00 : f32
    %78 = vector.broadcast %cst_40 : f32 to vector<8x128xf32>
    %79 = arith.addf %78, %77 : vector<8x128xf32>
    %80 = arith.divf %78, %79 : vector<8x128xf32>
    %c0_41 = arith.constant 0 : index
    %c0_42 = arith.constant 0 : index
    %81 = vector.load %arg9[%c0_41, %c0_42] : memref<8x128xf32, #tpu.memory_space<vmem>>, vector<8x128xf32>
    %82 = arith.mulf %72, %81 : vector<8x128xf32>
    %83 = arith.mulf %66, %74 : vector<8x128xf32>
    %84 = arith.addf %82, %83 : vector<8x128xf32>
    %85 = math.tanh %84 : vector<8x128xf32>
    %86 = arith.mulf %80, %85 : vector<8x128xf32>
    %c0_43 = arith.constant 0 : index
    %c0_44 = arith.constant 0 : index
    %87 = vector.load %arg9[%c0_43, %c0_44] : memref<8x128xf32, #tpu.memory_space<vmem>>, vector<8x128xf32>
    tpu.vector_store %arg9[%c0_43, %c0_44], %84 {strides = array<i32>} : memref<8x128xf32, #tpu.memory_space<vmem>>, vector<8x128xf32>,
    %c0_45 = arith.constant 0 : index
    %c0_46 = arith.constant 0 : index
    %88 = vector.load %arg8[%c0_45, %c0_46] : memref<8x128xf32, #tpu.memory_space<vmem>>, vector<8x128xf32>
    tpu.vector_store %arg8[%c0_45, %c0_46], %86 {strides = array<i32>} : memref<8x128xf32, #tpu.memory_space<vmem>>, vector<8x128xf32>,
    %c0_i32_47 = arith.constant 0 : i32
    %89 = arith.addi %c0_i32_47, %55 : i32
    %90 = tpu.assume_multiple %89, 8 : i32
    %91 = arith.index_cast %90 : i32 to index
    %c0_48 = arith.constant 0 : index
    %92 = vector.load %arg6[%91, %c0_48] : memref<64x128xf32, #tpu.memory_space<vmem>>, vector<8x128xf32>
    tpu.vector_store %arg6[%91, %c0_48], %86 {strides = array<i32>} : memref<64x128xf32, #tpu.memory_space<vmem>>, vector<8x128xf32>,
    %c2_i32 = arith.constant 2 : i32
    %c8_i32_49 = arith.constant 8 : i32
    %93 = arith.muli %c2_i32, %c8_i32_49 : i32
    %94 = tpu.assume_multiple %93, 8 : i32
    %95 = arith.index_cast %94 : i32 to index
    %c0_50 = arith.constant 0 : index
    %96 = vector.load %arg7[%95, %c0_50] : memref<64x512xf32, #tpu.memory_space<vmem>>, vector<8x512xf32>
    %c0_51 = arith.constant 0 : index
    %c0_52 = arith.constant 0 : index
    %97 = vector.load %arg8[%c0_51, %c0_52] : memref<8x128xf32, #tpu.memory_space<vmem>>, vector<8x128xf32>
    %cst_53 = arith.constant dense<0.000000e+00> : vector<8x512xf32>
    %98 = tpu.matmul %97, %7, %cst_53 {dimension_numbers = #tpu.dot_dimension_numbers<[1], [0], [0], [1], [0, 0, 1, 1], [], []>} : vector<8x128xf32>, vector<128x512xf32>, vector<8x512xf32> -> vector<8x512xf32>
    %99 = arith.addf %96, %98 : vector<8x512xf32>
    %100 = vector.extract_strided_slice %99 {offsets = [0, 0], sizes = [8, 128], strides = [1, 1]} : vector<8x512xf32> to vector<8x128xf32>
    %101 = arith.negf %100 : vector<8x128xf32>
    %102 = math.exp %101 : vector<8x128xf32>
    %cst_54 = arith.constant 1.000000e+00 : f32
    %103 = vector.broadcast %cst_54 : f32 to vector<8x128xf32>
    %104 = arith.addf %103, %102 : vector<8x128xf32>
    %105 = arith.divf %103, %104 : vector<8x128xf32>
    %106 = vector.extract_strided_slice %99 {offsets = [0, 128], sizes = [8, 128], strides = [1, 1]} : vector<8x512xf32> to vector<8x128xf32>
    %107 = arith.negf %106 : vector<8x128xf32>
    %108 = math.exp %107 : vector<8x128xf32>
    %cst_55 = arith.constant 1.000000e+00 : f32
    %109 = vector.broadcast %cst_55 : f32 to vector<8x128xf32>
    %110 = arith.addf %109, %108 : vector<8x128xf32>
    %111 = arith.divf %109, %110 : vector<8x128xf32>
    %112 = vector.extract_strided_slice %99 {offsets = [0, 256], sizes = [8, 128], strides = [1, 1]} : vector<8x512xf32> to vector<8x128xf32>
    %113 = math.tanh %112 : vector<8x128xf32>
    %114 = vector.extract_strided_slice %99 {offsets = [0, 384], sizes = [8, 128], strides = [1, 1]} : vector<8x512xf32> to vector<8x128xf32>
    %115 = arith.negf %114 : vector<8x128xf32>
    %116 = math.exp %115 : vector<8x128xf32>
    %cst_56 = arith.constant 1.000000e+00 : f32
    %117 = vector.broadcast %cst_56 : f32 to vector<8x128xf32>
    %118 = arith.addf %117, %116 : vector<8x128xf32>
    %119 = arith.divf %117, %118 : vector<8x128xf32>
    %c0_57 = arith.constant 0 : index
    %c0_58 = arith.constant 0 : index
    %120 = vector.load %arg9[%c0_57, %c0_58] : memref<8x128xf32, #tpu.memory_space<vmem>>, vector<8x128xf32>
    %121 = arith.mulf %111, %120 : vector<8x128xf32>
    %122 = arith.mulf %105, %113 : vector<8x128xf32>
    %123 = arith.addf %121, %122 : vector<8x128xf32>
    %124 = math.tanh %123 : vector<8x128xf32>
    %125 = arith.mulf %119, %124 : vector<8x128xf32>
    %c0_59 = arith.constant 0 : index
    %c0_60 = arith.constant 0 : index
    %126 = vector.load %arg9[%c0_59, %c0_60] : memref<8x128xf32, #tpu.memory_space<vmem>>, vector<8x128xf32>
    tpu.vector_store %arg9[%c0_59, %c0_60], %123 {strides = array<i32>} : memref<8x128xf32, #tpu.memory_space<vmem>>, vector<8x128xf32>,
    %c0_61 = arith.constant 0 : index
    %c0_62 = arith.constant 0 : index
    %127 = vector.load %arg8[%c0_61, %c0_62] : memref<8x128xf32, #tpu.memory_space<vmem>>, vector<8x128xf32>
    tpu.vector_store %arg8[%c0_61, %c0_62], %125 {strides = array<i32>} : memref<8x128xf32, #tpu.memory_space<vmem>>, vector<8x128xf32>,
    %c0_i32_63 = arith.constant 0 : i32
    %128 = arith.addi %c0_i32_63, %94 : i32
    %129 = tpu.assume_multiple %128, 8 : i32
    %130 = arith.index_cast %129 : i32 to index
    %c0_64 = arith.constant 0 : index
    %131 = vector.load %arg6[%130, %c0_64] : memref<64x128xf32, #tpu.memory_space<vmem>>, vector<8x128xf32>
    tpu.vector_store %arg6[%130, %c0_64], %125 {strides = array<i32>} : memref<64x128xf32, #tpu.memory_space<vmem>>, vector<8x128xf32>,
    %c3_i32 = arith.constant 3 : i32
    %c8_i32_65 = arith.constant 8 : i32
    %132 = arith.muli %c3_i32, %c8_i32_65 : i32
    %133 = tpu.assume_multiple %132, 8 : i32
    %134 = arith.index_cast %133 : i32 to index
    %c0_66 = arith.constant 0 : index
    %135 = vector.load %arg7[%134, %c0_66] : memref<64x512xf32, #tpu.memory_space<vmem>>, vector<8x512xf32>
    %c0_67 = arith.constant 0 : index
    %c0_68 = arith.constant 0 : index
    %136 = vector.load %arg8[%c0_67, %c0_68] : memref<8x128xf32, #tpu.memory_space<vmem>>, vector<8x128xf32>
    %cst_69 = arith.constant dense<0.000000e+00> : vector<8x512xf32>
    %137 = tpu.matmul %136, %7, %cst_69 {dimension_numbers = #tpu.dot_dimension_numbers<[1], [0], [0], [1], [0, 0, 1, 1], [], []>} : vector<8x128xf32>, vector<128x512xf32>, vector<8x512xf32> -> vector<8x512xf32>
    %138 = arith.addf %135, %137 : vector<8x512xf32>
    %139 = vector.extract_strided_slice %138 {offsets = [0, 0], sizes = [8, 128], strides = [1, 1]} : vector<8x512xf32> to vector<8x128xf32>
    %140 = arith.negf %139 : vector<8x128xf32>
    %141 = math.exp %140 : vector<8x128xf32>
    %cst_70 = arith.constant 1.000000e+00 : f32
    %142 = vector.broadcast %cst_70 : f32 to vector<8x128xf32>
    %143 = arith.addf %142, %141 : vector<8x128xf32>
    %144 = arith.divf %142, %143 : vector<8x128xf32>
    %145 = vector.extract_strided_slice %138 {offsets = [0, 128], sizes = [8, 128], strides = [1, 1]} : vector<8x512xf32> to vector<8x128xf32>
    %146 = arith.negf %145 : vector<8x128xf32>
    %147 = math.exp %146 : vector<8x128xf32>
    %cst_71 = arith.constant 1.000000e+00 : f32
    %148 = vector.broadcast %cst_71 : f32 to vector<8x128xf32>
    %149 = arith.addf %148, %147 : vector<8x128xf32>
    %150 = arith.divf %148, %149 : vector<8x128xf32>
    %151 = vector.extract_strided_slice %138 {offsets = [0, 256], sizes = [8, 128], strides = [1, 1]} : vector<8x512xf32> to vector<8x128xf32>
    %152 = math.tanh %151 : vector<8x128xf32>
    %153 = vector.extract_strided_slice %138 {offsets = [0, 384], sizes = [8, 128], strides = [1, 1]} : vector<8x512xf32> to vector<8x128xf32>
    %154 = arith.negf %153 : vector<8x128xf32>
    %155 = math.exp %154 : vector<8x128xf32>
    %cst_72 = arith.constant 1.000000e+00 : f32
    %156 = vector.broadcast %cst_72 : f32 to vector<8x128xf32>
    %157 = arith.addf %156, %155 : vector<8x128xf32>
    %158 = arith.divf %156, %157 : vector<8x128xf32>
    %c0_73 = arith.constant 0 : index
    %c0_74 = arith.constant 0 : index
    %159 = vector.load %arg9[%c0_73, %c0_74] : memref<8x128xf32, #tpu.memory_space<vmem>>, vector<8x128xf32>
    %160 = arith.mulf %150, %159 : vector<8x128xf32>
    %161 = arith.mulf %144, %152 : vector<8x128xf32>
    %162 = arith.addf %160, %161 : vector<8x128xf32>
    %163 = math.tanh %162 : vector<8x128xf32>
    %164 = arith.mulf %158, %163 : vector<8x128xf32>
    %c0_75 = arith.constant 0 : index
    %c0_76 = arith.constant 0 : index
    %165 = vector.load %arg9[%c0_75, %c0_76] : memref<8x128xf32, #tpu.memory_space<vmem>>, vector<8x128xf32>
    tpu.vector_store %arg9[%c0_75, %c0_76], %162 {strides = array<i32>} : memref<8x128xf32, #tpu.memory_space<vmem>>, vector<8x128xf32>,
    %c0_77 = arith.constant 0 : index
    %c0_78 = arith.constant 0 : index
    %166 = vector.load %arg8[%c0_77, %c0_78] : memref<8x128xf32, #tpu.memory_space<vmem>>, vector<8x128xf32>
    tpu.vector_store %arg8[%c0_77, %c0_78], %164 {strides = array<i32>} : memref<8x128xf32, #tpu.memory_space<vmem>>, vector<8x128xf32>,
    %c0_i32_79 = arith.constant 0 : i32
    %167 = arith.addi %c0_i32_79, %133 : i32
    %168 = tpu.assume_multiple %167, 8 : i32
    %169 = arith.index_cast %168 : i32 to index
    %c0_80 = arith.constant 0 : index
    %170 = vector.load %arg6[%169, %c0_80] : memref<64x128xf32, #tpu.memory_space<vmem>>, vector<8x128xf32>
    tpu.vector_store %arg6[%169, %c0_80], %164 {strides = array<i32>} : memref<64x128xf32, #tpu.memory_space<vmem>>, vector<8x128xf32>,
    %c4_i32 = arith.constant 4 : i32
    %c8_i32_81 = arith.constant 8 : i32
    %171 = arith.muli %c4_i32, %c8_i32_81 : i32
    %172 = tpu.assume_multiple %171, 8 : i32
    %173 = arith.index_cast %172 : i32 to index
    %c0_82 = arith.constant 0 : index
    %174 = vector.load %arg7[%173, %c0_82] : memref<64x512xf32, #tpu.memory_space<vmem>>, vector<8x512xf32>
    %c0_83 = arith.constant 0 : index
    %c0_84 = arith.constant 0 : index
    %175 = vector.load %arg8[%c0_83, %c0_84] : memref<8x128xf32, #tpu.memory_space<vmem>>, vector<8x128xf32>
    %cst_85 = arith.constant dense<0.000000e+00> : vector<8x512xf32>
    %176 = tpu.matmul %175, %7, %cst_85 {dimension_numbers = #tpu.dot_dimension_numbers<[1], [0], [0], [1], [0, 0, 1, 1], [], []>} : vector<8x128xf32>, vector<128x512xf32>, vector<8x512xf32> -> vector<8x512xf32>
    %177 = arith.addf %174, %176 : vector<8x512xf32>
    %178 = vector.extract_strided_slice %177 {offsets = [0, 0], sizes = [8, 128], strides = [1, 1]} : vector<8x512xf32> to vector<8x128xf32>
    %179 = arith.negf %178 : vector<8x128xf32>
    %180 = math.exp %179 : vector<8x128xf32>
    %cst_86 = arith.constant 1.000000e+00 : f32
    %181 = vector.broadcast %cst_86 : f32 to vector<8x128xf32>
    %182 = arith.addf %181, %180 : vector<8x128xf32>
    %183 = arith.divf %181, %182 : vector<8x128xf32>
    %184 = vector.extract_strided_slice %177 {offsets = [0, 128], sizes = [8, 128], strides = [1, 1]} : vector<8x512xf32> to vector<8x128xf32>
    %185 = arith.negf %184 : vector<8x128xf32>
    %186 = math.exp %185 : vector<8x128xf32>
    %cst_87 = arith.constant 1.000000e+00 : f32
    %187 = vector.broadcast %cst_87 : f32 to vector<8x128xf32>
    %188 = arith.addf %187, %186 : vector<8x128xf32>
    %189 = arith.divf %187, %188 : vector<8x128xf32>
    %190 = vector.extract_strided_slice %177 {offsets = [0, 256], sizes = [8, 128], strides = [1, 1]} : vector<8x512xf32> to vector<8x128xf32>
    %191 = math.tanh %190 : vector<8x128xf32>
    %192 = vector.extract_strided_slice %177 {offsets = [0, 384], sizes = [8, 128], strides = [1, 1]} : vector<8x512xf32> to vector<8x128xf32>
    %193 = arith.negf %192 : vector<8x128xf32>
    %194 = math.exp %193 : vector<8x128xf32>
    %cst_88 = arith.constant 1.000000e+00 : f32
    %195 = vector.broadcast %cst_88 : f32 to vector<8x128xf32>
    %196 = arith.addf %195, %194 : vector<8x128xf32>
    %197 = arith.divf %195, %196 : vector<8x128xf32>
    %c0_89 = arith.constant 0 : index
    %c0_90 = arith.constant 0 : index
    %198 = vector.load %arg9[%c0_89, %c0_90] : memref<8x128xf32, #tpu.memory_space<vmem>>, vector<8x128xf32>
    %199 = arith.mulf %189, %198 : vector<8x128xf32>
    %200 = arith.mulf %183, %191 : vector<8x128xf32>
    %201 = arith.addf %199, %200 : vector<8x128xf32>
    %202 = math.tanh %201 : vector<8x128xf32>
    %203 = arith.mulf %197, %202 : vector<8x128xf32>
    %c0_91 = arith.constant 0 : index
    %c0_92 = arith.constant 0 : index
    %204 = vector.load %arg9[%c0_91, %c0_92] : memref<8x128xf32, #tpu.memory_space<vmem>>, vector<8x128xf32>
    tpu.vector_store %arg9[%c0_91, %c0_92], %201 {strides = array<i32>} : memref<8x128xf32, #tpu.memory_space<vmem>>, vector<8x128xf32>,
    %c0_93 = arith.constant 0 : index
    %c0_94 = arith.constant 0 : index
    %205 = vector.load %arg8[%c0_93, %c0_94] : memref<8x128xf32, #tpu.memory_space<vmem>>, vector<8x128xf32>
    tpu.vector_store %arg8[%c0_93, %c0_94], %203 {strides = array<i32>} : memref<8x128xf32, #tpu.memory_space<vmem>>, vector<8x128xf32>,
    %c0_i32_95 = arith.constant 0 : i32
    %206 = arith.addi %c0_i32_95, %172 : i32
    %207 = tpu.assume_multiple %206, 8 : i32
    %208 = arith.index_cast %207 : i32 to index
    %c0_96 = arith.constant 0 : index
    %209 = vector.load %arg6[%208, %c0_96] : memref<64x128xf32, #tpu.memory_space<vmem>>, vector<8x128xf32>
    tpu.vector_store %arg6[%208, %c0_96], %203 {strides = array<i32>} : memref<64x128xf32, #tpu.memory_space<vmem>>, vector<8x128xf32>,
    %c5_i32 = arith.constant 5 : i32
    %c8_i32_97 = arith.constant 8 : i32
    %210 = arith.muli %c5_i32, %c8_i32_97 : i32
    %211 = tpu.assume_multiple %210, 8 : i32
    %212 = arith.index_cast %211 : i32 to index
    %c0_98 = arith.constant 0 : index
    %213 = vector.load %arg7[%212, %c0_98] : memref<64x512xf32, #tpu.memory_space<vmem>>, vector<8x512xf32>
    %c0_99 = arith.constant 0 : index
    %c0_100 = arith.constant 0 : index
    %214 = vector.load %arg8[%c0_99, %c0_100] : memref<8x128xf32, #tpu.memory_space<vmem>>, vector<8x128xf32>
    %cst_101 = arith.constant dense<0.000000e+00> : vector<8x512xf32>
    %215 = tpu.matmul %214, %7, %cst_101 {dimension_numbers = #tpu.dot_dimension_numbers<[1], [0], [0], [1], [0, 0, 1, 1], [], []>} : vector<8x128xf32>, vector<128x512xf32>, vector<8x512xf32> -> vector<8x512xf32>
    %216 = arith.addf %213, %215 : vector<8x512xf32>
    %217 = vector.extract_strided_slice %216 {offsets = [0, 0], sizes = [8, 128], strides = [1, 1]} : vector<8x512xf32> to vector<8x128xf32>
    %218 = arith.negf %217 : vector<8x128xf32>
    %219 = math.exp %218 : vector<8x128xf32>
    %cst_102 = arith.constant 1.000000e+00 : f32
    %220 = vector.broadcast %cst_102 : f32 to vector<8x128xf32>
    %221 = arith.addf %220, %219 : vector<8x128xf32>
    %222 = arith.divf %220, %221 : vector<8x128xf32>
    %223 = vector.extract_strided_slice %216 {offsets = [0, 128], sizes = [8, 128], strides = [1, 1]} : vector<8x512xf32> to vector<8x128xf32>
    %224 = arith.negf %223 : vector<8x128xf32>
    %225 = math.exp %224 : vector<8x128xf32>
    %cst_103 = arith.constant 1.000000e+00 : f32
    %226 = vector.broadcast %cst_103 : f32 to vector<8x128xf32>
    %227 = arith.addf %226, %225 : vector<8x128xf32>
    %228 = arith.divf %226, %227 : vector<8x128xf32>
    %229 = vector.extract_strided_slice %216 {offsets = [0, 256], sizes = [8, 128], strides = [1, 1]} : vector<8x512xf32> to vector<8x128xf32>
    %230 = math.tanh %229 : vector<8x128xf32>
    %231 = vector.extract_strided_slice %216 {offsets = [0, 384], sizes = [8, 128], strides = [1, 1]} : vector<8x512xf32> to vector<8x128xf32>
    %232 = arith.negf %231 : vector<8x128xf32>
    %233 = math.exp %232 : vector<8x128xf32>
    %cst_104 = arith.constant 1.000000e+00 : f32
    %234 = vector.broadcast %cst_104 : f32 to vector<8x128xf32>
    %235 = arith.addf %234, %233 : vector<8x128xf32>
    %236 = arith.divf %234, %235 : vector<8x128xf32>
    %c0_105 = arith.constant 0 : index
    %c0_106 = arith.constant 0 : index
    %237 = vector.load %arg9[%c0_105, %c0_106] : memref<8x128xf32, #tpu.memory_space<vmem>>, vector<8x128xf32>
    %238 = arith.mulf %228, %237 : vector<8x128xf32>
    %239 = arith.mulf %222, %230 : vector<8x128xf32>
    %240 = arith.addf %238, %239 : vector<8x128xf32>
    %241 = math.tanh %240 : vector<8x128xf32>
    %242 = arith.mulf %236, %241 : vector<8x128xf32>
    %c0_107 = arith.constant 0 : index
    %c0_108 = arith.constant 0 : index
    %243 = vector.load %arg9[%c0_107, %c0_108] : memref<8x128xf32, #tpu.memory_space<vmem>>, vector<8x128xf32>
    tpu.vector_store %arg9[%c0_107, %c0_108], %240 {strides = array<i32>} : memref<8x128xf32, #tpu.memory_space<vmem>>, vector<8x128xf32>,
    %c0_109 = arith.constant 0 : index
    %c0_110 = arith.constant 0 : index
    %244 = vector.load %arg8[%c0_109, %c0_110] : memref<8x128xf32, #tpu.memory_space<vmem>>, vector<8x128xf32>
    tpu.vector_store %arg8[%c0_109, %c0_110], %242 {strides = array<i32>} : memref<8x128xf32, #tpu.memory_space<vmem>>, vector<8x128xf32>,
    %c0_i32_111 = arith.constant 0 : i32
    %245 = arith.addi %c0_i32_111, %211 : i32
    %246 = tpu.assume_multiple %245, 8 : i32
    %247 = arith.index_cast %246 : i32 to index
    %c0_112 = arith.constant 0 : index
    %248 = vector.load %arg6[%247, %c0_112] : memref<64x128xf32, #tpu.memory_space<vmem>>, vector<8x128xf32>
    tpu.vector_store %arg6[%247, %c0_112], %242 {strides = array<i32>} : memref<64x128xf32, #tpu.memory_space<vmem>>, vector<8x128xf32>,
    %c6_i32 = arith.constant 6 : i32
    %c8_i32_113 = arith.constant 8 : i32
    %249 = arith.muli %c6_i32, %c8_i32_113 : i32
    %250 = tpu.assume_multiple %249, 8 : i32
    %251 = arith.index_cast %250 : i32 to index
    %c0_114 = arith.constant 0 : index
    %252 = vector.load %arg7[%251, %c0_114] : memref<64x512xf32, #tpu.memory_space<vmem>>, vector<8x512xf32>
    %c0_115 = arith.constant 0 : index
    %c0_116 = arith.constant 0 : index
    %253 = vector.load %arg8[%c0_115, %c0_116] : memref<8x128xf32, #tpu.memory_space<vmem>>, vector<8x128xf32>
    %cst_117 = arith.constant dense<0.000000e+00> : vector<8x512xf32>
    %254 = tpu.matmul %253, %7, %cst_117 {dimension_numbers = #tpu.dot_dimension_numbers<[1], [0], [0], [1], [0, 0, 1, 1], [], []>} : vector<8x128xf32>, vector<128x512xf32>, vector<8x512xf32> -> vector<8x512xf32>
    %255 = arith.addf %252, %254 : vector<8x512xf32>
    %256 = vector.extract_strided_slice %255 {offsets = [0, 0], sizes = [8, 128], strides = [1, 1]} : vector<8x512xf32> to vector<8x128xf32>
    %257 = arith.negf %256 : vector<8x128xf32>
    %258 = math.exp %257 : vector<8x128xf32>
    %cst_118 = arith.constant 1.000000e+00 : f32
    %259 = vector.broadcast %cst_118 : f32 to vector<8x128xf32>
    %260 = arith.addf %259, %258 : vector<8x128xf32>
    %261 = arith.divf %259, %260 : vector<8x128xf32>
    %262 = vector.extract_strided_slice %255 {offsets = [0, 128], sizes = [8, 128], strides = [1, 1]} : vector<8x512xf32> to vector<8x128xf32>
    %263 = arith.negf %262 : vector<8x128xf32>
    %264 = math.exp %263 : vector<8x128xf32>
    %cst_119 = arith.constant 1.000000e+00 : f32
    %265 = vector.broadcast %cst_119 : f32 to vector<8x128xf32>
    %266 = arith.addf %265, %264 : vector<8x128xf32>
    %267 = arith.divf %265, %266 : vector<8x128xf32>
    %268 = vector.extract_strided_slice %255 {offsets = [0, 256], sizes = [8, 128], strides = [1, 1]} : vector<8x512xf32> to vector<8x128xf32>
    %269 = math.tanh %268 : vector<8x128xf32>
    %270 = vector.extract_strided_slice %255 {offsets = [0, 384], sizes = [8, 128], strides = [1, 1]} : vector<8x512xf32> to vector<8x128xf32>
    %271 = arith.negf %270 : vector<8x128xf32>
    %272 = math.exp %271 : vector<8x128xf32>
    %cst_120 = arith.constant 1.000000e+00 : f32
    %273 = vector.broadcast %cst_120 : f32 to vector<8x128xf32>
    %274 = arith.addf %273, %272 : vector<8x128xf32>
    %275 = arith.divf %273, %274 : vector<8x128xf32>
    %c0_121 = arith.constant 0 : index
    %c0_122 = arith.constant 0 : index
    %276 = vector.load %arg9[%c0_121, %c0_122] : memref<8x128xf32, #tpu.memory_space<vmem>>, vector<8x128xf32>
    %277 = arith.mulf %267, %276 : vector<8x128xf32>
    %278 = arith.mulf %261, %269 : vector<8x128xf32>
    %279 = arith.addf %277, %278 : vector<8x128xf32>
    %280 = math.tanh %279 : vector<8x128xf32>
    %281 = arith.mulf %275, %280 : vector<8x128xf32>
    %c0_123 = arith.constant 0 : index
    %c0_124 = arith.constant 0 : index
    %282 = vector.load %arg9[%c0_123, %c0_124] : memref<8x128xf32, #tpu.memory_space<vmem>>, vector<8x128xf32>
    tpu.vector_store %arg9[%c0_123, %c0_124], %279 {strides = array<i32>} : memref<8x128xf32, #tpu.memory_space<vmem>>, vector<8x128xf32>,
    %c0_125 = arith.constant 0 : index
    %c0_126 = arith.constant 0 : index
    %283 = vector.load %arg8[%c0_125, %c0_126] : memref<8x128xf32, #tpu.memory_space<vmem>>, vector<8x128xf32>
    tpu.vector_store %arg8[%c0_125, %c0_126], %281 {strides = array<i32>} : memref<8x128xf32, #tpu.memory_space<vmem>>, vector<8x128xf32>,
    %c0_i32_127 = arith.constant 0 : i32
    %284 = arith.addi %c0_i32_127, %250 : i32
    %285 = tpu.assume_multiple %284, 8 : i32
    %286 = arith.index_cast %285 : i32 to index
    %c0_128 = arith.constant 0 : index
    %287 = vector.load %arg6[%286, %c0_128] : memref<64x128xf32, #tpu.memory_space<vmem>>, vector<8x128xf32>
    tpu.vector_store %arg6[%286, %c0_128], %281 {strides = array<i32>} : memref<64x128xf32, #tpu.memory_space<vmem>>, vector<8x128xf32>,
    %c7_i32 = arith.constant 7 : i32
    %c8_i32_129 = arith.constant 8 : i32
    %288 = arith.muli %c7_i32, %c8_i32_129 : i32
    %289 = tpu.assume_multiple %288, 8 : i32
    %290 = arith.index_cast %289 : i32 to index
    %c0_130 = arith.constant 0 : index
    %291 = vector.load %arg7[%290, %c0_130] : memref<64x512xf32, #tpu.memory_space<vmem>>, vector<8x512xf32>
    %c0_131 = arith.constant 0 : index
    %c0_132 = arith.constant 0 : index
    %292 = vector.load %arg8[%c0_131, %c0_132] : memref<8x128xf32, #tpu.memory_space<vmem>>, vector<8x128xf32>
    %cst_133 = arith.constant dense<0.000000e+00> : vector<8x512xf32>
    %293 = tpu.matmul %292, %7, %cst_133 {dimension_numbers = #tpu.dot_dimension_numbers<[1], [0], [0], [1], [0, 0, 1, 1], [], []>} : vector<8x128xf32>, vector<128x512xf32>, vector<8x512xf32> -> vector<8x512xf32>
    %294 = arith.addf %291, %293 : vector<8x512xf32>
    %295 = vector.extract_strided_slice %294 {offsets = [0, 0], sizes = [8, 128], strides = [1, 1]} : vector<8x512xf32> to vector<8x128xf32>
    %296 = arith.negf %295 : vector<8x128xf32>
    %297 = math.exp %296 : vector<8x128xf32>
    %cst_134 = arith.constant 1.000000e+00 : f32
    %298 = vector.broadcast %cst_134 : f32 to vector<8x128xf32>
    %299 = arith.addf %298, %297 : vector<8x128xf32>
    %300 = arith.divf %298, %299 : vector<8x128xf32>
    %301 = vector.extract_strided_slice %294 {offsets = [0, 128], sizes = [8, 128], strides = [1, 1]} : vector<8x512xf32> to vector<8x128xf32>
    %302 = arith.negf %301 : vector<8x128xf32>
    %303 = math.exp %302 : vector<8x128xf32>
    %cst_135 = arith.constant 1.000000e+00 : f32
    %304 = vector.broadcast %cst_135 : f32 to vector<8x128xf32>
    %305 = arith.addf %304, %303 : vector<8x128xf32>
    %306 = arith.divf %304, %305 : vector<8x128xf32>
    %307 = vector.extract_strided_slice %294 {offsets = [0, 256], sizes = [8, 128], strides = [1, 1]} : vector<8x512xf32> to vector<8x128xf32>
    %308 = math.tanh %307 : vector<8x128xf32>
    %309 = vector.extract_strided_slice %294 {offsets = [0, 384], sizes = [8, 128], strides = [1, 1]} : vector<8x512xf32> to vector<8x128xf32>
    %310 = arith.negf %309 : vector<8x128xf32>
    %311 = math.exp %310 : vector<8x128xf32>
    %cst_136 = arith.constant 1.000000e+00 : f32
    %312 = vector.broadcast %cst_136 : f32 to vector<8x128xf32>
    %313 = arith.addf %312, %311 : vector<8x128xf32>
    %314 = arith.divf %312, %313 : vector<8x128xf32>
    %c0_137 = arith.constant 0 : index
    %c0_138 = arith.constant 0 : index
    %315 = vector.load %arg9[%c0_137, %c0_138] : memref<8x128xf32, #tpu.memory_space<vmem>>, vector<8x128xf32>
    %316 = arith.mulf %306, %315 : vector<8x128xf32>
    %317 = arith.mulf %300, %308 : vector<8x128xf32>
    %318 = arith.addf %316, %317 : vector<8x128xf32>
    %319 = math.tanh %318 : vector<8x128xf32>
    %320 = arith.mulf %314, %319 : vector<8x128xf32>
    %c0_139 = arith.constant 0 : index
    %c0_140 = arith.constant 0 : index
    %321 = vector.load %arg9[%c0_139, %c0_140] : memref<8x128xf32, #tpu.memory_space<vmem>>, vector<8x128xf32>
    tpu.vector_store %arg9[%c0_139, %c0_140], %318 {strides = array<i32>} : memref<8x128xf32, #tpu.memory_space<vmem>>, vector<8x128xf32>,
    %c0_141 = arith.constant 0 : index
    %c0_142 = arith.constant 0 : index
    %322 = vector.load %arg8[%c0_141, %c0_142] : memref<8x128xf32, #tpu.memory_space<vmem>>, vector<8x128xf32>
    tpu.vector_store %arg8[%c0_141, %c0_142], %320 {strides = array<i32>} : memref<8x128xf32, #tpu.memory_space<vmem>>, vector<8x128xf32>,
    %c0_i32_143 = arith.constant 0 : i32
    %323 = arith.addi %c0_i32_143, %289 : i32
    %324 = tpu.assume_multiple %323, 8 : i32
    %325 = arith.index_cast %324 : i32 to index
    %c0_144 = arith.constant 0 : index
    %326 = vector.load %arg6[%325, %c0_144] : memref<64x128xf32, #tpu.memory_space<vmem>>, vector<8x128xf32>
    tpu.vector_store %arg6[%325, %c0_144], %320 {strides = array<i32>} : memref<64x128xf32, #tpu.memory_space<vmem>>, vector<8x128xf32>,
    %c8_i32_145 = arith.constant 8 : i32
    %c0_146 = arith.constant 0 : index
    %c0_147 = arith.constant 0 : index
    %327 = vector.load %arg8[%c0_146, %c0_147] : memref<8x128xf32, #tpu.memory_space<vmem>>, vector<8x128xf32>
    %c0_148 = arith.constant 0 : index
    %c0_149 = arith.constant 0 : index
    %c0_150 = arith.constant 0 : index
    %328 = vector.load %arg4[%c0_148, %c0_149, %c0_150] : memref<2x8x128xf32, #tpu.memory_space<vmem>>, vector<1x8x128xf32>
    %329 = vector.shape_cast %328 : vector<1x8x128xf32> to vector<8x128xf32>
    %330 = vector.shape_cast %327 : vector<8x128xf32> to vector<1x8x128xf32>
    tpu.vector_store %arg4[%c0_148, %c0_149, %c0_150], %330 {strides = array<i32>} : memref<2x8x128xf32, #tpu.memory_space<vmem>>, vector<1x8x128xf32>,
    %c0_151 = arith.constant 0 : index
    %c0_152 = arith.constant 0 : index
    %331 = vector.load %arg9[%c0_151, %c0_152] : memref<8x128xf32, #tpu.memory_space<vmem>>, vector<8x128xf32>
    %c0_153 = arith.constant 0 : index
    %c0_154 = arith.constant 0 : index
    %c0_155 = arith.constant 0 : index
    %332 = vector.load %arg5[%c0_153, %c0_154, %c0_155] : memref<2x8x128xf32, #tpu.memory_space<vmem>>, vector<1x8x128xf32>
    %333 = vector.shape_cast %332 : vector<1x8x128xf32> to vector<8x128xf32>
    %334 = vector.shape_cast %331 : vector<8x128xf32> to vector<1x8x128xf32>
    tpu.vector_store %arg5[%c0_153, %c0_154, %c0_155], %334 {strides = array<i32>} : memref<2x8x128xf32, #tpu.memory_space<vmem>>, vector<1x8x128xf32>,
    %cst_156 = arith.constant 0.000000e+00 : f32
    %335 = vector.broadcast %cst_156 : f32 to vector<8x128xf32>
    %c0_157 = arith.constant 0 : index
    %c0_158 = arith.constant 0 : index
    %336 = vector.load %arg8[%c0_157, %c0_158] : memref<8x128xf32, #tpu.memory_space<vmem>>, vector<8x128xf32>
    tpu.vector_store %arg8[%c0_157, %c0_158], %335 {strides = array<i32>} : memref<8x128xf32, #tpu.memory_space<vmem>>, vector<8x128xf32>,
    %cst_159 = arith.constant 0.000000e+00 : f32
    %337 = vector.broadcast %cst_159 : f32 to vector<8x128xf32>
    %c0_160 = arith.constant 0 : index
    %c0_161 = arith.constant 0 : index
    %338 = vector.load %arg9[%c0_160, %c0_161] : memref<8x128xf32, #tpu.memory_space<vmem>>, vector<8x128xf32>
    tpu.vector_store %arg9[%c0_160, %c0_161], %337 {strides = array<i32>} : memref<8x128xf32, #tpu.memory_space<vmem>>, vector<8x128xf32>,
    %c1 = arith.constant 1 : index
    %c0_162 = arith.constant 0 : index
    %c0_163 = arith.constant 0 : index
    %339 = vector.load %arg3[%c1, %c0_162, %c0_163] : memref<2x1x512xf32, #tpu.memory_space<vmem>>, vector<1x1x512xf32>
    %340 = vector.shape_cast %339 : vector<1x1x512xf32> to vector<1x512xf32>
    %c1_164 = arith.constant 1 : index
    %c0_165 = arith.constant 0 : index
    %c0_166 = arith.constant 0 : index
    %341 = vector.load %arg2[%c1_164, %c0_165, %c0_166] : memref<2x128x512xf32, #tpu.memory_space<vmem>>, vector<1x128x512xf32>
    %342 = vector.shape_cast %341 : vector<1x128x512xf32> to vector<128x512xf32>
    %c0_167 = arith.constant 0 : index
    %c0_168 = arith.constant 0 : index
    %343 = vector.load %arg6[%c0_167, %c0_168] : memref<64x128xf32, #tpu.memory_space<vmem>>, vector<64x128xf32>
    %344 = arith.truncf %343 : vector<64x128xf32> to vector<64x128xbf16>
    %c1_169 = arith.constant 1 : index
    %c0_170 = arith.constant 0 : index
    %c0_171 = arith.constant 0 : index
    %345 = vector.load %arg1[%c1_169, %c0_170, %c0_171] : memref<2x128x512xbf16, #tpu.memory_space<vmem>>, vector<1x128x512xbf16>
    %346 = vector.shape_cast %345 : vector<1x128x512xbf16> to vector<128x512xbf16>
    %cst_172 = arith.constant dense<0.000000e+00> : vector<64x512xf32>
    %347 = tpu.matmul %344, %346, %cst_172 {dimension_numbers = #tpu.dot_dimension_numbers<[1], [0], [0], [1], [0, 0, 1, 1], [], []>} : vector<64x128xbf16>, vector<128x512xbf16>, vector<64x512xf32> -> vector<64x512xf32>
    %348 = vector.broadcast %340 : vector<1x512xf32> to vector<64x512xf32>
    %349 = arith.addf %347, %348 : vector<64x512xf32>
    %c0_173 = arith.constant 0 : index
    %c0_174 = arith.constant 0 : index
    %350 = vector.load %arg7[%c0_173, %c0_174] : memref<64x512xf32, #tpu.memory_space<vmem>>, vector<64x512xf32>
    tpu.vector_store %arg7[%c0_173, %c0_174], %349 {strides = array<i32>} : memref<64x512xf32, #tpu.memory_space<vmem>>, vector<64x512xf32>,
    %c0_i32_175 = arith.constant 0 : i32
    %c8_i32_176 = arith.constant 8 : i32
    %351 = arith.muli %c0_i32_175, %c8_i32_176 : i32
    %352 = tpu.assume_multiple %351, 8 : i32
    %353 = arith.index_cast %352 : i32 to index
    %c0_177 = arith.constant 0 : index
    %354 = vector.load %arg7[%353, %c0_177] : memref<64x512xf32, #tpu.memory_space<vmem>>, vector<8x512xf32>
    %c0_178 = arith.constant 0 : index
    %c0_179 = arith.constant 0 : index
    %355 = vector.load %arg8[%c0_178, %c0_179] : memref<8x128xf32, #tpu.memory_space<vmem>>, vector<8x128xf32>
    %cst_180 = arith.constant dense<0.000000e+00> : vector<8x512xf32>
    %356 = tpu.matmul %355, %342, %cst_180 {dimension_numbers = #tpu.dot_dimension_numbers<[1], [0], [0], [1], [0, 0, 1, 1], [], []>} : vector<8x128xf32>, vector<128x512xf32>, vector<8x512xf32> -> vector<8x512xf32>
    %357 = arith.addf %354, %356 : vector<8x512xf32>
    %358 = vector.extract_strided_slice %357 {offsets = [0, 0], sizes = [8, 128], strides = [1, 1]} : vector<8x512xf32> to vector<8x128xf32>
    %359 = arith.negf %358 : vector<8x128xf32>
    %360 = math.exp %359 : vector<8x128xf32>
    %cst_181 = arith.constant 1.000000e+00 : f32
    %361 = vector.broadcast %cst_181 : f32 to vector<8x128xf32>
    %362 = arith.addf %361, %360 : vector<8x128xf32>
    %363 = arith.divf %361, %362 : vector<8x128xf32>
    %364 = vector.extract_strided_slice %357 {offsets = [0, 128], sizes = [8, 128], strides = [1, 1]} : vector<8x512xf32> to vector<8x128xf32>
    %365 = arith.negf %364 : vector<8x128xf32>
    %366 = math.exp %365 : vector<8x128xf32>
    %cst_182 = arith.constant 1.000000e+00 : f32
    %367 = vector.broadcast %cst_182 : f32 to vector<8x128xf32>
    %368 = arith.addf %367, %366 : vector<8x128xf32>
    %369 = arith.divf %367, %368 : vector<8x128xf32>
    %370 = vector.extract_strided_slice %357 {offsets = [0, 256], sizes = [8, 128], strides = [1, 1]} : vector<8x512xf32> to vector<8x128xf32>
    %371 = math.tanh %370 : vector<8x128xf32>
    %372 = vector.extract_strided_slice %357 {offsets = [0, 384], sizes = [8, 128], strides = [1, 1]} : vector<8x512xf32> to vector<8x128xf32>
    %373 = arith.negf %372 : vector<8x128xf32>
    %374 = math.exp %373 : vector<8x128xf32>
    %cst_183 = arith.constant 1.000000e+00 : f32
    %375 = vector.broadcast %cst_183 : f32 to vector<8x128xf32>
    %376 = arith.addf %375, %374 : vector<8x128xf32>
    %377 = arith.divf %375, %376 : vector<8x128xf32>
    %c0_184 = arith.constant 0 : index
    %c0_185 = arith.constant 0 : index
    %378 = vector.load %arg9[%c0_184, %c0_185] : memref<8x128xf32, #tpu.memory_space<vmem>>, vector<8x128xf32>
    %379 = arith.mulf %369, %378 : vector<8x128xf32>
    %380 = arith.mulf %363, %371 : vector<8x128xf32>
    %381 = arith.addf %379, %380 : vector<8x128xf32>
    %382 = math.tanh %381 : vector<8x128xf32>
    %383 = arith.mulf %377, %382 : vector<8x128xf32>
    %c0_186 = arith.constant 0 : index
    %c0_187 = arith.constant 0 : index
    %384 = vector.load %arg9[%c0_186, %c0_187] : memref<8x128xf32, #tpu.memory_space<vmem>>, vector<8x128xf32>
    tpu.vector_store %arg9[%c0_186, %c0_187], %381 {strides = array<i32>} : memref<8x128xf32, #tpu.memory_space<vmem>>, vector<8x128xf32>,
    %c0_188 = arith.constant 0 : index
    %c0_189 = arith.constant 0 : index
    %385 = vector.load %arg8[%c0_188, %c0_189] : memref<8x128xf32, #tpu.memory_space<vmem>>, vector<8x128xf32>
    tpu.vector_store %arg8[%c0_188, %c0_189], %383 {strides = array<i32>} : memref<8x128xf32, #tpu.memory_space<vmem>>, vector<8x128xf32>,
    %c1_i32_190 = arith.constant 1 : i32
    %c8_i32_191 = arith.constant 8 : i32
    %386 = arith.muli %c1_i32_190, %c8_i32_191 : i32
    %387 = tpu.assume_multiple %386, 8 : i32
    %388 = arith.index_cast %387 : i32 to index
    %c0_192 = arith.constant 0 : index
    %389 = vector.load %arg7[%388, %c0_192] : memref<64x512xf32, #tpu.memory_space<vmem>>, vector<8x512xf32>
    %c0_193 = arith.constant 0 : index
    %c0_194 = arith.constant 0 : index
    %390 = vector.load %arg8[%c0_193, %c0_194] : memref<8x128xf32, #tpu.memory_space<vmem>>, vector<8x128xf32>
    %cst_195 = arith.constant dense<0.000000e+00> : vector<8x512xf32>
    %391 = tpu.matmul %390, %342, %cst_195 {dimension_numbers = #tpu.dot_dimension_numbers<[1], [0], [0], [1], [0, 0, 1, 1], [], []>} : vector<8x128xf32>, vector<128x512xf32>, vector<8x512xf32> -> vector<8x512xf32>
    %392 = arith.addf %389, %391 : vector<8x512xf32>
    %393 = vector.extract_strided_slice %392 {offsets = [0, 0], sizes = [8, 128], strides = [1, 1]} : vector<8x512xf32> to vector<8x128xf32>
    %394 = arith.negf %393 : vector<8x128xf32>
    %395 = math.exp %394 : vector<8x128xf32>
    %cst_196 = arith.constant 1.000000e+00 : f32
    %396 = vector.broadcast %cst_196 : f32 to vector<8x128xf32>
    %397 = arith.addf %396, %395 : vector<8x128xf32>
    %398 = arith.divf %396, %397 : vector<8x128xf32>
    %399 = vector.extract_strided_slice %392 {offsets = [0, 128], sizes = [8, 128], strides = [1, 1]} : vector<8x512xf32> to vector<8x128xf32>
    %400 = arith.negf %399 : vector<8x128xf32>
    %401 = math.exp %400 : vector<8x128xf32>
    %cst_197 = arith.constant 1.000000e+00 : f32
    %402 = vector.broadcast %cst_197 : f32 to vector<8x128xf32>
    %403 = arith.addf %402, %401 : vector<8x128xf32>
    %404 = arith.divf %402, %403 : vector<8x128xf32>
    %405 = vector.extract_strided_slice %392 {offsets = [0, 256], sizes = [8, 128], strides = [1, 1]} : vector<8x512xf32> to vector<8x128xf32>
    %406 = math.tanh %405 : vector<8x128xf32>
    %407 = vector.extract_strided_slice %392 {offsets = [0, 384], sizes = [8, 128], strides = [1, 1]} : vector<8x512xf32> to vector<8x128xf32>
    %408 = arith.negf %407 : vector<8x128xf32>
    %409 = math.exp %408 : vector<8x128xf32>
    %cst_198 = arith.constant 1.000000e+00 : f32
    %410 = vector.broadcast %cst_198 : f32 to vector<8x128xf32>
    %411 = arith.addf %410, %409 : vector<8x128xf32>
    %412 = arith.divf %410, %411 : vector<8x128xf32>
    %c0_199 = arith.constant 0 : index
    %c0_200 = arith.constant 0 : index
    %413 = vector.load %arg9[%c0_199, %c0_200] : memref<8x128xf32, #tpu.memory_space<vmem>>, vector<8x128xf32>
    %414 = arith.mulf %404, %413 : vector<8x128xf32>
    %415 = arith.mulf %398, %406 : vector<8x128xf32>
    %416 = arith.addf %414, %415 : vector<8x128xf32>
    %417 = math.tanh %416 : vector<8x128xf32>
    %418 = arith.mulf %412, %417 : vector<8x128xf32>
    %c0_201 = arith.constant 0 : index
    %c0_202 = arith.constant 0 : index
    %419 = vector.load %arg9[%c0_201, %c0_202] : memref<8x128xf32, #tpu.memory_space<vmem>>, vector<8x128xf32>
    tpu.vector_store %arg9[%c0_201, %c0_202], %416 {strides = array<i32>} : memref<8x128xf32, #tpu.memory_space<vmem>>, vector<8x128xf32>,
    %c0_203 = arith.constant 0 : index
    %c0_204 = arith.constant 0 : index
    %420 = vector.load %arg8[%c0_203, %c0_204] : memref<8x128xf32, #tpu.memory_space<vmem>>, vector<8x128xf32>
    tpu.vector_store %arg8[%c0_203, %c0_204], %418 {strides = array<i32>} : memref<8x128xf32, #tpu.memory_space<vmem>>, vector<8x128xf32>,
    %c2_i32_205 = arith.constant 2 : i32
    %c8_i32_206 = arith.constant 8 : i32
    %421 = arith.muli %c2_i32_205, %c8_i32_206 : i32
    %422 = tpu.assume_multiple %421, 8 : i32
    %423 = arith.index_cast %422 : i32 to index
    %c0_207 = arith.constant 0 : index
    %424 = vector.load %arg7[%423, %c0_207] : memref<64x512xf32, #tpu.memory_space<vmem>>, vector<8x512xf32>
    %c0_208 = arith.constant 0 : index
    %c0_209 = arith.constant 0 : index
    %425 = vector.load %arg8[%c0_208, %c0_209] : memref<8x128xf32, #tpu.memory_space<vmem>>, vector<8x128xf32>
    %cst_210 = arith.constant dense<0.000000e+00> : vector<8x512xf32>
    %426 = tpu.matmul %425, %342, %cst_210 {dimension_numbers = #tpu.dot_dimension_numbers<[1], [0], [0], [1], [0, 0, 1, 1], [], []>} : vector<8x128xf32>, vector<128x512xf32>, vector<8x512xf32> -> vector<8x512xf32>
    %427 = arith.addf %424, %426 : vector<8x512xf32>
    %428 = vector.extract_strided_slice %427 {offsets = [0, 0], sizes = [8, 128], strides = [1, 1]} : vector<8x512xf32> to vector<8x128xf32>
    %429 = arith.negf %428 : vector<8x128xf32>
    %430 = math.exp %429 : vector<8x128xf32>
    %cst_211 = arith.constant 1.000000e+00 : f32
    %431 = vector.broadcast %cst_211 : f32 to vector<8x128xf32>
    %432 = arith.addf %431, %430 : vector<8x128xf32>
    %433 = arith.divf %431, %432 : vector<8x128xf32>
    %434 = vector.extract_strided_slice %427 {offsets = [0, 128], sizes = [8, 128], strides = [1, 1]} : vector<8x512xf32> to vector<8x128xf32>
    %435 = arith.negf %434 : vector<8x128xf32>
    %436 = math.exp %435 : vector<8x128xf32>
    %cst_212 = arith.constant 1.000000e+00 : f32
    %437 = vector.broadcast %cst_212 : f32 to vector<8x128xf32>
    %438 = arith.addf %437, %436 : vector<8x128xf32>
    %439 = arith.divf %437, %438 : vector<8x128xf32>
    %440 = vector.extract_strided_slice %427 {offsets = [0, 256], sizes = [8, 128], strides = [1, 1]} : vector<8x512xf32> to vector<8x128xf32>
    %441 = math.tanh %440 : vector<8x128xf32>
    %442 = vector.extract_strided_slice %427 {offsets = [0, 384], sizes = [8, 128], strides = [1, 1]} : vector<8x512xf32> to vector<8x128xf32>
    %443 = arith.negf %442 : vector<8x128xf32>
    %444 = math.exp %443 : vector<8x128xf32>
    %cst_213 = arith.constant 1.000000e+00 : f32
    %445 = vector.broadcast %cst_213 : f32 to vector<8x128xf32>
    %446 = arith.addf %445, %444 : vector<8x128xf32>
    %447 = arith.divf %445, %446 : vector<8x128xf32>
    %c0_214 = arith.constant 0 : index
    %c0_215 = arith.constant 0 : index
    %448 = vector.load %arg9[%c0_214, %c0_215] : memref<8x128xf32, #tpu.memory_space<vmem>>, vector<8x128xf32>
    %449 = arith.mulf %439, %448 : vector<8x128xf32>
    %450 = arith.mulf %433, %441 : vector<8x128xf32>
    %451 = arith.addf %449, %450 : vector<8x128xf32>
    %452 = math.tanh %451 : vector<8x128xf32>
    %453 = arith.mulf %447, %452 : vector<8x128xf32>
    %c0_216 = arith.constant 0 : index
    %c0_217 = arith.constant 0 : index
    %454 = vector.load %arg9[%c0_216, %c0_217] : memref<8x128xf32, #tpu.memory_space<vmem>>, vector<8x128xf32>
    tpu.vector_store %arg9[%c0_216, %c0_217], %451 {strides = array<i32>} : memref<8x128xf32, #tpu.memory_space<vmem>>, vector<8x128xf32>,
    %c0_218 = arith.constant 0 : index
    %c0_219 = arith.constant 0 : index
    %455 = vector.load %arg8[%c0_218, %c0_219] : memref<8x128xf32, #tpu.memory_space<vmem>>, vector<8x128xf32>
    tpu.vector_store %arg8[%c0_218, %c0_219], %453 {strides = array<i32>} : memref<8x128xf32, #tpu.memory_space<vmem>>, vector<8x128xf32>,
    %c3_i32_220 = arith.constant 3 : i32
    %c8_i32_221 = arith.constant 8 : i32
    %456 = arith.muli %c3_i32_220, %c8_i32_221 : i32
    %457 = tpu.assume_multiple %456, 8 : i32
    %458 = arith.index_cast %457 : i32 to index
    %c0_222 = arith.constant 0 : index
    %459 = vector.load %arg7[%458, %c0_222] : memref<64x512xf32, #tpu.memory_space<vmem>>, vector<8x512xf32>
    %c0_223 = arith.constant 0 : index
    %c0_224 = arith.constant 0 : index
    %460 = vector.load %arg8[%c0_223, %c0_224] : memref<8x128xf32, #tpu.memory_space<vmem>>, vector<8x128xf32>
    %cst_225 = arith.constant dense<0.000000e+00> : vector<8x512xf32>
    %461 = tpu.matmul %460, %342, %cst_225 {dimension_numbers = #tpu.dot_dimension_numbers<[1], [0], [0], [1], [0, 0, 1, 1], [], []>} : vector<8x128xf32>, vector<128x512xf32>, vector<8x512xf32> -> vector<8x512xf32>
    %462 = arith.addf %459, %461 : vector<8x512xf32>
    %463 = vector.extract_strided_slice %462 {offsets = [0, 0], sizes = [8, 128], strides = [1, 1]} : vector<8x512xf32> to vector<8x128xf32>
    %464 = arith.negf %463 : vector<8x128xf32>
    %465 = math.exp %464 : vector<8x128xf32>
    %cst_226 = arith.constant 1.000000e+00 : f32
    %466 = vector.broadcast %cst_226 : f32 to vector<8x128xf32>
    %467 = arith.addf %466, %465 : vector<8x128xf32>
    %468 = arith.divf %466, %467 : vector<8x128xf32>
    %469 = vector.extract_strided_slice %462 {offsets = [0, 128], sizes = [8, 128], strides = [1, 1]} : vector<8x512xf32> to vector<8x128xf32>
    %470 = arith.negf %469 : vector<8x128xf32>
    %471 = math.exp %470 : vector<8x128xf32>
    %cst_227 = arith.constant 1.000000e+00 : f32
    %472 = vector.broadcast %cst_227 : f32 to vector<8x128xf32>
    %473 = arith.addf %472, %471 : vector<8x128xf32>
    %474 = arith.divf %472, %473 : vector<8x128xf32>
    %475 = vector.extract_strided_slice %462 {offsets = [0, 256], sizes = [8, 128], strides = [1, 1]} : vector<8x512xf32> to vector<8x128xf32>
    %476 = math.tanh %475 : vector<8x128xf32>
    %477 = vector.extract_strided_slice %462 {offsets = [0, 384], sizes = [8, 128], strides = [1, 1]} : vector<8x512xf32> to vector<8x128xf32>
    %478 = arith.negf %477 : vector<8x128xf32>
    %479 = math.exp %478 : vector<8x128xf32>
    %cst_228 = arith.constant 1.000000e+00 : f32
    %480 = vector.broadcast %cst_228 : f32 to vector<8x128xf32>
    %481 = arith.addf %480, %479 : vector<8x128xf32>
    %482 = arith.divf %480, %481 : vector<8x128xf32>
    %c0_229 = arith.constant 0 : index
    %c0_230 = arith.constant 0 : index
    %483 = vector.load %arg9[%c0_229, %c0_230] : memref<8x128xf32, #tpu.memory_space<vmem>>, vector<8x128xf32>
    %484 = arith.mulf %474, %483 : vector<8x128xf32>
    %485 = arith.mulf %468, %476 : vector<8x128xf32>
    %486 = arith.addf %484, %485 : vector<8x128xf32>
    %487 = math.tanh %486 : vector<8x128xf32>
    %488 = arith.mulf %482, %487 : vector<8x128xf32>
    %c0_231 = arith.constant 0 : index
    %c0_232 = arith.constant 0 : index
    %489 = vector.load %arg9[%c0_231, %c0_232] : memref<8x128xf32, #tpu.memory_space<vmem>>, vector<8x128xf32>
    tpu.vector_store %arg9[%c0_231, %c0_232], %486 {strides = array<i32>} : memref<8x128xf32, #tpu.memory_space<vmem>>, vector<8x128xf32>,
    %c0_233 = arith.constant 0 : index
    %c0_234 = arith.constant 0 : index
    %490 = vector.load %arg8[%c0_233, %c0_234] : memref<8x128xf32, #tpu.memory_space<vmem>>, vector<8x128xf32>
    tpu.vector_store %arg8[%c0_233, %c0_234], %488 {strides = array<i32>} : memref<8x128xf32, #tpu.memory_space<vmem>>, vector<8x128xf32>,
    %c4_i32_235 = arith.constant 4 : i32
    %c8_i32_236 = arith.constant 8 : i32
    %491 = arith.muli %c4_i32_235, %c8_i32_236 : i32
    %492 = tpu.assume_multiple %491, 8 : i32
    %493 = arith.index_cast %492 : i32 to index
    %c0_237 = arith.constant 0 : index
    %494 = vector.load %arg7[%493, %c0_237] : memref<64x512xf32, #tpu.memory_space<vmem>>, vector<8x512xf32>
    %c0_238 = arith.constant 0 : index
    %c0_239 = arith.constant 0 : index
    %495 = vector.load %arg8[%c0_238, %c0_239] : memref<8x128xf32, #tpu.memory_space<vmem>>, vector<8x128xf32>
    %cst_240 = arith.constant dense<0.000000e+00> : vector<8x512xf32>
    %496 = tpu.matmul %495, %342, %cst_240 {dimension_numbers = #tpu.dot_dimension_numbers<[1], [0], [0], [1], [0, 0, 1, 1], [], []>} : vector<8x128xf32>, vector<128x512xf32>, vector<8x512xf32> -> vector<8x512xf32>
    %497 = arith.addf %494, %496 : vector<8x512xf32>
    %498 = vector.extract_strided_slice %497 {offsets = [0, 0], sizes = [8, 128], strides = [1, 1]} : vector<8x512xf32> to vector<8x128xf32>
    %499 = arith.negf %498 : vector<8x128xf32>
    %500 = math.exp %499 : vector<8x128xf32>
    %cst_241 = arith.constant 1.000000e+00 : f32
    %501 = vector.broadcast %cst_241 : f32 to vector<8x128xf32>
    %502 = arith.addf %501, %500 : vector<8x128xf32>
    %503 = arith.divf %501, %502 : vector<8x128xf32>
    %504 = vector.extract_strided_slice %497 {offsets = [0, 128], sizes = [8, 128], strides = [1, 1]} : vector<8x512xf32> to vector<8x128xf32>
    %505 = arith.negf %504 : vector<8x128xf32>
    %506 = math.exp %505 : vector<8x128xf32>
    %cst_242 = arith.constant 1.000000e+00 : f32
    %507 = vector.broadcast %cst_242 : f32 to vector<8x128xf32>
    %508 = arith.addf %507, %506 : vector<8x128xf32>
    %509 = arith.divf %507, %508 : vector<8x128xf32>
    %510 = vector.extract_strided_slice %497 {offsets = [0, 256], sizes = [8, 128], strides = [1, 1]} : vector<8x512xf32> to vector<8x128xf32>
    %511 = math.tanh %510 : vector<8x128xf32>
    %512 = vector.extract_strided_slice %497 {offsets = [0, 384], sizes = [8, 128], strides = [1, 1]} : vector<8x512xf32> to vector<8x128xf32>
    %513 = arith.negf %512 : vector<8x128xf32>
    %514 = math.exp %513 : vector<8x128xf32>
    %cst_243 = arith.constant 1.000000e+00 : f32
    %515 = vector.broadcast %cst_243 : f32 to vector<8x128xf32>
    %516 = arith.addf %515, %514 : vector<8x128xf32>
    %517 = arith.divf %515, %516 : vector<8x128xf32>
    %c0_244 = arith.constant 0 : index
    %c0_245 = arith.constant 0 : index
    %518 = vector.load %arg9[%c0_244, %c0_245] : memref<8x128xf32, #tpu.memory_space<vmem>>, vector<8x128xf32>
    %519 = arith.mulf %509, %518 : vector<8x128xf32>
    %520 = arith.mulf %503, %511 : vector<8x128xf32>
    %521 = arith.addf %519, %520 : vector<8x128xf32>
    %522 = math.tanh %521 : vector<8x128xf32>
    %523 = arith.mulf %517, %522 : vector<8x128xf32>
    %c0_246 = arith.constant 0 : index
    %c0_247 = arith.constant 0 : index
    %524 = vector.load %arg9[%c0_246, %c0_247] : memref<8x128xf32, #tpu.memory_space<vmem>>, vector<8x128xf32>
    tpu.vector_store %arg9[%c0_246, %c0_247], %521 {strides = array<i32>} : memref<8x128xf32, #tpu.memory_space<vmem>>, vector<8x128xf32>,
    %c0_248 = arith.constant 0 : index
    %c0_249 = arith.constant 0 : index
    %525 = vector.load %arg8[%c0_248, %c0_249] : memref<8x128xf32, #tpu.memory_space<vmem>>, vector<8x128xf32>
    tpu.vector_store %arg8[%c0_248, %c0_249], %523 {strides = array<i32>} : memref<8x128xf32, #tpu.memory_space<vmem>>, vector<8x128xf32>,
    %c5_i32_250 = arith.constant 5 : i32
    %c8_i32_251 = arith.constant 8 : i32
    %526 = arith.muli %c5_i32_250, %c8_i32_251 : i32
    %527 = tpu.assume_multiple %526, 8 : i32
    %528 = arith.index_cast %527 : i32 to index
    %c0_252 = arith.constant 0 : index
    %529 = vector.load %arg7[%528, %c0_252] : memref<64x512xf32, #tpu.memory_space<vmem>>, vector<8x512xf32>
    %c0_253 = arith.constant 0 : index
    %c0_254 = arith.constant 0 : index
    %530 = vector.load %arg8[%c0_253, %c0_254] : memref<8x128xf32, #tpu.memory_space<vmem>>, vector<8x128xf32>
    %cst_255 = arith.constant dense<0.000000e+00> : vector<8x512xf32>
    %531 = tpu.matmul %530, %342, %cst_255 {dimension_numbers = #tpu.dot_dimension_numbers<[1], [0], [0], [1], [0, 0, 1, 1], [], []>} : vector<8x128xf32>, vector<128x512xf32>, vector<8x512xf32> -> vector<8x512xf32>
    %532 = arith.addf %529, %531 : vector<8x512xf32>
    %533 = vector.extract_strided_slice %532 {offsets = [0, 0], sizes = [8, 128], strides = [1, 1]} : vector<8x512xf32> to vector<8x128xf32>
    %534 = arith.negf %533 : vector<8x128xf32>
    %535 = math.exp %534 : vector<8x128xf32>
    %cst_256 = arith.constant 1.000000e+00 : f32
    %536 = vector.broadcast %cst_256 : f32 to vector<8x128xf32>
    %537 = arith.addf %536, %535 : vector<8x128xf32>
    %538 = arith.divf %536, %537 : vector<8x128xf32>
    %539 = vector.extract_strided_slice %532 {offsets = [0, 128], sizes = [8, 128], strides = [1, 1]} : vector<8x512xf32> to vector<8x128xf32>
    %540 = arith.negf %539 : vector<8x128xf32>
    %541 = math.exp %540 : vector<8x128xf32>
    %cst_257 = arith.constant 1.000000e+00 : f32
    %542 = vector.broadcast %cst_257 : f32 to vector<8x128xf32>
    %543 = arith.addf %542, %541 : vector<8x128xf32>
    %544 = arith.divf %542, %543 : vector<8x128xf32>
    %545 = vector.extract_strided_slice %532 {offsets = [0, 256], sizes = [8, 128], strides = [1, 1]} : vector<8x512xf32> to vector<8x128xf32>
    %546 = math.tanh %545 : vector<8x128xf32>
    %547 = vector.extract_strided_slice %532 {offsets = [0, 384], sizes = [8, 128], strides = [1, 1]} : vector<8x512xf32> to vector<8x128xf32>
    %548 = arith.negf %547 : vector<8x128xf32>
    %549 = math.exp %548 : vector<8x128xf32>
    %cst_258 = arith.constant 1.000000e+00 : f32
    %550 = vector.broadcast %cst_258 : f32 to vector<8x128xf32>
    %551 = arith.addf %550, %549 : vector<8x128xf32>
    %552 = arith.divf %550, %551 : vector<8x128xf32>
    %c0_259 = arith.constant 0 : index
    %c0_260 = arith.constant 0 : index
    %553 = vector.load %arg9[%c0_259, %c0_260] : memref<8x128xf32, #tpu.memory_space<vmem>>, vector<8x128xf32>
    %554 = arith.mulf %544, %553 : vector<8x128xf32>
    %555 = arith.mulf %538, %546 : vector<8x128xf32>
    %556 = arith.addf %554, %555 : vector<8x128xf32>
    %557 = math.tanh %556 : vector<8x128xf32>
    %558 = arith.mulf %552, %557 : vector<8x128xf32>
    %c0_261 = arith.constant 0 : index
    %c0_262 = arith.constant 0 : index
    %559 = vector.load %arg9[%c0_261, %c0_262] : memref<8x128xf32, #tpu.memory_space<vmem>>, vector<8x128xf32>
    tpu.vector_store %arg9[%c0_261, %c0_262], %556 {strides = array<i32>} : memref<8x128xf32, #tpu.memory_space<vmem>>, vector<8x128xf32>,
    %c0_263 = arith.constant 0 : index
    %c0_264 = arith.constant 0 : index
    %560 = vector.load %arg8[%c0_263, %c0_264] : memref<8x128xf32, #tpu.memory_space<vmem>>, vector<8x128xf32>
    tpu.vector_store %arg8[%c0_263, %c0_264], %558 {strides = array<i32>} : memref<8x128xf32, #tpu.memory_space<vmem>>, vector<8x128xf32>,
    %c6_i32_265 = arith.constant 6 : i32
    %c8_i32_266 = arith.constant 8 : i32
    %561 = arith.muli %c6_i32_265, %c8_i32_266 : i32
    %562 = tpu.assume_multiple %561, 8 : i32
    %563 = arith.index_cast %562 : i32 to index
    %c0_267 = arith.constant 0 : index
    %564 = vector.load %arg7[%563, %c0_267] : memref<64x512xf32, #tpu.memory_space<vmem>>, vector<8x512xf32>
    %c0_268 = arith.constant 0 : index
    %c0_269 = arith.constant 0 : index
    %565 = vector.load %arg8[%c0_268, %c0_269] : memref<8x128xf32, #tpu.memory_space<vmem>>, vector<8x128xf32>
    %cst_270 = arith.constant dense<0.000000e+00> : vector<8x512xf32>
    %566 = tpu.matmul %565, %342, %cst_270 {dimension_numbers = #tpu.dot_dimension_numbers<[1], [0], [0], [1], [0, 0, 1, 1], [], []>} : vector<8x128xf32>, vector<128x512xf32>, vector<8x512xf32> -> vector<8x512xf32>
    %567 = arith.addf %564, %566 : vector<8x512xf32>
    %568 = vector.extract_strided_slice %567 {offsets = [0, 0], sizes = [8, 128], strides = [1, 1]} : vector<8x512xf32> to vector<8x128xf32>
    %569 = arith.negf %568 : vector<8x128xf32>
    %570 = math.exp %569 : vector<8x128xf32>
    %cst_271 = arith.constant 1.000000e+00 : f32
    %571 = vector.broadcast %cst_271 : f32 to vector<8x128xf32>
    %572 = arith.addf %571, %570 : vector<8x128xf32>
    %573 = arith.divf %571, %572 : vector<8x128xf32>
    %574 = vector.extract_strided_slice %567 {offsets = [0, 128], sizes = [8, 128], strides = [1, 1]} : vector<8x512xf32> to vector<8x128xf32>
    %575 = arith.negf %574 : vector<8x128xf32>
    %576 = math.exp %575 : vector<8x128xf32>
    %cst_272 = arith.constant 1.000000e+00 : f32
    %577 = vector.broadcast %cst_272 : f32 to vector<8x128xf32>
    %578 = arith.addf %577, %576 : vector<8x128xf32>
    %579 = arith.divf %577, %578 : vector<8x128xf32>
    %580 = vector.extract_strided_slice %567 {offsets = [0, 256], sizes = [8, 128], strides = [1, 1]} : vector<8x512xf32> to vector<8x128xf32>
    %581 = math.tanh %580 : vector<8x128xf32>
    %582 = vector.extract_strided_slice %567 {offsets = [0, 384], sizes = [8, 128], strides = [1, 1]} : vector<8x512xf32> to vector<8x128xf32>
    %583 = arith.negf %582 : vector<8x128xf32>
    %584 = math.exp %583 : vector<8x128xf32>
    %cst_273 = arith.constant 1.000000e+00 : f32
    %585 = vector.broadcast %cst_273 : f32 to vector<8x128xf32>
    %586 = arith.addf %585, %584 : vector<8x128xf32>
    %587 = arith.divf %585, %586 : vector<8x128xf32>
    %c0_274 = arith.constant 0 : index
    %c0_275 = arith.constant 0 : index
    %588 = vector.load %arg9[%c0_274, %c0_275] : memref<8x128xf32, #tpu.memory_space<vmem>>, vector<8x128xf32>
    %589 = arith.mulf %579, %588 : vector<8x128xf32>
    %590 = arith.mulf %573, %581 : vector<8x128xf32>
    %591 = arith.addf %589, %590 : vector<8x128xf32>
    %592 = math.tanh %591 : vector<8x128xf32>
    %593 = arith.mulf %587, %592 : vector<8x128xf32>
    %c0_276 = arith.constant 0 : index
    %c0_277 = arith.constant 0 : index
    %594 = vector.load %arg9[%c0_276, %c0_277] : memref<8x128xf32, #tpu.memory_space<vmem>>, vector<8x128xf32>
    tpu.vector_store %arg9[%c0_276, %c0_277], %591 {strides = array<i32>} : memref<8x128xf32, #tpu.memory_space<vmem>>, vector<8x128xf32>,
    %c0_278 = arith.constant 0 : index
    %c0_279 = arith.constant 0 : index
    %595 = vector.load %arg8[%c0_278, %c0_279] : memref<8x128xf32, #tpu.memory_space<vmem>>, vector<8x128xf32>
    tpu.vector_store %arg8[%c0_278, %c0_279], %593 {strides = array<i32>} : memref<8x128xf32, #tpu.memory_space<vmem>>, vector<8x128xf32>,
    %c7_i32_280 = arith.constant 7 : i32
    %c8_i32_281 = arith.constant 8 : i32
    %596 = arith.muli %c7_i32_280, %c8_i32_281 : i32
    %597 = tpu.assume_multiple %596, 8 : i32
    %598 = arith.index_cast %597 : i32 to index
    %c0_282 = arith.constant 0 : index
    %599 = vector.load %arg7[%598, %c0_282] : memref<64x512xf32, #tpu.memory_space<vmem>>, vector<8x512xf32>
    %c0_283 = arith.constant 0 : index
    %c0_284 = arith.constant 0 : index
    %600 = vector.load %arg8[%c0_283, %c0_284] : memref<8x128xf32, #tpu.memory_space<vmem>>, vector<8x128xf32>
    %cst_285 = arith.constant dense<0.000000e+00> : vector<8x512xf32>
    %601 = tpu.matmul %600, %342, %cst_285 {dimension_numbers = #tpu.dot_dimension_numbers<[1], [0], [0], [1], [0, 0, 1, 1], [], []>} : vector<8x128xf32>, vector<128x512xf32>, vector<8x512xf32> -> vector<8x512xf32>
    %602 = arith.addf %599, %601 : vector<8x512xf32>
    %603 = vector.extract_strided_slice %602 {offsets = [0, 0], sizes = [8, 128], strides = [1, 1]} : vector<8x512xf32> to vector<8x128xf32>
    %604 = arith.negf %603 : vector<8x128xf32>
    %605 = math.exp %604 : vector<8x128xf32>
    %cst_286 = arith.constant 1.000000e+00 : f32
    %606 = vector.broadcast %cst_286 : f32 to vector<8x128xf32>
    %607 = arith.addf %606, %605 : vector<8x128xf32>
    %608 = arith.divf %606, %607 : vector<8x128xf32>
    %609 = vector.extract_strided_slice %602 {offsets = [0, 128], sizes = [8, 128], strides = [1, 1]} : vector<8x512xf32> to vector<8x128xf32>
    %610 = arith.negf %609 : vector<8x128xf32>
    %611 = math.exp %610 : vector<8x128xf32>
    %cst_287 = arith.constant 1.000000e+00 : f32
    %612 = vector.broadcast %cst_287 : f32 to vector<8x128xf32>
    %613 = arith.addf %612, %611 : vector<8x128xf32>
    %614 = arith.divf %612, %613 : vector<8x128xf32>
    %615 = vector.extract_strided_slice %602 {offsets = [0, 256], sizes = [8, 128], strides = [1, 1]} : vector<8x512xf32> to vector<8x128xf32>
    %616 = math.tanh %615 : vector<8x128xf32>
    %617 = vector.extract_strided_slice %602 {offsets = [0, 384], sizes = [8, 128], strides = [1, 1]} : vector<8x512xf32> to vector<8x128xf32>
    %618 = arith.negf %617 : vector<8x128xf32>
    %619 = math.exp %618 : vector<8x128xf32>
    %cst_288 = arith.constant 1.000000e+00 : f32
    %620 = vector.broadcast %cst_288 : f32 to vector<8x128xf32>
    %621 = arith.addf %620, %619 : vector<8x128xf32>
    %622 = arith.divf %620, %621 : vector<8x128xf32>
    %c0_289 = arith.constant 0 : index
    %c0_290 = arith.constant 0 : index
    %623 = vector.load %arg9[%c0_289, %c0_290] : memref<8x128xf32, #tpu.memory_space<vmem>>, vector<8x128xf32>
    %624 = arith.mulf %614, %623 : vector<8x128xf32>
    %625 = arith.mulf %608, %616 : vector<8x128xf32>
    %626 = arith.addf %624, %625 : vector<8x128xf32>
    %627 = math.tanh %626 : vector<8x128xf32>
    %628 = arith.mulf %622, %627 : vector<8x128xf32>
    %c0_291 = arith.constant 0 : index
    %c0_292 = arith.constant 0 : index
    %629 = vector.load %arg9[%c0_291, %c0_292] : memref<8x128xf32, #tpu.memory_space<vmem>>, vector<8x128xf32>
    tpu.vector_store %arg9[%c0_291, %c0_292], %626 {strides = array<i32>} : memref<8x128xf32, #tpu.memory_space<vmem>>, vector<8x128xf32>,
    %c0_293 = arith.constant 0 : index
    %c0_294 = arith.constant 0 : index
    %630 = vector.load %arg8[%c0_293, %c0_294] : memref<8x128xf32, #tpu.memory_space<vmem>>, vector<8x128xf32>
    tpu.vector_store %arg8[%c0_293, %c0_294], %628 {strides = array<i32>} : memref<8x128xf32, #tpu.memory_space<vmem>>, vector<8x128xf32>,
    %c8_i32_295 = arith.constant 8 : i32
    %c0_296 = arith.constant 0 : index
    %c0_297 = arith.constant 0 : index
    %631 = vector.load %arg8[%c0_296, %c0_297] : memref<8x128xf32, #tpu.memory_space<vmem>>, vector<8x128xf32>
    %c1_298 = arith.constant 1 : index
    %c0_299 = arith.constant 0 : index
    %c0_300 = arith.constant 0 : index
    %632 = vector.load %arg4[%c1_298, %c0_299, %c0_300] : memref<2x8x128xf32, #tpu.memory_space<vmem>>, vector<1x8x128xf32>
    %633 = vector.shape_cast %632 : vector<1x8x128xf32> to vector<8x128xf32>
    %634 = vector.shape_cast %631 : vector<8x128xf32> to vector<1x8x128xf32>
    tpu.vector_store %arg4[%c1_298, %c0_299, %c0_300], %634 {strides = array<i32>} : memref<2x8x128xf32, #tpu.memory_space<vmem>>, vector<1x8x128xf32>,
    %c0_301 = arith.constant 0 : index
    %c0_302 = arith.constant 0 : index
    %635 = vector.load %arg9[%c0_301, %c0_302] : memref<8x128xf32, #tpu.memory_space<vmem>>, vector<8x128xf32>
    %c1_303 = arith.constant 1 : index
    %c0_304 = arith.constant 0 : index
    %c0_305 = arith.constant 0 : index
    %636 = vector.load %arg5[%c1_303, %c0_304, %c0_305] : memref<2x8x128xf32, #tpu.memory_space<vmem>>, vector<1x8x128xf32>
    %637 = vector.shape_cast %636 : vector<1x8x128xf32> to vector<8x128xf32>
    %638 = vector.shape_cast %635 : vector<8x128xf32> to vector<1x8x128xf32>
    tpu.vector_store %arg5[%c1_303, %c0_304, %c0_305], %638 {strides = array<i32>} : memref<2x8x128xf32, #tpu.memory_space<vmem>>, vector<1x8x128xf32>,
    return
  }
}

</mosaic_0001>

<bundles_post_ra>
// kernel: encoder_forward.1
= control target key start
LH: loop header
LB: loop body
LE: loop exit
PB: predicated region body
PF: predicated region fallthrough
CT: control target
= control target key end

     0   :  { %s7490_s1 = inlined_call_operand.vmem [shape: bf16[2,128,512], index: 1, kind: input, shape index: {}]   ;;  %s7491_s0 = inlined_call_operand.vmem [shape: bf16[64,128], index: 0, kind: input, shape index: {}]   ;;  %s7492_s2 = inlined_call_operand.vmem [shape: f32[2,128,512], index: 2, kind: input, shape index: {}]   ;;  %s7493_s3 = inlined_call_operand.vmem [shape: f32[2,1,512], index: 3, kind: input, shape index: {}]   ;;  %s7494_s5 = inlined_call_operand.vmem [shape: f32[2,8,128], index: 5, kind: output, shape index: {1}]   ;;  %s7495_s4 = inlined_call_operand.vmem [shape: f32[2,8,128], index: 4, kind: output, shape index: {0}]  }
   0x1   :  { %v3572_v0 = vld [vmem:[%s7490_s1 + $0xe0] sm:$0xf]  ;;  %v3895_v1 = vld [vmem:[%s7490_s1 + $0xec] sm:$0xf0]  ;;  %v3893_v2 = vld [vmem:[%s7490_s1 + $0xe4] sm:$0xf] }
   0x2   :  { %v3573_v3 = vor.u32 %v3895_v1, %v3572_v0  ;;  %v3574_v4 = vld [vmem:[%s7490_s1 + $0xf0] sm:$0xf0]  ;;  %v3580_v5 = vld [vmem:[%s7490_s1 + $0xe8] sm:$0xf]  ;;  %v3896_v6 = vld [vmem:[%s7490_s1 + $0xf4] sm:$0xf0] }
   0x3   :  { %v3577_v7 = vor.u32 %v3893_v2, %v3574_v4  ;;  %v3581_v8 = vor.u32 %v3896_v6, %v3580_v5  ;;  %v3894_v9 = vld [vmem:[%s7490_s1 + $0xec] sm:$0xf]  ;;  %v3582_v10 = vld [vmem:[%s7490_s1 + $0xf8] sm:$0xf0]  ;;  %v3556_v11 = vld [vmem:[%s7490_s1 + $0xc0] sm:$0xf] }
   0x4   :  { %319 = vmatpush.bf16.msra.mxu0 %v3573_v3  ;;  %v3585_v12 = vor.u32 %v3894_v9, %v3582_v10  ;;  %v3891_v13 = vld [vmem:[%s7490_s1 + $0xcc] sm:$0xf0]  ;;  %v3889_v14 = vld [vmem:[%s7490_s1 + $0xc4] sm:$0xf]  ;;  %v3558_v15 = vld [vmem:[%s7490_s1 + $0xd0] sm:$0xf0] }
   0x5   :  { %348 = vmatpush.bf16.msra.mxu1 %v3577_v7  ;;  %377 = vmatpush.bf16.msra.mxu2 %v3581_v8  ;;  %v3557_v16 = vor.u32 %v3891_v13, %v3556_v11  ;;  %v3561_v17 = vor.u32 %v3889_v14, %v3558_v15  ;;  %v3564_v18 = vld [vmem:[%s7490_s1 + $0xc8] sm:$0xf]  ;;  %v3892_v19 = vld [vmem:[%s7490_s1 + $0xd4] sm:$0xf0]  ;;  %v3890_v20 = vld [vmem:[%s7490_s1 + $0xcc] sm:$0xf] }
   0x6   :  { %406 = vmatpush.bf16.msra.mxu3 %v3585_v12  ;;  %v3565_v21 = vor.u32 %v3892_v19, %v3564_v18  ;;  %v3566_v22 = vld [vmem:[%s7490_s1 + $0xd8] sm:$0xf0]  ;;  %v3540_v23 = vld [vmem:[%s7490_s1 + $0xa0] sm:$0xf]  ;;  %v3887_v24 = vld [vmem:[%s7490_s1 + $0xac] sm:$0xf0] }
   0x7   :  { %v3569_v25 = vor.u32 %v3890_v20, %v3566_v22  ;;  %v3885_v26 = vld [vmem:[%s7490_s1 + $0xa4] sm:$0xf]  ;;  %v3542_v27 = vld [vmem:[%s7490_s1 + $0xb0] sm:$0xf0]  ;;  %v3548_v28 = vld [vmem:[%s7490_s1 + $0xa8] sm:$0xf]  ;;  %v3541_v29 = vor.u32 %v3887_v24, %v3540_v23 }
   0x8   :  { %320 = vmatpush.bf16.msra.mxu0 %v3557_v16  ;;  %v3888_v30 = vld [vmem:[%s7490_s1 + $0xb4] sm:$0xf0]  ;;  %v3886_v31 = vld [vmem:[%s7490_s1 + $0xac] sm:$0xf]  ;;  %v3550_v32 = vld [vmem:[%s7490_s1 + $0xb8] sm:$0xf0]  ;;  %v3545_v33 = vor.u32 %v3885_v26, %v3542_v27 }
   0x9   :  { %349 = vmatpush.bf16.msra.mxu1 %v3561_v17  ;;  %378 = vmatpush.bf16.msra.mxu2 %v3565_v21  ;;  %v3549_v34 = vor.u32 %v3888_v30, %v3548_v28  ;;  %v3524_v35 = vld [vmem:[%s7490_s1 + $0x80] sm:$0xf]  ;;  %v3883_v36 = vld [vmem:[%s7490_s1 + $0x8c] sm:$0xf0]  ;;  %v3881_v37 = vld [vmem:[%s7490_s1 + $0x84] sm:$0xf]  ;;  %v3553_v38 = vor.u32 %v3886_v31, %v3550_v32 }
   0xa   :  { %407 = vmatpush.bf16.msra.mxu3 %v3569_v25  ;;  %v3526_v39 = vld [vmem:[%s7490_s1 + $0x90] sm:$0xf0]  ;;  %v3532_v40 = vld [vmem:[%s7490_s1 + $0x88] sm:$0xf]  ;;  %v3884_v41 = vld [vmem:[%s7490_s1 + $0x94] sm:$0xf0]  ;;  %v3525_v44 = vor.u32 %v3883_v36, %v3524_v35 }
   0xb   :  { %v3882_v42 = vld [vmem:[%s7490_s1 + $0x8c] sm:$0xf]  ;;  %v3534_v43 = vld [vmem:[%s7490_s1 + $0x98] sm:$0xf0]  ;;  %v3529_v45 = vor.u32 %v3881_v37, %v3526_v39  ;;  %v3533_v46 = vor.u32 %v3884_v41, %v3532_v40  ;;  %v3508_v47 = vld [vmem:[%s7490_s1 + $0x60] sm:$0xf] }
   0xc   :  { %321 = vmatpush.bf16.msra.mxu0 %v3541_v29  ;;  %v3879_v48 = vld [vmem:[%s7490_s1 + $0x6c] sm:$0xf0]  ;;  %v3877_v49 = vld [vmem:[%s7490_s1 + $0x64] sm:$0xf]  ;;  %v3537_v50 = vor.u32 %v3882_v42, %v3534_v43  ;;  %v3510_v51 = vld [vmem:[%s7490_s1 + $0x70] sm:$0xf0] }
   0xd   :  { %350 = vmatpush.bf16.msra.mxu1 %v3545_v33  ;;  %379 = vmatpush.bf16.msra.mxu2 %v3549_v34  ;;  %v3516_v52 = vld [vmem:[%s7490_s1 + $0x68] sm:$0xf]  ;;  %v3880_v53 = vld [vmem:[%s7490_s1 + $0x74] sm:$0xf0]  ;;  %v3878_v54 = vld [vmem:[%s7490_s1 + $0x6c] sm:$0xf]  ;;  %v3509_v56 = vor.u32 %v3879_v48, %v3508_v47  ;;  %v3513_v57 = vor.u32 %v3877_v49, %v3510_v51 }
   0xe   :  { %408 = vmatpush.bf16.msra.mxu3 %v3553_v38  ;;  %v3518_v55 = vld [vmem:[%s7490_s1 + $0x78] sm:$0xf0]  ;;  %v3517_v58 = vor.u32 %v3880_v53, %v3516_v52  ;;  %v3492_v59 = vld [vmem:[%s7490_s1 + $0x40] sm:$0xf]  ;;  %v3875_v60 = vld [vmem:[%s7490_s1 + $0x4c] sm:$0xf0] }
   0xf   :  { %v3873_v61 = vld [vmem:[%s7490_s1 + $0x44] sm:$0xf]  ;;  %v3521_v62 = vor.u32 %v3878_v54, %v3518_v55  ;;  %v3494_v63 = vld [vmem:[%s7490_s1 + $0x50] sm:$0xf0]  ;;  %v3500_v0 = vld [vmem:[%s7490_s1 + $0x48] sm:$0xf]  ;;  %v3493_v4 = vor.u32 %v3875_v60, %v3492_v59 }
  0x10   :  { %322 = vmatpush.bf16.msra.mxu0 %v3525_v44  ;;  %v3876_v1 = vld [vmem:[%s7490_s1 + $0x54] sm:$0xf0]  ;;  %v3874_v2 = vld [vmem:[%s7490_s1 + $0x4c] sm:$0xf]  ;;  %v3502_v3 = vld [vmem:[%s7490_s1 + $0x58] sm:$0xf0]  ;;  %v3497_v5 = vor.u32 %v3873_v61, %v3494_v63 }
  0x11   :  { %351 = vmatpush.bf16.msra.mxu1 %v3529_v45  ;;  %380 = vmatpush.bf16.msra.mxu2 %v3533_v46  ;;  %v3501_v6 = vor.u32 %v3876_v1, %v3500_v0  ;;  %v3476_v7 = vld [vmem:[%s7490_s1 + $0x20] sm:$0xf]  ;;  %v3871_v8 = vld [vmem:[%s7490_s1 + $0x2c] sm:$0xf0]  ;;  %v3869_v9 = vld [vmem:[%s7490_s1 + $0x24] sm:$0xf]  ;;  %v3505_v10 = vor.u32 %v3874_v2, %v3502_v3 }
  0x12   :  { %409 = vmatpush.bf16.msra.mxu3 %v3537_v50  ;;  %v3478_v11 = vld [vmem:[%s7490_s1 + $0x30] sm:$0xf0]  ;;  %v3484_v12 = vld [vmem:[%s7490_s1 + $0x28] sm:$0xf]  ;;  %v3872_v13 = vld [vmem:[%s7490_s1 + $0x34] sm:$0xf0]  ;;  %v3477_v16 = vor.u32 %v3871_v8, %v3476_v7 }
  0x13   :  { %v3870_v14 = vld [vmem:[%s7490_s1 + $0x2c] sm:$0xf]  ;;  %v3486_v15 = vld [vmem:[%s7490_s1 + $0x38] sm:$0xf0]  ;;  %v3481_v17 = vor.u32 %v3869_v9, %v3478_v11  ;;  %v3485_v18 = vor.u32 %v3872_v13, %v3484_v12  ;;  %v3460_v19 = vld [vmem:[%s7490_s1] sm:$0xf] }
  0x14   :  { %323 = vmatpush.bf16.msra.mxu0 %v3509_v56  ;;  %v3867_v20 = vld [vmem:[%s7490_s1 + $0xc] sm:$0xf0]  ;;  %v3865_v21 = vld [vmem:[%s7490_s1 + $0x4] sm:$0xf]  ;;  %v3489_v22 = vor.u32 %v3870_v14, %v3486_v15  ;;  %v3462_v23 = vld [vmem:[%s7490_s1 + $0x10] sm:$0xf0] }
  0x15   :  { %352 = vmatpush.bf16.msra.mxu1 %v3513_v57  ;;  %381 = vmatpush.bf16.msra.mxu2 %v3517_v58  ;;  %v3468_v24 = vld [vmem:[%s7490_s1 + $0x8] sm:$0xf]  ;;  %v3868_v25 = vld [vmem:[%s7490_s1 + $0x14] sm:$0xf0]  ;;  %v3866_v26 = vld [vmem:[%s7490_s1 + $0xc] sm:$0xf]  ;;  %v3461_v28 = vor.u32 %v3867_v20, %v3460_v19  ;;  %v3465_v29 = vor.u32 %v3865_v21, %v3462_v23 }
  0x16   :  { %410 = vmatpush.bf16.msra.mxu3 %v3521_v62  ;;  %v3470_v27 = vld [vmem:[%s7490_s1 + $0x18] sm:$0xf0]  ;;  %v3469_v30 = vor.u32 %v3868_v25, %v3468_v24  ;;  %v3861_v32 = vld [vmem:[%s7491_s0] sm:$0xff]  ;;  %v4548_v34 = vld [vmem:[%s7492_s2 + $0x1e8] sm:$0xff] }
  0x17   :  { %v3473_v31 = vor.u32 %v3866_v26, %v3470_v27  ;;  %v4543_v33 = vld [vmem:[%s7492_s2 + $0x1e0] sm:$0xff]  ;;  %v4560_v36 = vld [vmem:[%s7492_s2 + $0x1c8] sm:$0xff]  ;;  %v4565_v37 = vld [vmem:[%s7492_s2 + $0x1f8] sm:$0xff] }
  0x18   :  { %324 = vmatpush.bf16.msra.mxu0 %v3493_v4  ;;  %v4554_v35 = vld [vmem:[%s7492_s2 + $0x1c0] sm:$0xff]  ;;  %v4575_v39 = vld [vmem:[%s7492_s2 + $0x1f0] sm:$0xff]  ;;  %v4581_v40 = vld [vmem:[%s7492_s2 + $0x1a8] sm:$0xff] }
  0x19   :  { %353 = vmatpush.bf16.msra.mxu1 %v3497_v5  ;;  %382 = vmatpush.bf16.msra.mxu2 %v3501_v6  ;;  %v4570_v38 = vld [vmem:[%s7492_s2 + $0x1a0] sm:$0xff]  ;;  %v4586_v41 = vld [vmem:[%s7492_s2 + $0x1d8] sm:$0xff]  ;;  %v4598_v43 = vld [vmem:[%s7492_s2 + $0x1d0] sm:$0xff] }
  0x1a   :  { %411 = vmatpush.bf16.msra.mxu3 %v3505_v10  ;;  %v4593_v42 = vld [vmem:[%s7492_s2 + $0x180] sm:$0xff]  ;;  %v4604_v44 = vld [vmem:[%s7492_s2 + $0x188] sm:$0xff]  ;;  %v4609_v45 = vld [vmem:[%s7492_s2 + $0x1b8] sm:$0xff] }
  0x1b   :  { %v4617_v46 = vld [vmem:[%s7492_s2 + $0x160] sm:$0xff]  ;;  %v4622_v47 = vld [vmem:[%s7492_s2 + $0x1b0] sm:$0xff]  ;;  %v4628_v48 = vld [vmem:[%s7492_s2 + $0x168] sm:$0xff] }
  0x1c   :  { %325 = vmatpush.bf16.msra.mxu0 %v3477_v16  ;;  %v4633_v49 = vld [vmem:[%s7492_s2 + $0x198] sm:$0xff]  ;;  %v4641_v50 = vld [vmem:[%s7492_s2 + $0x140] sm:$0xff]  ;;  %v4646_v51 = vld [vmem:[%s7492_s2 + $0x190] sm:$0xff] }
  0x1d   :  { %354 = vmatpush.bf16.msra.mxu1 %v3481_v17  ;;  %383 = vmatpush.bf16.msra.mxu2 %v3485_v18  ;;  %v4652_v52 = vld [vmem:[%s7492_s2 + $0x148] sm:$0xff]  ;;  %v4657_v53 = vld [vmem:[%s7492_s2 + $0x178] sm:$0xff]  ;;  %v4665_v54 = vld [vmem:[%s7492_s2 + $0x120] sm:$0xff] }
  0x1e   :  { %412 = vmatpush.bf16.msra.mxu3 %v3489_v22  ;;  %v4670_v55 = vld [vmem:[%s7492_s2 + $0x170] sm:$0xff]  ;;  %v4676_v56 = vld [vmem:[%s7492_s2 + $0x128] sm:$0xff]  ;;  %v4681_v57 = vld [vmem:[%s7492_s2 + $0x158] sm:$0xff] }
  0x1f   :  { %v4689_v58 = vld [vmem:[%s7492_s2 + $0x100] sm:$0xff]  ;;  %v4694_v59 = vld [vmem:[%s7492_s2 + $0x150] sm:$0xff]  ;;  %v3862_v60 = vld [vmem:[%s7491_s0 + $0x8] sm:$0xff] }
  0x20   :  { %326 = vmatpush.bf16.msra.mxu0 %v3461_v28  ;;  %v4703_v61 = vld [vmem:[%s7492_s2 + $0x108] sm:$0xff]  ;;  %v4708_v62 = vld [vmem:[%s7492_s2 + $0x138] sm:$0xff]  ;;  %v4716_v63 = vld [vmem:[%s7492_s2 + $0x130] sm:$0xff] }
  0x21   :  { %355 = vmatpush.bf16.msra.mxu1 %v3465_v29  ;;  %384 = vmatpush.bf16.msra.mxu2 %v3469_v30  ;;  %v4725_v0 = vld [vmem:[%s7492_s2 + $0xe0] sm:$0xff]  ;;  %v4730_v1 = vld [vmem:[%s7492_s2 + $0xe8] sm:$0xff]  ;;  %v4735_v2 = vld [vmem:[%s7492_s2 + $0x118] sm:$0xff] }
  0x22   :  { %413 = vmatpush.bf16.msra.mxu3 %v3473_v31  ;;  %v4741_v3 = vld [vmem:[%s7492_s2 + $0xc0] sm:$0xff]  ;;  %v4746_v4 = vld [vmem:[%s7492_s2 + $0x110] sm:$0xff]  ;;  %v4752_v5 = vld [vmem:[%s7492_s2 + $0xc8] sm:$0xff] }
  0x23   :  { %327 = vmatmul.bf16.vlgmr.msra.gmra.mxu0 %v3861_v32  ;;  %v4757_v6 = vld [vmem:[%s7492_s2 + $0xf8] sm:$0xff]  ;;  %v4764_v7 = vld [vmem:[%s7492_s2 + $0xa0] sm:$0xff]  ;;  %v4769_v8 = vld [vmem:[%s7492_s2 + $0xf0] sm:$0xff] }
  0x24   :  { %475 = vmatpush.msrb.mxu0 %v4543_v33  ;;  %356 = vmatmul.bf16.vlgmr.msra.gmra.mxu1 %v3861_v32  ;;  %7755 = vst [vmem:[#allocation6_spill] sm:$0xff] %v4764_v7  ;;  %v4775_v9 = vld [vmem:[%s7492_s2 + $0xa8] sm:$0xff]  ;;  %v4780_v10 = vld [vmem:[%s7492_s2 + $0xd8] sm:$0xff]  ;;  %v4788_v11 = vld [vmem:[%s7492_s2 + $0x80] sm:$0xff] }
  0x25   :  { %495 = vmatpush.msrb.mxu1 %v4548_v34  ;;  %385 = vmatmul.bf16.vlgmr.msra.gmra.mxu2 %v3861_v32  ;;  %7756 = vst [vmem:[#allocation7_spill] sm:$0xff] %v4775_v9  ;;  %v4793_v12 = vld [vmem:[%s7492_s2 + $0xd0] sm:$0xff]  ;;  %v4799_v13 = vld [vmem:[%s7492_s2 + $0x88] sm:$0xff]  ;;  %v4804_v14 = vld [vmem:[%s7492_s2 + $0xb8] sm:$0xff] }
  0x26   :  { %414 = vmatmul.bf16.vlgmr.msra.gmra.mxu3 %v3861_v32  ;;  %476 = vmatpush.msrb.mxu0 %v4554_v35  ;;  %7757 = vst [vmem:[#allocation8_spill] sm:$0xff] %v4780_v10  ;;  %v4812_v15 = vld [vmem:[%s7492_s2 + $0x60] sm:$0xff]  ;;  %v4817_v16 = vld [vmem:[%s7492_s2 + $0xb0] sm:$0xff]  ;;  %v4823_v17 = vld [vmem:[%s7492_s2 + $0x68] sm:$0xff] }
  0x27   :  { %496 = vmatpush.msrb.mxu1 %v4560_v36  ;;  %535 = vmatpush.msrb.mxu3 %v4565_v37  ;;  %7758 = vst [vmem:[#allocation9_spill] sm:$0xff] %v4788_v11  ;;  %v4828_v18 = vld [vmem:[%s7492_s2 + $0x98] sm:$0xff]  ;;  %v4836_v19 = vld [vmem:[%s7492_s2 + $0x40] sm:$0xff]  ;;  %v4841_v20 = vld [vmem:[%s7492_s2 + $0x90] sm:$0xff] }
  0x28   :  { %477 = vmatpush.msrb.mxu0 %v4570_v38  ;;  %515 = vmatpush.msrb.mxu2 %v4575_v39  ;;  %7759 = vst [vmem:[#allocation10_spill] sm:$0xff] %v4799_v13  ;;  %v4847_v21 = vld [vmem:[%s7492_s2 + $0x48] sm:$0xff]  ;;  %v4853_v22 = vld [vmem:[%s7492_s2 + $0x78] sm:$0xff]  ;;  %v4860_v23 = vld [vmem:[%s7492_s2 + $0x20] sm:$0xff] }
  0x29   :  { %497 = vmatpush.msrb.mxu1 %v4581_v40  ;;  %536 = vmatpush.msrb.mxu3 %v4586_v41  ;;  %7760 = vst [vmem:[#allocation11_spill] sm:$0xff] %v4804_v14  ;;  %v4865_v24 = vld [vmem:[%s7492_s2 + $0x70] sm:$0xff]  ;;  %v4875_v26 = vld [vmem:[%s7492_s2 + $0x28] sm:$0xff]  ;;  %v4880_v27 = vld [vmem:[%s7492_s2 + $0x58] sm:$0xff] }
  0x2a   :  { %478 = vmatpush.msrb.mxu0 %v4593_v42  ;;  %516 = vmatpush.msrb.mxu2 %v4598_v43  ;;  %7761 = vst [vmem:[#allocation12_spill] sm:$0xff] %v4812_v15  ;;  %v3863_v25 = vld [vmem:[%s7491_s0 + $0x10] sm:$0xff]  ;;  %v4896_v29 = vld [vmem:[%s7492_s2] sm:$0xff]  ;;  %v4902_v30 = vld [vmem:[%s7492_s2 + $0x8] sm:$0xff] }
  0x2b   :  { %498 = vmatpush.msrb.mxu1 %v4604_v44  ;;  %537 = vmatpush.msrb.mxu3 %v4609_v45  ;;  %7762 = vst [vmem:[#allocation13_spill] sm:$0xff] %v4817_v16  ;;  %v4887_v28 = vld [vmem:[%s7492_s2 + $0x50] sm:$0xff]  ;;  %v4912_v32 = vld [vmem:[%s7492_s2 + $0x38] sm:$0xff] }
  0x2c   :  { %479 = vmatpush.msrb.mxu0 %v4617_v46  ;;  %517 = vmatpush.msrb.mxu2 %v4622_v47  ;;  %7763 = vst [vmem:[#allocation14_spill] sm:$0xff] %v4823_v17  ;;  %v4907_v31 = vld [vmem:[%s7492_s2 + $0x30] sm:$0xff] }
  0x2d   :  { %499 = vmatpush.msrb.mxu1 %v4628_v48  ;;  %538 = vmatpush.msrb.mxu3 %v4633_v49  ;;  %7764 = vst [vmem:[#allocation15_spill] sm:$0xff] %v4828_v18 }
  0x2e   :  { %480 = vmatpush.msrb.mxu0 %v4641_v50  ;;  %518 = vmatpush.msrb.mxu2 %v4646_v51  ;;  %7765 = vst [vmem:[#allocation16_spill] sm:$0xff] %v4836_v19 }
  0x2f   :  { %500 = vmatpush.msrb.mxu1 %v4652_v52  ;;  %539 = vmatpush.msrb.mxu3 %v4657_v53  ;;  %7766 = vst [vmem:[#allocation17_spill] sm:$0xff] %v4841_v20 }
  0x30   :  { %481 = vmatpush.msrb.mxu0 %v4665_v54  ;;  %519 = vmatpush.msrb.mxu2 %v4670_v55  ;;  %7767 = vst [vmem:[#allocation18_spill] sm:$0xff] %v4847_v21 }
  0x31   :  { %501 = vmatpush.msrb.mxu1 %v4676_v56  ;;  %540 = vmatpush.msrb.mxu3 %v4681_v57  ;;  %7768 = vst [vmem:[#allocation19_spill] sm:$0xff] %v4853_v22 }
  0x32   :  { %482 = vmatpush.msrb.mxu0 %v4689_v58  ;;  %520 = vmatpush.msrb.mxu2 %v4694_v59  ;;  %7769 = vst [vmem:[#allocation20_spill] sm:$0xff] %v4860_v23 }
  0x33   :  { %502 = vmatpush.msrb.mxu1 %v4703_v61  ;;  %541 = vmatpush.msrb.mxu3 %v4708_v62  ;;  %7770 = vst [vmem:[#allocation21_spill] sm:$0xff] %v4865_v24 }
  0x34   :  { %332 = vmatmul.bf16.gmra.mxu0 %v3862_v60  ;;  %521 = vmatpush.msrb.mxu2 %v4716_v63  ;;  %7771 = vst [vmem:[#allocation22_spill] sm:$0xff] %v4875_v26 }
  0x35   :  { %361 = vmatmul.bf16.gmra.mxu1 %v3862_v60  ;;  %390 = vmatmul.bf16.gmra.mxu2 %v3862_v60  ;;  %7772 = vst [vmem:[#allocation23_spill] sm:$0xff] %v4880_v27 }
  0x36   :  { %419 = vmatmul.bf16.gmra.mxu3 %v3862_v60  ;;  %483 = vmatpush.msrb.mxu0 %v4725_v0  ;;  %7773 = vst [vmem:[#allocation24_spill] sm:$0xff] %v4887_v28  ;;  %v4918_v60 = vld [vmem:[%s7492_s2 + $0x10] sm:$0xff] }
  0x37   :  { %503 = vmatpush.msrb.mxu1 %v4730_v1  ;;  %542 = vmatpush.msrb.mxu3 %v4735_v2  ;;  %7774 = vst [vmem:[#allocation25_spill] sm:$0xff] %v4896_v29 }
  0x38   :  { %484 = vmatpush.msrb.mxu0 %v4741_v3  ;;  %522 = vmatpush.msrb.mxu2 %v4746_v4  ;;  %7775 = vst [vmem:[#allocation26_spill] sm:$0xff] %v4902_v30 }
  0x39   :  { %504 = vmatpush.msrb.mxu1 %v4752_v5  ;;  %543 = vmatpush.msrb.mxu3 %v4757_v6  ;;  %7776 = vst [vmem:[#allocation27_spill] sm:$0xff] %v4907_v31 }
  0x3a   :  { %485 = vmatpush.msrb.mxu0 %v4764_v7  ;;  %523 = vmatpush.msrb.mxu2 %v4769_v8  ;;  %7777 = vst [vmem:[#allocation28_spill] sm:$0xff] %v4912_v32 }
  0x3b   :  { %505 = vmatpush.msrb.mxu1 %v4775_v9  ;;  %544 = vmatpush.msrb.mxu3 %v4780_v10  ;;  %7778 = vst [vmem:[#allocation29_spill] sm:$0xff] %v4918_v60 }
  0x3c   :  { %486 = vmatpush.msrb.mxu0 %v4788_v11  ;;  %524 = vmatpush.msrb.mxu2 %v4793_v12 }
  0x3d   :  { %506 = vmatpush.msrb.mxu1 %v4799_v13  ;;  %545 = vmatpush.msrb.mxu3 %v4804_v14 }
  0x3e   :  { %487 = vmatpush.msrb.mxu0 %v4812_v15  ;;  %525 = vmatpush.msrb.mxu2 %v4817_v16 }
  0x3f   :  { %507 = vmatpush.msrb.mxu1 %v4823_v17  ;;  %546 = vmatpush.msrb.mxu3 %v4828_v18 }
  0x40   :  { %488 = vmatpush.msrb.mxu0 %v4836_v19  ;;  %526 = vmatpush.msrb.mxu2 %v4841_v20 }
  0x41   :  { %508 = vmatpush.msrb.mxu1 %v4847_v21  ;;  %547 = vmatpush.msrb.mxu3 %v4853_v22 }
  0x42   :  { %489 = vmatpush.msrb.mxu0 %v4860_v23  ;;  %527 = vmatpush.msrb.mxu2 %v4865_v24 }
  0x43   :  { %509 = vmatpush.msrb.mxu1 %v4875_v26  ;;  %548 = vmatpush.msrb.mxu3 %v4880_v27  ;;  %v4925_v26 = vld [vmem:[%s7492_s2 + $0x18] sm:$0xff] }
  0x44   :  { %337 = vmatmul.bf16.gmra.mxu0 %v3863_v25  ;;  %528 = vmatpush.msrb.mxu2 %v4887_v28  ;;  %7779 = vst [vmem:[#allocation30_spill] sm:$0xff] %v4925_v26 }
  0x45   :  { %366 = vmatmul.bf16.gmra.mxu1 %v3863_v25  ;;  %395 = vmatmul.bf16.gmra.mxu2 %v3863_v25 }
  0x46   :  { %424 = vmatmul.bf16.gmra.mxu3 %v3863_v25  ;;  %490 = vmatpush.msrb.mxu0 %v4896_v29  ;;  %v3864_v25 = vld [vmem:[%s7491_s0 + $0x18] sm:$0xff] }
  0x47   :  { %510 = vmatpush.msrb.mxu1 %v4902_v30  ;;  %529 = vmatpush.msrb.mxu2 %v4907_v31 }
  0x48   :  { %549 = vmatpush.msrb.mxu3 %v4912_v32  ;;  %634 = vmatpush.msra.mxu0 %v4543_v33 }
  0x49   :  { %530 = vmatpush.msrb.mxu2 %v4918_v60  ;;  %654 = vmatpush.msra.mxu1 %v4548_v34 }
  0x4a   :  { %550 = vmatpush.msrb.mxu3 %v4925_v26  ;;  %635 = vmatpush.msra.mxu0 %v4554_v35 }
  0x4b   :  { %674 = vmatpush.msra.mxu2 %v4575_v39  ;;  %655 = vmatpush.msra.mxu1 %v4560_v36 }
  0x4c   :  { %694 = vmatpush.msra.mxu3 %v4565_v37  ;;  %636 = vmatpush.msra.mxu0 %v4570_v38 }
  0x4d   :  { %675 = vmatpush.msra.mxu2 %v4598_v43  ;;  %656 = vmatpush.msra.mxu1 %v4581_v40 }
  0x4e   :  { %695 = vmatpush.msra.mxu3 %v4586_v41  ;;  %637 = vmatpush.msra.mxu0 %v4593_v42 }
  0x4f   :  { %676 = vmatpush.msra.mxu2 %v4622_v47  ;;  %657 = vmatpush.msra.mxu1 %v4604_v44 }
  0x50   :  { %696 = vmatpush.msra.mxu3 %v4609_v45  ;;  %638 = vmatpush.msra.mxu0 %v4617_v46 }
  0x51   :  { %677 = vmatpush.msra.mxu2 %v4646_v51  ;;  %658 = vmatpush.msra.mxu1 %v4628_v48 }
  0x52   :  { %697 = vmatpush.msra.mxu3 %v4633_v49  ;;  %639 = vmatpush.msra.mxu0 %v4641_v50 }
  0x53   :  { %678 = vmatpush.msra.mxu2 %v4670_v55  ;;  %659 = vmatpush.msra.mxu1 %v4652_v52 }
  0x54   :  { %698 = vmatpush.msra.mxu3 %v4657_v53  ;;  %342 = vmatmul.bf16.gmra.mxu0 %v3864_v25 }
  0x55   :  { %371 = vmatmul.bf16.gmra.mxu1 %v3864_v25  ;;  %400 = vmatmul.bf16.gmra.mxu2 %v3864_v25 }
  0x56   :  { %429 = vmatmul.bf16.gmra.mxu3 %v3864_v25  ;;  %679 = vmatpush.msra.mxu2 %v4694_v59  ;;  %v7500_v25 = vmov 0.0  }
  0x57   :  { %699 = vmatpush.msra.mxu3 %v4681_v57  ;;  %640 = vmatpush.msra.mxu0 %v4665_v54 }
  0x58   :  { %660 = vmatpush.msra.mxu1 %v4676_v56  ;;  %680 = vmatpush.msra.mxu2 %v4716_v63 }
  0x59   :  { %700 = vmatpush.msra.mxu3 %v4708_v62  ;;  %641 = vmatpush.msra.mxu0 %v4689_v58 }
  0x5a   :  { %661 = vmatpush.msra.mxu1 %v4703_v61  ;;  %681 = vmatpush.msra.mxu2 %v4746_v4 }
  0x5b   :  { %701 = vmatpush.msra.mxu3 %v4735_v2  ;;  %642 = vmatpush.msra.mxu0 %v4725_v0 }
  0x5c   :  { %662 = vmatpush.msra.mxu1 %v4730_v1  ;;  %682 = vmatpush.msra.mxu2 %v4769_v8 }
  0x5d   :  { %702 = vmatpush.msra.mxu3 %v4757_v6  ;;  %643 = vmatpush.msra.mxu0 %v4741_v3 }
  0x5e   :  { %663 = vmatpush.msra.mxu1 %v4752_v5  ;;  %683 = vmatpush.msra.mxu2 %v4793_v12 }
  0x5f   :  { %703 = vmatpush.msra.mxu3 %v4780_v10  ;;  %644 = vmatpush.msra.mxu0 %v4764_v7 }
  0x60   :  { %664 = vmatpush.msra.mxu1 %v4775_v9  ;;  %684 = vmatpush.msra.mxu2 %v4817_v16 }
  0x61   :  { %704 = vmatpush.msra.mxu3 %v4804_v14  ;;  %645 = vmatpush.msra.mxu0 %v4788_v11 }
  0x62   :  { %665 = vmatpush.msra.mxu1 %v4799_v13  ;;  %685 = vmatpush.msra.mxu2 %v4841_v20 }
  0x63   :  { %705 = vmatpush.msra.mxu3 %v4828_v18  ;;  %646 = vmatpush.msra.mxu0 %v4812_v15 }
  0x64   :  { %491 = vmatmul.f32.vlgmr.msrb.gmra.mxu0 %v7500_v25  ;;  %666 = vmatpush.msra.mxu1 %v4823_v17  ;;  %v7780_v17 = vld [vmem:[#allocation22_spill] sm:$0xff] }
  0x65   :  { %511 = vmatmul.f32.vlgmr.msrb.gmra.mxu1 %v7500_v25  ;;  %531 = vmatmul.f32.vlgmr.msrb.gmra.mxu2 %v7500_v25 }
  0x66   :  { %551 = vmatmul.f32.vlgmr.msrb.gmra.mxu3 %v7500_v25  ;;  %686 = vmatpush.msra.mxu2 %v4865_v24  ;;  %v7781_v25 = vld [vmem:[#allocation14_spill] sm:$0xff] }
  0x67   :  { %706 = vmatpush.msra.mxu3 %v4853_v22  ;;  %647 = vmatpush.msra.mxu0 %v4836_v19 }
  0x68   :  { %667 = vmatpush.msra.mxu1 %v4847_v21  ;;  %687 = vmatpush.msra.mxu2 %v4887_v28 }
  0x69   :  { %707 = vmatpush.msra.mxu3 %v4880_v27  ;;  %648 = vmatpush.msra.mxu0 %v4860_v23 }
  0x6a   :  { %668 = vmatpush.msra.mxu1 %v7780_v17  ;;  %688 = vmatpush.msra.mxu2 %v4907_v31 }
  0x6b   :  { %708 = vmatpush.msra.mxu3 %v4912_v32  ;;  %649 = vmatpush.msra.mxu0 %v4896_v29 }
  0x6c   :  { %669 = vmatpush.msra.mxu1 %v4902_v30  ;;  %689 = vmatpush.msra.mxu2 %v4918_v60 }
  0x6d   :  { %709 = vmatpush.msra.mxu3 %v4925_v26  ;;  %794 = vmatpush.msrb.mxu0 %v4543_v33 }
  0x6e   :  { %814 = vmatpush.msrb.mxu1 %v4548_v34  ;;  %834 = vmatpush.msrb.mxu2 %v4575_v39 }
  0x6f   :  { %854 = vmatpush.msrb.mxu3 %v4565_v37  ;;  %795 = vmatpush.msrb.mxu0 %v4554_v35 }
  0x70   :  { %815 = vmatpush.msrb.mxu1 %v4560_v36  ;;  %835 = vmatpush.msrb.mxu2 %v4598_v43 }
  0x71   :  { %855 = vmatpush.msrb.mxu3 %v4586_v41  ;;  %796 = vmatpush.msrb.mxu0 %v4570_v38 }
  0x72   :  { %816 = vmatpush.msrb.mxu1 %v4581_v40  ;;  %836 = vmatpush.msrb.mxu2 %v4622_v47 }
  0x73   :  { %856 = vmatpush.msrb.mxu3 %v4609_v45  ;;  %797 = vmatpush.msrb.mxu0 %v4593_v42 }
  0x74   :  { %817 = vmatpush.msrb.mxu1 %v4604_v44  ;;  %837 = vmatpush.msrb.mxu2 %v4646_v51 }
  0x75   :  { %857 = vmatpush.msrb.mxu3 %v4633_v49  ;;  %798 = vmatpush.msrb.mxu0 %v4617_v46 }
  0x76   :  { %818 = vmatpush.msrb.mxu1 %v4628_v48  ;;  %838 = vmatpush.msrb.mxu2 %v4670_v55 }
  0x77   :  { %858 = vmatpush.msrb.mxu3 %v4657_v53  ;;  %799 = vmatpush.msrb.mxu0 %v4641_v50 }
  0x78   :  { %819 = vmatpush.msrb.mxu1 %v4652_v52  ;;  %839 = vmatpush.msrb.mxu2 %v4694_v59 }
  0x79   :  { %859 = vmatpush.msrb.mxu3 %v4681_v57  ;;  %800 = vmatpush.msrb.mxu0 %v4665_v54 }
  0x7a   :  { %820 = vmatpush.msrb.mxu1 %v4676_v56  ;;  %840 = vmatpush.msrb.mxu2 %v4716_v63 }
  0x7b   :  { %860 = vmatpush.msrb.mxu3 %v4708_v62  ;;  %801 = vmatpush.msrb.mxu0 %v4689_v58 }
  0x7c   :  { %821 = vmatpush.msrb.mxu1 %v4703_v61  ;;  %841 = vmatpush.msrb.mxu2 %v4746_v4 }
  0x7d   :  { %861 = vmatpush.msrb.mxu3 %v4735_v2  ;;  %802 = vmatpush.msrb.mxu0 %v4725_v0 }
  0x7e   :  { %822 = vmatpush.msrb.mxu1 %v4730_v1  ;;  %842 = vmatpush.msrb.mxu2 %v4769_v8 }
  0x7f   :  { %862 = vmatpush.msrb.mxu3 %v4757_v6  ;;  %803 = vmatpush.msrb.mxu0 %v4741_v3 }
  0x80   :  { %823 = vmatpush.msrb.mxu1 %v4752_v5  ;;  %843 = vmatpush.msrb.mxu2 %v4793_v12 }
  0x81   :  { %863 = vmatpush.msrb.mxu3 %v4780_v10  ;;  %804 = vmatpush.msrb.mxu0 %v4764_v7 }
  0x82   :  { %824 = vmatpush.msrb.mxu1 %v4775_v9  ;;  %844 = vmatpush.msrb.mxu2 %v4817_v16 }
  0x83   :  { %864 = vmatpush.msrb.mxu3 %v4804_v14  ;;  %805 = vmatpush.msrb.mxu0 %v4788_v11 }
  0x84   :  { %825 = vmatpush.msrb.mxu1 %v4799_v13  ;;  %845 = vmatpush.msrb.mxu2 %v4841_v20 }
  0x85   :  { %865 = vmatpush.msrb.mxu3 %v4828_v18  ;;  %806 = vmatpush.msrb.mxu0 %v4812_v15 }
  0x86   :  { %826 = vmatpush.msrb.mxu1 %v7781_v25  ;;  %846 = vmatpush.msrb.mxu2 %v4865_v24 }
  0x87   :  { %866 = vmatpush.msrb.mxu3 %v4853_v22  ;;  %807 = vmatpush.msrb.mxu0 %v4836_v19 }
  0x88   :  { %827 = vmatpush.msrb.mxu1 %v4847_v21  ;;  %847 = vmatpush.msrb.mxu2 %v4887_v28 }
  0x89   :  { %867 = vmatpush.msrb.mxu3 %v4880_v27  ;;  %808 = vmatpush.msrb.mxu0 %v4860_v23 }
  0x8a   :  { %828 = vmatpush.msrb.mxu1 %v7780_v17  ;;  %848 = vmatpush.msrb.mxu2 %v4907_v31 }
  0x8b   :  { %868 = vmatpush.msrb.mxu3 %v4912_v32  ;;  %809 = vmatpush.msrb.mxu0 %v4896_v29 }
  0x8c   :  { %829 = vmatpush.msrb.mxu1 %v4902_v30  ;;  %849 = vmatpush.msrb.mxu2 %v4918_v60 }
  0x8d   :  { %869 = vmatpush.msrb.mxu3 %v4925_v26 }
  0xa0   :  { %v328_v21 = vpop.f32.mrf.mxu0 }
  0xa1   :  { %v357_v28 = vpop.f32.mrf.mxu1 }
  0xa8   :  { %v386_v19 = vpop.f32.mrf.mxu2  ;;  %v5065_v22 = vpop.f32.mrf.mxu0 }
  0xa9   :  { %v415_v27 = vpop.f32.mrf.mxu3  ;;  %7782 = vst [vmem:[#allocation31_spill] sm:$0xff] %v5065_v22  ;;  %v5067_v23 = vpop.f32.mrf.mxu1 }
  0xaa   :  { %7783 = vst [vmem:[#allocation32_spill] sm:$0xff] %v5067_v23 }
  0xb0   :  { %v5069_v17 = vpop.f32.mrf.mxu2 }
  0xb1   :  { %7784 = vst [vmem:[#allocation33_spill] sm:$0xff] %v5069_v17  ;;  %v5071_v31 = vpop.f32.mrf.mxu3  ;;  %v5073_v32 = vpop.f32.mrf.mxu0 }
  0xb2   :  { %7785 = vst [vmem:[#allocation34_spill] sm:$0xff] %v5071_v31  ;;  %v5075_v29 = vpop.f32.mrf.mxu1 }
  0xb3   :  { %7786 = vst [vmem:[#allocation35_spill] sm:$0xff] %v5073_v32 }
  0xb4   :  { %7787 = vst [vmem:[#allocation36_spill] sm:$0xff] %v5075_v29 }
  0xb8   :  { %v5077_v30 = vpop.f32.mrf.mxu2 }
  0xb9   :  { %7788 = vst [vmem:[#allocation37_spill] sm:$0xff] %v5077_v30  ;;  %v5079_v60 = vpop.f32.mrf.mxu3  ;;  %v5081_v26 = vpop.f32.mrf.mxu0 }
  0xba   :  { %7789 = vst [vmem:[#allocation38_spill] sm:$0xff] %v5079_v60  ;;  %v5083_v24 = vpop.f32.mrf.mxu1 }
  0xbb   :  { %7790 = vst [vmem:[#allocation39_spill] sm:$0xff] %v5081_v26 }
  0xbc   :  { %7791 = vst [vmem:[#allocation40_spill] sm:$0xff] %v5083_v24 }
  0xc0   :  { %v5085_v25 = vpop.f32.mrf.mxu2 }
  0xc1   :  { %7792 = vst [vmem:[#allocation41_spill] sm:$0xff] %v5085_v25  ;;  %v5087_v22 = vpop.f32.mrf.mxu3  ;;  %v5089_v23 = vpop.f32.mrf.mxu0 }
  0xc2   :  { %7793 = vst [vmem:[#allocation42_spill] sm:$0xff] %v5087_v22  ;;  %v5091_v17 = vpop.f32.mrf.mxu1 }
  0xc3   :  { %7794 = vst [vmem:[#allocation43_spill] sm:$0xff] %v5089_v23 }
  0xc4   :  { %7795 = vst [vmem:[#allocation44_spill] sm:$0xff] %v5091_v17  ;;  %v21_v17 = vld [vmem:[%s7493_s3] sm:$0xf] }
  0xc5   :  { %v5128_v20 = vperm.slane %v21_v17, 3 }
  0xc7   :  { %7811 = vst [vmem:[#allocation60_spill] sm:$0xff] %v5128_v20  ;;  %v416_v13 = vadd.f32 %v415_v27, %v5128_v20 }
  0xc8   :  { %v5097_v29 = vpop.f32.mrf.mxu2 }
  0xc9   :  { %v5093_v31 = vpop.f32.mrf.mxu3  ;;  %v5095_v32 = vpop.f32.mrf.mxu0  ;;  %7798 = vst [vmem:[#allocation47_spill] sm:$0xff] %v5097_v29  ;;  %v5118_v29 = vperm.slane %v21_v17, 0 }
  0xca   :  { %7796 = vst [vmem:[#allocation45_spill] sm:$0xff] %v5093_v31  ;;  %v5099_v30 = vpop.f32.mrf.mxu1 }
  0xcb   :  { %7797 = vst [vmem:[#allocation46_spill] sm:$0xff] %v5095_v32 }
  0xcc   :  { %7799 = vst [vmem:[#allocation48_spill] sm:$0xff] %v5099_v30  ;;  %v5120_v30 = vperm.slane %v21_v17, 1 }
  0xcd   :  { %7807 = vst [vmem:[#allocation56_spill] sm:$0xff] %v5118_v29 }
  0xce   :  { %7808 = vst [vmem:[#allocation57_spill] sm:$0xff] %v5120_v30 }
  0xd0   :  { %v5107_v25 = vpop.f32.mrf.mxu2 }
  0xd1   :  { %v5101_v60 = vpop.f32.mrf.mxu3  ;;  %v5103_v26 = vpop.f32.mrf.mxu0  ;;  %7803 = vst [vmem:[#allocation52_spill] sm:$0xff] %v5107_v25 }
  0xd2   :  { %7800 = vst [vmem:[#allocation49_spill] sm:$0xff] %v5101_v60  ;;  %v5105_v24 = vpop.f32.mrf.mxu1 }
  0xd3   :  { %7801 = vst [vmem:[#allocation50_spill] sm:$0xff] %v5103_v26  ;;  %v358_v26 = vadd.f32 %v357_v28, %v5120_v30 }
  0xd4   :  { %7802 = vst [vmem:[#allocation51_spill] sm:$0xff] %v5105_v24  ;;  %v329_v24 = vadd.f32 %v328_v21, %v5118_v29 }
  0xd8   :  { %v5122_v60 = vpop.f32.mrf.mxu2 }
  0xd9   :  { %v5112_v23 = vpop.f32.mrf.mxu3  ;;  %v5114_v31 = vpop.f32.mrf.mxu0  ;;  %7809 = vst [vmem:[#allocation58_spill] sm:$0xff] %v5122_v60 }
  0xda   :  { %7804 = vst [vmem:[#allocation53_spill] sm:$0xff] %v5112_v23  ;;  %v5116_v32 = vpop.f32.mrf.mxu1 }
  0xdb   :  { %7805 = vst [vmem:[#allocation54_spill] sm:$0xff] %v5114_v31 }
  0xdc   :  { %7806 = vst [vmem:[#allocation55_spill] sm:$0xff] %v5116_v32 }
  0xe0   :  { %v5131_v11 = vpop.f32.mrf.mxu2 }
  0xe1   :  { %v5126_v25 = vpop.f32.mrf.mxu3  ;;  %v492_v22 = vpop.f32.mrf.mxu0  ;;  %7812 = vst [vmem:[#allocation61_spill] sm:$0xff] %v5131_v11 }
  0xe2   :  { %7810 = vst [vmem:[#allocation59_spill] sm:$0xff] %v5126_v25  ;;  %v555_v15 = vadd.f32 %v492_v22, %v329_v24  ;;  %v512_v18 = vpop.f32.mrf.mxu1  ;;  %v5133_v22 = vperm.slane %v21_v17, 2 }
  0xe3   :  { %v556_v23 = vadd.f32 %v512_v18, %v358_v26 }
  0xe4   :  { %v3586_v31 = vmul.f32 -1.442695, %v555_v15  ;;  %7813 = vst [vmem:[#allocation62_spill] sm:$0xff] %v5133_v22  ;;  %v387_v18 = vadd.f32 %v386_v19, %v5133_v22 }
  0xe5   :  { %v3587_v32 = vmul.f32 -1.442695, %v556_v23 }
  0xe6   :  { %3930 = vpow2.f32 %v3586_v31 }
  0xe7   :  { %3932 = vpow2.f32 %v3587_v32 }
  0xe8   :  { %v532_v15 = vpop.f32.mrf.mxu2 }
  0xe9   :  { %v552_v60 = vpop.f32.mrf.mxu3  ;;  %v557_v26 = vadd.f32 %v532_v15, %v387_v18 }
  0xea   :  { %v558_v21 = vadd.f32 %v552_v60, %v416_v13 }
  0xec   :  { %v3931_v29 = vpop.eup %3930  ;;  %v3588_v28 = vmul.f32 -1.442695, %v558_v21 }
  0xed   :  { %v3933_v30 = vpop.eup %3932  ;;  %v562_v25 = vadd.f32 1.0, %v3931_v29 }
  0xee   :  { %v581_v14 = vadd.f32 1.0, %v3933_v30  ;;  %3934 = vpow2.f32 %v3588_v28 }
  0xef   :  { %3936 = vrcp.f32 %v562_v25  ;;  %v574_v29 = vand.u32 2147483648, %v562_v25  ;;  %v572_v28 = vand.u32 2147483647, %v562_v25  ;;  %vm568_vm2 = vweird.f32 %v562_v25 }
  0xf0   :  { %3938 = vrcp.f32 %v581_v14  ;;  %v593_v30 = vand.u32 2147483648, %v581_v14  ;;  %v591_v20 = vand.u32 2147483647, %v581_v14  ;;  %vm587_vm3 = vweird.f32 %v581_v14 }
  0xf1   :  { %v575_v15 = vor.u32 1.1754944e-38, %v574_v29  ;;  %vm573_vm5 = vcmp.eq.f32.partialorder %v572_v28, 8.507059e+37 }
  0xf2   :  { %vm592_vm7 = vcmp.eq.f32.partialorder %v591_v20, 8.507059e+37 }
  0xf4   :  { %v3935_v23 = vpop.eup %3934 }
  0xf5   :  { %v3937_v24 = vpop.eup %3936  ;;  %v601_v27 = vadd.f32 1.0, %v3935_v23  ;;  %v594_v23 = vor.u32 1.1754944e-38, %v593_v30 }
  0xf6   :  { %v3939_v31 = vpop.eup %3938  ;;  %v564_v32 = vmul.f32 %v3937_v24, %v562_v25  ;;  %vm569_vm0 = vweird.f32 %v3937_v24 }
  0xf7   :  { %v583_v13 = vmul.f32 %v3939_v31, %v581_v14  ;;  %3940 = vrcp.f32 %v601_v27  ;;  %vm588_vm1 = vweird.f32 %v3939_v31  ;;  %vm570_vm4 = vmor %vm568_vm2, %vm569_vm0  ;;  %vm607_vm9 = vweird.f32 %v601_v27 }
  0xf8   :  { %v565_v60 = vsub.f32 1.0, %v564_v32  ;;  %3942 = vtanh.f32 %v557_v26  ;;  %vm589_vm6 = vmor %vm587_vm3, %vm588_vm1 }
  0xf9   :  { %v584_v21 = vsub.f32 1.0, %v583_v13 }
  0xfa   :  { %v566_v17 = vmul.f32 %v3937_v24, %v565_v60 }
  0xfb   :  { %v585_v11 = vmul.f32 %v3939_v31, %v584_v21 }
  0xfc   :  { %v567_v19 = vadd.f32 %v3937_v24, %v566_v17 }
  0xfd   :  { %v3941_v22 = vpop.eup %3940  ;;  %v586_v18 = vadd.f32 %v3939_v31, %v585_v11  ;;  %v613_v11 = vand.u32 2147483648, %v601_v27 }
  0xfe   :  { %v571_v16 = vsel %vm570_vm4, %v3937_v24, %v567_v19  ;;  %v603_v32 = vmul.f32 %v3941_v22, %v601_v27  ;;  %v3943_v26 = vpop.eup %3942  ;;  %vm608_vm8 = vweird.f32 %v3941_v22  ;;  %v611_v24 = vand.u32 2147483647, %v601_v27 }
  0xff   :  { %v576_v13 = vsel %vm573_vm5, %v575_v15, %v571_v16  ;;  %v590_v60 = vsel %vm589_vm6, %v3939_v31, %v586_v18  ;;  %vm609_vm10 = vmor %vm607_vm9, %vm608_vm8  ;;  %v614_v30 = vor.u32 1.1754944e-38, %v613_v11  ;;  %v7844_v15 = vld [vmem:[#allocation60_spill] sm:$0xff]  ;;  %v7845_v18 = vld [vmem:[#allocation34_spill] sm:$0xff] }
 0x100   :  { %v595_v9 = vsel %vm592_vm7, %v594_v23, %v590_v60  ;;  %v619_v21 = vmul.f32 %v3943_v26, %v576_v13  ;;  %v604_v7 = vsub.f32 1.0, %v603_v32  ;;  %vm612_vm11 = vcmp.eq.f32.partialorder %v611_v24, 8.507059e+37 }
 0x101   :  { %v618_v10 = vmul.f32 0.0, %v595_v9  ;;  %v418_v23 = vadd.f32 %v7845_v18, %v7844_v15 }
 0x102   :  { %v605_v17 = vmul.f32 %v3941_v22, %v604_v7 }
 0x103   :  { %v5136_v25 = vadd.f32 %v619_v21, %v618_v10 }
 0x104   :  { %v606_v14 = vadd.f32 %v3941_v22, %v605_v17 }
 0x105   :  { %3944 = vtanh.f32 %v5136_v25 }
 0x106   :  { %v610_v29 = vsel %vm609_vm10, %v3941_v22, %v606_v14 }
 0x107   :  { %v615_v20 = vsel %vm612_vm11, %v614_v30, %v610_v29  ;;  %v7846_v29 = vld [vmem:[#allocation62_spill] sm:$0xff]  ;;  %v7847_v30 = vld [vmem:[#allocation33_spill] sm:$0xff] }
 0x10b   :  { %v3945_v16 = vpop.eup %3944 }
 0x10c   :  { %v5139_v31 = vmul.f32 %v3945_v16, %v615_v20  ;;  %v389_v16 = vadd.f32 %v7847_v30, %v7846_v29 }
 0x10e   :  { %7814 = vst [vmem:[#allocation63_spill] sm:$0xff] %v5139_v31  ;;  %650 = vmatmul.f32.vlgmr.msra.gmra.mxu0 %v5139_v31  ;;  %670 = vmatmul.f32.vlgmr.msra.gmra.mxu1 %v5139_v31 }
 0x10f   :  { %690 = vmatmul.f32.vlgmr.msra.gmra.mxu2 %v5139_v31  ;;  %710 = vmatmul.f32.vlgmr.msra.gmra.mxu3 %v5139_v31 }
 0x110   :  { %954 = vmatpush.msra.mxu0 %v4543_v33  ;;  %974 = vmatpush.msra.mxu1 %v4548_v34  ;;  %v7815_v33 = vld [vmem:[#allocation8_spill] sm:$0xff]  ;;  %v7816_v34 = vld [vmem:[#allocation6_spill] sm:$0xff] }
 0x111   :  { %994 = vmatpush.msra.mxu2 %v4575_v39  ;;  %1014 = vmatpush.msra.mxu3 %v4565_v37  ;;  %v7819_v37 = vld [vmem:[#allocation11_spill] sm:$0xff]  ;;  %v7821_v39 = vld [vmem:[#allocation10_spill] sm:$0xff] }
 0x112   :  { %955 = vmatpush.msra.mxu0 %v4554_v35  ;;  %975 = vmatpush.msra.mxu1 %v4560_v36  ;;  %v7817_v35 = vld [vmem:[#allocation7_spill] sm:$0xff]  ;;  %v7818_v36 = vld [vmem:[#allocation13_spill] sm:$0xff] }
 0x113   :  { %995 = vmatpush.msra.mxu2 %v4598_v43  ;;  %1015 = vmatpush.msra.mxu3 %v4586_v41  ;;  %v7823_v41 = vld [vmem:[#allocation15_spill] sm:$0xff]  ;;  %v7825_v43 = vld [vmem:[#allocation14_spill] sm:$0xff] }
 0x114   :  { %956 = vmatpush.msra.mxu0 %v4570_v38  ;;  %976 = vmatpush.msra.mxu1 %v4581_v40  ;;  %v7820_v38 = vld [vmem:[#allocation9_spill] sm:$0xff] }
 0x115   :  { %996 = vmatpush.msra.mxu2 %v4622_v47  ;;  %1016 = vmatpush.msra.mxu3 %v4609_v45  ;;  %v7822_v40 = vld [vmem:[#allocation17_spill] sm:$0xff]  ;;  %v7827_v45 = vld [vmem:[#allocation19_spill] sm:$0xff]  ;;  %v7829_v47 = vld [vmem:[#allocation18_spill] sm:$0xff] }
 0x116   :  { %957 = vmatpush.msra.mxu0 %v4593_v42  ;;  %977 = vmatpush.msra.mxu1 %v4604_v44  ;;  %v7824_v42 = vld [vmem:[#allocation12_spill] sm:$0xff]  ;;  %v7826_v44 = vld [vmem:[#allocation21_spill] sm:$0xff] }
 0x117   :  { %997 = vmatpush.msra.mxu2 %v4646_v51  ;;  %1017 = vmatpush.msra.mxu3 %v4633_v49  ;;  %v7831_v49 = vld [vmem:[#allocation23_spill] sm:$0xff]  ;;  %v7833_v51 = vld [vmem:[#allocation22_spill] sm:$0xff] }
 0x118   :  { %958 = vmatpush.msra.mxu0 %v4617_v46  ;;  %978 = vmatpush.msra.mxu1 %v4628_v48  ;;  %v7828_v46 = vld [vmem:[#allocation16_spill] sm:$0xff] }
 0x119   :  { %998 = vmatpush.msra.mxu2 %v4670_v55  ;;  %1018 = vmatpush.msra.mxu3 %v4657_v53  ;;  %v7830_v48 = vld [vmem:[#allocation24_spill] sm:$0xff]  ;;  %v7837_v55 = vld [vmem:[#allocation26_spill] sm:$0xff] }
 0x11a   :  { %959 = vmatpush.msra.mxu0 %v4641_v50  ;;  %979 = vmatpush.msra.mxu1 %v4652_v52  ;;  %v7832_v50 = vld [vmem:[#allocation20_spill] sm:$0xff]  ;;  %v7834_v52 = vld [vmem:[#allocation27_spill] sm:$0xff] }
 0x11b   :  { %999 = vmatpush.msra.mxu2 %v4694_v59  ;;  %1019 = vmatpush.msra.mxu3 %v4681_v57  ;;  %v7835_v53 = vld [vmem:[#allocation28_spill] sm:$0xff]  ;;  %v7839_v57 = vld [vmem:[#allocation30_spill] sm:$0xff]  ;;  %v7841_v59 = vld [vmem:[#allocation31_spill] sm:$0xff] }
 0x11c   :  { %960 = vmatpush.msra.mxu0 %v4665_v54  ;;  %980 = vmatpush.msra.mxu1 %v4676_v56  ;;  %v7836_v54 = vld [vmem:[#allocation25_spill] sm:$0xff] }
 0x11d   :  { %1000 = vmatpush.msra.mxu2 %v4716_v63  ;;  %1020 = vmatpush.msra.mxu3 %v4708_v62  ;;  %v7838_v56 = vld [vmem:[#allocation29_spill] sm:$0xff] }
 0x11e   :  { %961 = vmatpush.msra.mxu0 %v4689_v58  ;;  %981 = vmatpush.msra.mxu1 %v4703_v61  ;;  %v7840_v58 = vld [vmem:[#allocation56_spill] sm:$0xff]  ;;  %v7842_v62 = vld [vmem:[#allocation57_spill] sm:$0xff] }
 0x11f   :  { %1001 = vmatpush.msra.mxu2 %v4746_v4  ;;  %1021 = vmatpush.msra.mxu3 %v4735_v2  ;;  %v331_v61 = vadd.f32 %v7841_v59, %v7840_v58 }
 0x120   :  { %962 = vmatpush.msra.mxu0 %v4725_v0  ;;  %982 = vmatpush.msra.mxu1 %v4730_v1  ;;  %v7843_v0 = vld [vmem:[#allocation32_spill] sm:$0xff] }
 0x121   :  { %1002 = vmatpush.msra.mxu2 %v4769_v8  ;;  %1022 = vmatpush.msra.mxu3 %v4757_v6  ;;  %v360_v7 = vadd.f32 %v7843_v0, %v7842_v62 }
 0x122   :  { %963 = vmatpush.msra.mxu0 %v4741_v3  ;;  %983 = vmatpush.msra.mxu1 %v4752_v5 }
 0x123   :  { %1003 = vmatpush.msra.mxu2 %v4793_v12  ;;  %1023 = vmatpush.msra.mxu3 %v7815_v33 }
 0x124   :  { %964 = vmatpush.msra.mxu0 %v7816_v34  ;;  %984 = vmatpush.msra.mxu1 %v7817_v35 }
 0x125   :  { %1004 = vmatpush.msra.mxu2 %v7818_v36  ;;  %1024 = vmatpush.msra.mxu3 %v7819_v37 }
 0x126   :  { %965 = vmatpush.msra.mxu0 %v7820_v38  ;;  %985 = vmatpush.msra.mxu1 %v7821_v39 }
 0x127   :  { %1005 = vmatpush.msra.mxu2 %v7822_v40  ;;  %1025 = vmatpush.msra.mxu3 %v7823_v41 }
 0x128   :  { %966 = vmatpush.msra.mxu0 %v7824_v42  ;;  %986 = vmatpush.msra.mxu1 %v7825_v43 }
 0x129   :  { %1006 = vmatpush.msra.mxu2 %v7826_v44  ;;  %1026 = vmatpush.msra.mxu3 %v7827_v45 }
 0x12a   :  { %967 = vmatpush.msra.mxu0 %v7828_v46  ;;  %987 = vmatpush.msra.mxu1 %v7829_v47 }
 0x12b   :  { %1007 = vmatpush.msra.mxu2 %v7830_v48  ;;  %1027 = vmatpush.msra.mxu3 %v7831_v49 }
 0x12c   :  { %968 = vmatpush.msra.mxu0 %v7832_v50  ;;  %988 = vmatpush.msra.mxu1 %v7833_v51 }
 0x12d   :  { %1008 = vmatpush.msra.mxu2 %v7834_v52  ;;  %1028 = vmatpush.msra.mxu3 %v7835_v53 }
 0x12e   :  { %969 = vmatpush.msra.mxu0 %v7836_v54  ;;  %989 = vmatpush.msra.mxu1 %v7837_v55 }
 0x12f   :  { %1009 = vmatpush.msra.mxu2 %v7838_v56  ;;  %1029 = vmatpush.msra.mxu3 %v7839_v57 }
 0x18b   :  { %v651_v9 = vpop.f32.mrf.mxu0  ;;  %v671_v10 = vpop.f32.mrf.mxu1 }
 0x18c   :  { %v714_v22 = vadd.f32 %v651_v9, %v331_v61  ;;  %v715_v27 = vadd.f32 %v671_v10, %v360_v7 }
 0x18e   :  { %v3589_v28 = vmul.f32 -1.442695, %v714_v22  ;;  %v3590_v19 = vmul.f32 -1.442695, %v715_v27 }
 0x190   :  { %3946 = vpow2.f32 %v3589_v28 }
 0x191   :  { %3948 = vpow2.f32 %v3590_v19 }
 0x192   :  { %v711_v32 = vpop.f32.mrf.mxu3  ;;  %v691_v11 = vpop.f32.mrf.mxu2 }
 0x193   :  { %v717_v26 = vadd.f32 %v711_v32, %v418_v23  ;;  %v716_v61 = vadd.f32 %v691_v11, %v389_v16 }
 0x195   :  { %v3591_v13 = vmul.f32 -1.442695, %v717_v26 }
 0x196   :  { %v3947_v60 = vpop.eup %3946 }
 0x197   :  { %v3949_v21 = vpop.eup %3948  ;;  %v721_v17 = vadd.f32 1.0, %v3947_v60  ;;  %3950 = vpow2.f32 %v3591_v13 }
 0x198   :  { %v740_v14 = vadd.f32 1.0, %v3949_v21 }
 0x199   :  { %3952 = vrcp.f32 %v721_v17  ;;  %v733_v27 = vand.u32 2147483648, %v721_v17  ;;  %v731_v18 = vand.u32 2147483647, %v721_v17  ;;  %vm727_vm14 = vweird.f32 %v721_v17 }
 0x19a   :  { %3954 = vrcp.f32 %v740_v14  ;;  %v752_v28 = vand.u32 2147483648, %v740_v14  ;;  %v750_v32 = vand.u32 2147483647, %v740_v14  ;;  %vm746_vm15 = vweird.f32 %v740_v14 }
 0x19b   :  { %v734_v60 = vor.u32 1.1754944e-38, %v733_v27  ;;  %vm732_vm2 = vcmp.eq.f32.partialorder %v731_v18, 8.507059e+37 }
 0x19c   :  { %vm751_vm3 = vcmp.eq.f32.partialorder %v750_v32, 8.507059e+37 }
 0x19d   :  { %v3951_v24 = vpop.eup %3950 }
 0x19e   :  { %v760_v20 = vadd.f32 1.0, %v3951_v24  ;;  %v753_v24 = vor.u32 1.1754944e-38, %v752_v28 }
 0x19f   :  { %v3953_v59 = vpop.eup %3952 }
 0x1a0   :  { %v3955_v0 = vpop.eup %3954  ;;  %v723_v7 = vmul.f32 %v3953_v59, %v721_v17  ;;  %3956 = vrcp.f32 %v760_v20  ;;  %vm728_vm12 = vweird.f32 %v3953_v59  ;;  %v772_v27 = vand.u32 2147483648, %v760_v20 }
 0x1a1   :  { %v742_v9 = vmul.f32 %v3955_v0, %v740_v14  ;;  %3958 = vtanh.f32 %v716_v61  ;;  %vm747_vm13 = vweird.f32 %v3955_v0  ;;  %vm729_vm0 = vmor %vm727_vm14, %vm728_vm12  ;;  %vm766_vm5 = vweird.f32 %v760_v20 }
 0x1a2   :  { %v724_v10 = vsub.f32 1.0, %v723_v7  ;;  %vm748_vm1 = vmor %vm746_vm15, %vm747_vm13  ;;  %v773_v18 = vor.u32 1.1754944e-38, %v772_v27  ;;  %v5338_v27 = vld [vmem:[%s7492_s2 + $0x170] sm:$0xff] }
 0x1a3   :  { %v743_v22 = vsub.f32 1.0, %v742_v9 }
 0x1a4   :  { %v725_v19 = vmul.f32 %v3953_v59, %v724_v10 }
 0x1a5   :  { %v744_v23 = vmul.f32 %v3955_v0, %v743_v22 }
 0x1a6   :  { %v3957_v26 = vpop.eup %3956  ;;  %v726_v13 = vadd.f32 %v3953_v59, %v725_v19 }
 0x1a7   :  { %v745_v21 = vadd.f32 %v3955_v0, %v744_v23  ;;  %v762_v11 = vmul.f32 %v3957_v26, %v760_v20  ;;  %v3959_v16 = vpop.eup %3958  ;;  %vm767_vm4 = vweird.f32 %v3957_v26 }
 0x1a8   :  { %v730_v30 = vsel %vm729_vm0, %v3953_v59, %v726_v13  ;;  %v770_v59 = vand.u32 2147483647, %v760_v20  ;;  %vm768_vm6 = vmor %vm766_vm5, %vm767_vm4  ;;  %v5242_v20 = vld [vmem:[%s7492_s2 + $0x1f0] sm:$0xff]  ;;  %v5254_v13 = vld [vmem:[%s7492_s2 + $0x1c0] sm:$0xff] }
 0x1a9   :  { %v735_v61 = vsel %vm732_vm2, %v734_v60, %v730_v30  ;;  %v749_v7 = vsel %vm748_vm1, %v3955_v0, %v745_v21  ;;  %v763_v9 = vsub.f32 1.0, %v762_v11  ;;  %v5260_v60 = vld [vmem:[%s7492_s2 + $0x1c8] sm:$0xff]  ;;  %v5266_v21 = vld [vmem:[%s7492_s2 + $0x1d0] sm:$0xff]  ;;  %v5272_v11 = vld [vmem:[%s7492_s2 + $0x1d8] sm:$0xff] }
 0x1aa   :  { %v754_v10 = vsel %vm751_vm3, %v753_v24, %v749_v7  ;;  %v778_v22 = vmul.f32 %v3959_v16, %v735_v61  ;;  %vm771_vm7 = vcmp.eq.f32.partialorder %v770_v59, 8.507059e+37  ;;  %v5278_v24 = vld [vmem:[%s7492_s2 + $0x1a0] sm:$0xff]  ;;  %v5284_v30 = vld [vmem:[%s7492_s2 + $0x1a8] sm:$0xff]  ;;  %v5290_v16 = vld [vmem:[%s7492_s2 + $0x1b0] sm:$0xff] }
 0x1ab   :  { %v777_v31 = vmul.f32 %v754_v10, %v5136_v25  ;;  %v764_v19 = vmul.f32 %v3957_v26, %v763_v9  ;;  %v5230_v25 = vld [vmem:[%s7492_s2 + $0x1e0] sm:$0xff]  ;;  %v5296_v61 = vld [vmem:[%s7492_s2 + $0x1b8] sm:$0xff]  ;;  %v5308_v9 = vld [vmem:[%s7492_s2 + $0x188] sm:$0xff] }
 0x1ac   :  { %v5302_v7 = vld [vmem:[%s7492_s2 + $0x180] sm:$0xff]  ;;  %v5314_v10 = vld [vmem:[%s7492_s2 + $0x190] sm:$0xff]  ;;  %v5344_v59 = vld [vmem:[%s7492_s2 + $0x178] sm:$0xff] }
 0x1ad   :  { %v5218_v17 = vadd.f32 %v778_v22, %v777_v31  ;;  %v765_v14 = vadd.f32 %v3957_v26, %v764_v19  ;;  %v5236_v31 = vld [vmem:[%s7492_s2 + $0x1e8] sm:$0xff]  ;;  %v5320_v22 = vld [vmem:[%s7492_s2 + $0x198] sm:$0xff]  ;;  %v5326_v19 = vld [vmem:[%s7492_s2 + $0x160] sm:$0xff] }
 0x1af   :  { %3960 = vtanh.f32 %v5218_v17  ;;  %v769_v28 = vsel %vm768_vm6, %v3957_v26, %v765_v14  ;;  %v5248_v26 = vld [vmem:[%s7492_s2 + $0x1f8] sm:$0xff]  ;;  %v5332_v14 = vld [vmem:[%s7492_s2 + $0x168] sm:$0xff] }
 0x1b0   :  { %v774_v23 = vsel %vm771_vm7, %v773_v18, %v769_v28  ;;  %v5350_v28 = vld [vmem:[%s7492_s2 + $0x140] sm:$0xff]  ;;  %v5356_v18 = vld [vmem:[%s7492_s2 + $0x148] sm:$0xff] }
 0x1b1   :  { %7849 = vst [vmem:[#allocation6_spill] sm:$0xff] %v5356_v18 }
 0x1b5   :  { %v3961_v0 = vpop.eup %3960 }
 0x1b6   :  { %v5221_v32 = vmul.f32 %v3961_v0, %v774_v23  ;;  %v5362_v0 = vld [vmem:[%s7492_s2 + $0x150] sm:$0xff]  ;;  %v5368_v23 = vld [vmem:[%s7492_s2 + $0x158] sm:$0xff] }
 0x1b7   :  { %7850 = vst [vmem:[#allocation7_spill] sm:$0xff] %v5368_v23 }
 0x1b8   :  { %7848 = vst [vmem:[#allocation8_spill] sm:$0xff] %v5221_v32  ;;  %810 = vmatmul.f32.vlgmr.msrb.gmra.mxu0 %v5221_v32  ;;  %830 = vmatmul.f32.vlgmr.msrb.gmra.mxu1 %v5221_v32 }
 0x1b9   :  { %850 = vmatmul.f32.vlgmr.msrb.gmra.mxu2 %v5221_v32  ;;  %870 = vmatmul.f32.vlgmr.msrb.gmra.mxu3 %v5221_v32  ;;  %v5374_v32 = vld [vmem:[%s7492_s2 + $0x120] sm:$0xff] }
 0x1ba   :  { %1114 = vmatpush.msrb.mxu0 %v5230_v25  ;;  %1134 = vmatpush.msrb.mxu1 %v5236_v31  ;;  %7851 = vst [vmem:[#allocation13_spill] sm:$0xff] %v5374_v32 }
 0x1bb   :  { %1154 = vmatpush.msrb.mxu2 %v5242_v20  ;;  %1174 = vmatpush.msrb.mxu3 %v5248_v26 }
 0x1bc   :  { %1115 = vmatpush.msrb.mxu0 %v5254_v13  ;;  %1135 = vmatpush.msrb.mxu1 %v5260_v60 }
 0x1bd   :  { %1155 = vmatpush.msrb.mxu2 %v5266_v21  ;;  %1175 = vmatpush.msrb.mxu3 %v5272_v11 }
 0x1be   :  { %1116 = vmatpush.msrb.mxu0 %v5278_v24  ;;  %1136 = vmatpush.msrb.mxu1 %v5284_v30 }
 0x1bf   :  { %1156 = vmatpush.msrb.mxu2 %v5290_v16  ;;  %1176 = vmatpush.msrb.mxu3 %v5296_v61 }
 0x1c0   :  { %1117 = vmatpush.msrb.mxu0 %v5302_v7  ;;  %1137 = vmatpush.msrb.mxu1 %v5308_v9 }
 0x1c1   :  { %1157 = vmatpush.msrb.mxu2 %v5314_v10  ;;  %1177 = vmatpush.msrb.mxu3 %v5320_v22 }
 0x1c2   :  { %1118 = vmatpush.msrb.mxu0 %v5326_v19  ;;  %1138 = vmatpush.msrb.mxu1 %v5332_v14 }
 0x1c3   :  { %1158 = vmatpush.msrb.mxu2 %v5338_v27  ;;  %1178 = vmatpush.msrb.mxu3 %v5344_v59 }
 0x1c4   :  { %1119 = vmatpush.msrb.mxu0 %v5350_v28  ;;  %1139 = vmatpush.msrb.mxu1 %v5356_v18  ;;  %v5380_v18 = vld [vmem:[%s7492_s2 + $0x128] sm:$0xff] }
 0x1c5   :  { %1159 = vmatpush.msrb.mxu2 %v5362_v0  ;;  %1179 = vmatpush.msrb.mxu3 %v5368_v23  ;;  %7852 = vst [vmem:[#allocation11_spill] sm:$0xff] %v5380_v18  ;;  %v5387_v23 = vld [vmem:[%s7492_s2 + $0x138] sm:$0xff] }
 0x1c6   :  { %1120 = vmatpush.msrb.mxu0 %v5374_v32  ;;  %1140 = vmatpush.msrb.mxu1 %v5380_v18  ;;  %v5393_v32 = vld [vmem:[%s7492_s2 + $0x100] sm:$0xff]  ;;  %v5399_v18 = vld [vmem:[%s7492_s2 + $0x108] sm:$0xff] }
 0x1c7   :  { %1160 = vmatpush.msrb.mxu2 %v4716_v63  ;;  %1180 = vmatpush.msrb.mxu3 %v5387_v23  ;;  %v5407_v63 = vld [vmem:[%s7492_s2 + $0xe0] sm:$0xff] }
 0x1c8   :  { %1121 = vmatpush.msrb.mxu0 %v5393_v32  ;;  %1141 = vmatpush.msrb.mxu1 %v5399_v18 }
 0x1c9   :  { %1161 = vmatpush.msrb.mxu2 %v4746_v4  ;;  %1181 = vmatpush.msrb.mxu3 %v4735_v2 }
 0x1ca   :  { %1122 = vmatpush.msrb.mxu0 %v5407_v63  ;;  %1142 = vmatpush.msrb.mxu1 %v4730_v1  ;;  %v7853_v1 = vld [vmem:[#allocation35_spill] sm:$0xff] }
 0x1cb   :  { %1162 = vmatpush.msrb.mxu2 %v4769_v8  ;;  %1182 = vmatpush.msrb.mxu3 %v4757_v6  ;;  %v334_v2 = vadd.f32 %v7853_v1, %v7840_v58 }
 0x1cc   :  { %1123 = vmatpush.msrb.mxu0 %v4741_v3  ;;  %1143 = vmatpush.msrb.mxu1 %v4752_v5  ;;  %v7854_v3 = vld [vmem:[#allocation36_spill] sm:$0xff] }
 0x1cd   :  { %1163 = vmatpush.msrb.mxu2 %v4793_v12  ;;  %1183 = vmatpush.msrb.mxu3 %v7815_v33  ;;  %v363_v4 = vadd.f32 %v7854_v3, %v7842_v62 }
 0x1ce   :  { %1124 = vmatpush.msrb.mxu0 %v7816_v34  ;;  %1144 = vmatpush.msrb.mxu1 %v7817_v35  ;;  %v7855_v35 = vld [vmem:[#allocation38_spill] sm:$0xff] }
 0x1cf   :  { %1164 = vmatpush.msrb.mxu2 %v7818_v36  ;;  %1184 = vmatpush.msrb.mxu3 %v7819_v37  ;;  %v421_v36 = vadd.f32 %v7855_v35, %v7844_v15 }
 0x1d0   :  { %1125 = vmatpush.msrb.mxu0 %v7820_v38  ;;  %1145 = vmatpush.msrb.mxu1 %v7821_v39 }
 0x1d1   :  { %1165 = vmatpush.msrb.mxu2 %v7822_v40  ;;  %1185 = vmatpush.msrb.mxu3 %v7823_v41 }
 0x1d2   :  { %1126 = vmatpush.msrb.mxu0 %v7824_v42  ;;  %1146 = vmatpush.msrb.mxu1 %v7825_v43 }
 0x1d3   :  { %1166 = vmatpush.msrb.mxu2 %v7826_v44  ;;  %1186 = vmatpush.msrb.mxu3 %v7827_v45 }
 0x1d4   :  { %1127 = vmatpush.msrb.mxu0 %v7828_v46  ;;  %1147 = vmatpush.msrb.mxu1 %v7829_v47  ;;  %v7856_v46 = vld [vmem:[#allocation37_spill] sm:$0xff] }
 0x1d5   :  { %1167 = vmatpush.msrb.mxu2 %v7830_v48  ;;  %1187 = vmatpush.msrb.mxu3 %v7831_v49  ;;  %v392_v47 = vadd.f32 %v7856_v46, %v7846_v29 }
 0x1d6   :  { %1128 = vmatpush.msrb.mxu0 %v7832_v50  ;;  %1148 = vmatpush.msrb.mxu1 %v7833_v51 }
 0x1d7   :  { %1168 = vmatpush.msrb.mxu2 %v7834_v52  ;;  %1188 = vmatpush.msrb.mxu3 %v7835_v53 }
 0x1d8   :  { %1129 = vmatpush.msrb.mxu0 %v7836_v54  ;;  %1149 = vmatpush.msrb.mxu1 %v7837_v55 }
 0x1d9   :  { %1169 = vmatpush.msrb.mxu2 %v7838_v56  ;;  %1189 = vmatpush.msrb.mxu3 %v7839_v57 }
 0x235   :  { %v811_v5 = vpop.f32.mrf.mxu0  ;;  %v831_v6 = vpop.f32.mrf.mxu1 }
 0x236   :  { %v874_v8 = vadd.f32 %v811_v5, %v334_v2  ;;  %v875_v12 = vadd.f32 %v831_v6, %v363_v4 }
 0x238   :  { %v3592_v33 = vmul.f32 -1.442695, %v874_v8  ;;  %v3593_v34 = vmul.f32 -1.442695, %v875_v12 }
 0x23a   :  { %3962 = vpow2.f32 %v3592_v33 }
 0x23b   :  { %3964 = vpow2.f32 %v3593_v34 }
 0x23c   :  { %v871_v37 = vpop.f32.mrf.mxu3  ;;  %v851_v44 = vpop.f32.mrf.mxu2 }
 0x23d   :  { %v877_v38 = vadd.f32 %v871_v37, %v421_v36  ;;  %v876_v50 = vadd.f32 %v851_v44, %v392_v47 }
 0x23f   :  { %v3594_v39 = vmul.f32 -1.442695, %v877_v38 }
 0x240   :  { %v3963_v40 = vpop.eup %3962 }
 0x241   :  { %v3965_v41 = vpop.eup %3964  ;;  %v881_v42 = vadd.f32 1.0, %v3963_v40  ;;  %3966 = vpow2.f32 %v3594_v39 }
 0x242   :  { %v900_v43 = vadd.f32 1.0, %v3965_v41 }
 0x243   :  { %3968 = vrcp.f32 %v881_v42  ;;  %v893_v56 = vand.u32 2147483648, %v881_v42  ;;  %v891_v2 = vand.u32 2147483647, %v881_v42  ;;  %vm887_vm10 = vweird.f32 %v881_v42 }
 0x244   :  { %3970 = vrcp.f32 %v900_v43  ;;  %v912_v57 = vand.u32 2147483648, %v900_v43  ;;  %v910_v4 = vand.u32 2147483647, %v900_v43  ;;  %vm906_vm11 = vweird.f32 %v900_v43 }
 0x245   :  { %v894_v8 = vor.u32 1.1754944e-38, %v893_v56  ;;  %vm892_vm14 = vcmp.eq.f32.partialorder %v891_v2, 8.507059e+37  ;;  %v5488_v56 = vld [vmem:[%s7492_s2 + $0x130] sm:$0xff]  ;;  %v5510_v2 = vld [vmem:[%s7492_s2 + $0xe8] sm:$0xff] }
 0x246   :  { %v913_v34 = vor.u32 1.1754944e-38, %v912_v57  ;;  %vm911_vm15 = vcmp.eq.f32.partialorder %v910_v4, 8.507059e+37  ;;  %v5497_v57 = vld [vmem:[%s7492_s2 + $0x110] sm:$0xff]  ;;  %v5522_v4 = vld [vmem:[%s7492_s2 + $0xf8] sm:$0xff] }
 0x247   :  { %v3967_v45 = vpop.eup %3966 }
 0x248   :  { %v920_v48 = vadd.f32 1.0, %v3967_v45 }
 0x249   :  { %v3969_v49 = vpop.eup %3968 }
 0x24a   :  { %v3971_v51 = vpop.eup %3970  ;;  %v883_v52 = vmul.f32 %v3969_v49, %v881_v42  ;;  %3972 = vrcp.f32 %v920_v48  ;;  %vm888_vm8 = vweird.f32 %v3969_v49  ;;  %v932_v46 = vand.u32 2147483648, %v920_v48 }
 0x24b   :  { %v902_v53 = vmul.f32 %v3971_v51, %v900_v43  ;;  %3974 = vtanh.f32 %v876_v50  ;;  %vm907_vm9 = vweird.f32 %v3971_v51  ;;  %vm889_vm12 = vmor %vm887_vm10, %vm888_vm8  ;;  %vm926_vm1 = vweird.f32 %v920_v48 }
 0x24c   :  { %v884_v54 = vsub.f32 1.0, %v883_v52  ;;  %vm908_vm13 = vmor %vm906_vm11, %vm907_vm9  ;;  %v930_v47 = vand.u32 2147483647, %v920_v48  ;;  %v933_v50 = vor.u32 1.1754944e-38, %v932_v46  ;;  %v5624_v46 = vld [vmem:[%s7492_s2 + $0x40] sm:$0xff] }
 0x24d   :  { %v903_v55 = vsub.f32 1.0, %v902_v53  ;;  %7876 = vst [vmem:[#allocation28_spill] sm:$0xff] %v5624_v46 }
 0x24e   :  { %v885_v1 = vmul.f32 %v3969_v49, %v884_v54  ;;  %vm931_vm3 = vcmp.eq.f32.partialorder %v930_v47, 8.507059e+37  ;;  %v7860_v54 = vld [vmem:[#allocation13_spill] sm:$0xff]  ;;  %v5630_v47 = vld [vmem:[%s7492_s2 + $0x48] sm:$0xff] }
 0x24f   :  { %v904_v3 = vmul.f32 %v3971_v51, %v903_v55  ;;  %v7861_v55 = vld [vmem:[#allocation11_spill] sm:$0xff]  ;;  %7877 = vst [vmem:[#allocation25_spill] sm:$0xff] %v5630_v47 }
 0x250   :  { %v3973_v5 = vpop.eup %3972  ;;  %v886_v6 = vadd.f32 %v3969_v49, %v885_v1  ;;  %v5503_v1 = vld [vmem:[%s7492_s2 + $0x118] sm:$0xff] }
 0x251   :  { %v905_v12 = vadd.f32 %v3971_v51, %v904_v3  ;;  %v922_v33 = vmul.f32 %v3973_v5, %v920_v48  ;;  %v3975_v36 = vpop.eup %3974  ;;  %vm927_vm0 = vweird.f32 %v3973_v5  ;;  %v7859_v48 = vld [vmem:[#allocation7_spill] sm:$0xff]  ;;  %v5516_v3 = vld [vmem:[%s7492_s2 + $0xf0] sm:$0xff] }
 0x252   :  { %v890_v35 = vsel %vm889_vm12, %v3969_v49, %v886_v6  ;;  %vm928_vm2 = vmor %vm926_vm1, %vm927_vm0  ;;  %v5534_v6 = vld [vmem:[%s7492_s2 + $0xc8] sm:$0xff] }
 0x253   :  { %v895_v37 = vsel %vm892_vm14, %v894_v8, %v890_v35  ;;  %v909_v38 = vsel %vm908_vm13, %v3971_v51, %v905_v12  ;;  %v923_v39 = vsub.f32 1.0, %v922_v33  ;;  %v5540_v8 = vld [vmem:[%s7492_s2 + $0xd0] sm:$0xff]  ;;  %v5546_v12 = vld [vmem:[%s7492_s2 + $0xd8] sm:$0xff]  ;;  %v5552_v33 = vld [vmem:[%s7492_s2 + $0xa0] sm:$0xff] }
 0x254   :  { %v914_v40 = vsel %vm911_vm15, %v913_v34, %v909_v38  ;;  %v938_v41 = vmul.f32 %v3975_v36, %v895_v37  ;;  %7862 = vst [vmem:[#allocation10_spill] sm:$0xff] %v5540_v8  ;;  %v5558_v34 = vld [vmem:[%s7492_s2 + $0xa8] sm:$0xff]  ;;  %v5564_v35 = vld [vmem:[%s7492_s2 + $0xb0] sm:$0xff]  ;;  %v5570_v36 = vld [vmem:[%s7492_s2 + $0xb8] sm:$0xff] }
 0x255   :  { %v937_v44 = vmul.f32 %v914_v40, %v5218_v17  ;;  %v924_v45 = vmul.f32 %v3973_v5, %v923_v39  ;;  %v7858_v17 = vld [vmem:[#allocation6_spill] sm:$0xff]  ;;  %7863 = vst [vmem:[#allocation17_spill] sm:$0xff] %v5546_v12  ;;  %v5582_v38 = vld [vmem:[%s7492_s2 + $0x88] sm:$0xff]  ;;  %v5588_v39 = vld [vmem:[%s7492_s2 + $0x90] sm:$0xff] }
 0x256   :  { %7864 = vst [vmem:[#allocation15_spill] sm:$0xff] %v5552_v33  ;;  %v5576_v37 = vld [vmem:[%s7492_s2 + $0x80] sm:$0xff]  ;;  %v5594_v40 = vld [vmem:[%s7492_s2 + $0x98] sm:$0xff] }
 0x257   :  { %v5450_v42 = vadd.f32 %v938_v41, %v937_v44  ;;  %v925_v43 = vadd.f32 %v3973_v5, %v924_v45  ;;  %7865 = vst [vmem:[#allocation12_spill] sm:$0xff] %v5558_v34  ;;  %v5600_v41 = vld [vmem:[%s7492_s2 + $0x60] sm:$0xff]  ;;  %v5606_v44 = vld [vmem:[%s7492_s2 + $0x68] sm:$0xff]  ;;  %v5612_v45 = vld [vmem:[%s7492_s2 + $0x70] sm:$0xff] }
 0x258   :  { %7866 = vst [vmem:[#allocation14_spill] sm:$0xff] %v5564_v35 }
 0x259   :  { %3976 = vtanh.f32 %v5450_v42  ;;  %v929_v49 = vsel %vm928_vm2, %v3973_v5, %v925_v43  ;;  %v5528_v5 = vld [vmem:[%s7492_s2 + $0xc0] sm:$0xff]  ;;  %7867 = vst [vmem:[#allocation21_spill] sm:$0xff] %v5570_v36  ;;  %v5618_v43 = vld [vmem:[%s7492_s2 + $0x78] sm:$0xff] }
 0x25a   :  { %v934_v52 = vsel %vm931_vm3, %v933_v50, %v929_v49  ;;  %7868 = vst [vmem:[#allocation19_spill] sm:$0xff] %v5576_v37  ;;  %v5636_v49 = vld [vmem:[%s7492_s2 + $0x50] sm:$0xff]  ;;  %v5642_v50 = vld [vmem:[%s7492_s2 + $0x58] sm:$0xff] }
 0x25b   :  { %7869 = vst [vmem:[#allocation16_spill] sm:$0xff] %v5582_v38 }
 0x25c   :  { %7870 = vst [vmem:[#allocation18_spill] sm:$0xff] %v5588_v39 }
 0x25d   :  { %7871 = vst [vmem:[#allocation24_spill] sm:$0xff] %v5594_v40 }
 0x25e   :  { %7872 = vst [vmem:[#allocation23_spill] sm:$0xff] %v5600_v41 }
 0x25f   :  { %v3977_v51 = vpop.eup %3976  ;;  %7873 = vst [vmem:[#allocation20_spill] sm:$0xff] %v5606_v44 }
 0x260   :  { %v5453_v53 = vmul.f32 %v3977_v51, %v934_v52  ;;  %7874 = vst [vmem:[#allocation22_spill] sm:$0xff] %v5612_v45  ;;  %v5648_v51 = vld [vmem:[%s7492_s2 + $0x20] sm:$0xff]  ;;  %v5654_v52 = vld [vmem:[%s7492_s2 + $0x28] sm:$0xff] }
 0x261   :  { %7875 = vst [vmem:[#allocation27_spill] sm:$0xff] %v5618_v43 }
 0x262   :  { %7857 = vst [vmem:[#allocation9_spill] sm:$0xff] %v5453_v53  ;;  %970 = vmatmul.f32.vlgmr.msra.gmra.mxu0 %v5453_v53  ;;  %990 = vmatmul.f32.vlgmr.msra.gmra.mxu1 %v5453_v53 }
 0x263   :  { %1010 = vmatmul.f32.vlgmr.msra.gmra.mxu2 %v5453_v53  ;;  %1030 = vmatmul.f32.vlgmr.msra.gmra.mxu3 %v5453_v53  ;;  %7878 = vst [vmem:[#allocation26_spill] sm:$0xff] %v5636_v49  ;;  %v5660_v53 = vld [vmem:[%s7492_s2 + $0x30] sm:$0xff] }
 0x264   :  { %1274 = vmatpush.msra.mxu0 %v5230_v25  ;;  %1294 = vmatpush.msra.mxu1 %v5236_v31  ;;  %7879 = vst [vmem:[#allocation29_spill] sm:$0xff] %v5642_v50 }
 0x265   :  { %1314 = vmatpush.msra.mxu2 %v5242_v20  ;;  %1334 = vmatpush.msra.mxu3 %v5248_v26  ;;  %7880 = vst [vmem:[#allocation30_spill] sm:$0xff] %v5648_v51 }
 0x266   :  { %1275 = vmatpush.msra.mxu0 %v5254_v13  ;;  %1295 = vmatpush.msra.mxu1 %v5260_v60  ;;  %7881 = vst [vmem:[#allocation31_spill] sm:$0xff] %v5654_v52 }
 0x267   :  { %1315 = vmatpush.msra.mxu2 %v5266_v21  ;;  %1335 = vmatpush.msra.mxu3 %v5272_v11  ;;  %7882 = vst [vmem:[#allocation32_spill] sm:$0xff] %v5660_v53 }
 0x268   :  { %1276 = vmatpush.msra.mxu0 %v5278_v24  ;;  %1296 = vmatpush.msra.mxu1 %v5284_v30 }
 0x269   :  { %1316 = vmatpush.msra.mxu2 %v5290_v16  ;;  %1336 = vmatpush.msra.mxu3 %v5296_v61 }
 0x26a   :  { %1277 = vmatpush.msra.mxu0 %v5302_v7  ;;  %1297 = vmatpush.msra.mxu1 %v5308_v9 }
 0x26b   :  { %1317 = vmatpush.msra.mxu2 %v5314_v10  ;;  %1337 = vmatpush.msra.mxu3 %v5320_v22 }
 0x26c   :  { %1278 = vmatpush.msra.mxu0 %v5326_v19  ;;  %1298 = vmatpush.msra.mxu1 %v5332_v14 }
 0x26d   :  { %1318 = vmatpush.msra.mxu2 %v5338_v27  ;;  %1338 = vmatpush.msra.mxu3 %v5344_v59 }
 0x26e   :  { %1279 = vmatpush.msra.mxu0 %v5350_v28  ;;  %1299 = vmatpush.msra.mxu1 %v7858_v17 }
 0x26f   :  { %1319 = vmatpush.msra.mxu2 %v5362_v0  ;;  %1339 = vmatpush.msra.mxu3 %v7859_v48 }
 0x270   :  { %1280 = vmatpush.msra.mxu0 %v7860_v54  ;;  %1300 = vmatpush.msra.mxu1 %v7861_v55 }
 0x271   :  { %1320 = vmatpush.msra.mxu2 %v5488_v56  ;;  %1340 = vmatpush.msra.mxu3 %v5387_v23 }
 0x272   :  { %1281 = vmatpush.msra.mxu0 %v5393_v32  ;;  %1301 = vmatpush.msra.mxu1 %v5399_v18 }
 0x273   :  { %1321 = vmatpush.msra.mxu2 %v5497_v57  ;;  %1341 = vmatpush.msra.mxu3 %v5503_v1 }
 0x274   :  { %1282 = vmatpush.msra.mxu0 %v5407_v63  ;;  %1302 = vmatpush.msra.mxu1 %v5510_v2 }
 0x275   :  { %1322 = vmatpush.msra.mxu2 %v5516_v3  ;;  %1342 = vmatpush.msra.mxu3 %v5522_v4 }
 0x276   :  { %1283 = vmatpush.msra.mxu0 %v5528_v5  ;;  %1303 = vmatpush.msra.mxu1 %v5534_v6 }
 0x277   :  { %1323 = vmatpush.msra.mxu2 %v5540_v8  ;;  %1343 = vmatpush.msra.mxu3 %v5546_v12 }
 0x278   :  { %1284 = vmatpush.msra.mxu0 %v5552_v33  ;;  %1304 = vmatpush.msra.mxu1 %v5558_v34 }
 0x279   :  { %1324 = vmatpush.msra.mxu2 %v5564_v35  ;;  %1344 = vmatpush.msra.mxu3 %v5570_v36 }
 0x27a   :  { %1285 = vmatpush.msra.mxu0 %v5576_v37  ;;  %1305 = vmatpush.msra.mxu1 %v5582_v38 }
 0x27b   :  { %1325 = vmatpush.msra.mxu2 %v5588_v39  ;;  %1345 = vmatpush.msra.mxu3 %v5594_v40 }
 0x27c   :  { %1286 = vmatpush.msra.mxu0 %v5600_v41  ;;  %1306 = vmatpush.msra.mxu1 %v5606_v44 }
 0x27d   :  { %1326 = vmatpush.msra.mxu2 %v5612_v45  ;;  %1346 = vmatpush.msra.mxu3 %v5618_v43 }
 0x27e   :  { %1287 = vmatpush.msra.mxu0 %v5624_v46  ;;  %1307 = vmatpush.msra.mxu1 %v5630_v47  ;;  %v7889_v47 = vld [vmem:[#allocation40_spill] sm:$0xff] }
 0x27f   :  { %1327 = vmatpush.msra.mxu2 %v5636_v49  ;;  %1347 = vmatpush.msra.mxu3 %v5642_v50  ;;  %v5666_v50 = vld [vmem:[%s7492_s2 + $0x38] sm:$0xff] }
 0x280   :  { %1288 = vmatpush.msra.mxu0 %v5648_v51  ;;  %1308 = vmatpush.msra.mxu1 %v5654_v52  ;;  %7883 = vst [vmem:[#allocation34_spill] sm:$0xff] %v5666_v50  ;;  %v5672_v51 = vld [vmem:[%s7492_s2] sm:$0xff]  ;;  %v5678_v52 = vld [vmem:[%s7492_s2 + $0x8] sm:$0xff] }
 0x281   :  { %1328 = vmatpush.msra.mxu2 %v5660_v53  ;;  %1348 = vmatpush.msra.mxu3 %v5666_v50  ;;  %7884 = vst [vmem:[#allocation33_spill] sm:$0xff] %v5672_v51  ;;  %v5684_v53 = vld [vmem:[%s7492_s2 + $0x10] sm:$0xff]  ;;  %v5690_v50 = vld [vmem:[%s7492_s2 + $0x18] sm:$0xff] }
 0x282   :  { %1289 = vmatpush.msra.mxu0 %v5672_v51  ;;  %7885 = vst [vmem:[#allocation35_spill] sm:$0xff] %v5678_v52  ;;  %1309 = vmatpush.msra.mxu1 %v5678_v52  ;;  %v7888_v51 = vld [vmem:[#allocation39_spill] sm:$0xff]  ;;  %v365_v52 = vadd.f32 %v7889_v47, %v7842_v62 }
 0x283   :  { %7886 = vst [vmem:[#allocation36_spill] sm:$0xff] %v5684_v53  ;;  %1329 = vmatpush.msra.mxu2 %v5684_v53  ;;  %1349 = vmatpush.msra.mxu3 %v5690_v50  ;;  %v336_v49 = vadd.f32 %v7888_v51, %v7840_v58  ;;  %v7890_v53 = vld [vmem:[#allocation42_spill] sm:$0xff] }
 0x284   :  { %7887 = vst [vmem:[#allocation38_spill] sm:$0xff] %v5690_v50  ;;  %v423_v39 = vadd.f32 %v7890_v53, %v7844_v15 }
 0x2df   :  { %v971_v46 = vpop.f32.mrf.mxu0  ;;  %v991_v43 = vpop.f32.mrf.mxu1 }
 0x2e0   :  { %v1034_v45 = vadd.f32 %v971_v46, %v336_v49  ;;  %v1035_v44 = vadd.f32 %v991_v43, %v365_v52 }
 0x2e2   :  { %v3595_v41 = vmul.f32 -1.442695, %v1034_v45  ;;  %v3596_v40 = vmul.f32 -1.442695, %v1035_v44  ;;  %v7891_v45 = vld [vmem:[#allocation41_spill] sm:$0xff] }
 0x2e3   :  { %v394_v44 = vadd.f32 %v7891_v45, %v7846_v29 }
 0x2e4   :  { %3978 = vpow2.f32 %v3595_v41 }
 0x2e5   :  { %3980 = vpow2.f32 %v3596_v40 }
 0x2e6   :  { %v1031_v38 = vpop.f32.mrf.mxu3  ;;  %v1011_v47 = vpop.f32.mrf.mxu2 }
 0x2e7   :  { %v1037_v37 = vadd.f32 %v1031_v38, %v423_v39  ;;  %v1036_v49 = vadd.f32 %v1011_v47, %v394_v44 }
 0x2e9   :  { %v3597_v50 = vmul.f32 -1.442695, %v1037_v37 }
 0x2ea   :  { %v3979_v36 = vpop.eup %3978 }
 0x2eb   :  { %v3981_v35 = vpop.eup %3980  ;;  %v1041_v51 = vadd.f32 1.0, %v3979_v36  ;;  %3982 = vpow2.f32 %v3597_v50 }
 0x2ec   :  { %v1060_v58 = vadd.f32 1.0, %v3981_v35 }
 0x2ed   :  { %3984 = vrcp.f32 %v1041_v51  ;;  %v1053_v52 = vand.u32 2147483648, %v1041_v51  ;;  %v1051_v50 = vand.u32 2147483647, %v1041_v51  ;;  %vm1047_vm6 = vweird.f32 %v1041_v51 }
 0x2ee   :  { %3986 = vrcp.f32 %v1060_v58  ;;  %v1072_v36 = vand.u32 2147483648, %v1060_v58  ;;  %v1070_v62 = vand.u32 2147483647, %v1060_v58  ;;  %vm1066_vm7 = vweird.f32 %v1060_v58 }
 0x2ef   :  { %v1054_v47 = vor.u32 1.1754944e-38, %v1053_v52  ;;  %vm1052_vm10 = vcmp.eq.f32.partialorder %v1051_v50, 8.507059e+37 }
 0x2f0   :  { %vm1071_vm11 = vcmp.eq.f32.partialorder %v1070_v62, 8.507059e+37 }
 0x2f1   :  { %v3983_v46 = vpop.eup %3982 }
 0x2f2   :  { %v1080_v41 = vadd.f32 1.0, %v3983_v46 }
 0x2f3   :  { %v3985_v43 = vpop.eup %3984 }
 0x2f4   :  { %v3987_v53 = vpop.eup %3986  ;;  %v1043_v40 = vmul.f32 %v3985_v43, %v1041_v51  ;;  %3988 = vrcp.f32 %v1080_v41  ;;  %vm1048_vm4 = vweird.f32 %v3985_v43  ;;  %vm1086_vm13 = vweird.f32 %v1080_v41 }
 0x2f5   :  { %v1062_v38 = vmul.f32 %v3987_v53, %v1060_v58  ;;  %3990 = vtanh.f32 %v1036_v49  ;;  %vm1067_vm5 = vweird.f32 %v3987_v53  ;;  %vm1049_vm8 = vmor %vm1047_vm6, %vm1048_vm4 }
 0x2f6   :  { %v1044_v37 = vsub.f32 1.0, %v1043_v40  ;;  %vm1068_vm9 = vmor %vm1066_vm7, %vm1067_vm5  ;;  %v1073_v40 = vor.u32 1.1754944e-38, %v1072_v36 }
 0x2f7   :  { %v1063_v39 = vsub.f32 1.0, %v1062_v38 }
 0x2f8   :  { %v1045_v35 = vmul.f32 %v3985_v43, %v1044_v37 }
 0x2f9   :  { %v1064_v15 = vmul.f32 %v3987_v53, %v1063_v39 }
 0x2fa   :  { %v3989_v34 = vpop.eup %3988  ;;  %v1046_v45 = vadd.f32 %v3985_v43, %v1045_v35 }
 0x2fb   :  { %v1065_v46 = vadd.f32 %v3987_v53, %v1064_v15  ;;  %v1082_v44 = vmul.f32 %v3989_v34, %v1080_v41  ;;  %v3991_v49 = vpop.eup %3990  ;;  %vm1087_vm12 = vweird.f32 %v3989_v34  ;;  %v1092_v15 = vand.u32 2147483648, %v1080_v41 }
 0x2fc   :  { %v1050_v38 = vsel %vm1049_vm8, %v3985_v43, %v1046_v45  ;;  %v1090_v43 = vand.u32 2147483647, %v1080_v41  ;;  %vm1088_vm14 = vmor %vm1086_vm13, %vm1087_vm12  ;;  %v7899_v41 = vld [vmem:[#allocation19_spill] sm:$0xff]  ;;  %v7900_v45 = vld [vmem:[#allocation16_spill] sm:$0xff] }
 0x2fd   :  { %v1055_v29 = vsel %vm1052_vm10, %v1054_v47, %v1050_v38  ;;  %v1069_v37 = vsel %vm1068_vm9, %v3987_v53, %v1065_v46  ;;  %v1083_v33 = vsub.f32 1.0, %v1082_v44  ;;  %v1093_v36 = vor.u32 1.1754944e-38, %v1092_v15  ;;  %v7901_v47 = vld [vmem:[#allocation18_spill] sm:$0xff]  ;;  %v7902_v46 = vld [vmem:[#allocation24_spill] sm:$0xff]  ;;  %v7903_v44 = vld [vmem:[#allocation23_spill] sm:$0xff] }
 0x2fe   :  { %v1074_v39 = vsel %vm1071_vm11, %v1073_v40, %v1069_v37  ;;  %v1098_v12 = vmul.f32 %v3991_v49, %v1055_v29  ;;  %vm1091_vm15 = vcmp.eq.f32.partialorder %v1090_v43, 8.507059e+37  ;;  %v7893_v29 = vld [vmem:[#allocation10_spill] sm:$0xff]  ;;  %v7904_v40 = vld [vmem:[#allocation20_spill] sm:$0xff]  ;;  %v7906_v49 = vld [vmem:[#allocation27_spill] sm:$0xff] }
 0x2ff   :  { %v1097_v8 = vmul.f32 %v1074_v39, %v5450_v42  ;;  %v1084_v35 = vmul.f32 %v3989_v34, %v1083_v33  ;;  %v7894_v42 = vld [vmem:[#allocation17_spill] sm:$0xff]  ;;  %v7897_v33 = vld [vmem:[#allocation14_spill] sm:$0xff]  ;;  %v7907_v37 = vld [vmem:[#allocation28_spill] sm:$0xff] }
 0x300   :  { %v7905_v38 = vld [vmem:[#allocation22_spill] sm:$0xff]  ;;  %v7908_v39 = vld [vmem:[#allocation25_spill] sm:$0xff]  ;;  %v7912_v43 = vld [vmem:[#allocation31_spill] sm:$0xff] }
 0x301   :  { %v5702_v51 = vadd.f32 %v1098_v12, %v1097_v8  ;;  %v1085_v58 = vadd.f32 %v3989_v34, %v1084_v35  ;;  %v7895_v8 = vld [vmem:[#allocation15_spill] sm:$0xff]  ;;  %v7896_v12 = vld [vmem:[#allocation12_spill] sm:$0xff]  ;;  %v7909_v35 = vld [vmem:[#allocation26_spill] sm:$0xff] }
 0x302   :  { %v7911_v15 = vld [vmem:[#allocation30_spill] sm:$0xff] }
 0x303   :  { %3992 = vtanh.f32 %v5702_v51  ;;  %v1089_v52 = vsel %vm1088_vm14, %v3989_v34, %v1085_v58  ;;  %v7898_v34 = vld [vmem:[#allocation21_spill] sm:$0xff] }
 0x304   :  { %v1094_v53 = vsel %vm1091_vm15, %v1093_v36, %v1089_v52  ;;  %v7910_v58 = vld [vmem:[#allocation29_spill] sm:$0xff]  ;;  %v7913_v52 = vld [vmem:[#allocation32_spill] sm:$0xff]  ;;  %v7914_v36 = vld [vmem:[#allocation34_spill] sm:$0xff] }
 0x309   :  { %v3993_v62 = vpop.eup %3992 }
 0x30a   :  { %v5705_v50 = vmul.f32 %v3993_v62, %v1094_v53  ;;  %v7915_v62 = vld [vmem:[#allocation33_spill] sm:$0xff]  ;;  %v7916_v53 = vld [vmem:[#allocation35_spill] sm:$0xff] }
 0x30c   :  { %7892 = vst [vmem:[#allocation37_spill] sm:$0xff] %v5705_v50  ;;  %1130 = vmatmul.f32.vlgmr.msrb.gmra.mxu0 %v5705_v50  ;;  %1150 = vmatmul.f32.vlgmr.msrb.gmra.mxu1 %v5705_v50 }
 0x30d   :  { %1170 = vmatmul.f32.vlgmr.msrb.gmra.mxu2 %v5705_v50  ;;  %1190 = vmatmul.f32.vlgmr.msrb.gmra.mxu3 %v5705_v50  ;;  %v7917_v50 = vld [vmem:[#allocation36_spill] sm:$0xff] }
 0x30e   :  { %1434 = vmatpush.msrb.mxu0 %v5230_v25  ;;  %1454 = vmatpush.msrb.mxu1 %v5236_v31 }
 0x30f   :  { %1474 = vmatpush.msrb.mxu2 %v5242_v20  ;;  %1494 = vmatpush.msrb.mxu3 %v5248_v26 }
 0x310   :  { %1435 = vmatpush.msrb.mxu0 %v5254_v13  ;;  %1455 = vmatpush.msrb.mxu1 %v5260_v60 }
 0x311   :  { %1475 = vmatpush.msrb.mxu2 %v5266_v21  ;;  %1495 = vmatpush.msrb.mxu3 %v5272_v11 }
 0x312   :  { %1436 = vmatpush.msrb.mxu0 %v5278_v24  ;;  %1456 = vmatpush.msrb.mxu1 %v5284_v30 }
 0x313   :  { %1476 = vmatpush.msrb.mxu2 %v5290_v16  ;;  %1496 = vmatpush.msrb.mxu3 %v5296_v61 }
 0x314   :  { %1437 = vmatpush.msrb.mxu0 %v5302_v7  ;;  %1457 = vmatpush.msrb.mxu1 %v5308_v9 }
 0x315   :  { %1477 = vmatpush.msrb.mxu2 %v5314_v10  ;;  %1497 = vmatpush.msrb.mxu3 %v5320_v22 }
 0x316   :  { %1438 = vmatpush.msrb.mxu0 %v5326_v19  ;;  %1458 = vmatpush.msrb.mxu1 %v5332_v14 }
 0x317   :  { %1478 = vmatpush.msrb.mxu2 %v5338_v27  ;;  %1498 = vmatpush.msrb.mxu3 %v5344_v59 }
 0x318   :  { %1439 = vmatpush.msrb.mxu0 %v5350_v28  ;;  %1459 = vmatpush.msrb.mxu1 %v7858_v17 }
 0x319   :  { %1479 = vmatpush.msrb.mxu2 %v5362_v0  ;;  %1499 = vmatpush.msrb.mxu3 %v7859_v48 }
 0x31a   :  { %1440 = vmatpush.msrb.mxu0 %v7860_v54  ;;  %1460 = vmatpush.msrb.mxu1 %v7861_v55 }
 0x31b   :  { %1480 = vmatpush.msrb.mxu2 %v5488_v56  ;;  %1500 = vmatpush.msrb.mxu3 %v5387_v23 }
 0x31c   :  { %1441 = vmatpush.msrb.mxu0 %v5393_v32  ;;  %1461 = vmatpush.msrb.mxu1 %v5399_v18 }
 0x31d   :  { %1481 = vmatpush.msrb.mxu2 %v5497_v57  ;;  %1501 = vmatpush.msrb.mxu3 %v5503_v1 }
 0x31e   :  { %1442 = vmatpush.msrb.mxu0 %v5407_v63  ;;  %1462 = vmatpush.msrb.mxu1 %v5510_v2 }
 0x31f   :  { %1482 = vmatpush.msrb.mxu2 %v5516_v3  ;;  %1502 = vmatpush.msrb.mxu3 %v5522_v4 }
 0x320   :  { %1443 = vmatpush.msrb.mxu0 %v5528_v5  ;;  %1463 = vmatpush.msrb.mxu1 %v5534_v6 }
 0x321   :  { %1483 = vmatpush.msrb.mxu2 %v7893_v29  ;;  %1503 = vmatpush.msrb.mxu3 %v7894_v42 }
 0x322   :  { %1444 = vmatpush.msrb.mxu0 %v7895_v8  ;;  %1464 = vmatpush.msrb.mxu1 %v7896_v12 }
 0x323   :  { %1484 = vmatpush.msrb.mxu2 %v7897_v33  ;;  %1504 = vmatpush.msrb.mxu3 %v7898_v34 }
 0x324   :  { %1445 = vmatpush.msrb.mxu0 %v7899_v41  ;;  %1465 = vmatpush.msrb.mxu1 %v7900_v45 }
 0x325   :  { %1485 = vmatpush.msrb.mxu2 %v7901_v47  ;;  %1505 = vmatpush.msrb.mxu3 %v7902_v46  ;;  %v7924_v47 = vld [vmem:[#allocation45_spill] sm:$0xff] }
 0x326   :  { %1446 = vmatpush.msrb.mxu0 %v7903_v44  ;;  %1466 = vmatpush.msrb.mxu1 %v7904_v40 }
 0x327   :  { %1486 = vmatpush.msrb.mxu2 %v7905_v38  ;;  %1506 = vmatpush.msrb.mxu3 %v7906_v49  ;;  %v7922_v38 = vld [vmem:[#allocation44_spill] sm:$0xff] }
 0x328   :  { %1447 = vmatpush.msrb.mxu0 %v7907_v37  ;;  %1467 = vmatpush.msrb.mxu1 %v7908_v39  ;;  %v7918_v37 = vld [vmem:[#allocation38_spill] sm:$0xff]  ;;  %v7919_v39 = vld [vmem:[#allocation56_spill] sm:$0xff] }
 0x329   :  { %1487 = vmatpush.msrb.mxu2 %v7909_v35  ;;  %1507 = vmatpush.msrb.mxu3 %v7910_v58  ;;  %v7920_v35 = vld [vmem:[#allocation43_spill] sm:$0xff]  ;;  %v7921_v58 = vld [vmem:[#allocation57_spill] sm:$0xff] }
 0x32a   :  { %1448 = vmatpush.msrb.mxu0 %v7911_v15  ;;  %1468 = vmatpush.msrb.mxu1 %v7912_v43  ;;  %v339_v49 = vadd.f32 %v7920_v35, %v7919_v39  ;;  %v368_v15 = vadd.f32 %v7922_v38, %v7921_v58 }
 0x32b   :  { %1488 = vmatpush.msrb.mxu2 %v7913_v52  ;;  %1508 = vmatpush.msrb.mxu3 %v7914_v36 }
 0x32c   :  { %1449 = vmatpush.msrb.mxu0 %v7915_v62  ;;  %1469 = vmatpush.msrb.mxu1 %v7916_v53  ;;  %v7923_v62 = vld [vmem:[#allocation60_spill] sm:$0xff] }
 0x32d   :  { %1489 = vmatpush.msrb.mxu2 %v7917_v50  ;;  %1509 = vmatpush.msrb.mxu3 %v7918_v37  ;;  %v426_v53 = vadd.f32 %v7924_v47, %v7923_v62 }
 0x389   :  { %v1131_v40 = vpop.f32.mrf.mxu0  ;;  %v1151_v43 = vpop.f32.mrf.mxu1 }
 0x38a   :  { %v1194_v44 = vadd.f32 %v1131_v40, %v339_v49  ;;  %v1195_v52 = vadd.f32 %v1151_v43, %v368_v15  ;;  %v7925_v49 = vld [vmem:[#allocation62_spill] sm:$0xff] }
 0x38c   :  { %v3598_v46 = vmul.f32 -1.442695, %v1194_v44  ;;  %v3599_v36 = vmul.f32 -1.442695, %v1195_v52  ;;  %v7926_v44 = vld [vmem:[#allocation47_spill] sm:$0xff] }
 0x38d   :  { %v397_v15 = vadd.f32 %v7926_v44, %v7925_v49 }
 0x38e   :  { %3994 = vpow2.f32 %v3598_v46 }
 0x38f   :  { %3996 = vpow2.f32 %v3599_v36 }
 0x390   :  { %v1191_v50 = vpop.f32.mrf.mxu3  ;;  %v1171_v38 = vpop.f32.mrf.mxu2 }
 0x391   :  { %v1197_v45 = vadd.f32 %v1191_v50, %v426_v53  ;;  %v1196_v52 = vadd.f32 %v1171_v38, %v397_v15 }
 0x393   :  { %v3600_v37 = vmul.f32 -1.442695, %v1197_v45 }
 0x394   :  { %v3995_v41 = vpop.eup %3994 }
 0x395   :  { %v3997_v34 = vpop.eup %3996  ;;  %v1201_v35 = vadd.f32 1.0, %v3995_v41  ;;  %3998 = vpow2.f32 %v3600_v37 }
 0x396   :  { %v1220_v39 = vadd.f32 1.0, %v3997_v34 }
 0x397   :  { %4000 = vrcp.f32 %v1201_v35  ;;  %v1213_v62 = vand.u32 2147483648, %v1201_v35  ;;  %v1211_v37 = vand.u32 2147483647, %v1201_v35  ;;  %vm1207_vm2 = vweird.f32 %v1201_v35 }
 0x398   :  { %4002 = vrcp.f32 %v1220_v39  ;;  %v1232_v41 = vand.u32 2147483648, %v1220_v39  ;;  %v1230_v33 = vand.u32 2147483647, %v1220_v39  ;;  %vm1226_vm3 = vweird.f32 %v1220_v39 }
 0x399   :  { %v1214_v38 = vor.u32 1.1754944e-38, %v1213_v62  ;;  %vm1212_vm6 = vcmp.eq.f32.partialorder %v1211_v37, 8.507059e+37 }
 0x39a   :  { %vm1231_vm7 = vcmp.eq.f32.partialorder %v1230_v33, 8.507059e+37 }
 0x39b   :  { %v3999_v40 = vpop.eup %3998 }
 0x39c   :  { %v1240_v46 = vadd.f32 1.0, %v3999_v40 }
 0x39d   :  { %v4001_v43 = vpop.eup %4000 }
 0x39e   :  { %v4003_v47 = vpop.eup %4002  ;;  %v1203_v36 = vmul.f32 %v4001_v43, %v1201_v35  ;;  %4004 = vrcp.f32 %v1240_v46  ;;  %vm1208_vm0 = vweird.f32 %v4001_v43  ;;  %vm1246_vm9 = vweird.f32 %v1240_v46 }
 0x39f   :  { %v1222_v50 = vmul.f32 %v4003_v47, %v1220_v39  ;;  %4006 = vtanh.f32 %v1196_v52  ;;  %vm1227_vm1 = vweird.f32 %v4003_v47  ;;  %vm1209_vm4 = vmor %vm1207_vm2, %vm1208_vm0  ;;  %v1250_v62 = vand.u32 2147483647, %v1240_v46 }
 0x3a0   :  { %v1204_v45 = vsub.f32 1.0, %v1203_v36  ;;  %vm1228_vm5 = vmor %vm1226_vm3, %vm1227_vm1  ;;  %v1233_v36 = vor.u32 1.1754944e-38, %v1232_v41 }
 0x3a1   :  { %v1223_v53 = vsub.f32 1.0, %v1222_v50  ;;  %vm1251_vm11 = vcmp.eq.f32.partialorder %v1250_v62, 8.507059e+37 }
 0x3a2   :  { %v1205_v34 = vmul.f32 %v4001_v43, %v1204_v45 }
 0x3a3   :  { %v1224_v58 = vmul.f32 %v4003_v47, %v1223_v53 }
 0x3a4   :  { %v4005_v12 = vpop.eup %4004  ;;  %v1206_v44 = vadd.f32 %v4001_v43, %v1205_v34 }
 0x3a5   :  { %v1225_v40 = vadd.f32 %v4003_v47, %v1224_v58  ;;  %v1242_v15 = vmul.f32 %v4005_v12, %v1240_v46  ;;  %v4007_v52 = vpop.eup %4006  ;;  %vm1247_vm8 = vweird.f32 %v4005_v12  ;;  %v1252_v58 = vand.u32 2147483648, %v1240_v46 }
 0x3a6   :  { %v1210_v50 = vsel %vm1209_vm4, %v4001_v43, %v1206_v44  ;;  %vm1248_vm10 = vmor %vm1246_vm9, %vm1247_vm8 }
 0x3a7   :  { %v1215_v49 = vsel %vm1212_vm6, %v1214_v38, %v1210_v50  ;;  %v1229_v45 = vsel %vm1228_vm5, %v4003_v47, %v1225_v40  ;;  %v1243_v8 = vsub.f32 1.0, %v1242_v15  ;;  %v1253_v41 = vor.u32 1.1754944e-38, %v1252_v58  ;;  %v7959_v50 = vld [vmem:[#allocation62_spill] sm:$0xff] }
 0x3a8   :  { %v1234_v53 = vsel %vm1231_vm7, %v1233_v36, %v1229_v45  ;;  %v1258_v42 = vmul.f32 %v4007_v52, %v1215_v49  ;;  %v7960_v52 = vld [vmem:[#allocation52_spill] sm:$0xff] }
 0x3a9   :  { %v1257_v29 = vmul.f32 %v1234_v53, %v5702_v51  ;;  %v1244_v34 = vmul.f32 %v4005_v12, %v1243_v8  ;;  %v7957_v51 = vld [vmem:[#allocation60_spill] sm:$0xff]  ;;  %v399_v45 = vadd.f32 %v7960_v52, %v7959_v50 }
 0x3ab   :  { %v5784_v35 = vadd.f32 %v1258_v42, %v1257_v29  ;;  %v1245_v39 = vadd.f32 %v4005_v12, %v1244_v34  ;;  %v7958_v29 = vld [vmem:[#allocation49_spill] sm:$0xff] }
 0x3ac   :  { %v428_v42 = vadd.f32 %v7958_v29, %v7957_v51 }
 0x3ad   :  { %4008 = vtanh.f32 %v5784_v35  ;;  %v1249_v43 = vsel %vm1248_vm10, %v4005_v12, %v1245_v39 }
 0x3ae   :  { %v1254_v47 = vsel %vm1251_vm11, %v1253_v41, %v1249_v43 }
 0x3b3   :  { %v4009_v33 = vpop.eup %4008 }
 0x3b4   :  { %v5787_v37 = vmul.f32 %v4009_v33, %v1254_v47 }
 0x3b6   :  { %1290 = vmatmul.f32.vlgmr.msra.gmra.mxu0 %v5787_v37  ;;  %1310 = vmatmul.f32.vlgmr.msra.gmra.mxu1 %v5787_v37 }
 0x3b7   :  { %1330 = vmatmul.f32.vlgmr.msra.gmra.mxu2 %v5787_v37  ;;  %1350 = vmatmul.f32.vlgmr.msra.gmra.mxu3 %v5787_v37 }
 0x3b8   :  { %1594 = vmatpush.msra.mxu0 %v5230_v25  ;;  %1614 = vmatpush.msra.mxu1 %v5236_v31  ;;  %v7927_v25 = vld [vmem:[#allocation10_spill] sm:$0xff]  ;;  %v7929_v31 = vld [vmem:[#allocation15_spill] sm:$0xff] }
 0x3b9   :  { %1634 = vmatpush.msra.mxu2 %v5242_v20  ;;  %1654 = vmatpush.msra.mxu3 %v5248_v26  ;;  %v7930_v20 = vld [vmem:[#allocation12_spill] sm:$0xff]  ;;  %v7931_v26 = vld [vmem:[#allocation14_spill] sm:$0xff] }
 0x3ba   :  { %1595 = vmatpush.msra.mxu0 %v5254_v13  ;;  %1615 = vmatpush.msra.mxu1 %v5260_v60  ;;  %v7932_v13 = vld [vmem:[#allocation21_spill] sm:$0xff]  ;;  %v7933_v60 = vld [vmem:[#allocation19_spill] sm:$0xff] }
 0x3bb   :  { %1635 = vmatpush.msra.mxu2 %v5266_v21  ;;  %1655 = vmatpush.msra.mxu3 %v5272_v11  ;;  %v7934_v21 = vld [vmem:[#allocation16_spill] sm:$0xff]  ;;  %v7935_v11 = vld [vmem:[#allocation18_spill] sm:$0xff] }
 0x3bc   :  { %1596 = vmatpush.msra.mxu0 %v5278_v24  ;;  %1616 = vmatpush.msra.mxu1 %v5284_v30  ;;  %v7936_v24 = vld [vmem:[#allocation24_spill] sm:$0xff]  ;;  %v7937_v30 = vld [vmem:[#allocation23_spill] sm:$0xff] }
 0x3bd   :  { %1636 = vmatpush.msra.mxu2 %v5290_v16  ;;  %1656 = vmatpush.msra.mxu3 %v5296_v61  ;;  %v7938_v16 = vld [vmem:[#allocation20_spill] sm:$0xff]  ;;  %v7939_v61 = vld [vmem:[#allocation22_spill] sm:$0xff] }
 0x3be   :  { %1597 = vmatpush.msra.mxu0 %v5302_v7  ;;  %1617 = vmatpush.msra.mxu1 %v5308_v9  ;;  %v7940_v7 = vld [vmem:[#allocation27_spill] sm:$0xff]  ;;  %v7941_v9 = vld [vmem:[#allocation28_spill] sm:$0xff] }
 0x3bf   :  { %1637 = vmatpush.msra.mxu2 %v5314_v10  ;;  %1657 = vmatpush.msra.mxu3 %v5320_v22  ;;  %v7942_v10 = vld [vmem:[#allocation25_spill] sm:$0xff]  ;;  %v7943_v22 = vld [vmem:[#allocation26_spill] sm:$0xff] }
 0x3c0   :  { %1598 = vmatpush.msra.mxu0 %v5326_v19  ;;  %1618 = vmatpush.msra.mxu1 %v5332_v14  ;;  %v7944_v19 = vld [vmem:[#allocation29_spill] sm:$0xff]  ;;  %v7945_v14 = vld [vmem:[#allocation30_spill] sm:$0xff] }
 0x3c1   :  { %1638 = vmatpush.msra.mxu2 %v5338_v27  ;;  %1658 = vmatpush.msra.mxu3 %v5344_v59  ;;  %v7946_v27 = vld [vmem:[#allocation31_spill] sm:$0xff]  ;;  %v7947_v59 = vld [vmem:[#allocation32_spill] sm:$0xff] }
 0x3c2   :  { %1599 = vmatpush.msra.mxu0 %v5350_v28  ;;  %1619 = vmatpush.msra.mxu1 %v7858_v17  ;;  %v7948_v28 = vld [vmem:[#allocation34_spill] sm:$0xff]  ;;  %v7953_v17 = vld [vmem:[#allocation56_spill] sm:$0xff] }
 0x3c3   :  { %1639 = vmatpush.msra.mxu2 %v5362_v0  ;;  %1659 = vmatpush.msra.mxu3 %v7859_v48  ;;  %v7950_v0 = vld [vmem:[#allocation35_spill] sm:$0xff]  ;;  %v7954_v48 = vld [vmem:[#allocation46_spill] sm:$0xff] }
 0x3c4   :  { %1600 = vmatpush.msra.mxu0 %v7860_v54  ;;  %1620 = vmatpush.msra.mxu1 %v7861_v55  ;;  %v341_v54 = vadd.f32 %v7954_v48, %v7953_v17  ;;  %v7955_v55 = vld [vmem:[#allocation57_spill] sm:$0xff] }
 0x3c5   :  { %1640 = vmatpush.msra.mxu2 %v5488_v56  ;;  %1660 = vmatpush.msra.mxu3 %v5387_v23  ;;  %v7951_v23 = vld [vmem:[#allocation36_spill] sm:$0xff] }
 0x3c6   :  { %1601 = vmatpush.msra.mxu0 %v5393_v32  ;;  %1621 = vmatpush.msra.mxu1 %v5399_v18  ;;  %v7928_v32 = vld [vmem:[#allocation17_spill] sm:$0xff]  ;;  %v7956_v56 = vld [vmem:[#allocation48_spill] sm:$0xff] }
 0x3c7   :  { %1641 = vmatpush.msra.mxu2 %v5497_v57  ;;  %1661 = vmatpush.msra.mxu3 %v5503_v1  ;;  %v7949_v18 = vld [vmem:[#allocation33_spill] sm:$0xff]  ;;  %v370_v57 = vadd.f32 %v7956_v56, %v7955_v55 }
 0x3c8   :  { %1602 = vmatpush.msra.mxu0 %v5407_v63  ;;  %1622 = vmatpush.msra.mxu1 %v5510_v2  ;;  %v7952_v63 = vld [vmem:[#allocation38_spill] sm:$0xff] }
 0x3c9   :  { %1642 = vmatpush.msra.mxu2 %v5516_v3  ;;  %1662 = vmatpush.msra.mxu3 %v5522_v4 }
 0x3ca   :  { %1603 = vmatpush.msra.mxu0 %v5528_v5  ;;  %1623 = vmatpush.msra.mxu1 %v5534_v6 }
 0x3cb   :  { %1643 = vmatpush.msra.mxu2 %v7927_v25  ;;  %1663 = vmatpush.msra.mxu3 %v7928_v32 }
 0x3cc   :  { %1604 = vmatpush.msra.mxu0 %v7929_v31  ;;  %1624 = vmatpush.msra.mxu1 %v7930_v20 }
 0x3cd   :  { %1644 = vmatpush.msra.mxu2 %v7931_v26  ;;  %1664 = vmatpush.msra.mxu3 %v7932_v13 }
 0x3ce   :  { %1605 = vmatpush.msra.mxu0 %v7933_v60  ;;  %1625 = vmatpush.msra.mxu1 %v7934_v21 }
 0x3cf   :  { %1645 = vmatpush.msra.mxu2 %v7935_v11  ;;  %1665 = vmatpush.msra.mxu3 %v7936_v24 }
 0x3d0   :  { %1606 = vmatpush.msra.mxu0 %v7937_v30  ;;  %1626 = vmatpush.msra.mxu1 %v7938_v16 }
 0x3d1   :  { %1646 = vmatpush.msra.mxu2 %v7939_v61  ;;  %1666 = vmatpush.msra.mxu3 %v7940_v7 }
 0x3d2   :  { %1607 = vmatpush.msra.mxu0 %v7941_v9  ;;  %1627 = vmatpush.msra.mxu1 %v7942_v10 }
 0x3d3   :  { %1647 = vmatpush.msra.mxu2 %v7943_v22  ;;  %1667 = vmatpush.msra.mxu3 %v7944_v19 }
 0x3d4   :  { %1608 = vmatpush.msra.mxu0 %v7945_v14  ;;  %1628 = vmatpush.msra.mxu1 %v7946_v27 }
 0x3d5   :  { %1648 = vmatpush.msra.mxu2 %v7947_v59  ;;  %1668 = vmatpush.msra.mxu3 %v7948_v28 }
 0x3d6   :  { %1609 = vmatpush.msra.mxu0 %v7949_v18  ;;  %1629 = vmatpush.msra.mxu1 %v7950_v0 }
 0x3d7   :  { %1649 = vmatpush.msra.mxu2 %v7951_v23  ;;  %1669 = vmatpush.msra.mxu3 %v7952_v63 }
 0x433   :  { %v1291_v1 = vpop.f32.mrf.mxu0  ;;  %v1311_v2 = vpop.f32.mrf.mxu1 }
 0x434   :  { %v1354_v3 = vadd.f32 %v1291_v1, %v341_v54  ;;  %v1355_v4 = vadd.f32 %v1311_v2, %v370_v57  ;;  %v3927_v57 = vld [vmem:[%s7490_s1 + $0x1ec] sm:$0xf0]  ;;  %v3925_v1 = vld [vmem:[%s7490_s1 + $0x1e4] sm:$0xf] }
 0x436   :  { %v3601_v5 = vmul.f32 -1.442695, %v1354_v3  ;;  %v3602_v6 = vmul.f32 -1.442695, %v1355_v4  ;;  %v3823_v3 = vld [vmem:[%s7490_s1 + $0x1f0] sm:$0xf0] }
 0x437   :  { %v3829_v4 = vld [vmem:[%s7490_s1 + $0x1e8] sm:$0xf] }
 0x438   :  { %4010 = vpow2.f32 %v3601_v5  ;;  %v3928_v5 = vld [vmem:[%s7490_s1 + $0x1f4] sm:$0xf0] }
 0x439   :  { %4012 = vpow2.f32 %v3602_v6  ;;  %v3826_v6 = vor.u32 %v3925_v1, %v3823_v3  ;;  %v3830_v29 = vor.u32 %v3928_v5, %v3829_v4  ;;  %v3911_v1 = vld [vmem:[%s7490_s1 + $0x16c] sm:$0xf0]  ;;  %v3759_v4 = vld [vmem:[%s7490_s1 + $0x170] sm:$0xf0]  ;;  %v3765_v5 = vld [vmem:[%s7490_s1 + $0x168] sm:$0xf] }
 0x43a   :  { %v1351_v8 = vpop.f32.mrf.mxu3  ;;  %v1331_v15 = vpop.f32.mrf.mxu2 }
 0x43b   :  { %v1357_v12 = vadd.f32 %v1351_v8, %v428_v42  ;;  %v1356_v39 = vadd.f32 %v1331_v15, %v399_v45  ;;  %v3926_v42 = vld [vmem:[%s7490_s1 + $0x1ec] sm:$0xf]  ;;  %v3831_v8 = vld [vmem:[%s7490_s1 + $0x1f8] sm:$0xf0]  ;;  %v3813_v15 = vld [vmem:[%s7490_s1 + $0x1c8] sm:$0xf] }
 0x43d   :  { %v3603_v49 = vmul.f32 -1.442695, %v1357_v12  ;;  %v3834_v12 = vor.u32 %v3926_v42, %v3831_v8 }
 0x43e   :  { %v4011_v46 = vpop.eup %4010 }
 0x43f   :  { %v4013_v44 = vpop.eup %4012  ;;  %v1361_v38 = vadd.f32 1.0, %v4011_v46  ;;  %4014 = vpow2.f32 %v3603_v49  ;;  %v3805_v49 = vld [vmem:[%s7490_s1 + $0x1c0] sm:$0xf]  ;;  %v3923_v46 = vld [vmem:[%s7490_s1 + $0x1cc] sm:$0xf0] }
 0x440   :  { %v1380_v40 = vadd.f32 1.0, %v4013_v44  ;;  %v3921_v44 = vld [vmem:[%s7490_s1 + $0x1c4] sm:$0xf] }
 0x441   :  { %4016 = vrcp.f32 %v1361_v38  ;;  %v1373_v47 = vand.u32 2147483648, %v1361_v38  ;;  %v1371_v31 = vand.u32 2147483647, %v1361_v38  ;;  %vm1367_vm14 = vweird.f32 %v1361_v38 }
 0x442   :  { %4018 = vrcp.f32 %v1380_v40  ;;  %v1392_v25 = vand.u32 2147483648, %v1380_v40  ;;  %v1390_v26 = vand.u32 2147483647, %v1380_v40  ;;  %vm1386_vm15 = vweird.f32 %v1380_v40 }
 0x443   :  { %v1374_v21 = vor.u32 1.1754944e-38, %v1373_v47  ;;  %vm1372_vm2 = vcmp.eq.f32.partialorder %v1371_v31, 8.507059e+37  ;;  %v3797_v47 = vld [vmem:[%s7490_s1 + $0x1a8] sm:$0xf] }
 0x444   :  { %v1393_v30 = vor.u32 1.1754944e-38, %v1392_v25  ;;  %vm1391_vm3 = vcmp.eq.f32.partialorder %v1390_v26, 8.507059e+37  ;;  %v3920_v25 = vld [vmem:[%s7490_s1 + $0x1b4] sm:$0xf0]  ;;  %v3799_v26 = vld [vmem:[%s7490_s1 + $0x1b8] sm:$0xf0] }
 0x445   :  { %v4015_v36 = vpop.eup %4014  ;;  %v3798_v31 = vor.u32 %v3920_v25, %v3797_v47 }
 0x446   :  { %v1400_v53 = vadd.f32 1.0, %v4015_v36  ;;  %v3924_v36 = vld [vmem:[%s7490_s1 + $0x1d4] sm:$0xf0] }
 0x447   :  { %v4017_v34 = vpop.eup %4016  ;;  %v3814_v45 = vor.u32 %v3924_v36, %v3813_v15  ;;  %v3907_v15 = vld [vmem:[%s7490_s1 + $0x14c] sm:$0xf0]  ;;  %v3905_v36 = vld [vmem:[%s7490_s1 + $0x144] sm:$0xf] }
 0x448   :  { %v4019_v58 = vpop.eup %4018  ;;  %v1363_v62 = vmul.f32 %v4017_v34, %v1361_v38  ;;  %4020 = vrcp.f32 %v1400_v53  ;;  %vm1368_vm12 = vweird.f32 %v4017_v34  ;;  %v1412_v18 = vand.u32 2147483648, %v1400_v53 }
 0x449   :  { %v1382_v43 = vmul.f32 %v4019_v58, %v1380_v40  ;;  %4022 = vtanh.f32 %v1356_v39  ;;  %vm1387_vm13 = vweird.f32 %v4019_v58  ;;  %vm1369_vm0 = vmor %vm1367_vm14, %vm1368_vm12  ;;  %vm1406_vm5 = vweird.f32 %v1400_v53  ;;  %v3807_v40 = vld [vmem:[%s7490_s1 + $0x1d0] sm:$0xf0] }
 0x44a   :  { %v1364_v41 = vsub.f32 1.0, %v1363_v62  ;;  %vm1388_vm1 = vmor %vm1386_vm15, %vm1387_vm13  ;;  %v1410_v0 = vand.u32 2147483647, %v1400_v53  ;;  %v1413_v63 = vor.u32 1.1754944e-38, %v1412_v18  ;;  %v3806_v38 = vor.u32 %v3923_v46, %v3805_v49  ;;  %v3919_v62 = vld [vmem:[%s7490_s1 + $0x1ac] sm:$0xf0] }
 0x44b   :  { %v1383_v33 = vsub.f32 1.0, %v1382_v43  ;;  %v3810_v52 = vor.u32 %v3921_v44, %v3807_v40  ;;  %v3917_v43 = vld [vmem:[%s7490_s1 + $0x1a4] sm:$0xf]  ;;  %v3910_v49 = vld [vmem:[%s7490_s1 + $0x16c] sm:$0xf] }
 0x44c   :  { %v1365_v32 = vmul.f32 %v4017_v34, %v1364_v41  ;;  %vm1411_vm7 = vcmp.eq.f32.partialorder %v1410_v0, 8.507059e+37  ;;  %v3767_v46 = vld [vmem:[%s7490_s1 + $0x178] sm:$0xf0]  ;;  %v3741_v44 = vld [vmem:[%s7490_s1 + $0x140] sm:$0xf] }
 0x44d   :  { %v1384_v20 = vmul.f32 %v4019_v58, %v1383_v33  ;;  %v3791_v33 = vld [vmem:[%s7490_s1 + $0x1b0] sm:$0xf0]  ;;  %v3770_v40 = vor.u32 %v3910_v49, %v3767_v46 }
 0x44e   :  { %v4021_v13 = vpop.eup %4020  ;;  %v1366_v60 = vadd.f32 %v4017_v34, %v1365_v32  ;;  %v3794_v32 = vor.u32 %v3917_v43, %v3791_v33 }
 0x44f   :  { %v1385_v11 = vadd.f32 %v4019_v58, %v1384_v20  ;;  %v1402_v24 = vmul.f32 %v4021_v13, %v1400_v53  ;;  %v4023_v61 = vpop.eup %4022  ;;  %vm1407_vm4 = vweird.f32 %v4021_v13  ;;  %v3922_v53 = vld [vmem:[%s7490_s1 + $0x1cc] sm:$0xf] }
 0x450   :  { %v1370_v16 = vsel %vm1369_vm0, %v4017_v34, %v1366_v60  ;;  %vm1408_vm6 = vmor %vm1406_vm5, %vm1407_vm4  ;;  %v3815_v34 = vld [vmem:[%s7490_s1 + $0x1d8] sm:$0xf0]  ;;  %v3918_v20 = vld [vmem:[%s7490_s1 + $0x1ac] sm:$0xf] }
 0x451   :  { %v1375_v7 = vsel %vm1372_vm2, %v1374_v21, %v1370_v16  ;;  %v1389_v9 = vsel %vm1388_vm1, %v4019_v58, %v1385_v11  ;;  %v1403_v10 = vsub.f32 1.0, %v1402_v24  ;;  %v3818_v39 = vor.u32 %v3922_v53, %v3815_v34  ;;  %v3789_v58 = vld [vmem:[%s7490_s1 + $0x1a0] sm:$0xf]  ;;  %v7962_v21 = vld [vmem:[#allocation51_spill] sm:$0xff] }
 0x452   :  { %v1394_v22 = vsel %vm1391_vm3, %v1393_v30, %v1389_v9  ;;  %v1418_v19 = vmul.f32 %v4023_v61, %v1375_v7  ;;  %v3790_v41 = vor.u32 %v3919_v62, %v3789_v58  ;;  %v373_v11 = vadd.f32 %v7962_v21, %v7955_v55  ;;  %v3773_v61 = vld [vmem:[%s7490_s1 + $0x180] sm:$0xf]  ;;  %v3915_v7 = vld [vmem:[%s7490_s1 + $0x18c] sm:$0xf0]  ;;  %v3913_v9 = vld [vmem:[%s7490_s1 + $0x184] sm:$0xf] }
 0x453   :  { %v1417_v14 = vmul.f32 %v1394_v22, %v5784_v35  ;;  %v1404_v27 = vmul.f32 %v4021_v13, %v1403_v10  ;;  %v3821_v35 = vld [vmem:[%s7490_s1 + $0x1e0] sm:$0xf]  ;;  %v3802_v24 = vor.u32 %v3918_v20, %v3799_v26  ;;  %v3742_v53 = vor.u32 %v3907_v15, %v3741_v44  ;;  %v3749_v34 = vld [vmem:[%s7490_s1 + $0x148] sm:$0xf]  ;;  %v3906_v58 = vld [vmem:[%s7490_s1 + $0x14c] sm:$0xf] }
 0x454   :  { %v3822_v2 = vor.u32 %v3927_v57, %v3821_v35  ;;  %v3757_v57 = vld [vmem:[%s7490_s1 + $0x160] sm:$0xf]  ;;  %v3903_v26 = vld [vmem:[%s7490_s1 + $0x12c] sm:$0xf0]  ;;  %v3901_v21 = vld [vmem:[%s7490_s1 + $0x124] sm:$0xf] }
 0x455   :  { %v5866_v59 = vadd.f32 %v1418_v19, %v1417_v14  ;;  %v1405_v28 = vadd.f32 %v4021_v13, %v1404_v27  ;;  %v3774_v19 = vor.u32 %v3915_v7, %v3773_v61  ;;  %v3775_v14 = vld [vmem:[%s7490_s1 + $0x190] sm:$0xf0]  ;;  %v3781_v27 = vld [vmem:[%s7490_s1 + $0x188] sm:$0xf]  ;;  %v3758_v3 = vor.u32 %v3911_v1, %v3757_v57  ;;  %v3725_v20 = vld [vmem:[%s7490_s1 + $0x120] sm:$0xf] }
 0x456   :  { %v3778_v18 = vor.u32 %v3913_v9, %v3775_v14  ;;  %v3902_v7 = vld [vmem:[%s7490_s1 + $0x12c] sm:$0xf]  ;;  %v3735_v9 = vld [vmem:[%s7490_s1 + $0x138] sm:$0xf0]  ;;  %v3899_v14 = vld [vmem:[%s7490_s1 + $0x10c] sm:$0xf0] }
 0x457   :  { %4024 = vtanh.f32 %v5866_v59  ;;  %v1409_v23 = vsel %vm1408_vm6, %v4021_v13, %v1405_v28  ;;  %v7961_v13 = vld [vmem:[#allocation50_spill] sm:$0xff]  ;;  %v3916_v28 = vld [vmem:[%s7490_s1 + $0x194] sm:$0xf0] }
 0x458   :  { %v1414_v54 = vsel %vm1411_vm7, %v1413_v63, %v1409_v23  ;;  %v344_v60 = vadd.f32 %v7961_v13, %v7953_v17  ;;  %v3782_v0 = vor.u32 %v3916_v28, %v3781_v27  ;;  %v3914_v23 = vld [vmem:[%s7490_s1 + $0x18c] sm:$0xf]  ;;  %v3783_v63 = vld [vmem:[%s7490_s1 + $0x198] sm:$0xf0]  ;;  %v7964_v28 = vld [vmem:[#allocation58_spill] sm:$0xff] }
 0x459   :  { %v3786_v35 = vor.u32 %v3914_v23, %v3783_v63  ;;  %v3897_v23 = vld [vmem:[%s7490_s1 + $0x104] sm:$0xf]  ;;  %v3711_v63 = vld [vmem:[%s7490_s1 + $0x110] sm:$0xf0]  ;;  %v3900_v57 = vld [vmem:[%s7490_s1 + $0x114] sm:$0xf0] }
 0x45d   :  { %v4025_v48 = vpop.eup %4024 }
 0x45e   :  { %v5869_v56 = vmul.f32 %v4025_v48, %v1414_v54 }
 0x460   :  { %1450 = vmatmul.f32.vlgmr.msrb.gmra.mxu0 %v5869_v56  ;;  %1470 = vmatmul.f32.vlgmr.msrb.gmra.mxu1 %v5869_v56 }
 0x461   :  { %1490 = vmatmul.f32.vlgmr.msrb.gmra.mxu2 %v5869_v56  ;;  %1510 = vmatmul.f32.vlgmr.msrb.gmra.mxu3 %v5869_v56 }
 0x462   :  { %2033 = vmatpush.bf16.msrb.mxu0 %v3822_v2  ;;  %2062 = vmatpush.bf16.msrb.mxu1 %v3826_v6  ;;  %v3909_v2 = vld [vmem:[%s7490_s1 + $0x164] sm:$0xf]  ;;  %v3912_v6 = vld [vmem:[%s7490_s1 + $0x174] sm:$0xf0] }
 0x463   :  { %2091 = vmatpush.bf16.msrb.mxu2 %v3830_v29  ;;  %2120 = vmatpush.bf16.msrb.mxu3 %v3834_v12  ;;  %v7963_v29 = vld [vmem:[#allocation53_spill] sm:$0xff]  ;;  %v3762_v8 = vor.u32 %v3909_v2, %v3759_v4  ;;  %v3766_v12 = vor.u32 %v3912_v6, %v3765_v5  ;;  %v3898_v4 = vld [vmem:[%s7490_s1 + $0x10c] sm:$0xf] }
 0x464   :  { %v431_v42 = vadd.f32 %v7963_v29, %v7957_v51  ;;  %v3719_v5 = vld [vmem:[%s7490_s1 + $0x118] sm:$0xf0] }
 0x466   :  { %2034 = vmatpush.bf16.msrb.mxu0 %v3806_v38  ;;  %2063 = vmatpush.bf16.msrb.mxu1 %v3810_v52  ;;  %v3743_v52 = vld [vmem:[%s7490_s1 + $0x150] sm:$0xf0] }
 0x467   :  { %2092 = vmatpush.bf16.msrb.mxu2 %v3814_v45  ;;  %2121 = vmatpush.bf16.msrb.mxu3 %v3818_v39  ;;  %v3908_v39 = vld [vmem:[%s7490_s1 + $0x154] sm:$0xf0]  ;;  %v3746_v62 = vor.u32 %v3905_v36, %v3743_v52 }
 0x468   :  { %v3750_v43 = vor.u32 %v3908_v39, %v3749_v34 }
 0x46a   :  { %2035 = vmatpush.bf16.msrb.mxu0 %v3790_v41  ;;  %2064 = vmatpush.bf16.msrb.mxu1 %v3794_v32  ;;  %v3751_v41 = vld [vmem:[%s7490_s1 + $0x158] sm:$0xf0] }
 0x46b   :  { %2093 = vmatpush.bf16.msrb.mxu2 %v3798_v31  ;;  %2122 = vmatpush.bf16.msrb.mxu3 %v3802_v24  ;;  %v3754_v47 = vor.u32 %v3906_v58, %v3751_v41  ;;  %v3733_v24 = vld [vmem:[%s7490_s1 + $0x128] sm:$0xf] }
 0x46e   :  { %2036 = vmatpush.bf16.msrb.mxu0 %v3774_v19  ;;  %2065 = vmatpush.bf16.msrb.mxu1 %v3778_v18  ;;  %v3709_v19 = vld [vmem:[%s7490_s1 + $0x100] sm:$0xf]  ;;  %v402_v18 = vadd.f32 %v7964_v28, %v7959_v50  ;;  %v1829_v28 = vpack.c.bf16 %v5869_v56, %v5787_v37 }
 0x46f   :  { %2094 = vmatpush.bf16.msrb.mxu2 %v3782_v0  ;;  %2123 = vmatpush.bf16.msrb.mxu3 %v3786_v35  ;;  %v3710_v0 = vor.u32 %v3899_v14, %v3709_v19  ;;  %v3714_v35 = vor.u32 %v3897_v23, %v3711_v63  ;;  %v7967_v19 = vld [vmem:[#allocation9_spill] sm:$0xff]  ;;  %v7969_v37 = vld [vmem:[#allocation54_spill] sm:$0xff]  ;;  %v7970_v63 = vld [vmem:[#allocation55_spill] sm:$0xff] }
 0x470   :  { %v7968_v14 = vld [vmem:[#allocation37_spill] sm:$0xff]  ;;  %v346_v56 = vadd.f32 %v7969_v37, %v7953_v17  ;;  %v6153_v17 = vld [vmem:[%s7492_s2 + $0x3d0] sm:$0xff] }
 0x471   :  { %v6130_v23 = vld [vmem:[%s7492_s2 + $0x3f8] sm:$0xff] }
 0x472   :  { %2037 = vmatpush.bf16.msrb.mxu0 %v3758_v3  ;;  %2066 = vmatpush.bf16.msrb.mxu1 %v3762_v8  ;;  %v7975_v37 = vld [vmem:[#allocation61_spill] sm:$0xff] }
 0x473   :  { %2095 = vmatpush.bf16.msrb.mxu2 %v3766_v12  ;;  %2124 = vmatpush.bf16.msrb.mxu3 %v3770_v40  ;;  %v3722_v12 = vor.u32 %v3898_v4, %v3719_v5  ;;  %v6160_v5 = vld [vmem:[%s7492_s2 + $0x3a0] sm:$0xff] }
 0x476   :  { %2038 = vmatpush.bf16.msrb.mxu0 %v3742_v53  ;;  %2067 = vmatpush.bf16.msrb.mxu1 %v3746_v62 }
 0x477   :  { %2096 = vmatpush.bf16.msrb.mxu2 %v3750_v43  ;;  %2125 = vmatpush.bf16.msrb.mxu3 %v3754_v47 }
 0x4dd   :  { %v1451_v30 = vpop.f32.mrf.mxu0  ;;  %v1471_v16 = vpop.f32.mrf.mxu1 }
 0x4de   :  { %v1514_v10 = vadd.f32 %v1451_v30, %v344_v60  ;;  %v1515_v22 = vadd.f32 %v1471_v16, %v373_v11  ;;  %v3726_v60 = vor.u32 %v3903_v26, %v3725_v20  ;;  %v3727_v11 = vld [vmem:[%s7490_s1 + $0x130] sm:$0xf0]  ;;  %v3904_v30 = vld [vmem:[%s7490_s1 + $0x134] sm:$0xf0] }
 0x4df   :  { %v3730_v16 = vor.u32 %v3901_v21, %v3727_v11  ;;  %v3734_v61 = vor.u32 %v3904_v30, %v3733_v24 }
 0x4e0   :  { %v3604_v48 = vmul.f32 -1.442695, %v1514_v10  ;;  %v3605_v54 = vmul.f32 -1.442695, %v1515_v22  ;;  %2039 = vmatpush.bf16.msrb.mxu0 %v3726_v60  ;;  %v3738_v22 = vor.u32 %v3902_v7, %v3735_v9  ;;  %v7966_v7 = vld [vmem:[#allocation8_spill] sm:$0xff] }
 0x4e1   :  { %2068 = vmatpush.bf16.msrb.mxu1 %v3730_v16  ;;  %2097 = vmatpush.bf16.msrb.mxu2 %v3734_v61 }
 0x4e2   :  { %4026 = vpow2.f32 %v3604_v48  ;;  %v3717_v48 = vld [vmem:[%s7490_s1 + $0x108] sm:$0xf]  ;;  %2126 = vmatpush.bf16.msrb.mxu3 %v3738_v22 }
 0x4e3   :  { %4028 = vpow2.f32 %v3605_v54  ;;  %v3718_v3 = vor.u32 %v3900_v57, %v3717_v48  ;;  %v6109_v22 = vld [vmem:[%s7492_s2 + $0x3e8] sm:$0xff]  ;;  %v375_v48 = vadd.f32 %v7970_v63, %v7955_v55  ;;  %v6358_v63 = vld [vmem:[%s7492_s2 + $0x2b8] sm:$0xff] }
 0x4e4   :  { %v1511_v38 = vpop.f32.mrf.mxu3  ;;  %v1491_v10 = vpop.f32.mrf.mxu2  ;;  %2040 = vmatpush.bf16.msrb.mxu0 %v3710_v0  ;;  %v6125_v0 = vld [vmem:[%s7492_s2 + $0x3c8] sm:$0xff]  ;;  %7976 = vst [vmem:[#allocation11_spill] sm:$0xff] %v6358_v63 }
 0x4e5   :  { %v1517_v45 = vadd.f32 %v1511_v38, %v431_v42  ;;  %v1516_v2 = vadd.f32 %v1491_v10, %v402_v18  ;;  %2069 = vmatpush.bf16.msrb.mxu1 %v3714_v35  ;;  %2098 = vmatpush.bf16.msrb.mxu2 %v3718_v3  ;;  %v6104_v10 = vld [vmem:[%s7492_s2 + $0x3e0] sm:$0xff]  ;;  %v6148_v3 = vld [vmem:[%s7492_s2 + $0x3d8] sm:$0xff] }
 0x4e6   :  { %2127 = vmatpush.bf16.msrb.mxu3 %v3722_v12  ;;  %v6120_v18 = vld [vmem:[%s7492_s2 + $0x3c0] sm:$0xff] }
 0x4e7   :  { %v3606_v33 = vmul.f32 -1.442695, %v1517_v45  ;;  %v6188_v12 = vld [vmem:[%s7492_s2 + $0x360] sm:$0xff] }
 0x4e8   :  { %v4027_v25 = vpop.eup %4026 }
 0x4e9   :  { %v4029_v32 = vpop.eup %4028  ;;  %v6025_v31 = vadd.f32 1.0, %v4027_v25  ;;  %4030 = vpow2.f32 %v3606_v33 }
 0x4ea   :  { %v6033_v13 = vadd.f32 1.0, %v4029_v32 }
 0x4eb   :  { %4032 = vrcp.f32 %v6025_v31  ;;  %v1533_v46 = vand.u32 2147483648, %v6025_v31  ;;  %v1531_v40 = vand.u32 2147483647, %v6025_v31  ;;  %vm1527_vm10 = vweird.f32 %v6025_v31 }
 0x4ec   :  { %4034 = vrcp.f32 %v6033_v13  ;;  %v1552_v44 = vand.u32 2147483648, %v6033_v13  ;;  %v1550_v36 = vand.u32 2147483647, %v6033_v13  ;;  %vm1546_vm11 = vweird.f32 %v6033_v13 }
 0x4ed   :  { %v1534_v53 = vor.u32 1.1754944e-38, %v1533_v46  ;;  %vm1532_vm14 = vcmp.eq.f32.partialorder %v1531_v40, 8.507059e+37  ;;  %v6198_v46 = vld [vmem:[%s7492_s2 + $0x398] sm:$0xff] }
 0x4ee   :  { %v1553_v58 = vor.u32 1.1754944e-38, %v1552_v44  ;;  %vm1551_vm15 = vcmp.eq.f32.partialorder %v1550_v36, 8.507059e+37  ;;  %v7971_v44 = vld [vmem:[#allocation59_spill] sm:$0xff]  ;;  %v6207_v40 = vld [vmem:[%s7492_s2 + $0x378] sm:$0xff]  ;;  %v6213_v36 = vld [vmem:[%s7492_s2 + $0x340] sm:$0xff] }
 0x4ef   :  { %v4031_v27 = vpop.eup %4030 }
 0x4f0   :  { %v1560_v54 = vadd.f32 1.0, %v4031_v27  ;;  %v1828_v27 = vpack.c.bf16 %v7968_v14, %v7967_v19  ;;  %v6344_v14 = vld [vmem:[%s7492_s2 + $0x2a0] sm:$0xff] }
 0x4f1   :  { %v4033_v1 = vpop.eup %4032  ;;  %7973 = vst [vmem:[#allocation7_spill] sm:$0xff] %v6344_v14 }
 0x4f2   :  { %v4035_v6 = vpop.eup %4034  ;;  %v1523_v29 = vmul.f32 %v4033_v1, %v6025_v31  ;;  %4036 = vrcp.f32 %v1560_v54  ;;  %vm1528_vm8 = vweird.f32 %v4033_v1  ;;  %v1572_v60 = vand.u32 2147483648, %v1560_v54 }
 0x4f3   :  { %v1542_v42 = vmul.f32 %v4035_v6, %v6033_v13  ;;  %4038 = vtanh.f32 %v1516_v2  ;;  %vm1547_vm9 = vweird.f32 %v4035_v6  ;;  %vm1529_vm12 = vmor %vm1527_vm10, %vm1528_vm8  ;;  %vm1566_vm1 = vweird.f32 %v1560_v54 }
 0x4f4   :  { %v1524_v8 = vsub.f32 1.0, %v1523_v29  ;;  %vm1548_vm13 = vmor %vm1546_vm11, %vm1547_vm9  ;;  %v1570_v21 = vand.u32 2147483647, %v1560_v54  ;;  %v1573_v24 = vor.u32 1.1754944e-38, %v1572_v60  ;;  %v6172_v29 = vld [vmem:[%s7492_s2 + $0x380] sm:$0xff] }
 0x4f5   :  { %v1543_v49 = vsub.f32 1.0, %v1542_v42  ;;  %v6177_v42 = vld [vmem:[%s7492_s2 + $0x388] sm:$0xff] }
 0x4f6   :  { %v1525_v38 = vmul.f32 %v4033_v1, %v1524_v8  ;;  %vm1571_vm3 = vcmp.eq.f32.partialorder %v1570_v21, 8.507059e+37  ;;  %v6182_v8 = vld [vmem:[%s7492_s2 + $0x3b8] sm:$0xff]  ;;  %v6294_v21 = vld [vmem:[%s7492_s2 + $0x2e0] sm:$0xff] }
 0x4f7   :  { %v1544_v15 = vmul.f32 %v4035_v6, %v1543_v49  ;;  %v6193_v49 = vld [vmem:[%s7492_s2 + $0x368] sm:$0xff] }
 0x4f8   :  { %v4037_v52 = vpop.eup %4036  ;;  %v1526_v45 = vadd.f32 %v4033_v1, %v1525_v38  ;;  %v433_v38 = vadd.f32 %v7971_v44, %v7957_v51  ;;  %v6218_v51 = vld [vmem:[%s7492_s2 + $0x348] sm:$0xff] }
 0x4f9   :  { %v1545_v34 = vadd.f32 %v4035_v6, %v1544_v15  ;;  %v1562_v39 = vmul.f32 %v4037_v52, %v1560_v54  ;;  %v4039_v43 = vpop.eup %4038  ;;  %vm1567_vm0 = vweird.f32 %v4037_v52  ;;  %v6142_v54 = vld [vmem:[%s7492_s2 + $0x3f0] sm:$0xff] }
 0x4fa   :  { %v1530_v62 = vsel %vm1529_vm12, %v4033_v1, %v1526_v45  ;;  %vm1568_vm2 = vmor %vm1566_vm1, %vm1567_vm0 }
 0x4fb   :  { %v1535_v41 = vsel %vm1532_vm14, %v1534_v53, %v1530_v62  ;;  %v1549_v33 = vsel %vm1548_vm13, %v4035_v6, %v1545_v34  ;;  %v1563_v47 = vsub.f32 1.0, %v1562_v39  ;;  %v6165_v6 = vld [vmem:[%s7492_s2 + $0x3a8] sm:$0xff]  ;;  %v6230_v53 = vld [vmem:[%s7492_s2 + $0x358] sm:$0xff]  ;;  %v6235_v34 = vld [vmem:[%s7492_s2 + $0x390] sm:$0xff] }
 0x4fc   :  { %v1554_v25 = vsel %vm1551_vm15, %v1553_v58, %v1549_v33  ;;  %v1578_v32 = vmul.f32 %v4039_v43, %v1535_v41  ;;  %v6242_v39 = vld [vmem:[%s7492_s2 + $0x320] sm:$0xff]  ;;  %v6247_v58 = vld [vmem:[%s7492_s2 + $0x328] sm:$0xff]  ;;  %v6254_v43 = vld [vmem:[%s7492_s2 + $0x338] sm:$0xff] }
 0x4fd   :  { %v1577_v20 = vmul.f32 %v1554_v25, %v5866_v59  ;;  %v1564_v31 = vmul.f32 %v4037_v52, %v1563_v47  ;;  %v7965_v59 = vld [vmem:[#allocation63_spill] sm:$0xff]  ;;  %v6259_v41 = vld [vmem:[%s7492_s2 + $0x370] sm:$0xff]  ;;  %v6266_v47 = vld [vmem:[%s7492_s2 + $0x300] sm:$0xff] }
 0x4fe   :  { %v1827_v9 = vpack.c.bf16 %v7966_v7, %v7965_v59  ;;  %v6271_v25 = vld [vmem:[%s7492_s2 + $0x308] sm:$0xff]  ;;  %v6332_v7 = vld [vmem:[%s7492_s2 + $0x2d8] sm:$0xff] }
 0x4ff   :  { %v6090_v26 = vadd.f32 %v1578_v32, %v1577_v20  ;;  %v1565_v13 = vadd.f32 %v4037_v52, %v1564_v31  ;;  %v6280_v31 = vld [vmem:[%s7492_s2 + $0x318] sm:$0xff]  ;;  %v6325_v59 = vld [vmem:[%s7492_s2 + $0x2c8] sm:$0xff]  ;;  %7972 = vst [vmem:[#allocation6_spill] sm:$0xff] %v6332_v7 }
 0x501   :  { %4040 = vtanh.f32 %v6090_v26  ;;  %v1569_v11 = vsel %vm1568_vm2, %v4037_v52, %v1565_v13  ;;  %v6223_v52 = vld [vmem:[%s7492_s2 + $0x3b0] sm:$0xff] }
 0x502   :  { %v1574_v16 = vsel %vm1571_vm3, %v1573_v24, %v1569_v11  ;;  %v6285_v13 = vld [vmem:[%s7492_s2 + $0x350] sm:$0xff]  ;;  %v6299_v11 = vld [vmem:[%s7492_s2 + $0x2e8] sm:$0xff]  ;;  %v6307_v24 = vld [vmem:[%s7492_s2 + $0x2f8] sm:$0xff] }
 0x507   :  { %v4041_v30 = vpop.eup %4040 }
 0x508   :  { %v6093_v61 = vmul.f32 %v4041_v30, %v1574_v16  ;;  %v6312_v30 = vld [vmem:[%s7492_s2 + $0x330] sm:$0xff]  ;;  %v6320_v16 = vld [vmem:[%s7492_s2 + $0x2c0] sm:$0xff] }
 0x50a   :  { %1610 = vmatmul.f32.vlgmr.msra.gmra.mxu0 %v6093_v61  ;;  %1630 = vmatmul.f32.vlgmr.msra.gmra.mxu1 %v6093_v61 }
 0x50b   :  { %1650 = vmatmul.f32.vlgmr.msra.gmra.mxu2 %v6093_v61  ;;  %1670 = vmatmul.f32.vlgmr.msra.gmra.mxu3 %v6093_v61 }
 0x50c   :  { %2186 = vmatpush.msra.mxu0 %v6104_v10  ;;  %2206 = vmatpush.msra.mxu1 %v6109_v22 }
 0x50d   :  { %2246 = vmatpush.msra.mxu3 %v6130_v23  ;;  %2226 = vmatpush.msra.mxu2 %v6142_v54 }
 0x50e   :  { %2187 = vmatpush.msra.mxu0 %v6120_v18  ;;  %2207 = vmatpush.msra.mxu1 %v6125_v0 }
 0x50f   :  { %2247 = vmatpush.msra.mxu3 %v6148_v3  ;;  %2227 = vmatpush.msra.mxu2 %v6153_v17 }
 0x510   :  { %2188 = vmatpush.msra.mxu0 %v6160_v5  ;;  %2208 = vmatpush.msra.mxu1 %v6165_v6 }
 0x511   :  { %2248 = vmatpush.msra.mxu3 %v6182_v8  ;;  %2228 = vmatpush.msra.mxu2 %v6223_v52 }
 0x512   :  { %2041 = vmatmul.bf16.vlgmr.msrb.gmra.mxu0 %v1827_v9  ;;  %2070 = vmatmul.bf16.vlgmr.msrb.gmra.mxu1 %v1827_v9 }
 0x513   :  { %2099 = vmatmul.bf16.vlgmr.msrb.gmra.mxu2 %v1827_v9  ;;  %2128 = vmatmul.bf16.vlgmr.msrb.gmra.mxu3 %v1827_v9  ;;  %v6337_v9 = vld [vmem:[%s7492_s2 + $0x310] sm:$0xff] }
 0x514   :  { %2189 = vmatpush.msra.mxu0 %v6172_v29  ;;  %2209 = vmatpush.msra.mxu1 %v6177_v42 }
 0x515   :  { %2249 = vmatpush.msra.mxu3 %v6198_v46  ;;  %2229 = vmatpush.msra.mxu2 %v6235_v34 }
 0x516   :  { %2190 = vmatpush.msra.mxu0 %v6188_v12  ;;  %2210 = vmatpush.msra.mxu1 %v6193_v49 }
 0x517   :  { %2250 = vmatpush.msra.mxu3 %v6207_v40  ;;  %2230 = vmatpush.msra.mxu2 %v6259_v41 }
 0x518   :  { %2191 = vmatpush.msra.mxu0 %v6213_v36  ;;  %2211 = vmatpush.msra.mxu1 %v6218_v51 }
 0x519   :  { %2251 = vmatpush.msra.mxu3 %v6230_v53  ;;  %2231 = vmatpush.msra.mxu2 %v6285_v13 }
 0x51a   :  { %2192 = vmatpush.msra.mxu0 %v6242_v39  ;;  %2212 = vmatpush.msra.mxu1 %v6247_v58 }
 0x51b   :  { %2252 = vmatpush.msra.mxu3 %v6254_v43  ;;  %2232 = vmatpush.msra.mxu2 %v6312_v30 }
 0x51c   :  { %2193 = vmatpush.msra.mxu0 %v6266_v47  ;;  %2213 = vmatpush.msra.mxu1 %v6271_v25 }
 0x51d   :  { %2253 = vmatpush.msra.mxu3 %v6280_v31  ;;  %2233 = vmatpush.msra.mxu2 %v6337_v9 }
 0x51e   :  { %2194 = vmatpush.msra.mxu0 %v6294_v21  ;;  %2214 = vmatpush.msra.mxu1 %v6299_v11 }
 0x51f   :  { %2254 = vmatpush.msra.mxu3 %v6307_v24 }
 0x520   :  { %2195 = vmatpush.msra.mxu0 %v6320_v16  ;;  %2215 = vmatpush.msra.mxu1 %v6325_v59 }
 0x521   :  { %2255 = vmatpush.msra.mxu3 %v6332_v7 }
 0x522   :  { %2046 = vmatmul.bf16.gmra.mxu0 %v1828_v27  ;;  %2075 = vmatmul.bf16.gmra.mxu1 %v1828_v27 }
 0x523   :  { %2104 = vmatmul.bf16.gmra.mxu2 %v1828_v27  ;;  %2133 = vmatmul.bf16.gmra.mxu3 %v1828_v27  ;;  %v6349_v27 = vld [vmem:[%s7492_s2 + $0x2a8] sm:$0xff] }
 0x524   :  { %7974 = vst [vmem:[#allocation13_spill] sm:$0xff] %v6349_v27  ;;  %2196 = vmatpush.msra.mxu0 %v6344_v14  ;;  %2216 = vmatpush.msra.mxu1 %v6349_v27  ;;  %v6516_v14 = vld [vmem:[%s7492_s2 + $0x218] sm:$0xff] }
 0x525   :  { %2256 = vmatpush.msra.mxu3 %v6358_v63  ;;  %v6478_v63 = vld [vmem:[%s7492_s2 + $0x238] sm:$0xff]  ;;  %7998 = vst [vmem:[#allocation20_spill] sm:$0xff] %v6516_v14 }
 0x526   :  { %7992 = vst [vmem:[#allocation16_spill] sm:$0xff] %v6478_v63 }
 0x532   :  { %2051 = vmatmul.bf16.gmra.mxu0 %v1829_v28  ;;  %2080 = vmatmul.bf16.gmra.mxu1 %v1829_v28 }
 0x533   :  { %2109 = vmatmul.bf16.gmra.mxu2 %v1829_v28  ;;  %2138 = vmatmul.bf16.gmra.mxu3 %v1829_v28 }
 0x587   :  { %v1611_v35 = vpop.f32.mrf.mxu0  ;;  %v1631_v57 = vpop.f32.mrf.mxu1 }
 0x588   :  { %v1674_v1 = vadd.f32 %v1611_v35, %v346_v56  ;;  %v1675_v2 = vadd.f32 %v1631_v57, %v375_v48  ;;  %v404_v56 = vadd.f32 %v7975_v37, %v7959_v50  ;;  %v6363_v48 = vld [vmem:[%s7492_s2 + $0x2f0] sm:$0xff]  ;;  %v6372_v50 = vld [vmem:[%s7492_s2 + $0x280] sm:$0xff]  ;;  %v6377_v57 = vld [vmem:[%s7492_s2 + $0x288] sm:$0xff] }
 0x589   :  { %7977 = vst [vmem:[#allocation39_spill] sm:$0xff] %v6372_v50  ;;  %2234 = vmatpush.msra.mxu2 %v6363_v48  ;;  %2197 = vmatpush.msra.mxu0 %v6372_v50  ;;  %v6434_v37 = vld [vmem:[%s7492_s2 + $0x248] sm:$0xff] }
 0x58a   :  { %v3607_v55 = vmul.f32 -1.442695, %v1674_v1  ;;  %v3608_v4 = vmul.f32 -1.442695, %v1675_v2  ;;  %7978 = vst [vmem:[#allocation40_spill] sm:$0xff] %v6377_v57  ;;  %2217 = vmatpush.msra.mxu1 %v6377_v57 }
 0x58b   :  { %7986 = vst [vmem:[#allocation17_spill] sm:$0xff] %v6434_v37 }
 0x58c   :  { %4042 = vpow2.f32 %v3607_v55  ;;  %v6386_v55 = vld [vmem:[%s7492_s2 + $0x298] sm:$0xff] }
 0x58d   :  { %4044 = vpow2.f32 %v3608_v4  ;;  %7979 = vst [vmem:[#allocation42_spill] sm:$0xff] %v6386_v55  ;;  %v6391_v4 = vld [vmem:[%s7492_s2 + $0x2d0] sm:$0xff]  ;;  %2257 = vmatpush.msra.mxu3 %v6386_v55 }
 0x58e   :  { %v1671_v15 = vpop.f32.mrf.mxu3  ;;  %v1651_v19 = vpop.f32.mrf.mxu2  ;;  %7980 = vst [vmem:[#allocation41_spill] sm:$0xff] %v6391_v4  ;;  %2235 = vmatpush.msra.mxu2 %v6391_v4 }
 0x58f   :  { %v1677_v45 = vadd.f32 %v1671_v15, %v433_v38  ;;  %v1676_v2 = vadd.f32 %v1651_v19, %v404_v56  ;;  %v6403_v15 = vld [vmem:[%s7492_s2 + $0x260] sm:$0xff] }
 0x590   :  { %7981 = vst [vmem:[#allocation43_spill] sm:$0xff] %v6403_v15  ;;  %2198 = vmatpush.msra.mxu0 %v6403_v15 }
 0x591   :  { %v3609_v62 = vmul.f32 -1.442695, %v1677_v45  ;;  %v6408_v45 = vld [vmem:[%s7492_s2 + $0x268] sm:$0xff] }
 0x592   :  { %v4043_v33 = vpop.eup %4042  ;;  %7982 = vst [vmem:[#allocation44_spill] sm:$0xff] %v6408_v45  ;;  %2218 = vmatpush.msra.mxu1 %v6408_v45  ;;  %v6458_v45 = vld [vmem:[%s7492_s2 + $0x228] sm:$0xff] }
 0x593   :  { %v4045_v32 = vpop.eup %4044  ;;  %v6273_v20 = vadd.f32 1.0, %v4043_v33  ;;  %4046 = vpow2.f32 %v3609_v62  ;;  %v6417_v33 = vld [vmem:[%s7492_s2 + $0x2b0] sm:$0xff]  ;;  %7989 = vst [vmem:[#allocation14_spill] sm:$0xff] %v6458_v45 }
 0x594   :  { %v6287_v60 = vadd.f32 1.0, %v4045_v32  ;;  %7983 = vst [vmem:[#allocation45_spill] sm:$0xff] %v6417_v33  ;;  %v6422_v32 = vld [vmem:[%s7492_s2 + $0x278] sm:$0xff]  ;;  %2236 = vmatpush.msra.mxu2 %v6417_v33  ;;  %2219 = vmatpush.msra.mxu1 %v6434_v37  ;;  %v6473_v33 = vld [vmem:[%s7492_s2 + $0x270] sm:$0xff]  ;;  %v6489_v37 = vld [vmem:[%s7492_s2 + $0x200] sm:$0xff] }
 0x595   :  { %4048 = vrcp.f32 %v6273_v20  ;;  %7984 = vst [vmem:[#allocation47_spill] sm:$0xff] %v6422_v32  ;;  %v1693_v57 = vand.u32 2147483648, %v6273_v20  ;;  %2258 = vmatpush.msra.mxu3 %v6422_v32  ;;  %vm1687_vm6 = vweird.f32 %v6273_v20 }
 0x596   :  { %4050 = vrcp.f32 %v6287_v60  ;;  %v1712_v55 = vand.u32 2147483648, %v6287_v60  ;;  %v1710_v32 = vand.u32 2147483647, %v6287_v60  ;;  %7991 = vst [vmem:[#allocation19_spill] sm:$0xff] %v6473_v33  ;;  %vm1706_vm7 = vweird.f32 %v6287_v60  ;;  %2220 = vmatpush.msra.mxu1 %v6458_v45 }
 0x597   :  { %7993 = vst [vmem:[#allocation18_spill] sm:$0xff] %v6489_v37 }
 0x598   :  { %vm1711_vm11 = vcmp.eq.f32.partialorder %v1710_v32, 8.507059e+37  ;;  %v6540_v32 = vld [vmem:[%s7492_s2 + $0x210] sm:$0xff] }
 0x599   :  { %v4047_v28 = vpop.eup %4046  ;;  %8000 = vst [vmem:[#allocation27_spill] sm:$0xff] %v6540_v32 }
 0x59a   :  { %v6365_v35 = vadd.f32 1.0, %v4047_v28  ;;  %v6429_v28 = vld [vmem:[%s7492_s2 + $0x240] sm:$0xff] }
 0x59b   :  { %v6379_v1 = vpop.eup %4048  ;;  %7985 = vst [vmem:[#allocation10_spill] sm:$0xff] %v6429_v28  ;;  %2199 = vmatpush.msra.mxu0 %v6429_v28  ;;  %v6494_v28 = vld [vmem:[%s7492_s2 + $0x208] sm:$0xff] }
 0x59c   :  { %v6393_v44 = vpop.eup %4050  ;;  %v1683_v38 = vmul.f32 %v6379_v1, %v6273_v20  ;;  %4052 = vrcp.f32 %v6365_v35  ;;  %vm1688_vm4 = vweird.f32 %v6379_v1  ;;  %7994 = vst [vmem:[#allocation24_spill] sm:$0xff] %v6494_v28  ;;  %2221 = vmatpush.msra.mxu1 %v6494_v28  ;;  %vm1726_vm13 = vweird.f32 %v6365_v35 }
 0x59d   :  { %v1702_v62 = vmul.f32 %v6393_v44, %v6287_v60  ;;  %4054 = vtanh.f32 %v1676_v2  ;;  %v6453_v2 = vld [vmem:[%s7492_s2 + $0x220] sm:$0xff]  ;;  %vm1707_vm5 = vweird.f32 %v6393_v44  ;;  %vm6499_vm8 = vmor %vm1687_vm6, %vm1688_vm4  ;;  %v6511_v60 = vld [vmem:[%s7492_s2 + $0x250] sm:$0xff] }
 0x59e   :  { %v1684_v19 = vsub.f32 1.0, %v1683_v38  ;;  %v6442_v38 = vld [vmem:[%s7492_s2 + $0x290] sm:$0xff]  ;;  %7988 = vst [vmem:[#allocation12_spill] sm:$0xff] %v6453_v2  ;;  %2200 = vmatpush.msra.mxu0 %v6453_v2  ;;  %vm1708_vm9 = vmor %vm1706_vm7, %vm1707_vm5  ;;  %2361 = vmatpush.msrb.mxu1 %v6109_v22 }
 0x59f   :  { %v1703_v56 = vsub.f32 1.0, %v1702_v62  ;;  %7987 = vst [vmem:[#allocation15_spill] sm:$0xff] %v6442_v38  ;;  %v1691_v62 = vand.u32 2147483647, %v6273_v20  ;;  %2237 = vmatpush.msra.mxu2 %v6442_v38 }
 0x5a0   :  { %v1685_v50 = vmul.f32 %v6379_v1, %v1684_v19  ;;  %v6463_v19 = vld [vmem:[%s7492_s2 + $0x258] sm:$0xff]  ;;  %7997 = vst [vmem:[#allocation23_spill] sm:$0xff] %v6511_v60  ;;  %2201 = vmatpush.msra.mxu0 %v6489_v37  ;;  %2362 = vmatpush.msrb.mxu1 %v6125_v0 }
 0x5a1   :  { %7990 = vst [vmem:[#allocation21_spill] sm:$0xff] %v6463_v19  ;;  %v1704_v15 = vmul.f32 %v6393_v44, %v1703_v56  ;;  %2259 = vmatpush.msra.mxu3 %v6463_v19  ;;  %vm1692_vm10 = vcmp.eq.f32.partialorder %v1691_v62, 8.507059e+37  ;;  %2238 = vmatpush.msra.mxu2 %v6473_v33 }
 0x5a2   :  { %v6480_v27 = vpop.eup %4052  ;;  %v1686_v56 = vadd.f32 %v6379_v1, %v1685_v50  ;;  %v1694_v50 = vor.u32 1.1754944e-38, %v1693_v57  ;;  %v1713_v57 = vor.u32 1.1754944e-38, %v1712_v55  ;;  %v6531_v55 = vld [vmem:[%s7492_s2 + $0x230] sm:$0xff]  ;;  %2341 = vmatpush.msrb.mxu0 %v6104_v10  ;;  %2363 = vmatpush.msrb.mxu1 %v6165_v6 }
 0x5a3   :  { %v1705_v19 = vadd.f32 %v6393_v44, %v1704_v15  ;;  %v1722_v38 = vmul.f32 %v6480_v27, %v6365_v35  ;;  %2260 = vmatpush.msra.mxu3 %v6478_v63  ;;  %v4055_v45 = vpop.eup %4054  ;;  %7999 = vst [vmem:[#allocation22_spill] sm:$0xff] %v6531_v55  ;;  %2239 = vmatpush.msra.mxu2 %v6511_v60  ;;  %vm1727_vm12 = vweird.f32 %v6480_v27 }
 0x5a4   :  { %v1690_v15 = vsel %vm6499_vm8, %v6379_v1, %v1686_v56  ;;  %2342 = vmatpush.msrb.mxu0 %v6120_v18  ;;  %vm1728_vm14 = vmor %vm1726_vm13, %vm1727_vm12  ;;  %2364 = vmatpush.msrb.mxu1 %v6177_v42 }
 0x5a5   :  { %v1695_v2 = vsel %vm1692_vm10, %v1694_v50, %v1690_v15  ;;  %v1709_v4 = vsel %vm1708_vm9, %v6393_v44, %v1705_v19  ;;  %v1723_v7 = vsub.f32 1.0, %v1722_v38  ;;  %2261 = vmatpush.msra.mxu3 %v6516_v14  ;;  %2240 = vmatpush.msra.mxu2 %v6531_v55  ;;  %v8002_v50 = vld [vmem:[#allocation41_spill] sm:$0xff] }
 0x5a6   :  { %v1714_v1 = vsel %vm1711_vm11, %v1713_v57, %v1709_v4  ;;  %v1738_v62 = vmul.f32 %v4055_v45, %v1695_v2  ;;  %v1730_v45 = vand.u32 2147483647, %v6365_v35  ;;  %2343 = vmatpush.msrb.mxu0 %v6160_v5  ;;  %2365 = vmatpush.msrb.mxu1 %v6193_v49  ;;  %v8003_v57 = vld [vmem:[#allocation7_spill] sm:$0xff]  ;;  %v8004_v15 = vld [vmem:[#allocation13_spill] sm:$0xff] }
 0x5a7   :  { %v1737_v56 = vmul.f32 %v1714_v1, %v6090_v26  ;;  %v1724_v44 = vmul.f32 %v6480_v27, %v1723_v7  ;;  %2401 = vmatpush.msrb.mxu3 %v6130_v23  ;;  %2241 = vmatpush.msra.mxu2 %v6540_v32  ;;  %v1732_v7 = vand.u32 2147483648, %v6365_v35  ;;  %v8005_v1 = vld [vmem:[#allocation11_spill] sm:$0xff] }
 0x5a8   :  { %2344 = vmatpush.msrb.mxu0 %v6172_v29  ;;  %vm1731_vm15 = vcmp.eq.f32.partialorder %v1730_v45, 8.507059e+37  ;;  %2366 = vmatpush.msrb.mxu1 %v6218_v51  ;;  %v8012_v45 = vld [vmem:[#allocation44_spill] sm:$0xff] }
 0x5a9   :  { %v1739_v4 = vadd.f32 %v1738_v62, %v1737_v56  ;;  %v1725_v26 = vadd.f32 %v6480_v27, %v1724_v44  ;;  %2381 = vmatpush.msrb.mxu2 %v6142_v54  ;;  %2402 = vmatpush.msrb.mxu3 %v6148_v3  ;;  %v1733_v2 = vor.u32 1.1754944e-38, %v1732_v7  ;;  %v8006_v62 = vld [vmem:[#allocation45_spill] sm:$0xff]  ;;  %v8007_v56 = vld [vmem:[#allocation39_spill] sm:$0xff]  ;;  %v8008_v44 = vld [vmem:[#allocation40_spill] sm:$0xff] }
 0x5aa   :  { %2345 = vmatpush.msrb.mxu0 %v6188_v12  ;;  %2367 = vmatpush.msrb.mxu1 %v6247_v58  ;;  %v8011_v7 = vld [vmem:[#allocation43_spill] sm:$0xff] }
 0x5ab   :  { %4056 = vtanh.f32 %v1739_v4  ;;  %1749 = vst [vmem:[%s7494_s5] sm:$0xff] %v1739_v4  ;;  %2382 = vmatpush.msrb.mxu2 %v6153_v17  ;;  %2403 = vmatpush.msrb.mxu3 %v6182_v8  ;;  %v1729_v38 = vsel %vm1728_vm14, %v6480_v27, %v1725_v26  ;;  %v8009_v4 = vld [vmem:[#allocation42_spill] sm:$0xff]  ;;  %v8010_v26 = vld [vmem:[#allocation15_spill] sm:$0xff] }
 0x5ac   :  { %v1734_v19 = vsel %vm1731_vm15, %v1733_v2, %v1729_v38  ;;  %2346 = vmatpush.msrb.mxu0 %v6213_v36  ;;  %2368 = vmatpush.msrb.mxu1 %v6271_v25  ;;  %v8013_v38 = vld [vmem:[#allocation47_spill] sm:$0xff]  ;;  %v8014_v2 = vld [vmem:[#allocation10_spill] sm:$0xff] }
 0x5ad   :  { %2383 = vmatpush.msrb.mxu2 %v6223_v52  ;;  %2404 = vmatpush.msrb.mxu3 %v6198_v46 }
 0x5ae   :  { %2347 = vmatpush.msrb.mxu0 %v6242_v39  ;;  %2369 = vmatpush.msrb.mxu1 %v6299_v11 }
 0x5af   :  { %2384 = vmatpush.msrb.mxu2 %v6235_v34  ;;  %2405 = vmatpush.msrb.mxu3 %v6207_v40 }
 0x5b0   :  { %2348 = vmatpush.msrb.mxu0 %v6266_v47  ;;  %2370 = vmatpush.msrb.mxu1 %v6325_v59 }
 0x5b1   :  { %v4057_v35 = vpop.eup %4056  ;;  %2385 = vmatpush.msrb.mxu2 %v6259_v41  ;;  %2406 = vmatpush.msrb.mxu3 %v6230_v53 }
 0x5b2   :  { %v1741_v27 = vmul.f32 %v4057_v35, %v1734_v19  ;;  %2349 = vmatpush.msrb.mxu0 %v6294_v21  ;;  %2371 = vmatpush.msrb.mxu1 %v8004_v15  ;;  %v8015_v35 = vld [vmem:[#allocation17_spill] sm:$0xff] }
 0x5b3   :  { %2386 = vmatpush.msrb.mxu2 %v6285_v13  ;;  %2407 = vmatpush.msrb.mxu3 %v6254_v43  ;;  %v8016_v19 = vld [vmem:[#allocation21_spill] sm:$0xff] }
 0x5b4   :  { %1747 = vst [vmem:[%s7495_s4] sm:$0xff] %v1741_v27  ;;  %v1830_v20 = vpack.c.bf16 %v1741_v27, %v6093_v61  ;;  %2350 = vmatpush.msrb.mxu0 %v6320_v16  ;;  %v8001_v61 = vld [vmem:[#allocation6_spill] sm:$0xff]  ;;  %2372 = vmatpush.msrb.mxu1 %v8008_v44  ;;  %v8017_v27 = vmov 0.0  }
 0x5b5   :  { %2387 = vmatpush.msrb.mxu2 %v6312_v30  ;;  %2408 = vmatpush.msrb.mxu3 %v6280_v31 }
 0x5b6   :  { %2056 = vmatmul.bf16.gmra.mxu0 %v1830_v20  ;;  %2085 = vmatmul.bf16.gmra.mxu1 %v1830_v20 }
 0x5b7   :  { %2114 = vmatmul.bf16.gmra.mxu2 %v1830_v20  ;;  %2143 = vmatmul.bf16.gmra.mxu3 %v1830_v20  ;;  %v8018_v20 = vld [vmem:[#allocation12_spill] sm:$0xff] }
 0x5b8   :  { %2388 = vmatpush.msrb.mxu2 %v6337_v9  ;;  %2409 = vmatpush.msrb.mxu3 %v6307_v24 }
 0x5b9   :  { %2351 = vmatpush.msrb.mxu0 %v8003_v57  ;;  %2373 = vmatpush.msrb.mxu1 %v8012_v45 }
 0x5ba   :  { %2389 = vmatpush.msrb.mxu2 %v6363_v48  ;;  %2410 = vmatpush.msrb.mxu3 %v8001_v61 }
 0x5bb   :  { %2352 = vmatpush.msrb.mxu0 %v8007_v56  ;;  %2374 = vmatpush.msrb.mxu1 %v8015_v35 }
 0x5bc   :  { %2390 = vmatpush.msrb.mxu2 %v8002_v50  ;;  %2411 = vmatpush.msrb.mxu3 %v8005_v1 }
 0x5bd   :  { %2353 = vmatpush.msrb.mxu0 %v8011_v7 }
 0x5be   :  { %2391 = vmatpush.msrb.mxu2 %v8006_v62  ;;  %2412 = vmatpush.msrb.mxu3 %v8009_v4 }
 0x5bf   :  { %2354 = vmatpush.msrb.mxu0 %v8014_v2 }
 0x5c0   :  { %2392 = vmatpush.msrb.mxu2 %v8010_v26  ;;  %2413 = vmatpush.msrb.mxu3 %v8013_v38  ;;  %v8019_v38 = vld [vmem:[#allocation14_spill] sm:$0xff] }
 0x5c1   :  { %2355 = vmatpush.msrb.mxu0 %v8018_v20  ;;  %2375 = vmatpush.msrb.mxu1 %v8019_v38 }
 0x5c2   :  { %2393 = vmatpush.msrb.mxu2 %v6473_v33  ;;  %2414 = vmatpush.msrb.mxu3 %v8016_v19 }
 0x5c3   :  { %2356 = vmatpush.msrb.mxu0 %v6489_v37  ;;  %2376 = vmatpush.msrb.mxu1 %v6494_v28 }
 0x5c4   :  { %2394 = vmatpush.msrb.mxu2 %v6511_v60  ;;  %2415 = vmatpush.msrb.mxu3 %v6478_v63 }
 0x5c6   :  { %2202 = vmatmul.f32.vlgmr.msra.gmra.mxu0 %v8017_v27  ;;  %2222 = vmatmul.f32.vlgmr.msra.gmra.mxu1 %v8017_v27 }
 0x5c7   :  { %2242 = vmatmul.f32.vlgmr.msra.gmra.mxu2 %v8017_v27  ;;  %2262 = vmatmul.f32.vlgmr.msra.gmra.mxu3 %v8017_v27  ;;  %v8020_v27 = vld [vmem:[#allocation47_spill] sm:$0xff] }
 0x5c8   :  { %2395 = vmatpush.msrb.mxu2 %v6531_v55  ;;  %2416 = vmatpush.msrb.mxu3 %v6516_v14 }
 0x5c9   :  { %2496 = vmatpush.msra.mxu0 %v6104_v10  ;;  %2516 = vmatpush.msra.mxu1 %v6109_v22 }
 0x5ca   :  { %2396 = vmatpush.msrb.mxu2 %v6540_v32  ;;  %2556 = vmatpush.msra.mxu3 %v6130_v23 }
 0x5cb   :  { %2497 = vmatpush.msra.mxu0 %v6120_v18  ;;  %2517 = vmatpush.msra.mxu1 %v6125_v0 }
 0x5cc   :  { %2536 = vmatpush.msra.mxu2 %v6142_v54  ;;  %2557 = vmatpush.msra.mxu3 %v6148_v3 }
 0x5cd   :  { %2498 = vmatpush.msra.mxu0 %v6160_v5  ;;  %2518 = vmatpush.msra.mxu1 %v6165_v6 }
 0x5ce   :  { %2537 = vmatpush.msra.mxu2 %v6153_v17  ;;  %2558 = vmatpush.msra.mxu3 %v6182_v8 }
 0x5cf   :  { %2499 = vmatpush.msra.mxu0 %v6172_v29  ;;  %2519 = vmatpush.msra.mxu1 %v6177_v42 }
 0x5d0   :  { %2538 = vmatpush.msra.mxu2 %v6223_v52  ;;  %2559 = vmatpush.msra.mxu3 %v6198_v46 }
 0x5d1   :  { %2500 = vmatpush.msra.mxu0 %v6188_v12  ;;  %2520 = vmatpush.msra.mxu1 %v6193_v49 }
 0x5d2   :  { %2539 = vmatpush.msra.mxu2 %v6235_v34  ;;  %2560 = vmatpush.msra.mxu3 %v6207_v40 }
 0x5d3   :  { %2501 = vmatpush.msra.mxu0 %v6213_v36  ;;  %2521 = vmatpush.msra.mxu1 %v6218_v51 }
 0x5d4   :  { %2540 = vmatpush.msra.mxu2 %v6259_v41  ;;  %2561 = vmatpush.msra.mxu3 %v6230_v53 }
 0x5d5   :  { %2502 = vmatpush.msra.mxu0 %v6242_v39  ;;  %2522 = vmatpush.msra.mxu1 %v6247_v58 }
 0x5d6   :  { %2541 = vmatpush.msra.mxu2 %v6285_v13  ;;  %2562 = vmatpush.msra.mxu3 %v6254_v43 }
 0x5d7   :  { %2503 = vmatpush.msra.mxu0 %v6266_v47  ;;  %2523 = vmatpush.msra.mxu1 %v6271_v25 }
 0x5d8   :  { %2542 = vmatpush.msra.mxu2 %v6312_v30  ;;  %2563 = vmatpush.msra.mxu3 %v6280_v31 }
 0x5d9   :  { %2504 = vmatpush.msra.mxu0 %v6294_v21  ;;  %2524 = vmatpush.msra.mxu1 %v6299_v11 }
 0x5da   :  { %2543 = vmatpush.msra.mxu2 %v6337_v9  ;;  %2564 = vmatpush.msra.mxu3 %v6307_v24 }
 0x5db   :  { %2505 = vmatpush.msra.mxu0 %v6320_v16  ;;  %2525 = vmatpush.msra.mxu1 %v6325_v59 }
 0x5dc   :  { %2544 = vmatpush.msra.mxu2 %v6363_v48  ;;  %2565 = vmatpush.msra.mxu3 %v8001_v61 }
 0x5dd   :  { %2506 = vmatpush.msra.mxu0 %v8003_v57  ;;  %2526 = vmatpush.msra.mxu1 %v8004_v15 }
 0x5de   :  { %2545 = vmatpush.msra.mxu2 %v8002_v50  ;;  %2566 = vmatpush.msra.mxu3 %v8005_v1 }
 0x5df   :  { %2507 = vmatpush.msra.mxu0 %v8007_v56  ;;  %2527 = vmatpush.msra.mxu1 %v8008_v44 }
 0x5e0   :  { %2546 = vmatpush.msra.mxu2 %v8006_v62  ;;  %2567 = vmatpush.msra.mxu3 %v8009_v4 }
 0x5e1   :  { %2508 = vmatpush.msra.mxu0 %v8011_v7  ;;  %2528 = vmatpush.msra.mxu1 %v8012_v45 }
 0x5e2   :  { %2547 = vmatpush.msra.mxu2 %v8010_v26  ;;  %2568 = vmatpush.msra.mxu3 %v8020_v27 }
 0x5e3   :  { %2509 = vmatpush.msra.mxu0 %v8014_v2  ;;  %2529 = vmatpush.msra.mxu1 %v8015_v35  ;;  %v2042_v35 = vpop.f32.mrf.mxu0  ;;  %v2129_v2 = vpop.f32.mrf.mxu3 }
 0x5e4   :  { %2548 = vmatpush.msra.mxu2 %v6473_v33  ;;  %2569 = vmatpush.msra.mxu3 %v8016_v19 }
 0x5e5   :  { %2510 = vmatpush.msra.mxu0 %v8018_v20  ;;  %2530 = vmatpush.msra.mxu1 %v8019_v38  ;;  %v2100_v38 = vpop.f32.mrf.mxu2 }
 0x5e6   :  { %2549 = vmatpush.msra.mxu2 %v6511_v60  ;;  %2570 = vmatpush.msra.mxu3 %v6478_v63  ;;  %v2071_v60 = vpop.f32.mrf.mxu1 }
 0x5e7   :  { %2511 = vmatpush.msra.mxu0 %v6489_v37  ;;  %2531 = vmatpush.msra.mxu1 %v6494_v28 }
 0x5e8   :  { %2550 = vmatpush.msra.mxu2 %v6531_v55  ;;  %2571 = vmatpush.msra.mxu3 %v6516_v14 }
 0x5ea   :  { %2551 = vmatpush.msra.mxu2 %v6540_v32 }
 0x5eb   :  { %v6689_v19 = vpop.f32.mrf.mxu0  ;;  %v6693_v27 = vpop.f32.mrf.mxu3 }
 0x5ec   :  { %8021 = vst [vmem:[#allocation28_spill] sm:$0xff] %v6689_v19 }
 0x5ed   :  { %8023 = vst [vmem:[#allocation26_spill] sm:$0xff] %v6693_v27  ;;  %v6699_v37 = vpop.f32.mrf.mxu2 }
 0x5ee   :  { %v6691_v20 = vpop.f32.mrf.mxu1  ;;  %8026 = vst [vmem:[#allocation31_spill] sm:$0xff] %v6699_v37 }
 0x5ef   :  { %8022 = vst [vmem:[#allocation25_spill] sm:$0xff] %v6691_v20 }
 0x5f3   :  { %v6695_v55 = vpop.f32.mrf.mxu0  ;;  %v6701_v28 = vpop.f32.mrf.mxu3 }
 0x5f4   :  { %8024 = vst [vmem:[#allocation29_spill] sm:$0xff] %v6695_v55 }
 0x5f5   :  { %8027 = vst [vmem:[#allocation32_spill] sm:$0xff] %v6701_v28  ;;  %v6707_v33 = vpop.f32.mrf.mxu2 }
 0x5f6   :  { %v6697_v63 = vpop.f32.mrf.mxu1  ;;  %8030 = vst [vmem:[#allocation35_spill] sm:$0xff] %v6707_v33 }
 0x5f7   :  { %8025 = vst [vmem:[#allocation30_spill] sm:$0xff] %v6697_v63 }
 0x5fb   :  { %v6703_v32 = vpop.f32.mrf.mxu0  ;;  %v6709_v19 = vpop.f32.mrf.mxu3 }
 0x5fc   :  { %8028 = vst [vmem:[#allocation34_spill] sm:$0xff] %v6703_v32 }
 0x5fd   :  { %8031 = vst [vmem:[#allocation36_spill] sm:$0xff] %v6709_v19  ;;  %v6715_v27 = vpop.f32.mrf.mxu2 }
 0x5fe   :  { %v6705_v14 = vpop.f32.mrf.mxu1  ;;  %8034 = vst [vmem:[#allocation46_spill] sm:$0xff] %v6715_v27 }
 0x5ff   :  { %8029 = vst [vmem:[#allocation33_spill] sm:$0xff] %v6705_v14 }
 0x603   :  { %v6711_v20 = vpop.f32.mrf.mxu0  ;;  %v6717_v55 = vpop.f32.mrf.mxu3 }
 0x604   :  { %8032 = vst [vmem:[#allocation38_spill] sm:$0xff] %v6711_v20 }
 0x605   :  { %8035 = vst [vmem:[#allocation57_spill] sm:$0xff] %v6717_v55  ;;  %v6723_v28 = vpop.f32.mrf.mxu2  ;;  %v3610_v55 = vld [vmem:[%s7493_s3 + $0x4] sm:$0xf] }
 0x606   :  { %v6713_v45 = vpop.f32.mrf.mxu1  ;;  %8038 = vst [vmem:[#allocation49_spill] sm:$0xff] %v6723_v28  ;;  %v6744_v28 = vperm.slane %v3610_v55, 1  ;;  %v6752_v26 = vperm.slane %v3610_v55, 3 }
 0x607   :  { %8033 = vst [vmem:[#allocation56_spill] sm:$0xff] %v6713_v45 }
 0x608   :  { %8047 = vst [vmem:[#allocation9_spill] sm:$0xff] %v6744_v28  ;;  %v2130_v44 = vadd.f32 %v2129_v2, %v6752_v26 }
 0x609   :  { %8050 = vst [vmem:[#allocation55_spill] sm:$0xff] %v6752_v26 }
 0x60b   :  { %v6719_v63 = vpop.f32.mrf.mxu0  ;;  %v6725_v32 = vpop.f32.mrf.mxu3 }
 0x60c   :  { %8036 = vst [vmem:[#allocation48_spill] sm:$0xff] %v6719_v63 }
 0x60d   :  { %8039 = vst [vmem:[#allocation62_spill] sm:$0xff] %v6725_v32  ;;  %v6731_v19 = vpop.f32.mrf.mxu2 }
 0x60e   :  { %v6721_v37 = vpop.f32.mrf.mxu1  ;;  %8042 = vst [vmem:[#allocation51_spill] sm:$0xff] %v6731_v19 }
 0x60f   :  { %8037 = vst [vmem:[#allocation60_spill] sm:$0xff] %v6721_v37  ;;  %v6742_v37 = vperm.slane %v3610_v55, 0 }
 0x611   :  { %8046 = vst [vmem:[#allocation8_spill] sm:$0xff] %v6742_v37 }
 0x633   :  { %v6727_v14 = vpop.f32.mrf.mxu0  ;;  %v6729_v33 = vpop.f32.mrf.mxu1 }
 0x634   :  { %8040 = vst [vmem:[#allocation52_spill] sm:$0xff] %v6727_v14  ;;  %v2072_v14 = vadd.f32 %v2071_v60, %v6744_v28 }
 0x635   :  { %8041 = vst [vmem:[#allocation50_spill] sm:$0xff] %v6729_v33  ;;  %v2043_v33 = vadd.f32 %v2042_v35, %v6742_v37 }
 0x63a   :  { %v6733_v20 = vpop.f32.mrf.mxu3  ;;  %v6746_v32 = vpop.f32.mrf.mxu2 }
 0x63b   :  { %8043 = vst [vmem:[#allocation53_spill] sm:$0xff] %v6733_v20  ;;  %v6738_v45 = vpop.f32.mrf.mxu0  ;;  %v6740_v63 = vpop.f32.mrf.mxu1 }
 0x63c   :  { %8044 = vst [vmem:[#allocation58_spill] sm:$0xff] %v6738_v45 }
 0x63d   :  { %8045 = vst [vmem:[#allocation63_spill] sm:$0xff] %v6740_v63 }
 0x63e   :  { %8048 = vst [vmem:[#allocation37_spill] sm:$0xff] %v6746_v32 }
 0x642   :  { %v6750_v19 = vpop.f32.mrf.mxu3  ;;  %v6755_v56 = vpop.f32.mrf.mxu2 }
 0x643   :  { %8049 = vst [vmem:[#allocation54_spill] sm:$0xff] %v6750_v19  ;;  %v2203_v20 = vpop.f32.mrf.mxu0  ;;  %v2223_v27 = vpop.f32.mrf.mxu1 }
 0x644   :  { %v2266_v7 = vadd.f32 %v2203_v20, %v2043_v33  ;;  %v2267_v4 = vadd.f32 %v2223_v27, %v2072_v14  ;;  %8051 = vst [vmem:[#allocation59_spill] sm:$0xff] %v6755_v56  ;;  %v6757_v33 = vperm.slane %v3610_v55, 2 }
 0x646   :  { %v3835_v45 = vmul.f32 -1.442695, %v2266_v7  ;;  %v3836_v63 = vmul.f32 -1.442695, %v2267_v4  ;;  %8052 = vst [vmem:[#allocation61_spill] sm:$0xff] %v6757_v33  ;;  %v2101_v7 = vadd.f32 %v2100_v38, %v6757_v33 }
 0x648   :  { %4058 = vpow2.f32 %v3835_v45 }
 0x649   :  { %4060 = vpow2.f32 %v3836_v63 }
 0x64a   :  { %v2263_v32 = vpop.f32.mrf.mxu3  ;;  %v2243_v14 = vpop.f32.mrf.mxu2 }
 0x64b   :  { %v2269_v35 = vadd.f32 %v2263_v32, %v2130_v44  ;;  %v2268_v2 = vadd.f32 %v2243_v14, %v2101_v7 }
 0x64d   :  { %v3837_v37 = vmul.f32 -1.442695, %v2269_v35 }
 0x64e   :  { %v4059_v60 = vpop.eup %4058 }
 0x64f   :  { %v4061_v28 = vpop.eup %4060  ;;  %v2273_v19 = vadd.f32 1.0, %v4059_v60  ;;  %4062 = vpow2.f32 %v3837_v37 }
 0x650   :  { %v2292_v1 = vadd.f32 1.0, %v4061_v28 }
 0x651   :  { %4064 = vrcp.f32 %v2273_v19  ;;  %v2285_v60 = vand.u32 2147483648, %v2273_v19  ;;  %v2283_v55 = vand.u32 2147483647, %v2273_v19  ;;  %vm2279_vm2 = vweird.f32 %v2273_v19 }
 0x652   :  { %4066 = vrcp.f32 %v2292_v1  ;;  %v2304_v28 = vand.u32 2147483648, %v2292_v1  ;;  %v2302_v26 = vand.u32 2147483647, %v2292_v1  ;;  %vm2298_vm3 = vweird.f32 %v2292_v1 }
 0x653   :  { %v2286_v14 = vor.u32 1.1754944e-38, %v2285_v60  ;;  %vm2284_vm5 = vcmp.eq.f32.partialorder %v2283_v55, 8.507059e+37 }
 0x654   :  { %v2305_v33 = vor.u32 1.1754944e-38, %v2304_v28  ;;  %vm2303_vm7 = vcmp.eq.f32.partialorder %v2302_v26, 8.507059e+37 }
 0x655   :  { %v4063_v4 = vpop.eup %4062 }
 0x656   :  { %v2312_v45 = vadd.f32 1.0, %v4063_v4 }
 0x657   :  { %v4065_v63 = vpop.eup %4064 }
 0x658   :  { %v4067_v20 = vpop.eup %4066  ;;  %v2275_v27 = vmul.f32 %v4065_v63, %v2273_v19  ;;  %4068 = vrcp.f32 %v2312_v45  ;;  %vm2280_vm0 = vweird.f32 %v4065_v63  ;;  %vm2318_vm9 = vweird.f32 %v2312_v45 }
 0x659   :  { %v2294_v32 = vmul.f32 %v4067_v20, %v2292_v1  ;;  %4070 = vtanh.f32 %v2268_v2  ;;  %vm2299_vm1 = vweird.f32 %v4067_v20  ;;  %vm2281_vm4 = vmor %vm2279_vm2, %vm2280_vm0  ;;  %v2322_v19 = vand.u32 2147483647, %v2312_v45 }
 0x65a   :  { %v2276_v44 = vsub.f32 1.0, %v2275_v27  ;;  %vm2300_vm6 = vmor %vm2298_vm3, %vm2299_vm1 }
 0x65b   :  { %v2295_v35 = vsub.f32 1.0, %v2294_v32  ;;  %vm2323_vm11 = vcmp.eq.f32.partialorder %v2322_v19, 8.507059e+37 }
 0x65c   :  { %v2277_v37 = vmul.f32 %v4065_v63, %v2276_v44 }
 0x65d   :  { %v2296_v56 = vmul.f32 %v4067_v20, %v2295_v35 }
 0x65e   :  { %v4069_v62 = vpop.eup %4068  ;;  %v2278_v38 = vadd.f32 %v4065_v63, %v2277_v37 }
 0x65f   :  { %v2297_v4 = vadd.f32 %v4067_v20, %v2296_v56  ;;  %v2314_v7 = vmul.f32 %v4069_v62, %v2312_v45  ;;  %v4071_v2 = vpop.eup %4070  ;;  %vm2319_vm8 = vweird.f32 %v4069_v62  ;;  %v2324_v56 = vand.u32 2147483648, %v2312_v45 }
 0x660   :  { %v2282_v27 = vsel %vm2281_vm4, %v4065_v63, %v2278_v38  ;;  %vm2320_vm10 = vmor %vm2318_vm9, %vm2319_vm8 }
 0x661   :  { %v2287_v32 = vsel %vm2284_vm5, %v2286_v14, %v2282_v27  ;;  %v2301_v44 = vsel %vm2300_vm6, %v4067_v20, %v2297_v4  ;;  %v2315_v15 = vsub.f32 1.0, %v2314_v7  ;;  %v2325_v60 = vor.u32 1.1754944e-38, %v2324_v56  ;;  %v8085_v27 = vld [vmem:[#allocation61_spill] sm:$0xff] }
 0x662   :  { %v2306_v35 = vsel %vm2303_vm7, %v2305_v33, %v2301_v44  ;;  %v2330_v57 = vmul.f32 %v4071_v2, %v2287_v32  ;;  %v8086_v2 = vld [vmem:[#allocation31_spill] sm:$0xff] }
 0x663   :  { %v2329_v61 = vmul.f32 0.0, %v2306_v35  ;;  %v2316_v50 = vmul.f32 %v4069_v62, %v2315_v15  ;;  %v2103_v32 = vadd.f32 %v8086_v2, %v8085_v27  ;;  %v6932_v2 = vld [vmem:[%s7492_s2 + $0x398] sm:$0xff] }
 0x665   :  { %v6760_v37 = vadd.f32 %v2330_v57, %v2329_v61  ;;  %v2317_v1 = vadd.f32 %v4069_v62, %v2316_v50  ;;  %v8083_v61 = vld [vmem:[#allocation55_spill] sm:$0xff]  ;;  %v8084_v50 = vld [vmem:[#allocation26_spill] sm:$0xff] }
 0x666   :  { %v2132_v57 = vadd.f32 %v8084_v50, %v8083_v61  ;;  %v6866_v50 = vld [vmem:[%s7492_s2 + $0x3c0] sm:$0xff] }
 0x667   :  { %4072 = vtanh.f32 %v6760_v37  ;;  %v2321_v63 = vsel %vm2320_vm10, %v4069_v62, %v2317_v1 }
 0x668   :  { %v2326_v26 = vsel %vm2323_vm11, %v2325_v60, %v2321_v63 }
 0x66d   :  { %v4073_v20 = vpop.eup %4072 }
 0x66e   :  { %v2333_v28 = vmul.f32 %v4073_v20, %v2326_v26 }
 0x670   :  { %2357 = vmatmul.f32.vlgmr.msrb.gmra.mxu0 %v2333_v28  ;;  %2377 = vmatmul.f32.vlgmr.msrb.gmra.mxu1 %v2333_v28 }
 0x671   :  { %2397 = vmatmul.f32.vlgmr.msrb.gmra.mxu2 %v2333_v28  ;;  %2417 = vmatmul.f32.vlgmr.msrb.gmra.mxu3 %v2333_v28 }
 0x672   :  { %2651 = vmatpush.msrb.mxu0 %v6104_v10  ;;  %2671 = vmatpush.msrb.mxu1 %v6109_v22  ;;  %v8053_v10 = vld [vmem:[#allocation41_spill] sm:$0xff]  ;;  %v8054_v22 = vld [vmem:[#allocation6_spill] sm:$0xff] }
 0x673   :  { %2691 = vmatpush.msrb.mxu2 %v6142_v54  ;;  %2711 = vmatpush.msrb.mxu3 %v6130_v23  ;;  %v8057_v23 = vld [vmem:[#allocation45_spill] sm:$0xff]  ;;  %v8058_v54 = vld [vmem:[#allocation11_spill] sm:$0xff] }
 0x674   :  { %2652 = vmatpush.msrb.mxu0 %v6120_v18  ;;  %2672 = vmatpush.msrb.mxu1 %v6125_v0  ;;  %v8055_v18 = vld [vmem:[#allocation7_spill] sm:$0xff]  ;;  %v8056_v0 = vld [vmem:[#allocation13_spill] sm:$0xff] }
 0x675   :  { %2692 = vmatpush.msrb.mxu2 %v6153_v17  ;;  %2712 = vmatpush.msrb.mxu3 %v6148_v3  ;;  %v8059_v3 = vld [vmem:[#allocation39_spill] sm:$0xff]  ;;  %v8060_v17 = vld [vmem:[#allocation40_spill] sm:$0xff] }
 0x676   :  { %2653 = vmatpush.msrb.mxu0 %v6160_v5  ;;  %2673 = vmatpush.msrb.mxu1 %v6165_v6  ;;  %v8061_v5 = vld [vmem:[#allocation15_spill] sm:$0xff]  ;;  %v8062_v6 = vld [vmem:[#allocation42_spill] sm:$0xff] }
 0x677   :  { %2693 = vmatpush.msrb.mxu2 %v6223_v52  ;;  %2713 = vmatpush.msrb.mxu3 %v6182_v8  ;;  %v8065_v8 = vld [vmem:[#allocation19_spill] sm:$0xff]  ;;  %v8072_v52 = vld [vmem:[#allocation14_spill] sm:$0xff] }
 0x678   :  { %2654 = vmatpush.msrb.mxu0 %v6172_v29  ;;  %2674 = vmatpush.msrb.mxu1 %v6177_v42  ;;  %v8063_v29 = vld [vmem:[#allocation43_spill] sm:$0xff]  ;;  %v8064_v42 = vld [vmem:[#allocation44_spill] sm:$0xff] }
 0x679   :  { %2694 = vmatpush.msrb.mxu2 %v6235_v34  ;;  %2714 = vmatpush.msrb.mxu3 %v6198_v46  ;;  %v8068_v46 = vld [vmem:[#allocation17_spill] sm:$0xff]  ;;  %v8074_v34 = vld [vmem:[#allocation16_spill] sm:$0xff] }
 0x67a   :  { %2655 = vmatpush.msrb.mxu0 %v6188_v12  ;;  %2675 = vmatpush.msrb.mxu1 %v6193_v49  ;;  %v8066_v12 = vld [vmem:[#allocation47_spill] sm:$0xff]  ;;  %v8067_v49 = vld [vmem:[#allocation10_spill] sm:$0xff] }
 0x67b   :  { %2695 = vmatpush.msrb.mxu2 %v6259_v41  ;;  %2715 = vmatpush.msrb.mxu3 %v6207_v40  ;;  %v8069_v40 = vld [vmem:[#allocation23_spill] sm:$0xff]  ;;  %v8078_v41 = vld [vmem:[#allocation20_spill] sm:$0xff] }
 0x67c   :  { %2656 = vmatpush.msrb.mxu0 %v6213_v36  ;;  %2676 = vmatpush.msrb.mxu1 %v6218_v51  ;;  %v8070_v36 = vld [vmem:[#allocation21_spill] sm:$0xff]  ;;  %v8071_v51 = vld [vmem:[#allocation12_spill] sm:$0xff] }
 0x67d   :  { %2696 = vmatpush.msrb.mxu2 %v6285_v13  ;;  %2716 = vmatpush.msrb.mxu3 %v6230_v53  ;;  %v8073_v53 = vld [vmem:[#allocation22_spill] sm:$0xff]  ;;  %v8081_v13 = vld [vmem:[#allocation9_spill] sm:$0xff] }
 0x67e   :  { %2657 = vmatpush.msrb.mxu0 %v6242_v39  ;;  %2677 = vmatpush.msrb.mxu1 %v6247_v58  ;;  %v8075_v39 = vld [vmem:[#allocation18_spill] sm:$0xff]  ;;  %v8076_v58 = vld [vmem:[#allocation24_spill] sm:$0xff] }
 0x67f   :  { %2697 = vmatpush.msrb.mxu2 %v6312_v30  ;;  %2717 = vmatpush.msrb.mxu3 %v6254_v43  ;;  %v8077_v43 = vld [vmem:[#allocation27_spill] sm:$0xff] }
 0x680   :  { %2658 = vmatpush.msrb.mxu0 %v6266_v47  ;;  %2678 = vmatpush.msrb.mxu1 %v6271_v25  ;;  %v8079_v47 = vld [vmem:[#allocation8_spill] sm:$0xff] }
 0x681   :  { %2698 = vmatpush.msrb.mxu2 %v6337_v9  ;;  %2718 = vmatpush.msrb.mxu3 %v6280_v31  ;;  %v8080_v25 = vld [vmem:[#allocation28_spill] sm:$0xff] }
 0x682   :  { %2659 = vmatpush.msrb.mxu0 %v6294_v21  ;;  %2679 = vmatpush.msrb.mxu1 %v6299_v11  ;;  %v2045_v31 = vadd.f32 %v8080_v25, %v8079_v47  ;;  %v8082_v21 = vld [vmem:[#allocation25_spill] sm:$0xff] }
 0x683   :  { %2699 = vmatpush.msrb.mxu2 %v6363_v48  ;;  %2719 = vmatpush.msrb.mxu3 %v6307_v24  ;;  %v2074_v11 = vadd.f32 %v8082_v21, %v8081_v13 }
 0x684   :  { %2660 = vmatpush.msrb.mxu0 %v6320_v16  ;;  %2680 = vmatpush.msrb.mxu1 %v6325_v59 }
 0x685   :  { %2700 = vmatpush.msrb.mxu2 %v8053_v10  ;;  %2720 = vmatpush.msrb.mxu3 %v8054_v22 }
 0x686   :  { %2661 = vmatpush.msrb.mxu0 %v8055_v18  ;;  %2681 = vmatpush.msrb.mxu1 %v8056_v0 }
 0x687   :  { %2701 = vmatpush.msrb.mxu2 %v8057_v23  ;;  %2721 = vmatpush.msrb.mxu3 %v8058_v54 }
 0x688   :  { %2662 = vmatpush.msrb.mxu0 %v8059_v3  ;;  %2682 = vmatpush.msrb.mxu1 %v8060_v17 }
 0x689   :  { %2702 = vmatpush.msrb.mxu2 %v8061_v5  ;;  %2722 = vmatpush.msrb.mxu3 %v8062_v6 }
 0x68a   :  { %2663 = vmatpush.msrb.mxu0 %v8063_v29  ;;  %2683 = vmatpush.msrb.mxu1 %v8064_v42 }
 0x68b   :  { %2703 = vmatpush.msrb.mxu2 %v8065_v8  ;;  %2723 = vmatpush.msrb.mxu3 %v8066_v12 }
 0x68c   :  { %2664 = vmatpush.msrb.mxu0 %v8067_v49  ;;  %2684 = vmatpush.msrb.mxu1 %v8068_v46 }
 0x68d   :  { %2704 = vmatpush.msrb.mxu2 %v8069_v40  ;;  %2724 = vmatpush.msrb.mxu3 %v8070_v36 }
 0x68e   :  { %2665 = vmatpush.msrb.mxu0 %v8071_v51  ;;  %2685 = vmatpush.msrb.mxu1 %v8072_v52 }
 0x68f   :  { %2705 = vmatpush.msrb.mxu2 %v8073_v53  ;;  %2725 = vmatpush.msrb.mxu3 %v8074_v34 }
 0x690   :  { %2666 = vmatpush.msrb.mxu0 %v8075_v39  ;;  %2686 = vmatpush.msrb.mxu1 %v8076_v58 }
 0x691   :  { %2706 = vmatpush.msrb.mxu2 %v8077_v43  ;;  %2726 = vmatpush.msrb.mxu3 %v8078_v41 }
 0x6ed   :  { %v2358_v24 = vpop.f32.mrf.mxu0  ;;  %v2378_v30 = vpop.f32.mrf.mxu1 }
 0x6ee   :  { %v2421_v16 = vadd.f32 %v2358_v24, %v2045_v31  ;;  %v2422_v59 = vadd.f32 %v2378_v30, %v2074_v11 }
 0x6f0   :  { %v3838_v9 = vmul.f32 -1.442695, %v2421_v16  ;;  %v3839_v48 = vmul.f32 -1.442695, %v2422_v59  ;;  %v6848_v59 = vld [vmem:[%s7492_s2 + $0x3e8] sm:$0xff] }
 0x6f2   :  { %4074 = vpow2.f32 %v3838_v9  ;;  %v6854_v9 = vld [vmem:[%s7492_s2 + $0x3f0] sm:$0xff] }
 0x6f3   :  { %4076 = vpow2.f32 %v3839_v48  ;;  %v6860_v48 = vld [vmem:[%s7492_s2 + $0x3f8] sm:$0xff] }
 0x6f4   :  { %v2418_v15 = vpop.f32.mrf.mxu3  ;;  %v2398_v4 = vpop.f32.mrf.mxu2 }
 0x6f5   :  { %v2424_v62 = vadd.f32 %v2418_v15, %v2132_v57  ;;  %v2423_v1 = vadd.f32 %v2398_v4, %v2103_v32  ;;  %v6872_v57 = vld [vmem:[%s7492_s2 + $0x3c8] sm:$0xff]  ;;  %v6878_v15 = vld [vmem:[%s7492_s2 + $0x3d0] sm:$0xff]  ;;  %v6938_v32 = vld [vmem:[%s7492_s2 + $0x360] sm:$0xff] }
 0x6f6   :  { %v6920_v4 = vld [vmem:[%s7492_s2 + $0x388] sm:$0xff] }
 0x6f7   :  { %v3840_v33 = vmul.f32 -1.442695, %v2424_v62  ;;  %v6884_v62 = vld [vmem:[%s7492_s2 + $0x3d8] sm:$0xff] }
 0x6f8   :  { %v4075_v45 = vpop.eup %4074 }
 0x6f9   :  { %v4077_v55 = vpop.eup %4076  ;;  %v2428_v38 = vadd.f32 1.0, %v4075_v45  ;;  %4078 = vpow2.f32 %v3840_v33  ;;  %v6890_v33 = vld [vmem:[%s7492_s2 + $0x3a0] sm:$0xff]  ;;  %v6896_v45 = vld [vmem:[%s7492_s2 + $0x3a8] sm:$0xff] }
 0x6fa   :  { %v2447_v14 = vadd.f32 1.0, %v4077_v55  ;;  %v6902_v55 = vld [vmem:[%s7492_s2 + $0x3b0] sm:$0xff] }
 0x6fb   :  { %4080 = vrcp.f32 %v2428_v38  ;;  %v2440_v26 = vand.u32 2147483648, %v2428_v38  ;;  %v2438_v22 = vand.u32 2147483647, %v2428_v38  ;;  %vm2434_vm14 = vweird.f32 %v2428_v38 }
 0x6fc   :  { %4082 = vrcp.f32 %v2447_v14  ;;  %v2459_v28 = vand.u32 2147483648, %v2447_v14  ;;  %v2457_v0 = vand.u32 2147483647, %v2447_v14  ;;  %vm2453_vm15 = vweird.f32 %v2447_v14 }
 0x6fd   :  { %v2441_v3 = vor.u32 1.1754944e-38, %v2440_v26  ;;  %vm2439_vm2 = vcmp.eq.f32.partialorder %v2438_v22, 8.507059e+37  ;;  %v6992_v26 = vld [vmem:[%s7492_s2 + $0x328] sm:$0xff]  ;;  %v7010_v22 = vld [vmem:[%s7492_s2 + $0x300] sm:$0xff] }
 0x6fe   :  { %v2460_v6 = vor.u32 1.1754944e-38, %v2459_v28  ;;  %vm2458_vm3 = vcmp.eq.f32.partialorder %v2457_v0, 8.507059e+37  ;;  %v6998_v28 = vld [vmem:[%s7492_s2 + $0x330] sm:$0xff] }
 0x6ff   :  { %v4079_v7 = vpop.eup %4078  ;;  %v7022_v0 = vld [vmem:[%s7492_s2 + $0x310] sm:$0xff] }
 0x700   :  { %v2467_v44 = vadd.f32 1.0, %v4079_v7  ;;  %v6926_v7 = vld [vmem:[%s7492_s2 + $0x390] sm:$0xff] }
 0x701   :  { %v4081_v35 = vpop.eup %4080 }
 0x702   :  { %v4083_v56 = vpop.eup %4082  ;;  %v2430_v19 = vmul.f32 %v4081_v35, %v2428_v38  ;;  %4084 = vrcp.f32 %v2467_v44  ;;  %vm2435_vm12 = vweird.f32 %v4081_v35  ;;  %v2479_v25 = vand.u32 2147483648, %v2467_v44  ;;  %v6908_v38 = vld [vmem:[%s7492_s2 + $0x3b8] sm:$0xff] }
 0x703   :  { %v2449_v63 = vmul.f32 %v4083_v56, %v2447_v14  ;;  %4086 = vtanh.f32 %v2423_v1  ;;  %vm2454_vm13 = vweird.f32 %v4083_v56  ;;  %vm2436_vm0 = vmor %vm2434_vm14, %vm2435_vm12  ;;  %vm2473_vm5 = vweird.f32 %v2467_v44  ;;  %v6914_v14 = vld [vmem:[%s7492_s2 + $0x380] sm:$0xff]  ;;  %v6956_v1 = vld [vmem:[%s7492_s2 + $0x378] sm:$0xff] }
 0x704   :  { %v2431_v60 = vsub.f32 1.0, %v2430_v19  ;;  %vm2455_vm1 = vmor %vm2453_vm15, %vm2454_vm13  ;;  %v2477_v31 = vand.u32 2147483647, %v2467_v44  ;;  %v2480_v11 = vor.u32 1.1754944e-38, %v2479_v25  ;;  %v6968_v19 = vld [vmem:[%s7492_s2 + $0x348] sm:$0xff]  ;;  %v7124_v25 = vld [vmem:[%s7492_s2 + $0x298] sm:$0xff] }
 0x705   :  { %v2450_v20 = vsub.f32 1.0, %v2449_v63  ;;  %v6974_v63 = vld [vmem:[%s7492_s2 + $0x350] sm:$0xff]  ;;  %8096 = vst [vmem:[#allocation42_spill] sm:$0xff] %v7124_v25 }
 0x706   :  { %v2432_v10 = vmul.f32 %v4081_v35, %v2431_v60  ;;  %vm2478_vm7 = vcmp.eq.f32.partialorder %v2477_v31, 8.507059e+37  ;;  %v6980_v60 = vld [vmem:[%s7492_s2 + $0x358] sm:$0xff]  ;;  %v7130_v31 = vld [vmem:[%s7492_s2 + $0x260] sm:$0xff] }
 0x707   :  { %v2451_v18 = vmul.f32 %v4083_v56, %v2450_v20  ;;  %v6986_v20 = vld [vmem:[%s7492_s2 + $0x320] sm:$0xff]  ;;  %8097 = vst [vmem:[#allocation43_spill] sm:$0xff] %v7130_v31 }
 0x708   :  { %v4085_v23 = vpop.eup %4084  ;;  %v2433_v54 = vadd.f32 %v4081_v35, %v2432_v10  ;;  %v7004_v10 = vld [vmem:[%s7492_s2 + $0x338] sm:$0xff] }
 0x709   :  { %v2452_v17 = vadd.f32 %v4083_v56, %v2451_v18  ;;  %v2469_v5 = vmul.f32 %v4085_v23, %v2467_v44  ;;  %v4087_v42 = vpop.eup %4086  ;;  %vm2474_vm4 = vweird.f32 %v4085_v23  ;;  %v6944_v44 = vld [vmem:[%s7492_s2 + $0x368] sm:$0xff] }
 0x70a   :  { %v2437_v29 = vsel %vm2436_vm0, %v4081_v35, %v2433_v54  ;;  %vm2475_vm6 = vmor %vm2473_vm5, %vm2474_vm4  ;;  %v6950_v35 = vld [vmem:[%s7492_s2 + $0x370] sm:$0xff]  ;;  %v7016_v18 = vld [vmem:[%s7492_s2 + $0x308] sm:$0xff] }
 0x70b   :  { %v2442_v12 = vsel %vm2439_vm2, %v2441_v3, %v2437_v29  ;;  %v2456_v49 = vsel %vm2455_vm1, %v4083_v56, %v2452_v17  ;;  %v2470_v46 = vsub.f32 1.0, %v2469_v5  ;;  %v6962_v56 = vld [vmem:[%s7492_s2 + $0x340] sm:$0xff]  ;;  %v7040_v3 = vld [vmem:[%s7492_s2 + $0x2e8] sm:$0xff]  ;;  %v7046_v17 = vld [vmem:[%s7492_s2 + $0x2f0] sm:$0xff] }
 0x70c   :  { %v2461_v36 = vsel %vm2458_vm3, %v2460_v6, %v2456_v49  ;;  %v2485_v51 = vmul.f32 %v4087_v42, %v2442_v12  ;;  %v7034_v54 = vld [vmem:[%s7492_s2 + $0x2e0] sm:$0xff]  ;;  %v7052_v5 = vld [vmem:[%s7492_s2 + $0x2f8] sm:$0xff]  ;;  %v7064_v29 = vld [vmem:[%s7492_s2 + $0x2c8] sm:$0xff] }
 0x70d   :  { %v2484_v52 = vmul.f32 %v2461_v36, %v6760_v37  ;;  %v2471_v34 = vmul.f32 %v4085_v23, %v2470_v46  ;;  %v6842_v37 = vld [vmem:[%s7492_s2 + $0x3e0] sm:$0xff]  ;;  %v7070_v42 = vld [vmem:[%s7492_s2 + $0x2d0] sm:$0xff]  ;;  %v7076_v12 = vld [vmem:[%s7492_s2 + $0x2d8] sm:$0xff] }
 0x70e   :  { %v7058_v6 = vld [vmem:[%s7492_s2 + $0x2c0] sm:$0xff]  ;;  %8087 = vst [vmem:[#allocation41_spill] sm:$0xff] %v7070_v42  ;;  %v7088_v46 = vld [vmem:[%s7492_s2 + $0x2a8] sm:$0xff]  ;;  %v7094_v36 = vld [vmem:[%s7492_s2 + $0x2b0] sm:$0xff] }
 0x70f   :  { %v6836_v39 = vadd.f32 %v2485_v51, %v2484_v52  ;;  %v2472_v58 = vadd.f32 %v4085_v23, %v2471_v34  ;;  %8088 = vst [vmem:[#allocation6_spill] sm:$0xff] %v7076_v12  ;;  %v7082_v49 = vld [vmem:[%s7492_s2 + $0x2a0] sm:$0xff]  ;;  %v7100_v51 = vld [vmem:[%s7492_s2 + $0x2b8] sm:$0xff]  ;;  %v7112_v34 = vld [vmem:[%s7492_s2 + $0x288] sm:$0xff] }
 0x710   :  { %8089 = vst [vmem:[#allocation7_spill] sm:$0xff] %v7082_v49  ;;  %v7106_v52 = vld [vmem:[%s7492_s2 + $0x280] sm:$0xff] }
 0x711   :  { %4088 = vtanh.f32 %v6836_v39  ;;  %v2476_v21 = vsel %vm2475_vm6, %v4085_v23, %v2472_v58  ;;  %v7028_v23 = vld [vmem:[%s7492_s2 + $0x318] sm:$0xff]  ;;  %8090 = vst [vmem:[#allocation13_spill] sm:$0xff] %v7088_v46  ;;  %v7118_v58 = vld [vmem:[%s7492_s2 + $0x290] sm:$0xff] }
 0x712   :  { %v2481_v30 = vsel %vm2478_vm7, %v2480_v11, %v2476_v21  ;;  %8091 = vst [vmem:[#allocation45_spill] sm:$0xff] %v7094_v36  ;;  %v7136_v21 = vld [vmem:[%s7492_s2 + $0x268] sm:$0xff]  ;;  %v7143_v11 = vld [vmem:[%s7492_s2 + $0x278] sm:$0xff] }
 0x713   :  { %8092 = vst [vmem:[#allocation11_spill] sm:$0xff] %v7100_v51 }
 0x714   :  { %8093 = vst [vmem:[#allocation39_spill] sm:$0xff] %v7106_v52 }
 0x715   :  { %8094 = vst [vmem:[#allocation40_spill] sm:$0xff] %v7112_v34 }
 0x716   :  { %8095 = vst [vmem:[#allocation15_spill] sm:$0xff] %v7118_v58 }
 0x717   :  { %v4089_v24 = vpop.eup %4088  ;;  %8098 = vst [vmem:[#allocation44_spill] sm:$0xff] %v7136_v21 }
 0x718   :  { %v2488_v16 = vmul.f32 %v4089_v24, %v2481_v30  ;;  %8099 = vst [vmem:[#allocation19_spill] sm:$0xff] %v7143_v11  ;;  %v7149_v24 = vld [vmem:[%s7492_s2 + $0x240] sm:$0xff]  ;;  %v7155_v30 = vld [vmem:[%s7492_s2 + $0x248] sm:$0xff] }
 0x719   :  { %8100 = vst [vmem:[#allocation47_spill] sm:$0xff] %v7149_v24 }
 0x71a   :  { %2512 = vmatmul.f32.vlgmr.msra.gmra.mxu0 %v2488_v16  ;;  %2532 = vmatmul.f32.vlgmr.msra.gmra.mxu1 %v2488_v16  ;;  %8101 = vst [vmem:[#allocation10_spill] sm:$0xff] %v7155_v30 }
 0x71b   :  { %2552 = vmatmul.f32.vlgmr.msra.gmra.mxu2 %v2488_v16  ;;  %2572 = vmatmul.f32.vlgmr.msra.gmra.mxu3 %v2488_v16  ;;  %v7168_v16 = vld [vmem:[%s7492_s2 + $0x220] sm:$0xff] }
 0x71c   :  { %2806 = vmatpush.msra.mxu0 %v6842_v37  ;;  %2826 = vmatpush.msra.mxu1 %v6848_v59  ;;  %8103 = vst [vmem:[#allocation23_spill] sm:$0xff] %v7168_v16 }
 0x71d   :  { %2846 = vmatpush.msra.mxu2 %v6854_v9  ;;  %2866 = vmatpush.msra.mxu3 %v6860_v48 }
 0x71e   :  { %2807 = vmatpush.msra.mxu0 %v6866_v50  ;;  %2827 = vmatpush.msra.mxu1 %v6872_v57 }
 0x71f   :  { %2847 = vmatpush.msra.mxu2 %v6878_v15  ;;  %2867 = vmatpush.msra.mxu3 %v6884_v62 }
 0x720   :  { %2808 = vmatpush.msra.mxu0 %v6890_v33  ;;  %2828 = vmatpush.msra.mxu1 %v6896_v45 }
 0x721   :  { %2848 = vmatpush.msra.mxu2 %v6902_v55  ;;  %2868 = vmatpush.msra.mxu3 %v6908_v38 }
 0x722   :  { %2809 = vmatpush.msra.mxu0 %v6914_v14  ;;  %2829 = vmatpush.msra.mxu1 %v6920_v4 }
 0x723   :  { %2849 = vmatpush.msra.mxu2 %v6926_v7  ;;  %2869 = vmatpush.msra.mxu3 %v6932_v2 }
 0x724   :  { %2810 = vmatpush.msra.mxu0 %v6938_v32  ;;  %2830 = vmatpush.msra.mxu1 %v6944_v44 }
 0x725   :  { %2850 = vmatpush.msra.mxu2 %v6950_v35  ;;  %2870 = vmatpush.msra.mxu3 %v6956_v1 }
 0x726   :  { %2811 = vmatpush.msra.mxu0 %v6962_v56  ;;  %2831 = vmatpush.msra.mxu1 %v6968_v19 }
 0x727   :  { %2851 = vmatpush.msra.mxu2 %v6974_v63  ;;  %2871 = vmatpush.msra.mxu3 %v6980_v60 }
 0x728   :  { %2812 = vmatpush.msra.mxu0 %v6986_v20  ;;  %2832 = vmatpush.msra.mxu1 %v6992_v26 }
 0x729   :  { %2852 = vmatpush.msra.mxu2 %v6998_v28  ;;  %2872 = vmatpush.msra.mxu3 %v7004_v10 }
 0x72a   :  { %2813 = vmatpush.msra.mxu0 %v7010_v22  ;;  %2833 = vmatpush.msra.mxu1 %v7016_v18 }
 0x72b   :  { %2853 = vmatpush.msra.mxu2 %v7022_v0  ;;  %2873 = vmatpush.msra.mxu3 %v7028_v23 }
 0x72c   :  { %2814 = vmatpush.msra.mxu0 %v7034_v54  ;;  %2834 = vmatpush.msra.mxu1 %v7040_v3 }
 0x72d   :  { %2854 = vmatpush.msra.mxu2 %v7046_v17  ;;  %2874 = vmatpush.msra.mxu3 %v7052_v5 }
 0x72e   :  { %2815 = vmatpush.msra.mxu0 %v7058_v6  ;;  %2835 = vmatpush.msra.mxu1 %v7064_v29 }
 0x72f   :  { %2855 = vmatpush.msra.mxu2 %v7070_v42  ;;  %2875 = vmatpush.msra.mxu3 %v7076_v12 }
 0x730   :  { %2816 = vmatpush.msra.mxu0 %v7082_v49  ;;  %2836 = vmatpush.msra.mxu1 %v7088_v46 }
 0x731   :  { %2856 = vmatpush.msra.mxu2 %v7094_v36  ;;  %2876 = vmatpush.msra.mxu3 %v7100_v51 }
 0x732   :  { %2817 = vmatpush.msra.mxu0 %v7106_v52  ;;  %2837 = vmatpush.msra.mxu1 %v7112_v34  ;;  %v8110_v34 = vld [vmem:[#allocation32_spill] sm:$0xff] }
 0x733   :  { %2857 = vmatpush.msra.mxu2 %v7118_v58  ;;  %2877 = vmatpush.msra.mxu3 %v7124_v25 }
 0x734   :  { %2818 = vmatpush.msra.mxu0 %v7130_v31  ;;  %2838 = vmatpush.msra.mxu1 %v7136_v21 }
 0x735   :  { %2858 = vmatpush.msra.mxu2 %v8065_v8  ;;  %2878 = vmatpush.msra.mxu3 %v7143_v11  ;;  %v7162_v8 = vld [vmem:[%s7492_s2 + $0x258] sm:$0xff] }
 0x736   :  { %2819 = vmatpush.msra.mxu0 %v7149_v24  ;;  %2839 = vmatpush.msra.mxu1 %v7155_v30  ;;  %8102 = vst [vmem:[#allocation17_spill] sm:$0xff] %v7162_v8  ;;  %v7174_v30 = vld [vmem:[%s7492_s2 + $0x228] sm:$0xff] }
 0x737   :  { %2859 = vmatpush.msra.mxu2 %v8069_v40  ;;  %2879 = vmatpush.msra.mxu3 %v7162_v8  ;;  %8104 = vst [vmem:[#allocation21_spill] sm:$0xff] %v7174_v30  ;;  %v7181_v40 = vld [vmem:[%s7492_s2 + $0x238] sm:$0xff]  ;;  %v8109_v8 = vld [vmem:[#allocation30_spill] sm:$0xff] }
 0x738   :  { %2820 = vmatpush.msra.mxu0 %v7168_v16  ;;  %2840 = vmatpush.msra.mxu1 %v7174_v30  ;;  %8105 = vst [vmem:[#allocation12_spill] sm:$0xff] %v7181_v40  ;;  %v7187_v16 = vld [vmem:[%s7492_s2 + $0x200] sm:$0xff]  ;;  %v7193_v30 = vld [vmem:[%s7492_s2 + $0x208] sm:$0xff]  ;;  %v2077_v24 = vadd.f32 %v8109_v8, %v8081_v13 }
 0x739   :  { %2860 = vmatpush.msra.mxu2 %v8073_v53  ;;  %2880 = vmatpush.msra.mxu3 %v7181_v40  ;;  %8106 = vst [vmem:[#allocation14_spill] sm:$0xff] %v7187_v16  ;;  %v8108_v53 = vld [vmem:[#allocation29_spill] sm:$0xff] }
 0x73a   :  { %2821 = vmatpush.msra.mxu0 %v7187_v16  ;;  %8107 = vst [vmem:[#allocation22_spill] sm:$0xff] %v7193_v30  ;;  %2841 = vmatpush.msra.mxu1 %v7193_v30  ;;  %v2048_v40 = vadd.f32 %v8108_v53, %v8079_v47  ;;  %v2135_v30 = vadd.f32 %v8110_v34, %v8083_v61 }
 0x73b   :  { %2861 = vmatpush.msra.mxu2 %v8077_v43  ;;  %2881 = vmatpush.msra.mxu3 %v8078_v41 }
 0x797   :  { %v2513_v11 = vpop.f32.mrf.mxu0  ;;  %v2533_v21 = vpop.f32.mrf.mxu1 }
 0x798   :  { %v2576_v16 = vadd.f32 %v2513_v11, %v2048_v40  ;;  %v2577_v31 = vadd.f32 %v2533_v21, %v2077_v24  ;;  %v8111_v21 = vld [vmem:[#allocation35_spill] sm:$0xff] }
 0x79a   :  { %v3841_v25 = vmul.f32 -1.442695, %v2576_v16  ;;  %v3842_v58 = vmul.f32 -1.442695, %v2577_v31  ;;  %v2106_v31 = vadd.f32 %v8111_v21, %v8085_v27 }
 0x79c   :  { %4090 = vpow2.f32 %v3841_v25 }
 0x79d   :  { %4092 = vpow2.f32 %v3842_v58 }
 0x79e   :  { %v2573_v43 = vpop.f32.mrf.mxu3  ;;  %v2553_v8 = vpop.f32.mrf.mxu2 }
 0x79f   :  { %v2579_v52 = vadd.f32 %v2573_v43, %v2135_v30  ;;  %v2578_v16 = vadd.f32 %v2553_v8, %v2106_v31 }
 0x7a1   :  { %v3843_v41 = vmul.f32 -1.442695, %v2579_v52 }
 0x7a2   :  { %v4091_v51 = vpop.eup %4090 }
 0x7a3   :  { %v4093_v36 = vpop.eup %4092  ;;  %v2583_v53 = vadd.f32 1.0, %v4091_v51  ;;  %4094 = vpow2.f32 %v3843_v41 }
 0x7a4   :  { %v2602_v47 = vadd.f32 1.0, %v4093_v36 }
 0x7a5   :  { %4096 = vrcp.f32 %v2583_v53  ;;  %v2595_v43 = vand.u32 2147483648, %v2583_v53  ;;  %v2593_v41 = vand.u32 2147483647, %v2583_v53  ;;  %vm2589_vm10 = vweird.f32 %v2583_v53 }
 0x7a6   :  { %4098 = vrcp.f32 %v2602_v47  ;;  %v2614_v51 = vand.u32 2147483648, %v2602_v47  ;;  %v2612_v13 = vand.u32 2147483647, %v2602_v47  ;;  %vm2608_vm11 = vweird.f32 %v2602_v47 }
 0x7a7   :  { %v2596_v8 = vor.u32 1.1754944e-38, %v2595_v43  ;;  %vm2594_vm14 = vcmp.eq.f32.partialorder %v2593_v41, 8.507059e+37 }
 0x7a8   :  { %vm2613_vm15 = vcmp.eq.f32.partialorder %v2612_v13, 8.507059e+37 }
 0x7a9   :  { %v4095_v11 = vpop.eup %4094 }
 0x7aa   :  { %v2622_v25 = vadd.f32 1.0, %v4095_v11 }
 0x7ab   :  { %v4097_v24 = vpop.eup %4096 }
 0x7ac   :  { %v4099_v34 = vpop.eup %4098  ;;  %v2585_v58 = vmul.f32 %v4097_v24, %v2583_v53  ;;  %4100 = vrcp.f32 %v2622_v25  ;;  %vm2590_vm8 = vweird.f32 %v4097_v24  ;;  %vm2628_vm1 = vweird.f32 %v2622_v25 }
 0x7ad   :  { %v2604_v30 = vmul.f32 %v4099_v34, %v2602_v47  ;;  %4102 = vtanh.f32 %v2578_v16  ;;  %vm2609_vm9 = vweird.f32 %v4099_v34  ;;  %vm2591_vm12 = vmor %vm2589_vm10, %vm2590_vm8 }
 0x7ae   :  { %v2586_v52 = vsub.f32 1.0, %v2585_v58  ;;  %vm2610_vm13 = vmor %vm2608_vm11, %vm2609_vm9  ;;  %v2615_v58 = vor.u32 1.1754944e-38, %v2614_v51 }
 0x7af   :  { %v2605_v40 = vsub.f32 1.0, %v2604_v30 }
 0x7b0   :  { %v2587_v36 = vmul.f32 %v4097_v24, %v2586_v52 }
 0x7b1   :  { %v2606_v61 = vmul.f32 %v4099_v34, %v2605_v40 }
 0x7b2   :  { %v4101_v46 = vpop.eup %4100  ;;  %v2588_v21 = vadd.f32 %v4097_v24, %v2587_v36 }
 0x7b3   :  { %v2607_v11 = vadd.f32 %v4099_v34, %v2606_v61  ;;  %v2624_v31 = vmul.f32 %v4101_v46, %v2622_v25  ;;  %v4103_v16 = vpop.eup %4102  ;;  %vm2629_vm0 = vweird.f32 %v4101_v46  ;;  %v2634_v61 = vand.u32 2147483648, %v2622_v25 }
 0x7b4   :  { %v2592_v30 = vsel %vm2591_vm12, %v4097_v24, %v2588_v21  ;;  %v2632_v24 = vand.u32 2147483647, %v2622_v25  ;;  %vm2630_vm2 = vmor %vm2628_vm1, %vm2629_vm0  ;;  %v8118_v25 = vld [vmem:[#allocation39_spill] sm:$0xff]  ;;  %v8119_v21 = vld [vmem:[#allocation40_spill] sm:$0xff] }
 0x7b5   :  { %v2597_v27 = vsel %vm2594_vm14, %v2596_v8, %v2592_v30  ;;  %v2611_v52 = vsel %vm2610_vm13, %v4099_v34, %v2607_v11  ;;  %v2625_v49 = vsub.f32 1.0, %v2624_v31  ;;  %v2635_v51 = vor.u32 1.1754944e-38, %v2634_v61  ;;  %v8120_v8 = vld [vmem:[#allocation15_spill] sm:$0xff]  ;;  %v8121_v11 = vld [vmem:[#allocation42_spill] sm:$0xff]  ;;  %v7263_v30 = vld [vmem:[%s7492_s2 + $0x270] sm:$0xff] }
 0x7b6   :  { %v2616_v40 = vsel %vm2613_vm15, %v2615_v58, %v2611_v52  ;;  %v2640_v12 = vmul.f32 %v4103_v16, %v2597_v27  ;;  %vm2633_vm3 = vcmp.eq.f32.partialorder %v2632_v24, 8.507059e+37  ;;  %v8112_v27 = vld [vmem:[#allocation41_spill] sm:$0xff]  ;;  %v8122_v31 = vld [vmem:[#allocation43_spill] sm:$0xff]  ;;  %v8123_v58 = vld [vmem:[#allocation44_spill] sm:$0xff]  ;;  %8124 = vst [vmem:[#allocation16_spill] sm:$0xff] %v7263_v30 }
 0x7b7   :  { %v2639_v42 = vmul.f32 %v2616_v40, %v6836_v39  ;;  %v2626_v36 = vmul.f32 %v4101_v46, %v2625_v49  ;;  %v8113_v39 = vld [vmem:[#allocation6_spill] sm:$0xff]  ;;  %v8116_v49 = vld [vmem:[#allocation45_spill] sm:$0xff]  ;;  %v8125_v16 = vld [vmem:[#allocation19_spill] sm:$0xff] }
 0x7b8   :  { %v8126_v52 = vld [vmem:[#allocation47_spill] sm:$0xff]  ;;  %v8127_v40 = vld [vmem:[#allocation10_spill] sm:$0xff]  ;;  %v8131_v24 = vld [vmem:[#allocation21_spill] sm:$0xff] }
 0x7b9   :  { %v7207_v53 = vadd.f32 %v2640_v12, %v2639_v42  ;;  %v2627_v47 = vadd.f32 %v4101_v46, %v2626_v36  ;;  %v8114_v42 = vld [vmem:[#allocation7_spill] sm:$0xff]  ;;  %v8115_v12 = vld [vmem:[#allocation13_spill] sm:$0xff]  ;;  %v7272_v36 = vld [vmem:[%s7492_s2 + $0x250] sm:$0xff] }
 0x7ba   :  { %8128 = vst [vmem:[#allocation18_spill] sm:$0xff] %v7272_v36  ;;  %v8130_v61 = vld [vmem:[#allocation23_spill] sm:$0xff] }
 0x7bb   :  { %4104 = vtanh.f32 %v7207_v53  ;;  %v2631_v43 = vsel %vm2630_vm2, %v4101_v46, %v2627_v47  ;;  %v8117_v46 = vld [vmem:[#allocation11_spill] sm:$0xff]  ;;  %v8129_v47 = vld [vmem:[#allocation17_spill] sm:$0xff] }
 0x7bc   :  { %v2636_v34 = vsel %vm2633_vm3, %v2635_v51, %v2631_v43  ;;  %v7281_v43 = vld [vmem:[%s7492_s2 + $0x230] sm:$0xff] }
 0x7bd   :  { %8132 = vst [vmem:[#allocation24_spill] sm:$0xff] %v7281_v43  ;;  %v8133_v51 = vld [vmem:[#allocation12_spill] sm:$0xff] }
 0x7c1   :  { %v4105_v13 = vpop.eup %4104 }
 0x7c2   :  { %v2643_v41 = vmul.f32 %v4105_v13, %v2636_v34  ;;  %v8134_v13 = vld [vmem:[#allocation14_spill] sm:$0xff] }
 0x7c3   :  { %v8135_v34 = vld [vmem:[#allocation22_spill] sm:$0xff] }
 0x7c4   :  { %2667 = vmatmul.f32.vlgmr.msrb.gmra.mxu0 %v2643_v41  ;;  %2687 = vmatmul.f32.vlgmr.msrb.gmra.mxu1 %v2643_v41 }
 0x7c5   :  { %2707 = vmatmul.f32.vlgmr.msrb.gmra.mxu2 %v2643_v41  ;;  %2727 = vmatmul.f32.vlgmr.msrb.gmra.mxu3 %v2643_v41  ;;  %v7290_v41 = vld [vmem:[%s7492_s2 + $0x210] sm:$0xff] }
 0x7c6   :  { %2961 = vmatpush.msrb.mxu0 %v6842_v37  ;;  %2981 = vmatpush.msrb.mxu1 %v6848_v59  ;;  %8136 = vst [vmem:[#allocation27_spill] sm:$0xff] %v7290_v41 }
 0x7c7   :  { %3001 = vmatpush.msrb.mxu2 %v6854_v9  ;;  %3021 = vmatpush.msrb.mxu3 %v6860_v48 }
 0x7c8   :  { %2962 = vmatpush.msrb.mxu0 %v6866_v50  ;;  %2982 = vmatpush.msrb.mxu1 %v6872_v57 }
 0x7c9   :  { %3002 = vmatpush.msrb.mxu2 %v6878_v15  ;;  %3022 = vmatpush.msrb.mxu3 %v6884_v62 }
 0x7ca   :  { %2963 = vmatpush.msrb.mxu0 %v6890_v33  ;;  %2983 = vmatpush.msrb.mxu1 %v6896_v45 }
 0x7cb   :  { %3003 = vmatpush.msrb.mxu2 %v6902_v55  ;;  %3023 = vmatpush.msrb.mxu3 %v6908_v38 }
 0x7cc   :  { %2964 = vmatpush.msrb.mxu0 %v6914_v14  ;;  %2984 = vmatpush.msrb.mxu1 %v6920_v4 }
 0x7cd   :  { %3004 = vmatpush.msrb.mxu2 %v6926_v7  ;;  %3024 = vmatpush.msrb.mxu3 %v6932_v2 }
 0x7ce   :  { %2965 = vmatpush.msrb.mxu0 %v6938_v32  ;;  %2985 = vmatpush.msrb.mxu1 %v6944_v44 }
 0x7cf   :  { %3005 = vmatpush.msrb.mxu2 %v6950_v35  ;;  %3025 = vmatpush.msrb.mxu3 %v6956_v1 }
 0x7d0   :  { %2966 = vmatpush.msrb.mxu0 %v6962_v56  ;;  %2986 = vmatpush.msrb.mxu1 %v6968_v19 }
 0x7d1   :  { %3006 = vmatpush.msrb.mxu2 %v6974_v63  ;;  %3026 = vmatpush.msrb.mxu3 %v6980_v60 }
 0x7d2   :  { %2967 = vmatpush.msrb.mxu0 %v6986_v20  ;;  %2987 = vmatpush.msrb.mxu1 %v6992_v26 }
 0x7d3   :  { %3007 = vmatpush.msrb.mxu2 %v6998_v28  ;;  %3027 = vmatpush.msrb.mxu3 %v7004_v10 }
 0x7d4   :  { %2968 = vmatpush.msrb.mxu0 %v7010_v22  ;;  %2988 = vmatpush.msrb.mxu1 %v7016_v18 }
 0x7d5   :  { %3008 = vmatpush.msrb.mxu2 %v7022_v0  ;;  %3028 = vmatpush.msrb.mxu3 %v7028_v23 }
 0x7d6   :  { %2969 = vmatpush.msrb.mxu0 %v7034_v54  ;;  %2989 = vmatpush.msrb.mxu1 %v7040_v3 }
 0x7d7   :  { %3009 = vmatpush.msrb.mxu2 %v7046_v17  ;;  %3029 = vmatpush.msrb.mxu3 %v7052_v5 }
 0x7d8   :  { %2970 = vmatpush.msrb.mxu0 %v7058_v6  ;;  %2990 = vmatpush.msrb.mxu1 %v7064_v29 }
 0x7d9   :  { %3010 = vmatpush.msrb.mxu2 %v8112_v27  ;;  %3030 = vmatpush.msrb.mxu3 %v8113_v39 }
 0x7da   :  { %2971 = vmatpush.msrb.mxu0 %v8114_v42  ;;  %2991 = vmatpush.msrb.mxu1 %v8115_v12 }
 0x7db   :  { %3011 = vmatpush.msrb.mxu2 %v8116_v49  ;;  %3031 = vmatpush.msrb.mxu3 %v8117_v46 }
 0x7dc   :  { %2972 = vmatpush.msrb.mxu0 %v8118_v25  ;;  %2992 = vmatpush.msrb.mxu1 %v8119_v21 }
 0x7dd   :  { %3012 = vmatpush.msrb.mxu2 %v8120_v8  ;;  %3032 = vmatpush.msrb.mxu3 %v8121_v11 }
 0x7de   :  { %2973 = vmatpush.msrb.mxu0 %v8122_v31  ;;  %2993 = vmatpush.msrb.mxu1 %v8123_v58  ;;  %v8143_v31 = vld [vmem:[#allocation36_spill] sm:$0xff] }
 0x7df   :  { %3013 = vmatpush.msrb.mxu2 %v7263_v30  ;;  %3033 = vmatpush.msrb.mxu3 %v8125_v16 }
 0x7e0   :  { %2974 = vmatpush.msrb.mxu0 %v8126_v52  ;;  %2994 = vmatpush.msrb.mxu1 %v8127_v40 }
 0x7e1   :  { %3014 = vmatpush.msrb.mxu2 %v7272_v36  ;;  %3034 = vmatpush.msrb.mxu3 %v8129_v47  ;;  %v8141_v47 = vld [vmem:[#allocation33_spill] sm:$0xff] }
 0x7e2   :  { %2975 = vmatpush.msrb.mxu0 %v8130_v61  ;;  %2995 = vmatpush.msrb.mxu1 %v8131_v24  ;;  %v7296_v24 = vld [vmem:[%s7492_s2 + $0x218] sm:$0xff] }
 0x7e3   :  { %3015 = vmatpush.msrb.mxu2 %v7281_v43  ;;  %3035 = vmatpush.msrb.mxu3 %v8133_v51  ;;  %8137 = vst [vmem:[#allocation20_spill] sm:$0xff] %v7296_v24  ;;  %v8138_v43 = vld [vmem:[#allocation8_spill] sm:$0xff]  ;;  %v8139_v51 = vld [vmem:[#allocation34_spill] sm:$0xff] }
 0x7e4   :  { %2976 = vmatpush.msrb.mxu0 %v8134_v13  ;;  %2996 = vmatpush.msrb.mxu1 %v8135_v34  ;;  %v2050_v61 = vadd.f32 %v8139_v51, %v8138_v43  ;;  %v8140_v13 = vld [vmem:[#allocation9_spill] sm:$0xff] }
 0x7e5   :  { %3016 = vmatpush.msrb.mxu2 %v7290_v41  ;;  %3036 = vmatpush.msrb.mxu3 %v7296_v24  ;;  %v2079_v34 = vadd.f32 %v8141_v47, %v8140_v13  ;;  %v8142_v41 = vld [vmem:[#allocation55_spill] sm:$0xff] }
 0x7e6   :  { %v2137_v11 = vadd.f32 %v8143_v31, %v8142_v41 }
 0x841   :  { %v2668_v36 = vpop.f32.mrf.mxu0  ;;  %v2688_v40 = vpop.f32.mrf.mxu1 }
 0x842   :  { %v2731_v52 = vadd.f32 %v2668_v36, %v2050_v61  ;;  %v2732_v16 = vadd.f32 %v2688_v40, %v2079_v34  ;;  %v8144_v40 = vld [vmem:[#allocation61_spill] sm:$0xff] }
 0x844   :  { %v3844_v30 = vmul.f32 -1.442695, %v2731_v52  ;;  %v3845_v58 = vmul.f32 -1.442695, %v2732_v16  ;;  %v8145_v52 = vld [vmem:[#allocation46_spill] sm:$0xff] }
 0x845   :  { %v2108_v16 = vadd.f32 %v8145_v52, %v8144_v40 }
 0x846   :  { %4106 = vpow2.f32 %v3844_v30 }
 0x847   :  { %4108 = vpow2.f32 %v3845_v58 }
 0x848   :  { %v2728_v8 = vpop.f32.mrf.mxu3  ;;  %v2708_v47 = vpop.f32.mrf.mxu2 }
 0x849   :  { %v2734_v21 = vadd.f32 %v2728_v8, %v2137_v11  ;;  %v2733_v34 = vadd.f32 %v2708_v47, %v2108_v16 }
 0x84b   :  { %v3846_v24 = vmul.f32 -1.442695, %v2734_v21 }
 0x84c   :  { %v4107_v25 = vpop.eup %4106 }
 0x84d   :  { %v4109_v46 = vpop.eup %4108  ;;  %v2738_v51 = vadd.f32 1.0, %v4107_v25  ;;  %4110 = vpow2.f32 %v3846_v24 }
 0x84e   :  { %v2757_v43 = vadd.f32 1.0, %v4109_v46 }
 0x84f   :  { %4112 = vrcp.f32 %v2738_v51  ;;  %v2750_v41 = vand.u32 2147483648, %v2738_v51  ;;  %v2748_v24 = vand.u32 2147483647, %v2738_v51  ;;  %vm2744_vm6 = vweird.f32 %v2738_v51 }
 0x850   :  { %4114 = vrcp.f32 %v2757_v43  ;;  %v2769_v25 = vand.u32 2147483648, %v2757_v43  ;;  %v2767_v49 = vand.u32 2147483647, %v2757_v43  ;;  %vm2763_vm7 = vweird.f32 %v2757_v43 }
 0x851   :  { %v2751_v47 = vor.u32 1.1754944e-38, %v2750_v41  ;;  %vm2749_vm10 = vcmp.eq.f32.partialorder %v2748_v24, 8.507059e+37 }
 0x852   :  { %vm2768_vm11 = vcmp.eq.f32.partialorder %v2767_v49, 8.507059e+37 }
 0x853   :  { %v4111_v36 = vpop.eup %4110 }
 0x854   :  { %v2777_v30 = vadd.f32 1.0, %v4111_v36 }
 0x855   :  { %v4113_v61 = vpop.eup %4112 }
 0x856   :  { %v4115_v31 = vpop.eup %4114  ;;  %v2740_v58 = vmul.f32 %v4113_v61, %v2738_v51  ;;  %4116 = vrcp.f32 %v2777_v30  ;;  %vm2745_vm4 = vweird.f32 %v4113_v61  ;;  %vm2783_vm13 = vweird.f32 %v2777_v30 }
 0x857   :  { %v2759_v8 = vmul.f32 %v4115_v31, %v2757_v43  ;;  %4118 = vtanh.f32 %v2733_v34  ;;  %vm2764_vm5 = vweird.f32 %v4115_v31  ;;  %vm2746_vm8 = vmor %vm2744_vm6, %vm2745_vm4  ;;  %v2787_v41 = vand.u32 2147483647, %v2777_v30 }
 0x858   :  { %v2741_v21 = vsub.f32 1.0, %v2740_v58  ;;  %vm2765_vm9 = vmor %vm2763_vm7, %vm2764_vm5  ;;  %v2770_v58 = vor.u32 1.1754944e-38, %v2769_v25 }
 0x859   :  { %v2760_v11 = vsub.f32 1.0, %v2759_v8  ;;  %vm2788_vm15 = vcmp.eq.f32.partialorder %v2787_v41, 8.507059e+37  ;;  %v8165_v41 = vld [vmem:[#allocation21_spill] sm:$0xff] }
 0x85a   :  { %v2742_v46 = vmul.f32 %v4113_v61, %v2741_v21 }
 0x85b   :  { %v2761_v13 = vmul.f32 %v4115_v31, %v2760_v11 }
 0x85c   :  { %v4117_v12 = vpop.eup %4116  ;;  %v2743_v52 = vadd.f32 %v4113_v61, %v2742_v46 }
 0x85d   :  { %v2762_v36 = vadd.f32 %v4115_v31, %v2761_v13  ;;  %v2779_v16 = vmul.f32 %v4117_v12, %v2777_v30  ;;  %v4119_v34 = vpop.eup %4118  ;;  %vm2784_vm12 = vweird.f32 %v4117_v12  ;;  %v2789_v13 = vand.u32 2147483648, %v2777_v30  ;;  %v8152_v30 = vld [vmem:[#allocation39_spill] sm:$0xff] }
 0x85e   :  { %v2747_v8 = vsel %vm2746_vm8, %v4113_v61, %v2743_v52  ;;  %vm2785_vm14 = vmor %vm2783_vm13, %vm2784_vm12  ;;  %v8153_v52 = vld [vmem:[#allocation40_spill] sm:$0xff] }
 0x85f   :  { %v2752_v40 = vsel %vm2749_vm10, %v2751_v47, %v2747_v8  ;;  %v2766_v21 = vsel %vm2765_vm9, %v4115_v31, %v2762_v36  ;;  %v2780_v42 = vsub.f32 1.0, %v2779_v16  ;;  %v2790_v25 = vor.u32 1.1754944e-38, %v2789_v13  ;;  %v8154_v47 = vld [vmem:[#allocation15_spill] sm:$0xff]  ;;  %v8155_v36 = vld [vmem:[#allocation42_spill] sm:$0xff]  ;;  %v8158_v8 = vld [vmem:[#allocation16_spill] sm:$0xff] }
 0x860   :  { %v2771_v11 = vsel %vm2768_vm11, %v2770_v58, %v2766_v21  ;;  %v2795_v39 = vmul.f32 %v4119_v34, %v2752_v40  ;;  %v8151_v40 = vld [vmem:[#allocation11_spill] sm:$0xff]  ;;  %v8157_v58 = vld [vmem:[#allocation44_spill] sm:$0xff] }
 0x861   :  { %v2794_v27 = vmul.f32 %v2771_v11, %v7207_v53  ;;  %v2781_v46 = vmul.f32 %v4117_v12, %v2780_v42  ;;  %v8146_v53 = vld [vmem:[#allocation41_spill] sm:$0xff]  ;;  %v8156_v16 = vld [vmem:[#allocation43_spill] sm:$0xff]  ;;  %v8161_v11 = vld [vmem:[#allocation10_spill] sm:$0xff] }
 0x862   :  { %v8149_v42 = vld [vmem:[#allocation13_spill] sm:$0xff]  ;;  %v8159_v34 = vld [vmem:[#allocation19_spill] sm:$0xff] }
 0x863   :  { %v7308_v51 = vadd.f32 %v2795_v39, %v2794_v27  ;;  %v2782_v43 = vadd.f32 %v4117_v12, %v2781_v46  ;;  %v8147_v27 = vld [vmem:[#allocation6_spill] sm:$0xff]  ;;  %v8148_v39 = vld [vmem:[#allocation7_spill] sm:$0xff] }
 0x864   :  { %v8160_v21 = vld [vmem:[#allocation47_spill] sm:$0xff]  ;;  %v8162_v46 = vld [vmem:[#allocation18_spill] sm:$0xff] }
 0x865   :  { %4120 = vtanh.f32 %v7308_v51  ;;  %v2786_v61 = vsel %vm2785_vm14, %v4117_v12, %v2782_v43  ;;  %v8150_v12 = vld [vmem:[#allocation45_spill] sm:$0xff]  ;;  %v8164_v13 = vld [vmem:[#allocation23_spill] sm:$0xff] }
 0x866   :  { %v2791_v31 = vsel %vm2788_vm15, %v2790_v25, %v2786_v61  ;;  %v8163_v43 = vld [vmem:[#allocation17_spill] sm:$0xff]  ;;  %v8166_v61 = vld [vmem:[#allocation24_spill] sm:$0xff] }
 0x867   :  { %v8167_v25 = vld [vmem:[#allocation12_spill] sm:$0xff] }
 0x86b   :  { %v4121_v49 = vpop.eup %4120 }
 0x86c   :  { %v2798_v24 = vmul.f32 %v4121_v49, %v2791_v31  ;;  %v8168_v49 = vld [vmem:[#allocation14_spill] sm:$0xff] }
 0x86d   :  { %v8169_v31 = vld [vmem:[#allocation22_spill] sm:$0xff] }
 0x86e   :  { %2822 = vmatmul.f32.vlgmr.msra.gmra.mxu0 %v2798_v24  ;;  %2842 = vmatmul.f32.vlgmr.msra.gmra.mxu1 %v2798_v24 }
 0x86f   :  { %2862 = vmatmul.f32.vlgmr.msra.gmra.mxu2 %v2798_v24  ;;  %2882 = vmatmul.f32.vlgmr.msra.gmra.mxu3 %v2798_v24  ;;  %v8170_v24 = vld [vmem:[#allocation27_spill] sm:$0xff] }
 0x870   :  { %3116 = vmatpush.msra.mxu0 %v6842_v37  ;;  %3136 = vmatpush.msra.mxu1 %v6848_v59 }
 0x871   :  { %3156 = vmatpush.msra.mxu2 %v6854_v9  ;;  %3176 = vmatpush.msra.mxu3 %v6860_v48 }
 0x872   :  { %3117 = vmatpush.msra.mxu0 %v6866_v50  ;;  %3137 = vmatpush.msra.mxu1 %v6872_v57 }
 0x873   :  { %3157 = vmatpush.msra.mxu2 %v6878_v15  ;;  %3177 = vmatpush.msra.mxu3 %v6884_v62 }
 0x874   :  { %3118 = vmatpush.msra.mxu0 %v6890_v33  ;;  %3138 = vmatpush.msra.mxu1 %v6896_v45 }
 0x875   :  { %3158 = vmatpush.msra.mxu2 %v6902_v55  ;;  %3178 = vmatpush.msra.mxu3 %v6908_v38 }
 0x876   :  { %3119 = vmatpush.msra.mxu0 %v6914_v14  ;;  %3139 = vmatpush.msra.mxu1 %v6920_v4 }
 0x877   :  { %3159 = vmatpush.msra.mxu2 %v6926_v7  ;;  %3179 = vmatpush.msra.mxu3 %v6932_v2 }
 0x878   :  { %3120 = vmatpush.msra.mxu0 %v6938_v32  ;;  %3140 = vmatpush.msra.mxu1 %v6944_v44 }
 0x879   :  { %3160 = vmatpush.msra.mxu2 %v6950_v35  ;;  %3180 = vmatpush.msra.mxu3 %v6956_v1 }
 0x87a   :  { %3121 = vmatpush.msra.mxu0 %v6962_v56  ;;  %3141 = vmatpush.msra.mxu1 %v6968_v19 }
 0x87b   :  { %3161 = vmatpush.msra.mxu2 %v6974_v63  ;;  %3181 = vmatpush.msra.mxu3 %v6980_v60 }
 0x87c   :  { %3122 = vmatpush.msra.mxu0 %v6986_v20  ;;  %3142 = vmatpush.msra.mxu1 %v6992_v26 }
 0x87d   :  { %3162 = vmatpush.msra.mxu2 %v6998_v28  ;;  %3182 = vmatpush.msra.mxu3 %v7004_v10 }
 0x87e   :  { %3123 = vmatpush.msra.mxu0 %v7010_v22  ;;  %3143 = vmatpush.msra.mxu1 %v7016_v18 }
 0x87f   :  { %3163 = vmatpush.msra.mxu2 %v7022_v0  ;;  %3183 = vmatpush.msra.mxu3 %v7028_v23 }
 0x880   :  { %3124 = vmatpush.msra.mxu0 %v7034_v54  ;;  %3144 = vmatpush.msra.mxu1 %v7040_v3 }
 0x881   :  { %3164 = vmatpush.msra.mxu2 %v7046_v17  ;;  %3184 = vmatpush.msra.mxu3 %v7052_v5 }
 0x882   :  { %3125 = vmatpush.msra.mxu0 %v7058_v6  ;;  %3145 = vmatpush.msra.mxu1 %v7064_v29 }
 0x883   :  { %3165 = vmatpush.msra.mxu2 %v8146_v53  ;;  %3185 = vmatpush.msra.mxu3 %v8147_v27 }
 0x884   :  { %3126 = vmatpush.msra.mxu0 %v8148_v39  ;;  %3146 = vmatpush.msra.mxu1 %v8149_v42 }
 0x885   :  { %3166 = vmatpush.msra.mxu2 %v8150_v12  ;;  %3186 = vmatpush.msra.mxu3 %v8151_v40 }
 0x886   :  { %3127 = vmatpush.msra.mxu0 %v8152_v30  ;;  %3147 = vmatpush.msra.mxu1 %v8153_v52 }
 0x887   :  { %3167 = vmatpush.msra.mxu2 %v8154_v47  ;;  %3187 = vmatpush.msra.mxu3 %v8155_v36  ;;  %v8177_v47 = vld [vmem:[#allocation57_spill] sm:$0xff] }
 0x888   :  { %3128 = vmatpush.msra.mxu0 %v8156_v16  ;;  %3148 = vmatpush.msra.mxu1 %v8157_v58 }
 0x889   :  { %3168 = vmatpush.msra.mxu2 %v8158_v8  ;;  %3188 = vmatpush.msra.mxu3 %v8159_v34  ;;  %v8175_v8 = vld [vmem:[#allocation56_spill] sm:$0xff] }
 0x88a   :  { %3129 = vmatpush.msra.mxu0 %v8160_v21  ;;  %3149 = vmatpush.msra.mxu1 %v8161_v11  ;;  %v8171_v21 = vld [vmem:[#allocation20_spill] sm:$0xff] }
 0x88b   :  { %3169 = vmatpush.msra.mxu2 %v8162_v46  ;;  %3189 = vmatpush.msra.mxu3 %v8163_v43  ;;  %v8172_v11 = vld [vmem:[#allocation8_spill] sm:$0xff]  ;;  %v8173_v46 = vld [vmem:[#allocation38_spill] sm:$0xff]  ;;  %v8174_v43 = vld [vmem:[#allocation9_spill] sm:$0xff] }
 0x88c   :  { %3130 = vmatpush.msra.mxu0 %v8164_v13  ;;  %3150 = vmatpush.msra.mxu1 %v8165_v41  ;;  %v2053_v34 = vadd.f32 %v8173_v46, %v8172_v11  ;;  %v2082_v13 = vadd.f32 %v8175_v8, %v8174_v43 }
 0x88d   :  { %3170 = vmatpush.msra.mxu2 %v8166_v61  ;;  %3190 = vmatpush.msra.mxu3 %v8167_v25 }
 0x88e   :  { %3131 = vmatpush.msra.mxu0 %v8168_v49  ;;  %3151 = vmatpush.msra.mxu1 %v8169_v31  ;;  %v8176_v49 = vld [vmem:[#allocation55_spill] sm:$0xff] }
 0x88f   :  { %3171 = vmatpush.msra.mxu2 %v8170_v24  ;;  %3191 = vmatpush.msra.mxu3 %v8171_v21  ;;  %v2140_v31 = vadd.f32 %v8177_v47, %v8176_v49 }
 0x8eb   :  { %v2823_v58 = vpop.f32.mrf.mxu0  ;;  %v2843_v41 = vpop.f32.mrf.mxu1 }
 0x8ec   :  { %v2886_v16 = vadd.f32 %v2823_v58, %v2053_v34  ;;  %v2887_v61 = vadd.f32 %v2843_v41, %v2082_v13  ;;  %v8178_v34 = vld [vmem:[#allocation61_spill] sm:$0xff] }
 0x8ee   :  { %v3847_v36 = vmul.f32 -1.442695, %v2886_v16  ;;  %v3848_v25 = vmul.f32 -1.442695, %v2887_v61  ;;  %v8179_v16 = vld [vmem:[#allocation49_spill] sm:$0xff] }
 0x8ef   :  { %v2111_v13 = vadd.f32 %v8179_v16, %v8178_v34 }
 0x8f0   :  { %4122 = vpow2.f32 %v3847_v36 }
 0x8f1   :  { %4124 = vpow2.f32 %v3848_v25 }
 0x8f2   :  { %v2883_v24 = vpop.f32.mrf.mxu3  ;;  %v2863_v8 = vpop.f32.mrf.mxu2 }
 0x8f3   :  { %v2889_v52 = vadd.f32 %v2883_v24, %v2140_v31  ;;  %v2888_v61 = vadd.f32 %v2863_v8, %v2111_v13 }
 0x8f5   :  { %v3849_v21 = vmul.f32 -1.442695, %v2889_v52 }
 0x8f6   :  { %v4123_v30 = vpop.eup %4122 }
 0x8f7   :  { %v4125_v40 = vpop.eup %4124  ;;  %v2893_v46 = vadd.f32 1.0, %v4123_v30  ;;  %4126 = vpow2.f32 %v3849_v21 }
 0x8f8   :  { %v2912_v11 = vadd.f32 1.0, %v4125_v40 }
 0x8f9   :  { %4128 = vrcp.f32 %v2893_v46  ;;  %v2905_v49 = vand.u32 2147483648, %v2893_v46  ;;  %v2903_v21 = vand.u32 2147483647, %v2893_v46  ;;  %vm2899_vm2 = vweird.f32 %v2893_v46 }
 0x8fa   :  { %4130 = vrcp.f32 %v2912_v11  ;;  %v2924_v30 = vand.u32 2147483648, %v2912_v11  ;;  %v2922_v12 = vand.u32 2147483647, %v2912_v11  ;;  %vm2918_vm3 = vweird.f32 %v2912_v11 }
 0x8fb   :  { %v2906_v8 = vor.u32 1.1754944e-38, %v2905_v49  ;;  %vm2904_vm6 = vcmp.eq.f32.partialorder %v2903_v21, 8.507059e+37 }
 0x8fc   :  { %vm2923_vm7 = vcmp.eq.f32.partialorder %v2922_v12, 8.507059e+37 }
 0x8fd   :  { %v4127_v58 = vpop.eup %4126 }
 0x8fe   :  { %v2932_v36 = vadd.f32 1.0, %v4127_v58 }
 0x8ff   :  { %v4129_v41 = vpop.eup %4128 }
 0x900   :  { %v4131_v47 = vpop.eup %4130  ;;  %v2895_v25 = vmul.f32 %v4129_v41, %v2893_v46  ;;  %4132 = vrcp.f32 %v2932_v36  ;;  %vm2900_vm0 = vweird.f32 %v4129_v41  ;;  %vm2938_vm9 = vweird.f32 %v2932_v36 }
 0x901   :  { %v2914_v31 = vmul.f32 %v4131_v47, %v2912_v11  ;;  %4134 = vtanh.f32 %v2888_v61  ;;  %vm2919_vm1 = vweird.f32 %v4131_v47  ;;  %vm2901_vm4 = vmor %vm2899_vm2, %vm2900_vm0  ;;  %v2942_v49 = vand.u32 2147483647, %v2932_v36 }
 0x902   :  { %v2896_v52 = vsub.f32 1.0, %v2895_v25  ;;  %vm2920_vm5 = vmor %vm2918_vm3, %vm2919_vm1  ;;  %v2925_v25 = vor.u32 1.1754944e-38, %v2924_v30 }
 0x903   :  { %v2915_v24 = vsub.f32 1.0, %v2914_v31  ;;  %vm2943_vm11 = vcmp.eq.f32.partialorder %v2942_v49, 8.507059e+37 }
 0x904   :  { %v2897_v40 = vmul.f32 %v4129_v41, %v2896_v52 }
 0x905   :  { %v2916_v43 = vmul.f32 %v4131_v47, %v2915_v24 }
 0x906   :  { %v4133_v42 = vpop.eup %4132  ;;  %v2898_v16 = vadd.f32 %v4129_v41, %v2897_v40 }
 0x907   :  { %v2917_v58 = vadd.f32 %v4131_v47, %v2916_v43  ;;  %v2934_v13 = vmul.f32 %v4133_v42, %v2932_v36  ;;  %v4135_v61 = vpop.eup %4134  ;;  %vm2939_vm8 = vweird.f32 %v4133_v42  ;;  %v2944_v43 = vand.u32 2147483648, %v2932_v36 }
 0x908   :  { %v2902_v31 = vsel %vm2901_vm4, %v4129_v41, %v2898_v16  ;;  %vm2940_vm10 = vmor %vm2938_vm9, %vm2939_vm8 }
 0x909   :  { %v2907_v34 = vsel %vm2904_vm6, %v2906_v8, %v2902_v31  ;;  %v2921_v52 = vsel %vm2920_vm5, %v4131_v47, %v2917_v58  ;;  %v2935_v39 = vsub.f32 1.0, %v2934_v13  ;;  %v2945_v30 = vor.u32 1.1754944e-38, %v2944_v43  ;;  %v8212_v31 = vld [vmem:[#allocation61_spill] sm:$0xff] }
 0x90a   :  { %v2926_v24 = vsel %vm2923_vm7, %v2925_v25, %v2921_v52  ;;  %v2950_v27 = vmul.f32 %v4135_v61, %v2907_v34  ;;  %v8213_v61 = vld [vmem:[#allocation51_spill] sm:$0xff] }
 0x90b   :  { %v2949_v53 = vmul.f32 %v2926_v24, %v7308_v51  ;;  %v2936_v40 = vmul.f32 %v4133_v42, %v2935_v39  ;;  %v8210_v51 = vld [vmem:[#allocation55_spill] sm:$0xff]  ;;  %v2113_v52 = vadd.f32 %v8213_v61, %v8212_v31 }
 0x90d   :  { %v7384_v46 = vadd.f32 %v2950_v27, %v2949_v53  ;;  %v2937_v11 = vadd.f32 %v4133_v42, %v2936_v40  ;;  %v8211_v53 = vld [vmem:[#allocation62_spill] sm:$0xff] }
 0x90e   :  { %v2142_v27 = vadd.f32 %v8211_v53, %v8210_v51 }
 0x90f   :  { %4136 = vtanh.f32 %v7384_v46  ;;  %v2941_v41 = vsel %vm2940_vm10, %v4133_v42, %v2937_v11 }
 0x910   :  { %v2946_v47 = vsel %vm2943_vm11, %v2945_v30, %v2941_v41 }
 0x915   :  { %v4137_v12 = vpop.eup %4136 }
 0x916   :  { %v2953_v21 = vmul.f32 %v4137_v12, %v2946_v47 }
 0x918   :  { %2977 = vmatmul.f32.vlgmr.msrb.gmra.mxu0 %v2953_v21  ;;  %2997 = vmatmul.f32.vlgmr.msrb.gmra.mxu1 %v2953_v21 }
 0x919   :  { %3017 = vmatmul.f32.vlgmr.msrb.gmra.mxu2 %v2953_v21  ;;  %3037 = vmatmul.f32.vlgmr.msrb.gmra.mxu3 %v2953_v21 }
 0x91a   :  { %3271 = vmatpush.msrb.mxu0 %v6842_v37  ;;  %3291 = vmatpush.msrb.mxu1 %v6848_v59  ;;  %v8180_v37 = vld [vmem:[#allocation41_spill] sm:$0xff]  ;;  %v8181_v59 = vld [vmem:[#allocation6_spill] sm:$0xff] }
 0x91b   :  { %3311 = vmatpush.msrb.mxu2 %v6854_v9  ;;  %3331 = vmatpush.msrb.mxu3 %v6860_v48  ;;  %v8182_v9 = vld [vmem:[#allocation7_spill] sm:$0xff]  ;;  %v8183_v48 = vld [vmem:[#allocation13_spill] sm:$0xff] }
 0x91c   :  { %3272 = vmatpush.msrb.mxu0 %v6866_v50  ;;  %3292 = vmatpush.msrb.mxu1 %v6872_v57  ;;  %v8184_v50 = vld [vmem:[#allocation45_spill] sm:$0xff]  ;;  %v8185_v57 = vld [vmem:[#allocation11_spill] sm:$0xff] }
 0x91d   :  { %3312 = vmatpush.msrb.mxu2 %v6878_v15  ;;  %3332 = vmatpush.msrb.mxu3 %v6884_v62  ;;  %v8186_v15 = vld [vmem:[#allocation39_spill] sm:$0xff]  ;;  %v8187_v62 = vld [vmem:[#allocation40_spill] sm:$0xff] }
 0x91e   :  { %3273 = vmatpush.msrb.mxu0 %v6890_v33  ;;  %3293 = vmatpush.msrb.mxu1 %v6896_v45  ;;  %v8188_v33 = vld [vmem:[#allocation15_spill] sm:$0xff]  ;;  %v8189_v45 = vld [vmem:[#allocation42_spill] sm:$0xff] }
 0x91f   :  { %3313 = vmatpush.msrb.mxu2 %v6902_v55  ;;  %3333 = vmatpush.msrb.mxu3 %v6908_v38  ;;  %v8190_v55 = vld [vmem:[#allocation43_spill] sm:$0xff]  ;;  %v8191_v38 = vld [vmem:[#allocation44_spill] sm:$0xff] }
 0x920   :  { %3274 = vmatpush.msrb.mxu0 %v6914_v14  ;;  %3294 = vmatpush.msrb.mxu1 %v6920_v4  ;;  %v8192_v14 = vld [vmem:[#allocation16_spill] sm:$0xff]  ;;  %v8193_v4 = vld [vmem:[#allocation19_spill] sm:$0xff] }
 0x921   :  { %3314 = vmatpush.msrb.mxu2 %v6926_v7  ;;  %3334 = vmatpush.msrb.mxu3 %v6932_v2  ;;  %v8194_v7 = vld [vmem:[#allocation47_spill] sm:$0xff]  ;;  %v8195_v2 = vld [vmem:[#allocation10_spill] sm:$0xff] }
 0x922   :  { %3275 = vmatpush.msrb.mxu0 %v6938_v32  ;;  %3295 = vmatpush.msrb.mxu1 %v6944_v44  ;;  %v8196_v32 = vld [vmem:[#allocation18_spill] sm:$0xff]  ;;  %v8197_v44 = vld [vmem:[#allocation17_spill] sm:$0xff] }
 0x923   :  { %3315 = vmatpush.msrb.mxu2 %v6950_v35  ;;  %3335 = vmatpush.msrb.mxu3 %v6956_v1  ;;  %v8198_v35 = vld [vmem:[#allocation23_spill] sm:$0xff]  ;;  %v8199_v1 = vld [vmem:[#allocation21_spill] sm:$0xff] }
 0x924   :  { %3276 = vmatpush.msrb.mxu0 %v6962_v56  ;;  %3296 = vmatpush.msrb.mxu1 %v6968_v19  ;;  %v8200_v56 = vld [vmem:[#allocation24_spill] sm:$0xff] }
 0x925   :  { %3316 = vmatpush.msrb.mxu2 %v6974_v63  ;;  %3336 = vmatpush.msrb.mxu3 %v6980_v60  ;;  %v8201_v19 = vld [vmem:[#allocation12_spill] sm:$0xff]  ;;  %v8202_v63 = vld [vmem:[#allocation14_spill] sm:$0xff] }
 0x926   :  { %3277 = vmatpush.msrb.mxu0 %v6986_v20  ;;  %3297 = vmatpush.msrb.mxu1 %v6992_v26  ;;  %v8203_v60 = vld [vmem:[#allocation22_spill] sm:$0xff]  ;;  %v8204_v20 = vld [vmem:[#allocation27_spill] sm:$0xff]  ;;  %v8205_v26 = vld [vmem:[#allocation20_spill] sm:$0xff] }
 0x927   :  { %3317 = vmatpush.msrb.mxu2 %v6998_v28  ;;  %3337 = vmatpush.msrb.mxu3 %v7004_v10  ;;  %v8206_v28 = vld [vmem:[#allocation8_spill] sm:$0xff] }
 0x928   :  { %3278 = vmatpush.msrb.mxu0 %v7010_v22  ;;  %3298 = vmatpush.msrb.mxu1 %v7016_v18  ;;  %v8207_v10 = vld [vmem:[#allocation48_spill] sm:$0xff]  ;;  %v8208_v18 = vld [vmem:[#allocation9_spill] sm:$0xff] }
 0x929   :  { %3318 = vmatpush.msrb.mxu2 %v7022_v0  ;;  %3338 = vmatpush.msrb.mxu3 %v7028_v23  ;;  %v2055_v22 = vadd.f32 %v8207_v10, %v8206_v28  ;;  %v8209_v0 = vld [vmem:[#allocation60_spill] sm:$0xff] }
 0x92a   :  { %3279 = vmatpush.msrb.mxu0 %v7034_v54  ;;  %3299 = vmatpush.msrb.mxu1 %v7040_v3  ;;  %v2084_v23 = vadd.f32 %v8209_v0, %v8208_v18 }
 0x92b   :  { %3319 = vmatpush.msrb.mxu2 %v7046_v17  ;;  %3339 = vmatpush.msrb.mxu3 %v7052_v5 }
 0x92c   :  { %3280 = vmatpush.msrb.mxu0 %v7058_v6  ;;  %3300 = vmatpush.msrb.mxu1 %v7064_v29 }
 0x92d   :  { %3320 = vmatpush.msrb.mxu2 %v8180_v37  ;;  %3340 = vmatpush.msrb.mxu3 %v8181_v59 }
 0x92e   :  { %3281 = vmatpush.msrb.mxu0 %v8182_v9  ;;  %3301 = vmatpush.msrb.mxu1 %v8183_v48 }
 0x92f   :  { %3321 = vmatpush.msrb.mxu2 %v8184_v50  ;;  %3341 = vmatpush.msrb.mxu3 %v8185_v57 }
 0x930   :  { %3282 = vmatpush.msrb.mxu0 %v8186_v15  ;;  %3302 = vmatpush.msrb.mxu1 %v8187_v62 }
 0x931   :  { %3322 = vmatpush.msrb.mxu2 %v8188_v33  ;;  %3342 = vmatpush.msrb.mxu3 %v8189_v45 }
 0x932   :  { %3283 = vmatpush.msrb.mxu0 %v8190_v55  ;;  %3303 = vmatpush.msrb.mxu1 %v8191_v38 }
 0x933   :  { %3323 = vmatpush.msrb.mxu2 %v8192_v14  ;;  %3343 = vmatpush.msrb.mxu3 %v8193_v4 }
 0x934   :  { %3284 = vmatpush.msrb.mxu0 %v8194_v7  ;;  %3304 = vmatpush.msrb.mxu1 %v8195_v2 }
 0x935   :  { %3324 = vmatpush.msrb.mxu2 %v8196_v32  ;;  %3344 = vmatpush.msrb.mxu3 %v8197_v44 }
 0x936   :  { %3285 = vmatpush.msrb.mxu0 %v8198_v35  ;;  %3305 = vmatpush.msrb.mxu1 %v8199_v1 }
 0x937   :  { %3325 = vmatpush.msrb.mxu2 %v8200_v56  ;;  %3345 = vmatpush.msrb.mxu3 %v8201_v19 }
 0x938   :  { %3286 = vmatpush.msrb.mxu0 %v8202_v63  ;;  %3306 = vmatpush.msrb.mxu1 %v8203_v60 }
 0x939   :  { %3326 = vmatpush.msrb.mxu2 %v8204_v20  ;;  %3346 = vmatpush.msrb.mxu3 %v8205_v26 }
 0x995   :  { %v2978_v54 = vpop.f32.mrf.mxu0  ;;  %v2998_v3 = vpop.f32.mrf.mxu1 }
 0x996   :  { %v3041_v17 = vadd.f32 %v2978_v54, %v2055_v22  ;;  %v3042_v5 = vadd.f32 %v2998_v3, %v2084_v23  ;;  %v8215_v23 = vld [vmem:[#allocation50_spill] sm:$0xff] }
 0x997   :  { %v2087_v54 = vadd.f32 %v8215_v23, %v8208_v18 }
 0x998   :  { %v3850_v6 = vmul.f32 -1.442695, %v3041_v17  ;;  %v3851_v29 = vmul.f32 -1.442695, %v3042_v5 }
 0x99a   :  { %4138 = vpow2.f32 %v3850_v6 }
 0x99b   :  { %4140 = vpow2.f32 %v3851_v29 }
 0x99c   :  { %v3038_v39 = vpop.f32.mrf.mxu3  ;;  %v3018_v13 = vpop.f32.mrf.mxu2 }
 0x99d   :  { %v3044_v42 = vadd.f32 %v3038_v39, %v2142_v27  ;;  %v3043_v11 = vadd.f32 %v3018_v13, %v2113_v52  ;;  %v8216_v27 = vld [vmem:[#allocation53_spill] sm:$0xff] }
 0x99e   :  { %v2145_v39 = vadd.f32 %v8216_v27, %v8210_v51  ;;  %v8217_v52 = vld [vmem:[#allocation37_spill] sm:$0xff] }
 0x99f   :  { %v3852_v34 = vmul.f32 -1.442695, %v3044_v42 }
 0x9a0   :  { %v4139_v36 = vpop.eup %4138 }
 0x9a1   :  { %v4141_v16 = vpop.eup %4140  ;;  %v3048_v8 = vadd.f32 1.0, %v4139_v36  ;;  %4142 = vpow2.f32 %v3852_v34 }
 0x9a2   :  { %v3067_v58 = vadd.f32 1.0, %v4141_v16 }
 0x9a3   :  { %4144 = vrcp.f32 %v3048_v8  ;;  %v3060_v47 = vand.u32 2147483648, %v3048_v8  ;;  %v3058_v59 = vand.u32 2147483647, %v3048_v8  ;;  %vm3054_vm14 = vweird.f32 %v3048_v8 }
 0x9a4   :  { %4146 = vrcp.f32 %v3067_v58  ;;  %v3079_v21 = vand.u32 2147483648, %v3067_v58  ;;  %v3077_v48 = vand.u32 2147483647, %v3067_v58  ;;  %vm3073_vm15 = vweird.f32 %v3067_v58 }
 0x9a5   :  { %v3061_v15 = vor.u32 1.1754944e-38, %v3060_v47  ;;  %vm3059_vm2 = vcmp.eq.f32.partialorder %v3058_v59, 8.507059e+37 }
 0x9a6   :  { %v3080_v45 = vor.u32 1.1754944e-38, %v3079_v21  ;;  %vm3078_vm3 = vcmp.eq.f32.partialorder %v3077_v48, 8.507059e+37 }
 0x9a7   :  { %v4143_v25 = vpop.eup %4142 }
 0x9a8   :  { %v3087_v24 = vadd.f32 1.0, %v4143_v25 }
 0x9a9   :  { %v4145_v40 = vpop.eup %4144 }
 0x9aa   :  { %v4147_v43 = vpop.eup %4146  ;;  %v3050_v49 = vmul.f32 %v4145_v40, %v3048_v8  ;;  %4148 = vrcp.f32 %v3087_v24  ;;  %vm3055_vm12 = vweird.f32 %v4145_v40  ;;  %v3099_v19 = vand.u32 2147483648, %v3087_v24 }
 0x9ab   :  { %v3069_v41 = vmul.f32 %v4147_v43, %v3067_v58  ;;  %4150 = vtanh.f32 %v3043_v11  ;;  %vm3074_vm13 = vweird.f32 %v4147_v43  ;;  %vm3056_vm0 = vmor %vm3054_vm14, %vm3055_vm12  ;;  %vm3093_vm5 = vweird.f32 %v3087_v24 }
 0x9ac   :  { %v3051_v30 = vsub.f32 1.0, %v3050_v49  ;;  %vm3075_vm1 = vmor %vm3073_vm15, %vm3074_vm13  ;;  %v3097_v63 = vand.u32 2147483647, %v3087_v24  ;;  %v3100_v20 = vor.u32 1.1754944e-38, %v3099_v19 }
 0x9ad   :  { %v3070_v12 = vsub.f32 1.0, %v3069_v41 }
 0x9ae   :  { %v3052_v37 = vmul.f32 %v4145_v40, %v3051_v30  ;;  %vm3098_vm7 = vcmp.eq.f32.partialorder %v3097_v63, 8.507059e+37 }
 0x9af   :  { %v3071_v9 = vmul.f32 %v4147_v43, %v3070_v12 }
 0x9b0   :  { %v4149_v50 = vpop.eup %4148  ;;  %v3053_v57 = vadd.f32 %v4145_v40, %v3052_v37 }
 0x9b1   :  { %v3072_v62 = vadd.f32 %v4147_v43, %v3071_v9  ;;  %v3089_v33 = vmul.f32 %v4149_v50, %v3087_v24  ;;  %v4151_v38 = vpop.eup %4150  ;;  %vm3094_vm4 = vweird.f32 %v4149_v50  ;;  %v2116_v24 = vadd.f32 %v8217_v52, %v8212_v31 }
 0x9b2   :  { %v3057_v55 = vsel %vm3056_vm0, %v4145_v40, %v3053_v57  ;;  %vm3095_vm6 = vmor %vm3093_vm5, %vm3094_vm4 }
 0x9b3   :  { %v3062_v14 = vsel %vm3059_vm2, %v3061_v15, %v3057_v55  ;;  %v3076_v4 = vsel %vm3075_vm1, %v4147_v43, %v3072_v62  ;;  %v3090_v7 = vsub.f32 1.0, %v3089_v33 }
 0x9b4   :  { %v3081_v2 = vsel %vm3078_vm3, %v3080_v45, %v3076_v4  ;;  %v3105_v32 = vmul.f32 %v4151_v38, %v3062_v14 }
 0x9b5   :  { %v3104_v44 = vmul.f32 %v3081_v2, %v7384_v46  ;;  %v3091_v35 = vmul.f32 %v4149_v50, %v3090_v7  ;;  %v8214_v46 = vld [vmem:[#allocation52_spill] sm:$0xff] }
 0x9b6   :  { %v2058_v0 = vadd.f32 %v8214_v46, %v8206_v28 }
 0x9b7   :  { %v7460_v1 = vadd.f32 %v3105_v32, %v3104_v44  ;;  %v3092_v56 = vadd.f32 %v4149_v50, %v3091_v35 }
 0x9b9   :  { %4152 = vtanh.f32 %v7460_v1  ;;  %v3096_v60 = vsel %vm3095_vm6, %v4149_v50, %v3092_v56 }
 0x9ba   :  { %v3101_v10 = vsel %vm3098_vm7, %v3100_v20, %v3096_v60 }
 0x9bf   :  { %v4153_v26 = vpop.eup %4152 }
 0x9c0   :  { %v3108_v22 = vmul.f32 %v4153_v26, %v3101_v10 }
 0x9c2   :  { %3132 = vmatmul.f32.vlgmr.msra.gmra.mxu0 %v3108_v22  ;;  %3152 = vmatmul.f32.vlgmr.msra.gmra.mxu1 %v3108_v22 }
 0x9c3   :  { %3172 = vmatmul.f32.vlgmr.msra.gmra.mxu2 %v3108_v22  ;;  %3192 = vmatmul.f32.vlgmr.msra.gmra.mxu3 %v3108_v22 }
 0xa3f   :  { %v3133_v3 = vpop.f32.mrf.mxu0  ;;  %v3153_v17 = vpop.f32.mrf.mxu1 }
 0xa40   :  { %v3196_v5 = vadd.f32 %v3133_v3, %v2058_v0  ;;  %v3197_v6 = vadd.f32 %v3153_v17, %v2087_v54  ;;  %v8219_v54 = vld [vmem:[#allocation63_spill] sm:$0xff] }
 0xa41   :  { %v2089_v3 = vadd.f32 %v8219_v54, %v8208_v18 }
 0xa42   :  { %v3853_v29 = vmul.f32 -1.442695, %v3196_v5  ;;  %v3854_v53 = vmul.f32 -1.442695, %v3197_v6 }
 0xa44   :  { %4154 = vpow2.f32 %v3853_v29 }
 0xa45   :  { %4156 = vpow2.f32 %v3854_v53 }
 0xa46   :  { %v3193_v42 = vpop.f32.mrf.mxu3  ;;  %v3173_v25 = vpop.f32.mrf.mxu2 }
 0xa47   :  { %v3199_v34 = vadd.f32 %v3193_v42, %v2145_v39  ;;  %v3198_v43 = vadd.f32 %v3173_v25, %v2116_v24  ;;  %v8220_v39 = vld [vmem:[#allocation54_spill] sm:$0xff] }
 0xa48   :  { %v2147_v42 = vadd.f32 %v8220_v39, %v8210_v51 }
 0xa49   :  { %v3855_v36 = vmul.f32 -1.442695, %v3199_v34 }
 0xa4a   :  { %v4155_v16 = vpop.eup %4154 }
 0xa4b   :  { %v4157_v8 = vpop.eup %4156  ;;  %v3203_v58 = vadd.f32 1.0, %v4155_v16  ;;  %4158 = vpow2.f32 %v3855_v36 }
 0xa4c   :  { %v3222_v13 = vadd.f32 1.0, %v4157_v8 }
 0xa4d   :  { %4160 = vrcp.f32 %v3203_v58  ;;  %v3215_v21 = vand.u32 2147483648, %v3203_v58  ;;  %v3213_v9 = vand.u32 2147483647, %v3203_v58  ;;  %vm3209_vm10 = vweird.f32 %v3203_v58 }
 0xa4e   :  { %4162 = vrcp.f32 %v3222_v13  ;;  %v3234_v37 = vand.u32 2147483648, %v3222_v13  ;;  %v3232_v50 = vand.u32 2147483647, %v3222_v13  ;;  %vm3228_vm11 = vweird.f32 %v3222_v13 }
 0xa4f   :  { %v3216_v62 = vor.u32 1.1754944e-38, %v3215_v21  ;;  %vm3214_vm14 = vcmp.eq.f32.partialorder %v3213_v9, 8.507059e+37 }
 0xa50   :  { %v3235_v55 = vor.u32 1.1754944e-38, %v3234_v37  ;;  %vm3233_vm15 = vcmp.eq.f32.partialorder %v3232_v50, 8.507059e+37 }
 0xa51   :  { %v4159_v61 = vpop.eup %4158 }
 0xa52   :  { %v3242_v40 = vadd.f32 1.0, %v4159_v61  ;;  %v8221_v61 = vld [vmem:[#allocation59_spill] sm:$0xff] }
 0xa53   :  { %v4161_v11 = vpop.eup %4160  ;;  %v2118_v52 = vadd.f32 %v8221_v61, %v8212_v31 }
 0xa54   :  { %v4163_v49 = vpop.eup %4162  ;;  %v3205_v41 = vmul.f32 %v4161_v11, %v3203_v58  ;;  %4164 = vrcp.f32 %v3242_v40  ;;  %vm3210_vm8 = vweird.f32 %v4161_v11  ;;  %v3254_v60 = vand.u32 2147483648, %v3242_v40 }
 0xa55   :  { %v3224_v30 = vmul.f32 %v4163_v49, %v3222_v13  ;;  %4166 = vtanh.f32 %v3198_v43  ;;  %vm3229_vm9 = vweird.f32 %v4163_v49  ;;  %vm3211_vm12 = vmor %vm3209_vm10, %vm3210_vm8  ;;  %vm3248_vm1 = vweird.f32 %v3242_v40 }
 0xa56   :  { %v3206_v12 = vsub.f32 1.0, %v3205_v41  ;;  %vm3230_vm13 = vmor %vm3228_vm11, %vm3229_vm9  ;;  %v3252_v20 = vand.u32 2147483647, %v3242_v40  ;;  %v3255_v10 = vor.u32 1.1754944e-38, %v3254_v60 }
 0xa57   :  { %v3225_v47 = vsub.f32 1.0, %v3224_v30 }
 0xa58   :  { %v3207_v59 = vmul.f32 %v4161_v11, %v3206_v12  ;;  %vm3253_vm3 = vcmp.eq.f32.partialorder %v3252_v20, 8.507059e+37 }
 0xa59   :  { %v3226_v48 = vmul.f32 %v4163_v49, %v3225_v47 }
 0xa5a   :  { %v4165_v57 = vpop.eup %4164  ;;  %v3208_v15 = vadd.f32 %v4161_v11, %v3207_v59 }
 0xa5b   :  { %v3227_v33 = vadd.f32 %v4163_v49, %v3226_v48  ;;  %v3244_v45 = vmul.f32 %v4165_v57, %v3242_v40  ;;  %v4167_v14 = vpop.eup %4166  ;;  %vm3249_vm0 = vweird.f32 %v4165_v57 }
 0xa5c   :  { %v3212_v38 = vsel %vm3211_vm12, %v4161_v11, %v3208_v15  ;;  %vm3250_vm2 = vmor %vm3248_vm1, %vm3249_vm0 }
 0xa5d   :  { %v3217_v4 = vsel %vm3214_vm14, %v3216_v62, %v3212_v38  ;;  %v3231_v7 = vsel %vm3230_vm13, %v4163_v49, %v3227_v33  ;;  %v3245_v2 = vsub.f32 1.0, %v3244_v45 }
 0xa5e   :  { %v3236_v32 = vsel %vm3233_vm15, %v3235_v55, %v3231_v7  ;;  %v3260_v44 = vmul.f32 %v4167_v14, %v3217_v4 }
 0xa5f   :  { %v3259_v35 = vmul.f32 %v3236_v32, %v7460_v1  ;;  %v3246_v56 = vmul.f32 %v4165_v57, %v3245_v2  ;;  %v8218_v1 = vld [vmem:[#allocation58_spill] sm:$0xff] }
 0xa60   :  { %v2060_v23 = vadd.f32 %v8218_v1, %v8206_v28 }
 0xa61   :  { %v7472_v19 = vadd.f32 %v3260_v44, %v3259_v35  ;;  %v3247_v63 = vadd.f32 %v4165_v57, %v3246_v56 }
 0xa63   :  { %4168 = vtanh.f32 %v7472_v19  ;;  %v3251_v26 = vsel %vm3250_vm2, %v4165_v57, %v3247_v63 }
 0xa64   :  { %v3256_v46 = vsel %vm3253_vm3, %v3255_v10, %v3251_v26 }
 0xa69   :  { %v4169_v22 = vpop.eup %4168 }
 0xa6a   :  { %v3263_v0 = vmul.f32 %v4169_v22, %v3256_v46 }
 0xa6c   :  { %3287 = vmatmul.f32.vlgmr.msrb.gmra.mxu0 %v3263_v0  ;;  %3307 = vmatmul.f32.vlgmr.msrb.gmra.mxu1 %v3263_v0 }
 0xa6d   :  { %3327 = vmatmul.f32.vlgmr.msrb.gmra.mxu2 %v3263_v0  ;;  %3347 = vmatmul.f32.vlgmr.msrb.gmra.mxu3 %v3263_v0 }
 0xae9   :  { %v3288_v17 = vpop.f32.mrf.mxu0  ;;  %v3308_v5 = vpop.f32.mrf.mxu1 }
 0xaea   :  { %v3351_v6 = vadd.f32 %v3288_v17, %v2060_v23  ;;  %v3352_v29 = vadd.f32 %v3308_v5, %v2089_v3 }
 0xaec   :  { %v3856_v53 = vmul.f32 -1.442695, %v3351_v6  ;;  %v3857_v27 = vmul.f32 -1.442695, %v3352_v29 }
 0xaee   :  { %4170 = vpow2.f32 %v3856_v53 }
 0xaef   :  { %4172 = vpow2.f32 %v3857_v27 }
 0xaf0   :  { %v3348_v34 = vpop.f32.mrf.mxu3  ;;  %v3328_v18 = vpop.f32.mrf.mxu2 }
 0xaf1   :  { %v3354_v36 = vadd.f32 %v3348_v34, %v2147_v42  ;;  %v3353_v11 = vadd.f32 %v3328_v18, %v2118_v52 }
 0xaf3   :  { %v3858_v16 = vmul.f32 -1.442695, %v3354_v36 }
 0xaf4   :  { %v4171_v8 = vpop.eup %4170 }
 0xaf5   :  { %v4173_v58 = vpop.eup %4172  ;;  %v3358_v28 = vadd.f32 1.0, %v4171_v8  ;;  %4174 = vpow2.f32 %v3858_v16 }
 0xaf6   :  { %v3377_v13 = vadd.f32 1.0, %v4173_v58 }
 0xaf7   :  { %4176 = vrcp.f32 %v3358_v28  ;;  %v3370_v12 = vand.u32 2147483648, %v3358_v28  ;;  %v3368_v37 = vand.u32 2147483647, %v3358_v28  ;;  %vm3364_vm6 = vweird.f32 %v3358_v28 }
 0xaf8   :  { %4178 = vrcp.f32 %v3377_v13  ;;  %v3389_v47 = vand.u32 2147483648, %v3377_v13  ;;  %v3387_v9 = vand.u32 2147483647, %v3377_v13  ;;  %vm3383_vm7 = vweird.f32 %v3377_v13 }
 0xaf9   :  { %v3371_v50 = vor.u32 1.1754944e-38, %v3370_v12  ;;  %vm3369_vm10 = vcmp.eq.f32.partialorder %v3368_v37, 8.507059e+37 }
 0xafa   :  { %v3390_v62 = vor.u32 1.1754944e-38, %v3389_v47  ;;  %vm3388_vm11 = vcmp.eq.f32.partialorder %v3387_v9, 8.507059e+37 }
 0xafb   :  { %v4175_v25 = vpop.eup %4174 }
 0xafc   :  { %v3397_v24 = vadd.f32 1.0, %v4175_v25 }
 0xafd   :  { %v4177_v40 = vpop.eup %4176 }
 0xafe   :  { %v4179_v51 = vpop.eup %4178  ;;  %v3360_v43 = vmul.f32 %v4177_v40, %v3358_v28  ;;  %4180 = vrcp.f32 %v3397_v24  ;;  %vm3365_vm4 = vweird.f32 %v4177_v40  ;;  %v3409_v56 = vand.u32 2147483648, %v3397_v24 }
 0xaff   :  { %v3379_v49 = vmul.f32 %v4179_v51, %v3377_v13  ;;  %4182 = vtanh.f32 %v3353_v11  ;;  %vm3384_vm5 = vweird.f32 %v4179_v51  ;;  %vm3366_vm8 = vmor %vm3364_vm6, %vm3365_vm4  ;;  %vm3403_vm13 = vweird.f32 %v3397_v24 }
 0xb00   :  { %v3361_v41 = vsub.f32 1.0, %v3360_v43  ;;  %vm3385_vm9 = vmor %vm3383_vm7, %vm3384_vm5  ;;  %v3407_v63 = vand.u32 2147483647, %v3397_v24  ;;  %v3410_v20 = vor.u32 1.1754944e-38, %v3409_v56 }
 0xb01   :  { %v3380_v30 = vsub.f32 1.0, %v3379_v49 }
 0xb02   :  { %v3362_v21 = vmul.f32 %v4177_v40, %v3361_v41  ;;  %vm3408_vm15 = vcmp.eq.f32.partialorder %v3407_v63, 8.507059e+37 }
 0xb03   :  { %v3381_v59 = vmul.f32 %v4179_v51, %v3380_v30 }
 0xb04   :  { %v4181_v48 = vpop.eup %4180  ;;  %v3363_v31 = vadd.f32 %v4177_v40, %v3362_v21 }
 0xb05   :  { %v3382_v57 = vadd.f32 %v4179_v51, %v3381_v59  ;;  %v3399_v15 = vmul.f32 %v4181_v48, %v3397_v24  ;;  %v4183_v45 = vpop.eup %4182  ;;  %vm3404_vm12 = vweird.f32 %v4181_v48 }
 0xb06   :  { %v3367_v33 = vsel %vm3366_vm8, %v4177_v40, %v3363_v31  ;;  %vm3405_vm14 = vmor %vm3403_vm13, %vm3404_vm12 }
 0xb07   :  { %v3372_v55 = vsel %vm3369_vm10, %v3371_v50, %v3367_v33  ;;  %v3386_v38 = vsel %vm3385_vm9, %v4179_v51, %v3382_v57  ;;  %v3400_v14 = vsub.f32 1.0, %v3399_v15 }
 0xb08   :  { %v3391_v4 = vsel %vm3388_vm11, %v3390_v62, %v3386_v38  ;;  %v3415_v7 = vmul.f32 %v4183_v45, %v3372_v55 }
 0xb09   :  { %v3414_v2 = vmul.f32 %v3391_v4, %v7472_v19  ;;  %v3401_v32 = vmul.f32 %v4181_v48, %v3400_v14 }
 0xb0b   :  { %v3416_v44 = vadd.f32 %v3415_v7, %v3414_v2  ;;  %v3402_v35 = vadd.f32 %v4181_v48, %v3401_v32 }
 0xb0d   :  { %4184 = vtanh.f32 %v3416_v44  ;;  %3860 = vst [vmem:[%s7494_s5 + $0x8] sm:$0xff] %v3416_v44  ;;  %v3406_v60 = vsel %vm3405_vm14, %v4181_v48, %v3402_v35 }
 0xb0e   :  { %v3411_v10 = vsel %vm3408_vm15, %v3410_v20, %v3406_v60 }
 0xb13   :  { %v4185_v26 = vpop.eup %4184 }
 0xb14   :  { %v3418_v22 = vmul.f32 %v4185_v26, %v3411_v10 }
 0xb16   :  { %3859 = vst [vmem:[%s7495_s4 + $0x8] sm:$0xff] %v3418_v22 }

</bundles_post_ra>
